<compile_context>
chip_gen: v6e
topology: v6e:2x2x1
jax: 0.10.0
libtpu: 0.0.40
codegen_flags: <defaults>
</compile_context>

<pallas_src>
import functools

import numpy as np
import jax
import jax.numpy as jnp
from jax import lax
from jax.experimental import pallas as pl
from jax.experimental.pallas import tpu as pltpu


def _round_up(x, m):
    return ((int(x) + m - 1) // m) * m


def _rdf_hist_kernel(meta_ref, a_ref, bt_ref, out_ref, *, inver_delta):
    """One (element pair, A-tile, B-tile) step of the pairwise-distance histogram.

    meta_ref: SMEM int32 (n_pairs, 5) = [elem_i, elem_j, na, nb, same]
    a_ref:    VMEM f32 (ta_tile, 3)   scaled positions of element i (atoms on sublanes)
    bt_ref:   VMEM f32 (3, tb_tile)   scaled positions of element j, transposed (lane-dense)
    out_ref:  VMEM f32 (1, total_pad) per-pair raw bin counts (accumulated across tiles)
    """
    p = pl.program_id(0)
    ia = pl.program_id(1)
    ib = pl.program_id(2)

    ta_tile = a_ref.shape[0]
    tb_tile = bt_ref.shape[1]
    total_pad = out_ref.shape[1]

    na = meta_ref[p, 2]
    nb = meta_ref[p, 3]
    same = meta_ref[p, 4]

    a = a_ref[...]                                   # (ta, 3)
    bt = bt_ref[...]                                 # (3, tb)

    # Direct-difference euclidean distance (== torch.cdist); kept on the VPU on purpose
    # (the |a|^2+|b|^2-2ab^T MXU identity loses ~1e-4 on dist^2 via cancellation, enough
    # to flip a bin, and distance math is a tiny fraction of the VALU work here).
    dx = a[:, 0:1] - bt[0:1, :]                      # (ta, tb)
    dy = a[:, 1:2] - bt[1:2, :]
    dz = a[:, 2:3] - bt[2:3, :]
    dist = jnp.sqrt(dx * dx + dy * dy + dz * dz)
    bins = (dist * inver_delta).astype(jnp.int32)    # truncation == .int()

    rows = ia * ta_tile + lax.broadcasted_iota(jnp.int32, (ta_tile, tb_tile), 0)
    cols = ib * tb_tile + lax.broadcasted_iota(jnp.int32, (ta_tile, tb_tile), 1)
    valid = (rows < na) & (cols < nb)                                  # mask atom padding
    valid = valid & jnp.logical_not((same > 0) & (rows == cols))       # fill_diagonal_(9999)
    bins = jnp.where(valid, bins, total_pad + 7)                       # dropped by one-hot

    # One-hot histogram (replaces torch.unique + scatter).  Bin iota is a tiny (1,1,256)
    # broadcast; the (ta, tb, 256) slab is bounded by the tile size (4 MiB at 32x128).
    bin_iota = lax.broadcasted_iota(jnp.int32, (1, 1, total_pad), 2)
    onehot = (bins[:, :, None] == bin_iota).astype(jnp.float32)        # (ta, tb, 256)

    # Cheap elementwise fold over the small A-tile axis, then offload the big lane-dense
    # reduction (tb -> 1) to the MXU with a ones-row matmul.  Counts <= ta_tile are exact
    # in bf16; accumulation is f32 -> exact integer counts.
    partial = jnp.sum(onehot, axis=0).astype(jnp.bfloat16)             # (tb, 256)
    ones_row = jnp.ones((1, tb_tile), jnp.bfloat16)
    hist = jnp.dot(ones_row, partial, preferred_element_type=jnp.float32)   # (1, 256)

    @pl.when(jnp.logical_and(ia == 0, ib == 0))
    def _():
        out_ref[...] = jnp.zeros_like(out_ref)

    out_ref[...] += hist


def rdf_pair_histograms(meta, a_stack, bt_stack, *, inver_delta, total_pad,
                        ta_tile, tb_tile):
    """Raw per-pair bin counts for all element pairs in one gridded pallas_call.

    meta:     (n_pairs, 5) int32 [elem_i, elem_j, na, nb, same]
    a_stack:  (n_elem, n_pad, 3) f32 scaled positions (atoms on sublanes)
    bt_stack: (n_elem, 3, n_pad) f32 scaled positions transposed (atoms on lanes)
    returns:  (n_pairs, total_pad) f32 raw counts
    """
    n_elem, n_pad, _ = a_stack.shape
    n_pairs = meta.shape[0]
    grid = (n_pairs, n_pad // ta_tile, n_pad // tb_tile)

    kernel = functools.partial(_rdf_hist_kernel, inver_delta=float(inver_delta))

    out = pl.pallas_call(
        kernel,
        out_shape=jax.ShapeDtypeStruct((n_pairs, 1, total_pad), jnp.float32),
        grid_spec=pltpu.PrefetchScalarGridSpec(
            num_scalar_prefetch=1,
            grid=grid,
            in_specs=[
                # Element-i positions: (ta_tile, 3) block chosen by the prefetched meta.
                pl.BlockSpec((None, ta_tile, 3),
                             lambda p, ia, ib, m: (m[p, 0], ia, 0)),
                # Element-j positions, transposed: (3, tb_tile) lane-dense block.
                pl.BlockSpec((None, 3, tb_tile),
                             lambda p, ia, ib, m: (m[p, 1], 0, ib)),
            ],
            # Per-pair (1, total_pad) lane-dense accumulator: same block across (ia, ib).
            out_specs=pl.BlockSpec((None, 1, total_pad),
                                   lambda p, ia, ib, m: (p, 0, 0)),
        ),
        compiler_params=pltpu.CompilerParams(
            dimension_semantics=("parallel", "arbitrary", "arbitrary"),
            vmem_limit_bytes=32 * 1024 * 1024,
        ),
    )(meta, a_stack, bt_stack)
    return out[:, 0, :]


class RDFPallas:
    """JAX/Pallas re-implementation of the PyTorch RDF module's forward()."""

    def __init__(self, elem, real_size, delta=0.05, stop=10):
        self.elem = list(elem)
        self.delta = float(delta)
        self.stop = float(stop)
        self.inver_delta = 1.0 / delta
        self.total = int(stop * self.inver_delta)                 # 200
        self.total_pad = _round_up(self.total, 128)               # 256
        self.real_size = jnp.asarray(real_size, jnp.float32)
        self.vol = float(real_size[0]) * float(real_size[1]) * float(real_size[2])
        # torch.arange(delta/2, stop, delta) ** 1 * delta * 2 * pi * 3
        self.slice_vol = (
            (jnp.arange(self.total, dtype=jnp.float32) * delta + delta / 2.0)
            * delta * 2.0 * np.pi * 3.0
        )
        self.number = jnp.zeros((1,), jnp.float32)
        self.count = jnp.zeros((len(self.elem), len(self.elem), self.total),
                               jnp.float32)

    def forward(self, pos):
        n_elem = len(self.elem)
        ns = [int(p.shape[0]) for p in pos]
        n_pad = max(128, _round_up(max(ns), 128))
        # Tile the pair space: 32 x 128 atoms per step -> 4 MiB one-hot slab (v7x-safe).
        ta_tile = min(32, n_pad)
        tb_tile = min(128, n_pad)

        # Glue: scale by real_size, pad, and stack positions once for all pairs.
        a_stack = jnp.zeros((n_elem, n_pad, 3), jnp.float32)
        bt_stack = jnp.zeros((n_elem, 3, n_pad), jnp.float32)
        for i, p in enumerate(pos):
            scaled = p.astype(jnp.float32) * self.real_size
            a_stack = a_stack.at[i, :ns[i], :].set(scaled)
            bt_stack = bt_stack.at[i, :, :ns[i]].set(scaled.T)

        meta_rows = []
        for i in range(n_elem):
            for j in range(n_elem):
                meta_rows.append([i, j, ns[i], ns[j], 1 if i == j else 0])
        meta = jnp.asarray(meta_rows, dtype=jnp.int32)            # (n_pairs, 5)

        hist = rdf_pair_histograms(
            meta, a_stack, bt_stack,
            inver_delta=self.inver_delta, total_pad=self.total_pad,
            ta_tile=ta_tile, tb_tile=tb_tile)                     # (n_pairs, total_pad)
        hist = hist[:, :self.total]                               # drop padded bins

        # Single fused normalization over all pairs:
        # buf = hist / density / slice_vol / len(ele_pos), density = nb / vol.
        na = jnp.asarray([ns[i] for i in range(n_elem) for _ in range(n_elem)],
                         jnp.float32)
        nb = jnp.asarray([ns[j] for _ in range(n_elem) for j in range(n_elem)],
                         jnp.float32)
        scale = self.vol / (na * nb)
        buf = hist * scale[:, None] / self.slice_vol[None, :]
        self.count = self.count + buf.reshape(n_elem, n_elem, self.total)
        self.number = self.number + 1.0

    # TODO(synk): save() does torch.save to LOG_DIR (file I/O) — not translated.


def _reference_forward(pos, real_size, vol, inver_delta, total, slice_vol):
    """Pure NumPy reference mirroring the PyTorch forward semantics."""
    n_elem = len(pos)
    real_size = np.asarray(real_size, np.float32)
    count = np.zeros((n_elem, n_elem, total), np.float32)
    for i in range(n_elem):
        for j in range(n_elem):
            a = np.asarray(pos[i], np.float32) * real_size
            b = np.asarray(pos[j], np.float32) * real_size
            diff = a[:, None, :] - b[None, :, :]
            dist = np.sqrt((diff * diff).sum(-1, dtype=np.float32))
            bins = (dist * np.float32(inver_delta)).astype(np.int32)
            if i == j:
                np.fill_diagonal(bins, 9999)
            density = b.shape[0] / vol
            flat = bins.ravel()
            flat = flat[flat < total]
            buf = np.bincount(flat, minlength=total)[:total].astype(np.float32)
            buf = buf / density / np.asarray(slice_vol, np.float32) / a.shape[0]
            count[i, j] += buf
    return count


if __name__ == "__main__":
    # Small synthetic setup (mimics cfg.DATA.ELE_NAME / cfg.DATA.REAL_SIZE).
    elem = ["O", "H"]
    real_size = (25.0, 25.0, 3.0)

    key = jax.random.PRNGKey(0)
    k1, k2 = jax.random.split(key)
    pos = [
        jax.random.uniform(k1, (6, 3), dtype=jnp.float32),    # "O" fractional coords
        jax.random.uniform(k2, (12, 3), dtype=jnp.float32),   # "H" fractional coords
    ]

    rdf = RDFPallas(elem, real_size, delta=0.05, stop=10)
    rdf.forward(pos)
    count = jax.block_until_ready(rdf.count)

    ref = _reference_forward(
        pos, real_size, rdf.vol, rdf.inver_delta, rdf.total,
        np.asarray(rdf.slice_vol))
    np.testing.assert_allclose(np.asarray(count), ref, rtol=1e-4, atol=1e-4)
    assert float(rdf.number[0]) == 1.0

    print("KERNEL_OK")
</pallas_src>

<mosaic_0001>
module attributes {stable_mosaic.version = 11 : i64} {
  func.func @_rdf_hist_kernel(%arg0: i32, %arg1: i32, %arg2: i32, %arg3: memref<4x5xi32, #tpu.memory_space<smem>>, %arg4: memref<1x32x3xf32, #tpu.memory_space<vmem>>, %arg5: memref<1x3x128xf32, #tpu.memory_space<vmem>>, %arg6: memref<1x1x256xf32, #tpu.memory_space<vmem>>) attributes {dimension_semantics = [#tpu.dimension_semantics<parallel>, #tpu.dimension_semantics<arbitrary>, #tpu.dimension_semantics<arbitrary>], iteration_bounds = array<i64: 4, 4, 1>, scalar_prefetch = 1 : i64, scratch_operands = 0 : i64, tpu.core_type = #tpu.core_type<tc>, window_params = [{transform_indices = @transform_0, window_bounds = array<i64: 1, 32, 3>}, {transform_indices = @transform_1, window_bounds = array<i64: 1, 3, 128>}, {transform_indices = @transform_2, window_bounds = array<i64: 1, 1, 256>}]} {
    %0 = arith.index_cast %arg0 : i32 to index
    %c2 = arith.constant 2 : index
    %1 = memref.load %arg3[%0, %c2] : memref<4x5xi32, #tpu.memory_space<smem>>
    %2 = arith.index_cast %arg0 : i32 to index
    %c3 = arith.constant 3 : index
    %3 = memref.load %arg3[%2, %c3] : memref<4x5xi32, #tpu.memory_space<smem>>
    %4 = arith.index_cast %arg0 : i32 to index
    %c4 = arith.constant 4 : index
    %5 = memref.load %arg3[%4, %c4] : memref<4x5xi32, #tpu.memory_space<smem>>
    %c0 = arith.constant 0 : index
    %c0_0 = arith.constant 0 : index
    %c0_1 = arith.constant 0 : index
    %6 = vector.load %arg4[%c0, %c0_0, %c0_1] : memref<1x32x3xf32, #tpu.memory_space<vmem>>, vector<1x32x3xf32>
    %7 = vector.shape_cast %6 : vector<1x32x3xf32> to vector<32x3xf32>
    %c0_2 = arith.constant 0 : index
    %c0_3 = arith.constant 0 : index
    %c0_4 = arith.constant 0 : index
    %8 = vector.load %arg5[%c0_2, %c0_3, %c0_4] : memref<1x3x128xf32, #tpu.memory_space<vmem>>, vector<1x3x128xf32>
    %9 = vector.shape_cast %8 : vector<1x3x128xf32> to vector<3x128xf32>
    %10 = vector.extract_strided_slice %7 {offsets = [0, 0], sizes = [32, 1], strides = [1, 1]} : vector<32x3xf32> to vector<32x1xf32>
    %11 = vector.extract_strided_slice %9 {offsets = [0, 0], sizes = [1, 128], strides = [1, 1]} : vector<3x128xf32> to vector<1x128xf32>
    %12 = vector.broadcast %10 : vector<32x1xf32> to vector<32x128xf32>
    %13 = vector.broadcast %11 : vector<1x128xf32> to vector<32x128xf32>
    %14 = arith.subf %12, %13 : vector<32x128xf32>
    %15 = vector.extract_strided_slice %7 {offsets = [0, 1], sizes = [32, 1], strides = [1, 1]} : vector<32x3xf32> to vector<32x1xf32>
    %16 = vector.extract_strided_slice %9 {offsets = [1, 0], sizes = [1, 128], strides = [1, 1]} : vector<3x128xf32> to vector<1x128xf32>
    %17 = vector.broadcast %15 : vector<32x1xf32> to vector<32x128xf32>
    %18 = vector.broadcast %16 : vector<1x128xf32> to vector<32x128xf32>
    %19 = arith.subf %17, %18 : vector<32x128xf32>
    %20 = vector.extract_strided_slice %7 {offsets = [0, 2], sizes = [32, 1], strides = [1, 1]} : vector<32x3xf32> to vector<32x1xf32>
    %21 = vector.extract_strided_slice %9 {offsets = [2, 0], sizes = [1, 128], strides = [1, 1]} : vector<3x128xf32> to vector<1x128xf32>
    %22 = vector.broadcast %20 : vector<32x1xf32> to vector<32x128xf32>
    %23 = vector.broadcast %21 : vector<1x128xf32> to vector<32x128xf32>
    %24 = arith.subf %22, %23 : vector<32x128xf32>
    %25 = arith.mulf %14, %14 : vector<32x128xf32>
    %26 = arith.mulf %19, %19 : vector<32x128xf32>
    %27 = arith.addf %25, %26 : vector<32x128xf32>
    %28 = arith.mulf %24, %24 : vector<32x128xf32>
    %29 = arith.addf %27, %28 : vector<32x128xf32>
    %30 = math.sqrt %29 : vector<32x128xf32>
    %cst = arith.constant 2.000000e+01 : f32
    %31 = vector.broadcast %cst : f32 to vector<32x128xf32>
    %32 = arith.mulf %30, %31 : vector<32x128xf32>
    %33 = arith.fptosi %32 : vector<32x128xf32> to vector<32x128xi32>
    %c32_i32 = arith.constant 32 : i32
    %34 = arith.muli %arg1, %c32_i32 : i32
    %35 = tpu.iota {dimensions = array<i32: 0>} : vector<32x128xi32>
    %36 = vector.broadcast %34 : i32 to vector<32x128xi32>
    %37 = arith.addi %36, %35 : vector<32x128xi32>
    %c128_i32 = arith.constant 128 : i32
    %38 = arith.muli %arg2, %c128_i32 : i32
    %39 = tpu.iota {dimensions = array<i32: 1>} : vector<32x128xi32>
    %40 = vector.broadcast %38 : i32 to vector<32x128xi32>
    %41 = arith.addi %40, %39 : vector<32x128xi32>
    %42 = vector.broadcast %1 : i32 to vector<32x128xi32>
    %43 = arith.cmpi slt, %37, %42 : vector<32x128xi32>
    %44 = vector.broadcast %3 : i32 to vector<32x128xi32>
    %45 = arith.cmpi slt, %41, %44 : vector<32x128xi32>
    %46 = arith.andi %43, %45 : vector<32x128xi1>
    %c0_i32 = arith.constant 0 : i32
    %47 = arith.cmpi sgt, %5, %c0_i32 : i32
    %48 = arith.cmpi eq, %37, %41 : vector<32x128xi32>
    %49 = vector.broadcast %47 : i1 to vector<32x128xi1>
    %50 = arith.andi %49, %48 : vector<32x128xi1>
    %cst_5 = arith.constant dense<true> : vector<32x128xi1>
    %51 = arith.xori %50, %cst_5 : vector<32x128xi1>
    %52 = arith.andi %46, %51 : vector<32x128xi1>
    %c263_i32 = arith.constant 263 : i32
    %53 = vector.broadcast %c263_i32 : i32 to vector<32x128xi32>
    %54 = arith.select %52, %33, %53 : vector<32x128xi1>, vector<32x128xi32>
    %55 = tpu.iota {dimensions = array<i32: 2>} : vector<1x1x256xi32>
    %56 = vector.shape_cast %54 : vector<32x128xi32> to vector<32x128x1xi32>
    %57 = vector.broadcast %56 : vector<32x128x1xi32> to vector<32x128x256xi32>
    %58 = vector.broadcast %55 : vector<1x1x256xi32> to vector<32x128x256xi32>
    %59 = arith.cmpi eq, %57, %58 : vector<32x128x256xi32>
    %60 = arith.extui %59 : vector<32x128x256xi1> to vector<32x128x256xi32>
    %61 = arith.sitofp %60 : vector<32x128x256xi32> to vector<32x128x256xf32>
    %cst_6 = arith.constant dense<0.000000e+00> : vector<128x256xf32>
    %62 = vector.multi_reduction <add>, %61, %cst_6 [0] : vector<32x128x256xf32> to vector<128x256xf32>
    %63 = arith.truncf %62 : vector<128x256xf32> to vector<128x256xbf16>
    %cst_7 = arith.constant 1.000000e+00 : bf16
    %64 = vector.broadcast %cst_7 : bf16 to vector<1x128xbf16>
    %cst_8 = arith.constant dense<0.000000e+00> : vector<1x256xf32>
    %65 = tpu.matmul %64, %63, %cst_8 {dimension_numbers = #tpu.dot_dimension_numbers<[1], [0], [0], [1], [0, 0, 1, 1], [], []>} : vector<1x128xbf16>, vector<128x256xbf16>, vector<1x256xf32> -> vector<1x256xf32>
    %c0_i32_9 = arith.constant 0 : i32
    %66 = arith.cmpi eq, %arg1, %c0_i32_9 : i32
    %c0_i32_10 = arith.constant 0 : i32
    %67 = arith.cmpi eq, %arg2, %c0_i32_10 : i32
    %68 = arith.andi %66, %67 : i1
    %69 = arith.extui %68 : i1 to i32
    %c0_i32_11 = arith.constant 0 : i32
    %70 = arith.cmpi ne, %69, %c0_i32_11 : i32
    scf.if %70 {
      %cst_18 = arith.constant 0.000000e+00 : f32
      %77 = vector.broadcast %cst_18 : f32 to vector<1x256xf32>
      %c0_19 = arith.constant 0 : index
      %c0_20 = arith.constant 0 : index
      %c0_21 = arith.constant 0 : index
      %78 = vector.load %arg6[%c0_19, %c0_20, %c0_21] : memref<1x1x256xf32, #tpu.memory_space<vmem>>, vector<1x1x256xf32>
      %79 = vector.shape_cast %78 : vector<1x1x256xf32> to vector<1x256xf32>
      %80 = vector.shape_cast %77 : vector<1x256xf32> to vector<1x1x256xf32>
      tpu.vector_store %arg6[%c0_19, %c0_20, %c0_21], %80 {strides = array<i32>} : memref<1x1x256xf32, #tpu.memory_space<vmem>>, vector<1x1x256xf32>,
    } else {
    }
    %c0_12 = arith.constant 0 : index
    %c0_13 = arith.constant 0 : index
    %c0_14 = arith.constant 0 : index
    %71 = vector.load %arg6[%c0_12, %c0_13, %c0_14] : memref<1x1x256xf32, #tpu.memory_space<vmem>>, vector<1x1x256xf32>
    %72 = vector.shape_cast %71 : vector<1x1x256xf32> to vector<1x256xf32>
    %73 = arith.addf %72, %65 : vector<1x256xf32>
    %c0_15 = arith.constant 0 : index
    %c0_16 = arith.constant 0 : index
    %c0_17 = arith.constant 0 : index
    %74 = vector.load %arg6[%c0_15, %c0_16, %c0_17] : memref<1x1x256xf32, #tpu.memory_space<vmem>>, vector<1x1x256xf32>
    %75 = vector.shape_cast %74 : vector<1x1x256xf32> to vector<1x256xf32>
    %76 = vector.shape_cast %73 : vector<1x256xf32> to vector<1x1x256xf32>
    tpu.vector_store %arg6[%c0_15, %c0_16, %c0_17], %76 {strides = array<i32>} : memref<1x1x256xf32, #tpu.memory_space<vmem>>, vector<1x1x256xf32>,
    return
  }
  func.func @transform_0(%arg0: i32, %arg1: i32, %arg2: i32, %arg3: memref<4x5xi32, #tpu.memory_space<smem>>) -> (i32, i32, i32) {
    %0 = arith.index_cast %arg0 : i32 to index
    %c0 = arith.constant 0 : index
    %1 = memref.load %arg3[%0, %c0] : memref<4x5xi32, #tpu.memory_space<smem>>
    %c0_i32 = arith.constant 0 : i32
    %c0_i32_0 = arith.constant 0 : i32
    return %1, %arg1, %c0_i32 : i32, i32, i32
  }
  func.func @transform_1(%arg0: i32, %arg1: i32, %arg2: i32, %arg3: memref<4x5xi32, #tpu.memory_space<smem>>) -> (i32, i32, i32) {
    %0 = arith.index_cast %arg0 : i32 to index
    %c1 = arith.constant 1 : index
    %1 = memref.load %arg3[%0, %c1] : memref<4x5xi32, #tpu.memory_space<smem>>
    %c0_i32 = arith.constant 0 : i32
    %c0_i32_0 = arith.constant 0 : i32
    return %1, %c0_i32, %arg2 : i32, i32, i32
  }
  func.func @transform_2(%arg0: i32, %arg1: i32, %arg2: i32, %arg3: memref<4x5xi32, #tpu.memory_space<smem>>) -> (i32, i32, i32) {
    %c0_i32 = arith.constant 0 : i32
    %c0_i32_0 = arith.constant 0 : i32
    %c0_i32_1 = arith.constant 0 : i32
    return %arg0, %c0_i32, %c0_i32_0 : i32, i32, i32
  }
}

</mosaic_0001>

<bundles_post_ra>
// kernel: tpu_custom_call.1
= control target key start
LH: loop header
LB: loop body
LE: loop exit
PB: predicated region body
PF: predicated region fallthrough
CT: control target
= control target key end

     0   :  { %s15849_s0 = inlined_call_operand.vmem [shape: s32[4,5], index: 0, kind: input, shape index: {}]   ;;  %s15850_s1 = inlined_call_operand.vmem [shape: f32[2,128,3], index: 1, kind: input, shape index: {}]   ;;  %s15851_s2 = inlined_call_operand.vmem [shape: f32[2,3,128], index: 2, kind: input, shape index: {}]   ;;  %s15852_s3 = inlined_call_operand.hbm [shape: f32[4,1,256], index: 3, kind: output, shape index: {}]  }
   0x1   :  { %s8_s14 = sshll.u32 %s15849_s0, 4  ;;  %s9_s14 = int_to_ptr.vmem [resolvable:$true] %s8_s14 }
   0x2   :  { %s8007_s15 = scalar_lea.vmem %s9_s14, 64  ;;  %p8012_p1 = scmp.lt.s32.totalorder %s9_s14, %s9_s14 }
   0x3   :  { %p8008_p0 = scmp.ne.s32.totalorder %s9_s14, %s8007_s15  ;;  %p8013_p2 = scmp.lt.s32.totalorder %s8007_s15, %s8007_s15 }
   0x5   :  { %p8014_p3 = por %p8013_p2, %p8012_p1 }
   0x7   :  { %p8015_p4 = pnand %p8014_p3, %p8008_p0 }
   0x9   :  { %8018 = shalt.err (!%p8015_p4)  }
   0xa   :  { %s8115_s16 = smov [#allocation3]  }
   0xb   :  { %11 = dma.vmem_to_smem %s9_s14, 64, %s8115_s16, [#allocation2] }
   0xc   :  { %8077 = dma.done.wait [#allocation2], 64 }
   0xd   :  { %8078 = vsyncadd [#allocation2], 4294967232 }
   0xe   :  { %13 = sfence }
   0xf   :  { %14 = vsyncpa [#allocation5], 0 }
  0x10   :  { %16 = vsyncpa [#allocation5 + $0x1], 0  ;;  %s8148_s17 = smov 0   ;;  %s8150_s18 = smov 0  }
  0x11   :  { %s8152_s0 = smov 0   ;;  %s8154_s19 = smov 0  }
  0x12   :  { %s8156_s20 = smov 0   ;;  %s8158_s21 = smov 0  }
  0x13   :  { %s8160_s22 = smov 0   ;;  %s8162_s23 = smov 0  }
  0x14 LB: > { %s6855_s24 = sadd.s32 4294967295, %s8113_s23   ;;  %s6856_s25 = sadd.s32 4294967294, %s8113_s23   ;;  %s8113_s23 = sphi %s8162_s23, %s22_s23   ;;  %s8109_s22 = sphi %s8160_s22, %s16900_s22   ;;  %s8105_s21 = sphi %s8158_s21, %s16899_s21   ;;  %s8101_s20 = sphi %s8156_s20, %s16898_s20   ;;  %s8097_s19 = sphi %s8154_s19, %s16897_s19   ;;  %s8093_s0 = sphi %s8152_s0, %s16896_s0   ;;  %s8089_s18 = sphi %s8150_s18, %s16895_s18   ;;  %s8085_s17 = sphi %s8148_s17, %s16894_s17  }
  0x15   : > { %s37_s26 = sadd.s32 1, %s8105_s21  ;;  %s41_s27 = sadd.s32 1, %s8109_s22 }
  0x16   : > { %p39_p5 = scmp.ge.s32.totalorder %s37_s26, 4  ;;  %p124_p6 = scmp.ne.s32.totalorder %s8093_s0, %s8089_s18 }
  0x17   : > { %p125_p7 = scmp.eq.s32.totalorder %s6855_s24, 15  ;;  %p130_p9 = scmp.ne.s32.totalorder %s8089_s18, %s8085_s17 }
  0x18   : > { %s16902_s26 = smov (%p39_p5, %s37_s26), 0  ;;  %s16904_s27 = smov (!%p39_p5, %s41_s27), %s8109_s22 }
  0x19   : > { %p8197_p8 = por %p125_p7, %p124_p6  ;;  %p43_p10 = scmp.ge.s32.totalorder %s16904_s27, 4 }
  0x1a   : > { %p131_p11 = scmp.eq.s32.totalorder %s6856_s25, 15  ;;  %p6863_p12 = scmp.ge.s32.totalorder %s8113_s23, 1 }
  0x1b   : > { %p182_p13 = scmp.lt.s32.totalorder %s8113_s23, 17  ;;  %s16906_s27 = smov (%p43_p10, %s16904_s27), 0 }
  0x1c   : > { %p8207_p0 = por %p131_p11, %p130_p9  ;;  %s111_s30 = ssub.s32 %s8109_s22, %s16906_s27 }
  0x1d   : > { %p183_p1 = pnand %p6863_p12, %p182_p13  ;;  %s114_s4 = sadd.s32 1, %s8093_s0 }
  0x1e   : > { %p112_p2 = scmp.eq.s32.totalorder %s111_s30, 0 }
  0x1f   : > { %186 = sbr.rel (%p183_p1) target bundleno = 1598 (0x63e), region = 28 }
  0x20   : > { %s8215_s5 = scalar_select %p112_p2, %s8093_s0, %s114_s4  }
  0x24   : > { %s8218_s6 = sshll.u32 %s8101_s20, 7  ;;  %v8116_v0 = vmov 0   ;;  %s6866_s8 = sshll.u32 %s8097_s19, 2  ;;  %v8117_v5 = vmov 1   ;;  %v8118_v6 = vmov 2   ;;  %v15856_v7 = vlaneseq }
  0x25   : > { %7994 = vset.pattern.permute.xlu1 %v8116_v0  ;;  %7993 = vset.pattern.permute.xlu0 %v8116_v0  ;;  %s221_s7 = sld [smem:[#allocation3 + %s8218_s6]]  ;;  %p225_p3 = scmp.lt.s32.totalorder %s6866_s8, 15  ;;  %vm15853_vm6 = vmmov 1   ;;  %v16196_v26 = vmov 0  ;;  %v16198_v27 = vmov 0 }
  0x26   : > { %6701 = vmatprep.mubr.bf16.mxu0 %v8116_v0  ;;  %s254_s15 = sadd.s32 4, %s8218_s6  ;;  %s252_s24 = sadd.s32 3, %s8218_s6  ;;  %v8230_v8 = vshrl.u32 %v15856_v7, 7  ;;  %v8233_v9 = vand.u32 127, %v15856_v7 }
  0x27   : > { %s16908_s8 = smov (!%p225_p3, %s6866_s8), 15  ;;  %s255_s16 = sld [smem:[#allocation3 + %s254_s15]] }
  0x28   : > { %s250_s25 = sadd.s32 2, %s8218_s6  ;;  %s253_s30 = sld [smem:[#allocation3 + %s252_s24]]  ;;  %16183 = vst [vmem:[#allocation8_spill] sm:$0xff] %v8230_v8  ;;  %v396_v13 = vadd.s32 8, %v8230_v8  ;;  %v397_v20 = vadd.s32 16, %v8230_v8  ;;  %v398_v22 = vadd.s32 24, %v8230_v8 }
  0x29   : > { %s251_s4 = sld [smem:[#allocation3 + %s250_s25]]  ;;  %v8316_v30 = vsub.s32 0, %v8230_v8  ;;  %v8319_v31 = vsub.s32 1, %v8230_v8  ;;  %v8324_v41 = vsub.s32 2, %v8230_v8  ;;  %v715_v17 = vsub.s32 4, %v8230_v8  ;;  %p6710_p7 = scmp.eq.s32.totalorder %s8097_s19, 0 }
  0x2b   : > { %p223_p4 = scmp.lt.s32.totalorder %s221_s7, 1 }
  0x2d   : > { %s16910_s7 = smov (!%p223_p4, %s221_s7), 1  ;;  %p420_p5 = scmp.gt.s32.totalorder %s255_s16, 0 }
  0x2e   : > { %s6867_s9 = sshll.u32 %s16910_s7, 4  ;;  %v414_v12 = vstv %s253_s30 }
  0x2f   : > { %s228_s10 = sadd.s32 %s6867_s9, %s16908_s8  ;;  %s6872_s8 = sshll.u32 %s8097_s19, 5  ;;  %v8238_v14 = vstv %s251_s4  ;;  %vm8246_vm1 = vcmp.lt.s32.totalorder %v8233_v9, %v414_v12 }
  0x30   : > { %s6868_s11 = sshll.u32 %s228_s10, 3  ;;  %v8235_v11 = vstv %s6872_s8  ;;  %s235_s9 = sadd.s32 1, %s8218_s6 }
  0x31   : > { %s230_s14 = scalar_lea.vmem %s15850_s1, %s6868_s11  ;;  %v401_v16 = vadd.s32 %v8235_v11, %v396_v13  ;;  %v402_v21 = vadd.s32 %v8235_v11, %v397_v20  ;;  %v403_v25 = vadd.s32 %v8235_v11, %v398_v22  ;;  %s236_s10 = sld [smem:[#allocation3 + %s235_s9]] }
  0x32   : > { %v258_v1 = vld [vmem:[%s230_s14 + $0x10] sm:$0xff]  ;;  %v256_v2 = vld [vmem:[%s230_s14] sm:$0xff]  ;;  %v259_v3 = vld [vmem:[%s230_s14 + $0x18] sm:$0xff]  ;;  %s425_s7 = scalar_select %p420_p5, 1, 0 }
  0x33   : > { %273 = vperm.xlu1 %7994, %v258_v1   ;;  %263 = vperm.xlu0 %7993, %v256_v2   ;;  %v257_v4 = vld [vmem:[%s230_s14 + $0x8] sm:$0xff]  ;;  %vm422_vm2 = vcmp.eq.s32.totalorder %v401_v16, %v8233_v9  ;;  %vm411_vm3 = vcmp.lt.s32.totalorder %v401_v16, %v8238_v14  ;;  %vm423_vm9 = vcmp.eq.s32.totalorder %v402_v21, %v8233_v9  ;;  %s217_s6 = sand.u32 1, %s8089_s18  }
  0x34   : > { %v426_v10 = vstv %s425_s7  ;;  %vm8256_vm5 = vmand %vm411_vm3, %vm8246_vm1  ;;  %vm412_vm10 = vcmp.lt.s32.totalorder %v402_v21, %v8238_v14  ;;  %vm424_vm15 = vcmp.eq.s32.totalorder %v403_v25, %v8233_v9  ;;  %s13519_s15 = sshll.u32 %s217_s6, 1 }
  0x35   : > { %vm8240_vm0 = vcmp.eq.s32.totalorder %v426_v10, 1  ;;  %vm8278_vm12 = vmand %vm412_vm10, %vm8246_vm1  ;;  %s219_s16 = scalar_lea.vmem [#allocation4], %s13519_s15 }
  0x36   : > { %vm429_vm4 = vmand %vm8240_vm0, %vm422_vm2  ;;  %vm413_vm2 = vcmp.lt.s32.totalorder %v403_v25, %v8238_v14 }
  0x37   : > { %278 = vperm.xlu1 %7994, %v259_v3   ;;  %268 = vperm.xlu0 %7993, %v257_v4   ;;  %vm8261_vm7 = vmxor %vm429_vm4, %vm15853_vm6  ;;  %p237_p6 = scmp.lt.s32.totalorder %s236_s10, 1 }
  0x38   : > { %vm430_vm11 = vmand %vm8240_vm0, %vm423_vm9 }
  0x39   : > { %vm8283_vm13 = vmxor %vm430_vm11, %vm15853_vm6  ;;  %s16912_s10 = smov (!%p237_p6, %s236_s10), 1 }
  0x3a   : > { %vm431_vm3 = vmand %vm8240_vm0, %vm424_vm15  ;;  %s6870_s11 = sshll.u32 %s16912_s10, 2 }
  0x3b   : > { %7996 = vset.pattern.permute.xlu1 %v8117_v5  ;;  %7995 = vset.pattern.permute.xlu0 %v8117_v5  ;;  %vm8298_vm4 = vmand %vm413_vm2, %vm8246_vm1  ;;  %s243_s14 = scalar_lea.vmem %s15851_s2, %s6870_s11 }
  0x3c   : > { %294 = vperm.xlu1 %7996, %v257_v4   ;;  %290 = vperm.xlu0 %7995, %v256_v2   ;;  %v16197_v26 = vsel %vm8298_vm4, 4294967295, %v16196_v26  ;;  %vm8303_vm9 = vmxor %vm431_vm3, %vm15853_vm6  ;;  %v260_v32 = vld [vmem:[%s243_s14] sm:$0x7] }
  0x3d   : > { %v16199_v27 = vsel %vm8303_vm9, 4294967295, %v16198_v27  ;;  %v284_v35 = vrot.slane %v260_v32, %v8316_v30  ;;  %v308_v36 = vrot.slane %v260_v32, %v8319_v31  ;;  %v332_v53 = vrot.slane %v260_v32, %v8324_v41 }
  0x3e   : > { %vm16202_vm9 = vmmov 1  }
  0x40   : > { %298 = vperm.xlu1 %7996, %v258_v1   ;;  %302 = vperm.xlu0 %7995, %v259_v3  }
  0x44   : > { %7997 = vset.pattern.permute.xlu1 %v8118_v6  ;;  %7998 = vset.pattern.permute.xlu0 %v8118_v6 }
  0x45   : > { %314 = vperm.xlu1 %7997, %v256_v2   ;;  %318 = vperm.xlu0 %7998, %v257_v4  }
  0x49   : > { %322 = vperm.xlu1 %7997, %v258_v1  }
  0x4d   : > { %326 = vperm.xlu1 %7997, %v259_v3  }
  0xae   : > { %v274_v28 = vpop.permute.xlu1 %273  ;;  %v264_v29 = vpop.permute.xlu0 %263 }
  0xaf   : > { %v287_v42 = vsub.f32 %v274_v28, %v284_v35  ;;  %v285_v52 = vsub.f32 %v264_v29, %v284_v35  ;;  %v400_v28 = vadd.s32 %v8235_v11, %v8230_v8 }
  0xb1   : > { %v339_v54 = vmul.f32 %v287_v42, %v287_v42  ;;  %v337_v63 = vmul.f32 %v285_v52, %v285_v52  ;;  %vm421_vm11 = vcmp.eq.s32.totalorder %v400_v28, %v8233_v9  ;;  %vm410_vm15 = vcmp.lt.s32.totalorder %v400_v28, %v8238_v14 }
  0xb2   : > { %v279_v33 = vpop.permute.xlu1 %278  ;;  %v269_v34 = vpop.permute.xlu0 %268  ;;  %vm428_vm2 = vmand %vm8240_vm0, %vm421_vm11  ;;  %v916_v52 = vsub.s32 7, %v8230_v8 }
  0xb3   : > { %v286_v37 = vsub.f32 %v269_v34, %v284_v35  ;;  %v288_v43 = vsub.f32 %v279_v33, %v284_v35  ;;  %vm8338_vm8 = vmand %vm410_vm15, %vm8246_vm1 }
  0xb4   : > { %vm8343_vm4 = vmxor %vm428_vm2, %vm16202_vm9 }
  0xb5   : > { %v338_v44 = vmul.f32 %v286_v37, %v286_v37  ;;  %v340_v55 = vmul.f32 %v288_v43, %v288_v43  ;;  %v648_v43 = vsub.s32 3, %v8230_v8  ;;  %vm436_vm0 = vmand %vm8338_vm8, %vm8343_vm4 }
  0xb7   : > { %v295_v38 = vpop.permute.xlu1 %294  ;;  %v291_v39 = vpop.permute.xlu0 %290 }
  0xb8   : > { %v310_v40 = vsub.f32 %v295_v38, %v308_v36  ;;  %v309_v46 = vsub.f32 %v291_v39, %v308_v36 }
  0xba   : > { %v342_v45 = vmul.f32 %v310_v40, %v310_v40  ;;  %v341_v58 = vmul.f32 %v309_v46, %v309_v46 }
  0xbb   : > { %v299_v47 = vpop.permute.xlu1 %298  ;;  %v303_v48 = vpop.permute.xlu0 %302 }
  0xbc   : > { %v346_v49 = vadd.f32 %v342_v45, %v338_v44  ;;  %v311_v50 = vsub.f32 %v299_v47, %v308_v36  ;;  %v312_v51 = vsub.f32 %v303_v48, %v308_v36  ;;  %v345_v2 = vadd.f32 %v341_v58, %v337_v63 }
  0xbd   : > { %v782_v45 = vsub.s32 5, %v8230_v8  ;;  %v849_v48 = vsub.s32 6, %v8230_v8 }
  0xbe   : > { %v343_v56 = vmul.f32 %v311_v50, %v311_v50  ;;  %v344_v57 = vmul.f32 %v312_v51, %v312_v51 }
  0xc0   : > { %v347_v59 = vadd.f32 %v343_v56, %v339_v54  ;;  %v348_v60 = vadd.f32 %v344_v57, %v340_v55  ;;  %v315_v61 = vpop.permute.xlu1 %314  ;;  %v319_v62 = vpop.permute.xlu0 %318 }
  0xc1   : > { %v333_v0 = vsub.f32 %v315_v61, %v332_v53  ;;  %v334_v1 = vsub.f32 %v319_v62, %v332_v53 }
  0xc3   : > { %v349_v3 = vmul.f32 %v333_v0, %v333_v0  ;;  %v350_v4 = vmul.f32 %v334_v1, %v334_v1 }
  0xc4   : > { %v323_v5 = vpop.permute.xlu1 %322 }
  0xc5   : > { %v353_v6 = vadd.f32 %v349_v3, %v345_v2  ;;  %v354_v10 = vadd.f32 %v350_v4, %v346_v49  ;;  %v335_v12 = vsub.f32 %v323_v5, %v332_v53 }
  0xc7   : > { %7999 = vrsqrt.f32 %v353_v6  ;;  %v351_v16 = vmul.f32 %v335_v12, %v335_v12  ;;  %vm359_vm3 = vcmp.eq.f32.partialorder %v353_v6, inf  ;;  %v362_v34 = vand.u32 2147483648, %v353_v6 }
  0xc8   : > { %8001 = vrsqrt.f32 %v354_v10  ;;  %v327_v13 = vpop.permute.xlu1 %326  ;;  %vm361_vm10 = vcmp.eq.f32.partialorder %v353_v6, 0.0  ;;  %vm366_vm14 = vcmp.eq.f32.partialorder %v354_v10, inf  ;;  %v369_v37 = vand.u32 2147483648, %v354_v10 }
  0xc9   : > { %v336_v20 = vsub.f32 %v327_v13, %v332_v53  ;;  %v355_v21 = vadd.f32 %v351_v16, %v347_v59  ;;  %vm368_vm6 = vcmp.eq.f32.partialorder %v354_v10, 0.0 }
  0xcb   : > { %v352_v22 = vmul.f32 %v336_v20, %v336_v20  ;;  %8003 = vrsqrt.f32 %v355_v21  ;;  %vm373_vm1 = vcmp.eq.f32.partialorder %v355_v21, inf  ;;  %v376_v50 = vand.u32 2147483648, %v355_v21 }
  0xcd   : > { %v8327_v25 = vadd.f32 %v352_v22, %v348_v60 }
  0xcf   : > { %8005 = vrsqrt.f32 %v8327_v25  ;;  %vm380_vm8 = vcmp.eq.f32.partialorder %v8327_v25, inf  ;;  %vm382_vm4 = vcmp.eq.f32.partialorder %v8327_v25, 0.0 }
  0xd4   : > { %v8000_v29 = vpop.eup %7999 }
  0xd5   : > { %v8002_v32 = vpop.eup %8001  ;;  %v358_v33 = vmul.f32 %v8000_v29, %v353_v6 }
  0xd6   : > { %v365_v35 = vmul.f32 %v8002_v32, %v354_v10 }
  0xd7   : > { %v360_v36 = vsel %vm359_vm3, %v353_v6, %v358_v33  ;;  %v383_v6 = vand.u32 2147483648, %v8327_v25 }
  0xd8   : > { %v363_v38 = vsel %vm361_vm10, %v362_v34, %v360_v36  ;;  %v367_v39 = vsel %vm366_vm14, %v354_v10, %v365_v35  ;;  %v8004_v42 = vpop.eup %8003  ;;  %vm16205_vm14 = vmand %vm8256_vm5, %vm8261_vm7  ;;  %vm16215_vm7 = vnez %v16197_v26 }
  0xd9   : > { %v385_v15 = vmul.f32 20.0, %v363_v38  ;;  %v370_v40 = vsel %vm368_vm6, %v369_v37, %v367_v39  ;;  %v372_v47 = vmul.f32 %v8004_v42, %v355_v21  ;;  %vm375_vm6 = vcmp.eq.f32.partialorder %v355_v21, 0.0  ;;  %vm16209_vm5 = vmand %vm8278_vm12, %vm8283_vm13 }
  0xda   : > { %v386_v44 = vmul.f32 20.0, %v370_v40  ;;  %vm16216_vm12 = vnez %v16199_v27 }
  0xdb   : > { %v7905_v46 = vtrunc.f32 %v385_v15  ;;  %v374_v54 = vsel %vm373_vm1, %v355_v21, %v372_v47  ;;  %vm16217_vm13 = vmand %vm16215_vm7, %vm16216_vm12 }
  0xdc   : > { %v7907_v49 = vtrunc.f32 %v386_v44  ;;  %v8006_v51 = vpop.eup %8005  ;;  %v377_v56 = vsel %vm375_vm6, %v376_v50, %v374_v54 }
  0xdd   : > { %v7906_v53 = vcvt.f32.s32 %v7905_v46  ;;  %v379_v57 = vmul.f32 %v8006_v51, %v8327_v25  ;;  %v387_v59 = vmul.f32 20.0, %v377_v56 }
  0xde   : > { %v7908_v55 = vcvt.f32.s32 %v7907_v49 }
  0xdf   : > { %v8357_v58 = vsel %vm436_vm0, %v7906_v53, 263  ;;  %v7909_v3 = vtrunc.f32 %v387_v59  ;;  %v381_v4 = vsel %vm380_vm8, %v8327_v25, %v379_v57 }
  0xe0   : > { %v448_v60 = vrot.slane %v8357_v58, %v8316_v30  ;;  %v8362_v61 = vrot.slane %v8357_v58, %v648_v43  ;;  %v8366_v62 = vrot.slane %v8357_v58, %v715_v17  ;;  %v8369_v63 = vrot.slane %v8357_v58, %v782_v45 }
  0xe1   : > { %v8372_v0 = vrot.slane %v8357_v58, %v849_v48  ;;  %v8375_v1 = vrot.slane %v8357_v58, %v916_v52  ;;  %v8382_v2 = vsel %vm16205_vm14, %v7908_v55, 263  ;;  %v7910_v13 = vcvt.f32.s32 %v7909_v3 }
  0xe2   : > { %454 = vbcast.lane.b32.xlu1 %v448_v60, 264  ;;  %450 = vbcast.lane.b32.xlu0 %v448_v60, 256  ;;  %v8386_v5 = vrot.slane %v8382_v2, %v648_v43  ;;  %v8391_v10 = vrot.slane %v8382_v2, %v715_v17  ;;  %v8394_v18 = vrot.slane %v8382_v2, %v782_v45 }
  0xe3   : > { %v8397_v19 = vrot.slane %v8382_v2, %v849_v48  ;;  %v8400_v12 = vrot.slane %v8382_v2, %v916_v52  ;;  %v384_v16 = vsel %vm382_vm4, %v383_v6, %v381_v4  ;;  %v8407_v21 = vsel %vm16209_vm5, %v7910_v13, 263 }
  0xe4   : > { %16206 = vst [vmem:[#allocation9_spill] sm:$0xff] %v8394_v18  ;;  %v388_v20 = vmul.f32 20.0, %v384_v16  ;;  %v8410_v22 = vrot.slane %v8407_v21, %v648_v43  ;;  %v8413_v25 = vrot.slane %v8407_v21, %v715_v17  ;;  %v8416_v28 = vrot.slane %v8407_v21, %v782_v45 }
  0xe5   : > { %16207 = vst [vmem:[#allocation10_spill] sm:$0xff] %v8397_v19  ;;  %16208 = vst [vmem:[#allocation11_spill] sm:$0xff] %v8400_v12  ;;  %v8419_v29 = vrot.slane %v8407_v21, %v849_v48  ;;  %v8422_v32 = vrot.slane %v8407_v21, %v916_v52  ;;  %v515_v27 = vrot.slane %v8357_v58, %v8319_v31 }
  0xe6   : > { %462 = vbcast.lane.b32.xlu1 %v448_v60, 280  ;;  %458 = vbcast.lane.b32.xlu0 %v448_v60, 272  ;;  %16210 = vst [vmem:[#allocation12_spill] sm:$0xff] %v8410_v22  ;;  %16211 = vst [vmem:[#allocation13_spill] sm:$0xff] %v8413_v25  ;;  %v7911_v23 = vtrunc.f32 %v388_v20  ;;  %v582_v11 = vrot.slane %v8357_v58, %v8324_v41 }
  0xe7   : > { %16212 = vst [vmem:[#allocation14_spill] sm:$0xff] %v8416_v28  ;;  %16213 = vst [vmem:[#allocation15_spill] sm:$0xff] %v8419_v29 }
  0xe8   : > { %16214 = vst [vmem:[#allocation16_spill] sm:$0xff] %v8422_v32  ;;  %v7912_v24 = vcvt.f32.s32 %v7911_v23 }
  0xea   : > { %470 = vbcast.lane.b32.xlu1 %v448_v60, 296  ;;  %466 = vbcast.lane.b32.xlu0 %v448_v60, 288  ;;  %v8429_v33 = vsel %vm16217_vm13, %v7912_v24, 263 }
  0xeb   : > { %v8432_v34 = vrot.slane %v8429_v33, %v648_v43  ;;  %v8435_v35 = vrot.slane %v8429_v33, %v715_v17  ;;  %v8438_v36 = vrot.slane %v8429_v33, %v782_v45  ;;  %v8441_v37 = vrot.slane %v8429_v33, %v849_v48 }
  0xec   : > { %v8444_v26 = vrot.slane %v8429_v33, %v916_v52 }
  0xed   : > { %16218 = vst [vmem:[#allocation17_spill] sm:$0xff] %v8432_v34  ;;  %16219 = vst [vmem:[#allocation18_spill] sm:$0xff] %v8435_v35 }
  0xee   : > { %478 = vbcast.lane.b32.xlu1 %v448_v60, 312  ;;  %474 = vbcast.lane.b32.xlu0 %v448_v60, 304  ;;  %16220 = vst [vmem:[#allocation19_spill] sm:$0xff] %v8438_v36  ;;  %16221 = vst [vmem:[#allocation20_spill] sm:$0xff] %v8441_v37 }
  0xef   : > { %16222 = vst [vmem:[#allocation21_spill] sm:$0xff] %v8444_v26 }
  0xf2   : > { %486 = vbcast.lane.b32.xlu1 %v448_v60, 328  ;;  %482 = vbcast.lane.b32.xlu0 %v448_v60, 320 }
  0xf6   : > { %494 = vbcast.lane.b32.xlu1 %v448_v60, 344  ;;  %490 = vbcast.lane.b32.xlu0 %v448_v60, 336 }
  0xfa   : > { %502 = vbcast.lane.b32.xlu1 %v448_v60, 360  ;;  %498 = vbcast.lane.b32.xlu0 %v448_v60, 352 }
  0xfe   : > { %510 = vbcast.lane.b32.xlu1 %v448_v60, 376  ;;  %506 = vbcast.lane.b32.xlu0 %v448_v60, 368 }
 0x102   : > { %521 = vbcast.lane.b32.xlu1 %v515_v27, 264  ;;  %517 = vbcast.lane.b32.xlu0 %v515_v27, 256 }
 0x106   : > { %529 = vbcast.lane.b32.xlu1 %v515_v27, 280  ;;  %525 = vbcast.lane.b32.xlu0 %v515_v27, 272 }
 0x10a   : > { %537 = vbcast.lane.b32.xlu1 %v515_v27, 296  ;;  %533 = vbcast.lane.b32.xlu0 %v515_v27, 288 }
 0x10e   : > { %545 = vbcast.lane.b32.xlu1 %v515_v27, 312  ;;  %541 = vbcast.lane.b32.xlu0 %v515_v27, 304 }
 0x112   : > { %553 = vbcast.lane.b32.xlu1 %v515_v27, 328  ;;  %549 = vbcast.lane.b32.xlu0 %v515_v27, 320 }
 0x116   : > { %561 = vbcast.lane.b32.xlu1 %v515_v27, 344  ;;  %557 = vbcast.lane.b32.xlu0 %v515_v27, 336 }
 0x11a   : > { %569 = vbcast.lane.b32.xlu1 %v515_v27, 360  ;;  %565 = vbcast.lane.b32.xlu0 %v515_v27, 352 }
 0x11e   : > { %577 = vbcast.lane.b32.xlu1 %v515_v27, 376  ;;  %573 = vbcast.lane.b32.xlu0 %v515_v27, 368 }
 0x122   : > { %588 = vbcast.lane.b32.xlu1 %v582_v11, 264  ;;  %584 = vbcast.lane.b32.xlu0 %v582_v11, 256 }
 0x126   : > { %596 = vbcast.lane.b32.xlu1 %v582_v11, 280  ;;  %592 = vbcast.lane.b32.xlu0 %v582_v11, 272 }
 0x12a   : > { %604 = vbcast.lane.b32.xlu1 %v582_v11, 296  ;;  %600 = vbcast.lane.b32.xlu0 %v582_v11, 288 }
 0x12e   : > { %612 = vbcast.lane.b32.xlu1 %v582_v11, 312  ;;  %608 = vbcast.lane.b32.xlu0 %v582_v11, 304 }
 0x132   : > { %620 = vbcast.lane.b32.xlu1 %v582_v11, 328  ;;  %616 = vbcast.lane.b32.xlu0 %v582_v11, 320 }
 0x136   : > { %628 = vbcast.lane.b32.xlu1 %v582_v11, 344  ;;  %624 = vbcast.lane.b32.xlu0 %v582_v11, 336 }
 0x13a   : > { %636 = vbcast.lane.b32.xlu1 %v582_v11, 360  ;;  %632 = vbcast.lane.b32.xlu0 %v582_v11, 352 }
 0x13e   : > { %644 = vbcast.lane.b32.xlu1 %v582_v11, 376  ;;  %640 = vbcast.lane.b32.xlu0 %v582_v11, 368 }
 0x142   : > { %655 = vbcast.lane.b32.xlu1 %v8362_v61, 264  ;;  %651 = vbcast.lane.b32.xlu0 %v8362_v61, 256 }
 0x146   : > { %663 = vbcast.lane.b32.xlu1 %v8362_v61, 280  ;;  %659 = vbcast.lane.b32.xlu0 %v8362_v61, 272 }
 0x14a   : > { %671 = vbcast.lane.b32.xlu1 %v8362_v61, 296  ;;  %667 = vbcast.lane.b32.xlu0 %v8362_v61, 288 }
 0x14e   : > { %679 = vbcast.lane.b32.xlu1 %v8362_v61, 312  ;;  %675 = vbcast.lane.b32.xlu0 %v8362_v61, 304 }
 0x152   : > { %687 = vbcast.lane.b32.xlu1 %v8362_v61, 328  ;;  %683 = vbcast.lane.b32.xlu0 %v8362_v61, 320 }
 0x154   : > { %v8460_v38 = vpop.permute.xlu1 %454  ;;  %v8462_v39 = vpop.permute.xlu0 %450 }
 0x155   : > { %vm2591_vm9 = vcmp.eq.s32.totalorder %v8460_v38, %v8233_v9  ;;  %vm2589_vm11 = vcmp.eq.s32.totalorder %v8462_v39, %v8233_v9 }
 0x156   : > { %695 = vbcast.lane.b32.xlu1 %v8362_v61, 344  ;;  %691 = vbcast.lane.b32.xlu0 %v8362_v61, 336 }
 0x158   : > { %v8466_v14 = vpop.permute.xlu1 %462  ;;  %v8468_v15 = vpop.permute.xlu0 %458 }
 0x159   : > { %vm2595_vm2 = vcmp.eq.s32.totalorder %v8466_v14, %v8233_v9  ;;  %vm2593_vm0 = vcmp.eq.s32.totalorder %v8468_v15, %v8233_v9 }
 0x15a   : > { %703 = vbcast.lane.b32.xlu1 %v8362_v61, 360  ;;  %699 = vbcast.lane.b32.xlu0 %v8362_v61, 352 }
 0x15c   : > { %v8472_v40 = vpop.permute.xlu1 %470  ;;  %v8474_v42 = vpop.permute.xlu0 %466 }
 0x15d   : > { %vm2599_vm6 = vcmp.eq.s32.totalorder %v8472_v40, %v8233_v9  ;;  %vm2597_vm14 = vcmp.eq.s32.totalorder %v8474_v42, %v8233_v9 }
 0x15e   : > { %711 = vbcast.lane.b32.xlu1 %v8362_v61, 376  ;;  %707 = vbcast.lane.b32.xlu0 %v8362_v61, 368 }
 0x160   : > { %v8478_v43 = vpop.permute.xlu1 %478  ;;  %v8480_v44 = vpop.permute.xlu0 %474 }
 0x161   : > { %vm2603_vm5 = vcmp.eq.s32.totalorder %v8478_v43, %v8233_v9  ;;  %vm2601_vm12 = vcmp.eq.s32.totalorder %v8480_v44, %v8233_v9 }
 0x162   : > { %722 = vbcast.lane.b32.xlu1 %v8366_v62, 264  ;;  %718 = vbcast.lane.b32.xlu0 %v8366_v62, 256 }
 0x164   : > { %v8484_v17 = vpop.permute.xlu1 %486  ;;  %v8486_v45 = vpop.permute.xlu0 %482 }
 0x166   : > { %730 = vbcast.lane.b32.xlu1 %v8366_v62, 280  ;;  %726 = vbcast.lane.b32.xlu0 %v8366_v62, 272 }
 0x168   : > { %v8490_v46 = vpop.permute.xlu1 %494  ;;  %v8492_v47 = vpop.permute.xlu0 %490 }
 0x16a   : > { %738 = vbcast.lane.b32.xlu1 %v8366_v62, 296  ;;  %734 = vbcast.lane.b32.xlu0 %v8366_v62, 288 }
 0x16c   : > { %v8496_v48 = vpop.permute.xlu1 %502  ;;  %v8498_v49 = vpop.permute.xlu0 %498 }
 0x16e   : > { %746 = vbcast.lane.b32.xlu1 %v8366_v62, 312  ;;  %742 = vbcast.lane.b32.xlu0 %v8366_v62, 304 }
 0x170   : > { %v8502_v50 = vpop.permute.xlu1 %510  ;;  %v8504_v51 = vpop.permute.xlu0 %506 }
 0x172   : > { %754 = vbcast.lane.b32.xlu1 %v8366_v62, 328  ;;  %750 = vbcast.lane.b32.xlu0 %v8366_v62, 320 }
 0x174   : > { %v8508_v52 = vpop.permute.xlu1 %521  ;;  %v8510_v53 = vpop.permute.xlu0 %517 }
 0x176   : > { %762 = vbcast.lane.b32.xlu1 %v8366_v62, 344  ;;  %758 = vbcast.lane.b32.xlu0 %v8366_v62, 336 }
 0x178   : > { %v8514_v54 = vpop.permute.xlu1 %529  ;;  %v8516_v55 = vpop.permute.xlu0 %525 }
 0x17a   : > { %770 = vbcast.lane.b32.xlu1 %v8366_v62, 360  ;;  %766 = vbcast.lane.b32.xlu0 %v8366_v62, 352 }
 0x17c   : > { %v8520_v56 = vpop.permute.xlu1 %537  ;;  %v8522_v57 = vpop.permute.xlu0 %533 }
 0x17e   : > { %778 = vbcast.lane.b32.xlu1 %v8366_v62, 376  ;;  %774 = vbcast.lane.b32.xlu0 %v8366_v62, 368 }
 0x180   : > { %v8526_v58 = vpop.permute.xlu1 %545  ;;  %v8528_v59 = vpop.permute.xlu0 %541 }
 0x182   : > { %789 = vbcast.lane.b32.xlu1 %v8369_v63, 264  ;;  %785 = vbcast.lane.b32.xlu0 %v8369_v63, 256 }
 0x184   : > { %v8532_v60 = vpop.permute.xlu1 %553  ;;  %v8534_v61 = vpop.permute.xlu0 %549 }
 0x186   : > { %797 = vbcast.lane.b32.xlu1 %v8369_v63, 280  ;;  %793 = vbcast.lane.b32.xlu0 %v8369_v63, 272 }
 0x188   : > { %v8538_v3 = vpop.permute.xlu1 %561  ;;  %v8540_v4 = vpop.permute.xlu0 %557 }
 0x18a   : > { %805 = vbcast.lane.b32.xlu1 %v8369_v63, 296  ;;  %801 = vbcast.lane.b32.xlu0 %v8369_v63, 288 }
 0x18c   : > { %v8544_v62 = vpop.permute.xlu1 %569  ;;  %v8546_v6 = vpop.permute.xlu0 %565 }
 0x18e   : > { %813 = vbcast.lane.b32.xlu1 %v8369_v63, 312  ;;  %809 = vbcast.lane.b32.xlu0 %v8369_v63, 304 }
 0x190   : > { %v8550_v13 = vpop.permute.xlu1 %577  ;;  %v8552_v16 = vpop.permute.xlu0 %573 }
 0x192   : > { %821 = vbcast.lane.b32.xlu1 %v8369_v63, 328  ;;  %817 = vbcast.lane.b32.xlu0 %v8369_v63, 320 }
 0x194   : > { %v8556_v20 = vpop.permute.xlu1 %588  ;;  %v8558_v23 = vpop.permute.xlu0 %584 }
 0x196   : > { %829 = vbcast.lane.b32.xlu1 %v8369_v63, 344  ;;  %825 = vbcast.lane.b32.xlu0 %v8369_v63, 336 }
 0x198   : > { %v8562_v24 = vpop.permute.xlu1 %596  ;;  %v8564_v27 = vpop.permute.xlu0 %592 }
 0x199   : > { %16223 = vst [vmem:[#allocation22_spill] sm:$0xff] %v8564_v27 }
 0x19a   : > { %837 = vbcast.lane.b32.xlu1 %v8369_v63, 360  ;;  %833 = vbcast.lane.b32.xlu0 %v8369_v63, 352 }
 0x19c   : > { %v8568_v11 = vpop.permute.xlu1 %604  ;;  %v8570_v7 = vpop.permute.xlu0 %600 }
 0x19d   : > { %16224 = vst [vmem:[#allocation23_spill] sm:$0xff] %v8568_v11  ;;  %16225 = vst [vmem:[#allocation24_spill] sm:$0xff] %v8570_v7 }
 0x19e   : > { %845 = vbcast.lane.b32.xlu1 %v8369_v63, 376  ;;  %841 = vbcast.lane.b32.xlu0 %v8369_v63, 368 }
 0x1a0   : > { %v8574_v8 = vpop.permute.xlu1 %612  ;;  %v8576_v26 = vpop.permute.xlu0 %608 }
 0x1a1   : > { %16226 = vst [vmem:[#allocation25_spill] sm:$0xff] %v8574_v8  ;;  %16227 = vst [vmem:[#allocation26_spill] sm:$0xff] %v8576_v26 }
 0x1a2   : > { %856 = vbcast.lane.b32.xlu1 %v8372_v0, 264  ;;  %852 = vbcast.lane.b32.xlu0 %v8372_v0, 256 }
 0x1a4   : > { %v8580_v37 = vpop.permute.xlu1 %620  ;;  %v8582_v36 = vpop.permute.xlu0 %616 }
 0x1a5   : > { %16228 = vst [vmem:[#allocation27_spill] sm:$0xff] %v8580_v37  ;;  %16229 = vst [vmem:[#allocation28_spill] sm:$0xff] %v8582_v36 }
 0x1a6   : > { %864 = vbcast.lane.b32.xlu1 %v8372_v0, 280  ;;  %860 = vbcast.lane.b32.xlu0 %v8372_v0, 272 }
 0x1a8   : > { %v8586_v35 = vpop.permute.xlu1 %628  ;;  %v8588_v34 = vpop.permute.xlu0 %624 }
 0x1a9   : > { %16230 = vst [vmem:[#allocation29_spill] sm:$0xff] %v8586_v35  ;;  %16231 = vst [vmem:[#allocation30_spill] sm:$0xff] %v8588_v34 }
 0x1aa   : > { %872 = vbcast.lane.b32.xlu1 %v8372_v0, 296  ;;  %868 = vbcast.lane.b32.xlu0 %v8372_v0, 288 }
 0x1ac   : > { %v8592_v63 = vpop.permute.xlu1 %636  ;;  %v8594_v32 = vpop.permute.xlu0 %632 }
 0x1ad   : > { %16232 = vst [vmem:[#allocation31_spill] sm:$0xff] %v8592_v63  ;;  %16233 = vst [vmem:[#allocation32_spill] sm:$0xff] %v8594_v32 }
 0x1ae   : > { %880 = vbcast.lane.b32.xlu1 %v8372_v0, 312  ;;  %876 = vbcast.lane.b32.xlu0 %v8372_v0, 304 }
 0x1b0   : > { %v8598_v29 = vpop.permute.xlu1 %644  ;;  %v8600_v28 = vpop.permute.xlu0 %640 }
 0x1b1   : > { %16234 = vst [vmem:[#allocation33_spill] sm:$0xff] %v8598_v29  ;;  %16235 = vst [vmem:[#allocation34_spill] sm:$0xff] %v8600_v28 }
 0x1b2   : > { %888 = vbcast.lane.b32.xlu1 %v8372_v0, 328  ;;  %884 = vbcast.lane.b32.xlu0 %v8372_v0, 320 }
 0x1b4   : > { %v8604_v25 = vpop.permute.xlu1 %655  ;;  %v8606_v22 = vpop.permute.xlu0 %651 }
 0x1b5   : > { %16236 = vst [vmem:[#allocation35_spill] sm:$0xff] %v8604_v25  ;;  %16237 = vst [vmem:[#allocation36_spill] sm:$0xff] %v8606_v22 }
 0x1b6   : > { %896 = vbcast.lane.b32.xlu1 %v8372_v0, 344  ;;  %892 = vbcast.lane.b32.xlu0 %v8372_v0, 336 }
 0x1b8   : > { %v8610_v12 = vpop.permute.xlu1 %663  ;;  %v8612_v19 = vpop.permute.xlu0 %659 }
 0x1b9   : > { %16238 = vst [vmem:[#allocation37_spill] sm:$0xff] %v8610_v12  ;;  %16239 = vst [vmem:[#allocation38_spill] sm:$0xff] %v8612_v19 }
 0x1ba   : > { %904 = vbcast.lane.b32.xlu1 %v8372_v0, 360  ;;  %900 = vbcast.lane.b32.xlu0 %v8372_v0, 352 }
 0x1bc   : > { %v8616_v28 = vpop.permute.xlu1 %671  ;;  %v8618_v29 = vpop.permute.xlu0 %667 }
 0x1bd   : > { %16240 = vst [vmem:[#allocation39_spill] sm:$0xff] %v8616_v28  ;;  %16241 = vst [vmem:[#allocation40_spill] sm:$0xff] %v8618_v29 }
 0x1be   : > { %912 = vbcast.lane.b32.xlu1 %v8372_v0, 376  ;;  %908 = vbcast.lane.b32.xlu0 %v8372_v0, 368 }
 0x1c0   : > { %v8622_v22 = vpop.permute.xlu1 %679  ;;  %v8624_v25 = vpop.permute.xlu0 %675 }
 0x1c1   : > { %16242 = vst [vmem:[#allocation41_spill] sm:$0xff] %v8622_v22  ;;  %16243 = vst [vmem:[#allocation42_spill] sm:$0xff] %v8624_v25 }
 0x1c2   : > { %923 = vbcast.lane.b32.xlu1 %v8375_v1, 264  ;;  %919 = vbcast.lane.b32.xlu0 %v8375_v1, 256 }
 0x1c4   : > { %v8628_v19 = vpop.permute.xlu1 %687  ;;  %v8630_v12 = vpop.permute.xlu0 %683 }
 0x1c5   : > { %16244 = vst [vmem:[#allocation43_spill] sm:$0xff] %v8628_v19  ;;  %16245 = vst [vmem:[#allocation44_spill] sm:$0xff] %v8630_v12 }
 0x1c6   : > { %931 = vbcast.lane.b32.xlu1 %v8375_v1, 280  ;;  %927 = vbcast.lane.b32.xlu0 %v8375_v1, 272 }
 0x1c8   : > { %v8634_v29 = vpop.permute.xlu1 %695  ;;  %v8636_v28 = vpop.permute.xlu0 %691 }
 0x1c9   : > { %16246 = vst [vmem:[#allocation45_spill] sm:$0xff] %v8634_v29  ;;  %16247 = vst [vmem:[#allocation46_spill] sm:$0xff] %v8636_v28 }
 0x1ca   : > { %939 = vbcast.lane.b32.xlu1 %v8375_v1, 296  ;;  %935 = vbcast.lane.b32.xlu0 %v8375_v1, 288 }
 0x1cc   : > { %v8640_v0 = vpop.permute.xlu1 %703  ;;  %v8642_v25 = vpop.permute.xlu0 %699 }
 0x1cd   : > { %16248 = vst [vmem:[#allocation47_spill] sm:$0xff] %v8640_v0  ;;  %16249 = vst [vmem:[#allocation48_spill] sm:$0xff] %v8642_v25 }
 0x1ce   : > { %947 = vbcast.lane.b32.xlu1 %v8375_v1, 312  ;;  %943 = vbcast.lane.b32.xlu0 %v8375_v1, 304 }
 0x1d0   : > { %v8646_v12 = vpop.permute.xlu1 %711  ;;  %v8648_v19 = vpop.permute.xlu0 %707 }
 0x1d1   : > { %16250 = vst [vmem:[#allocation49_spill] sm:$0xff] %v8646_v12  ;;  %16251 = vst [vmem:[#allocation50_spill] sm:$0xff] %v8648_v19 }
 0x1d2   : > { %955 = vbcast.lane.b32.xlu1 %v8375_v1, 328  ;;  %951 = vbcast.lane.b32.xlu0 %v8375_v1, 320 }
 0x1d4   : > { %v8652_v28 = vpop.permute.xlu1 %722  ;;  %v8654_v29 = vpop.permute.xlu0 %718 }
 0x1d5   : > { %16252 = vst [vmem:[#allocation51_spill] sm:$0xff] %v8652_v28  ;;  %16253 = vst [vmem:[#allocation52_spill] sm:$0xff] %v8654_v29  ;;  %v984_v29 = vrot.slane %v8382_v2, %v8316_v30 }
 0x1d6   : > { %963 = vbcast.lane.b32.xlu1 %v8375_v1, 344  ;;  %959 = vbcast.lane.b32.xlu0 %v8375_v1, 336 }
 0x1d8   : > { %v8658_v25 = vpop.permute.xlu1 %730  ;;  %v8660_v0 = vpop.permute.xlu0 %726 }
 0x1d9   : > { %16254 = vst [vmem:[#allocation53_spill] sm:$0xff] %v8658_v25  ;;  %16255 = vst [vmem:[#allocation54_spill] sm:$0xff] %v8660_v0 }
 0x1da   : > { %971 = vbcast.lane.b32.xlu1 %v8375_v1, 360  ;;  %967 = vbcast.lane.b32.xlu0 %v8375_v1, 352 }
 0x1dc   : > { %v8664_v19 = vpop.permute.xlu1 %738  ;;  %v8666_v12 = vpop.permute.xlu0 %734 }
 0x1dd   : > { %16256 = vst [vmem:[#allocation55_spill] sm:$0xff] %v8664_v19  ;;  %16257 = vst [vmem:[#allocation56_spill] sm:$0xff] %v8666_v12 }
 0x1de   : > { %979 = vbcast.lane.b32.xlu1 %v8375_v1, 376  ;;  %975 = vbcast.lane.b32.xlu0 %v8375_v1, 368 }
 0x1e0   : > { %v8672_v28 = vpop.permute.xlu1 %746  ;;  %v8674_v25 = vpop.permute.xlu0 %742 }
 0x1e1   : > { %16258 = vst [vmem:[#allocation57_spill] sm:$0xff] %v8672_v28  ;;  %16259 = vst [vmem:[#allocation58_spill] sm:$0xff] %v8674_v25 }
 0x1e2   : > { %990 = vbcast.lane.b32.xlu1 %v984_v29, 264  ;;  %986 = vbcast.lane.b32.xlu0 %v984_v29, 256 }
 0x1e4   : > { %v8676_v0 = vpop.permute.xlu1 %754  ;;  %v8678_v22 = vpop.permute.xlu0 %750 }
 0x1e5   : > { %16260 = vst [vmem:[#allocation59_spill] sm:$0xff] %v8676_v0  ;;  %16261 = vst [vmem:[#allocation60_spill] sm:$0xff] %v8678_v22 }
 0x1e6   : > { %998 = vbcast.lane.b32.xlu1 %v984_v29, 280  ;;  %994 = vbcast.lane.b32.xlu0 %v984_v29, 272 }
 0x1e8   : > { %v8680_v12 = vpop.permute.xlu1 %762  ;;  %v8682_v19 = vpop.permute.xlu0 %758 }
 0x1e9   : > { %16262 = vst [vmem:[#allocation61_spill] sm:$0xff] %v8680_v12  ;;  %16263 = vst [vmem:[#allocation62_spill] sm:$0xff] %v8682_v19 }
 0x1ea   : > { %1006 = vbcast.lane.b32.xlu1 %v984_v29, 296  ;;  %1002 = vbcast.lane.b32.xlu0 %v984_v29, 288 }
 0x1ec   : > { %v8684_v1 = vpop.permute.xlu1 %770  ;;  %v8686_v32 = vpop.permute.xlu0 %766 }
 0x1ed   : > { %16264 = vst [vmem:[#allocation63_spill] sm:$0xff] %v8684_v1  ;;  %16265 = vst [vmem:[#allocation64_spill] sm:$0xff] %v8686_v32 }
 0x1ee   : > { %1014 = vbcast.lane.b32.xlu1 %v984_v29, 312  ;;  %1010 = vbcast.lane.b32.xlu0 %v984_v29, 304 }
 0x1f0   : > { %v8688_v25 = vpop.permute.xlu1 %778  ;;  %v8690_v28 = vpop.permute.xlu0 %774 }
 0x1f1   : > { %16266 = vst [vmem:[#allocation65_spill] sm:$0xff] %v8688_v25  ;;  %16267 = vst [vmem:[#allocation66_spill] sm:$0xff] %v8690_v28  ;;  %v1051_v28 = vrot.slane %v8382_v2, %v8319_v31 }
 0x1f2   : > { %1022 = vbcast.lane.b32.xlu1 %v984_v29, 328  ;;  %1018 = vbcast.lane.b32.xlu0 %v984_v29, 320 }
 0x1f4   : > { %v8692_v22 = vpop.permute.xlu1 %789  ;;  %v8694_v0 = vpop.permute.xlu0 %785 }
 0x1f5   : > { %16268 = vst [vmem:[#allocation67_spill] sm:$0xff] %v8692_v22  ;;  %16269 = vst [vmem:[#allocation68_spill] sm:$0xff] %v8694_v0 }
 0x1f6   : > { %1030 = vbcast.lane.b32.xlu1 %v984_v29, 344  ;;  %1026 = vbcast.lane.b32.xlu0 %v984_v29, 336 }
 0x1f8   : > { %v8696_v19 = vpop.permute.xlu1 %797  ;;  %v8698_v12 = vpop.permute.xlu0 %793 }
 0x1f9   : > { %16270 = vst [vmem:[#allocation69_spill] sm:$0xff] %v8696_v19  ;;  %16271 = vst [vmem:[#allocation70_spill] sm:$0xff] %v8698_v12 }
 0x1fa   : > { %1038 = vbcast.lane.b32.xlu1 %v984_v29, 360  ;;  %1034 = vbcast.lane.b32.xlu0 %v984_v29, 352 }
 0x1fc   : > { %v8700_v32 = vpop.permute.xlu1 %805  ;;  %v8702_v1 = vpop.permute.xlu0 %801 }
 0x1fd   : > { %16272 = vst [vmem:[#allocation71_spill] sm:$0xff] %v8700_v32  ;;  %16273 = vst [vmem:[#allocation72_spill] sm:$0xff] %v8702_v1 }
 0x1fe   : > { %1046 = vbcast.lane.b32.xlu1 %v984_v29, 376  ;;  %1042 = vbcast.lane.b32.xlu0 %v984_v29, 368 }
 0x200   : > { %v8706_v22 = vpop.permute.xlu1 %813  ;;  %v8708_v0 = vpop.permute.xlu0 %809 }
 0x201   : > { %16274 = vst [vmem:[#allocation73_spill] sm:$0xff] %v8706_v22  ;;  %16275 = vst [vmem:[#allocation74_spill] sm:$0xff] %v8708_v0 }
 0x202   : > { %1057 = vbcast.lane.b32.xlu1 %v1051_v28, 264  ;;  %1053 = vbcast.lane.b32.xlu0 %v1051_v28, 256 }
 0x204   : > { %v8710_v19 = vpop.permute.xlu1 %821  ;;  %v8712_v12 = vpop.permute.xlu0 %817 }
 0x205   : > { %16276 = vst [vmem:[#allocation75_spill] sm:$0xff] %v8710_v19  ;;  %16277 = vst [vmem:[#allocation76_spill] sm:$0xff] %v8712_v12 }
 0x206   : > { %1065 = vbcast.lane.b32.xlu1 %v1051_v28, 280  ;;  %1061 = vbcast.lane.b32.xlu0 %v1051_v28, 272 }
 0x208   : > { %v8714_v32 = vpop.permute.xlu1 %829  ;;  %v8716_v1 = vpop.permute.xlu0 %825 }
 0x209   : > { %16278 = vst [vmem:[#allocation77_spill] sm:$0xff] %v8714_v32  ;;  %16279 = vst [vmem:[#allocation78_spill] sm:$0xff] %v8716_v1 }
 0x20a   : > { %1073 = vbcast.lane.b32.xlu1 %v1051_v28, 296  ;;  %1069 = vbcast.lane.b32.xlu0 %v1051_v28, 288 }
 0x20c   : > { %v8718_v29 = vpop.permute.xlu1 %837  ;;  %v8720_v25 = vpop.permute.xlu0 %833 }
 0x20d   : > { %16280 = vst [vmem:[#allocation79_spill] sm:$0xff] %v8718_v29  ;;  %16281 = vst [vmem:[#allocation80_spill] sm:$0xff] %v8720_v25 }
 0x20e   : > { %1081 = vbcast.lane.b32.xlu1 %v1051_v28, 312  ;;  %1077 = vbcast.lane.b32.xlu0 %v1051_v28, 304 }
 0x210   : > { %v8722_v0 = vpop.permute.xlu1 %845  ;;  %v8724_v22 = vpop.permute.xlu0 %841 }
 0x211   : > { %16282 = vst [vmem:[#allocation81_spill] sm:$0xff] %v8722_v0  ;;  %16283 = vst [vmem:[#allocation82_spill] sm:$0xff] %v8724_v22  ;;  %v1118_v22 = vrot.slane %v8382_v2, %v8324_v41 }
 0x212   : > { %1089 = vbcast.lane.b32.xlu1 %v1051_v28, 328  ;;  %1085 = vbcast.lane.b32.xlu0 %v1051_v28, 320 }
 0x214   : > { %v8726_v12 = vpop.permute.xlu1 %856  ;;  %v8728_v19 = vpop.permute.xlu0 %852 }
 0x215   : > { %16284 = vst [vmem:[#allocation83_spill] sm:$0xff] %v8726_v12  ;;  %16285 = vst [vmem:[#allocation84_spill] sm:$0xff] %v8728_v19 }
 0x216   : > { %1097 = vbcast.lane.b32.xlu1 %v1051_v28, 344  ;;  %1093 = vbcast.lane.b32.xlu0 %v1051_v28, 336 }
 0x218   : > { %v8730_v1 = vpop.permute.xlu1 %864  ;;  %v8732_v32 = vpop.permute.xlu0 %860 }
 0x219   : > { %16286 = vst [vmem:[#allocation85_spill] sm:$0xff] %v8730_v1  ;;  %16287 = vst [vmem:[#allocation86_spill] sm:$0xff] %v8732_v32 }
 0x21a   : > { %1105 = vbcast.lane.b32.xlu1 %v1051_v28, 360  ;;  %1101 = vbcast.lane.b32.xlu0 %v1051_v28, 352 }
 0x21c   : > { %v8734_v25 = vpop.permute.xlu1 %872  ;;  %v8736_v29 = vpop.permute.xlu0 %868 }
 0x21d   : > { %16288 = vst [vmem:[#allocation87_spill] sm:$0xff] %v8734_v25  ;;  %16289 = vst [vmem:[#allocation88_spill] sm:$0xff] %v8736_v29 }
 0x21e   : > { %1113 = vbcast.lane.b32.xlu1 %v1051_v28, 376  ;;  %1109 = vbcast.lane.b32.xlu0 %v1051_v28, 368 }
 0x220   : > { %v8740_v12 = vpop.permute.xlu1 %880  ;;  %v8742_v19 = vpop.permute.xlu0 %876 }
 0x221   : > { %16290 = vst [vmem:[#allocation89_spill] sm:$0xff] %v8740_v12  ;;  %16291 = vst [vmem:[#allocation90_spill] sm:$0xff] %v8742_v19 }
 0x222   : > { %1124 = vbcast.lane.b32.xlu1 %v1118_v22, 264  ;;  %1120 = vbcast.lane.b32.xlu0 %v1118_v22, 256 }
 0x224   : > { %v8744_v1 = vpop.permute.xlu1 %888  ;;  %v8746_v32 = vpop.permute.xlu0 %884 }
 0x225   : > { %16292 = vst [vmem:[#allocation91_spill] sm:$0xff] %v8744_v1  ;;  %16293 = vst [vmem:[#allocation92_spill] sm:$0xff] %v8746_v32 }
 0x226   : > { %1132 = vbcast.lane.b32.xlu1 %v1118_v22, 280  ;;  %1128 = vbcast.lane.b32.xlu0 %v1118_v22, 272 }
 0x228   : > { %v8748_v25 = vpop.permute.xlu1 %896  ;;  %v8750_v29 = vpop.permute.xlu0 %892 }
 0x229   : > { %16294 = vst [vmem:[#allocation93_spill] sm:$0xff] %v8748_v25  ;;  %16295 = vst [vmem:[#allocation94_spill] sm:$0xff] %v8750_v29 }
 0x22a   : > { %1140 = vbcast.lane.b32.xlu1 %v1118_v22, 296  ;;  %1136 = vbcast.lane.b32.xlu0 %v1118_v22, 288 }
 0x22c   : > { %v8752_v28 = vpop.permute.xlu1 %904  ;;  %v8754_v2 = vpop.permute.xlu0 %900 }
 0x22d   : > { %16296 = vst [vmem:[#allocation95_spill] sm:$0xff] %v8752_v28  ;;  %16297 = vst [vmem:[#allocation96_spill] sm:$0xff] %v8754_v2 }
 0x22e   : > { %1148 = vbcast.lane.b32.xlu1 %v1118_v22, 312  ;;  %1144 = vbcast.lane.b32.xlu0 %v1118_v22, 304 }
 0x230   : > { %v8756_v19 = vpop.permute.xlu1 %912  ;;  %v8758_v12 = vpop.permute.xlu0 %908 }
 0x231   : > { %16298 = vst [vmem:[#allocation97_spill] sm:$0xff] %v8756_v19  ;;  %16299 = vst [vmem:[#allocation98_spill] sm:$0xff] %v8758_v12 }
 0x232   : > { %1156 = vbcast.lane.b32.xlu1 %v1118_v22, 328  ;;  %1152 = vbcast.lane.b32.xlu0 %v1118_v22, 320 }
 0x234   : > { %v8760_v32 = vpop.permute.xlu1 %923  ;;  %v8762_v1 = vpop.permute.xlu0 %919 }
 0x235   : > { %16300 = vst [vmem:[#allocation99_spill] sm:$0xff] %v8760_v32  ;;  %16301 = vst [vmem:[#allocation100_spill] sm:$0xff] %v8762_v1 }
 0x236   : > { %1164 = vbcast.lane.b32.xlu1 %v1118_v22, 344  ;;  %1160 = vbcast.lane.b32.xlu0 %v1118_v22, 336 }
 0x238   : > { %v8764_v29 = vpop.permute.xlu1 %931  ;;  %v8766_v25 = vpop.permute.xlu0 %927 }
 0x239   : > { %16302 = vst [vmem:[#allocation101_spill] sm:$0xff] %v8764_v29  ;;  %16303 = vst [vmem:[#allocation102_spill] sm:$0xff] %v8766_v25 }
 0x23a   : > { %1172 = vbcast.lane.b32.xlu1 %v1118_v22, 360  ;;  %1168 = vbcast.lane.b32.xlu0 %v1118_v22, 352 }
 0x23c   : > { %v8768_v2 = vpop.permute.xlu1 %939  ;;  %v8770_v28 = vpop.permute.xlu0 %935 }
 0x23d   : > { %16304 = vst [vmem:[#allocation103_spill] sm:$0xff] %v8768_v2  ;;  %16305 = vst [vmem:[#allocation104_spill] sm:$0xff] %v8770_v28 }
 0x23e   : > { %1180 = vbcast.lane.b32.xlu1 %v1118_v22, 376  ;;  %1176 = vbcast.lane.b32.xlu0 %v1118_v22, 368  ;;  %v8791_v22 = vadd.s32 128, %v8233_v9 }
 0x240   : > { %v8772_v12 = vpop.permute.xlu1 %947  ;;  %v8774_v19 = vpop.permute.xlu0 %943  ;;  %vm2592_vm10 = vcmp.eq.s32.totalorder %v8460_v38, %v8791_v22  ;;  %vm2590_vm15 = vcmp.eq.s32.totalorder %v8462_v39, %v8791_v22  ;;  %v8829_v38 = vrot.slane %v8429_v33, %v8319_v31  ;;  %vm2596_vm3 = vcmp.eq.s32.totalorder %v8466_v14, %v8791_v22 }
 0x241   : > { %16306 = vst [vmem:[#allocation105_spill] sm:$0xff] %v8772_v12  ;;  %16307 = vst [vmem:[#allocation106_spill] sm:$0xff] %v8774_v19  ;;  %v8823_v12 = vrot.slane %v8429_v33, %v8316_v30  ;;  %vm2594_vm1 = vcmp.eq.s32.totalorder %v8468_v15, %v8791_v22  ;;  %vm2600_vm8 = vcmp.eq.s32.totalorder %v8472_v40, %v8791_v22 }
 0x242   : > { %1191 = vbcast.lane.b32.xlu1 %v8386_v5, 264  ;;  %1187 = vbcast.lane.b32.xlu0 %v8386_v5, 256  ;;  %16320 = vst [vmem:[#allocation119_spill] sm:$0xff] %v8829_v38  ;;  %vm2598_vm4 = vcmp.eq.s32.totalorder %v8474_v42, %v8791_v22  ;;  %vm2604_vm7 = vcmp.eq.s32.totalorder %v8478_v43, %v8791_v22 }
 0x243   : > { %16319 = vst [vmem:[#allocation118_spill] sm:$0xff] %v8823_v12  ;;  %vm2602_vm13 = vcmp.eq.s32.totalorder %v8480_v44, %v8791_v22 }
 0x244   : > { %v8778_v1 = vpop.permute.xlu1 %955  ;;  %v8780_v29 = vpop.permute.xlu0 %951 }
 0x245   : > { %16308 = vst [vmem:[#allocation107_spill] sm:$0xff] %v8778_v1  ;;  %16309 = vst [vmem:[#allocation108_spill] sm:$0xff] %v8780_v29  ;;  %v8819_v29 = vrot.slane %v8407_v21, %v8324_v41 }
 0x246   : > { %1199 = vbcast.lane.b32.xlu1 %v8386_v5, 280  ;;  %1195 = vbcast.lane.b32.xlu0 %v8386_v5, 272 }
 0x247   : > { %16318 = vst [vmem:[#allocation117_spill] sm:$0xff] %v8819_v29 }
 0x248   : > { %v8784_v2 = vpop.permute.xlu1 %963  ;;  %v8786_v28 = vpop.permute.xlu0 %959 }
 0x249   : > { %16310 = vst [vmem:[#allocation109_spill] sm:$0xff] %v8784_v2  ;;  %16311 = vst [vmem:[#allocation110_spill] sm:$0xff] %v8786_v28  ;;  %v8803_v28 = vrot.slane %v8407_v21, %v8316_v30  ;;  %v8815_v2 = vrot.slane %v8407_v21, %v8319_v31 }
 0x24a   : > { %1207 = vbcast.lane.b32.xlu1 %v8386_v5, 296  ;;  %1203 = vbcast.lane.b32.xlu0 %v8386_v5, 288 }
 0x24b   : > { %16314 = vst [vmem:[#allocation113_spill] sm:$0xff] %v8803_v28  ;;  %16317 = vst [vmem:[#allocation116_spill] sm:$0xff] %v8815_v2 }
 0x24c   : > { %v8793_v19 = vpop.permute.xlu1 %971  ;;  %v8795_v1 = vpop.permute.xlu0 %967 }
 0x24d   : > { %16312 = vst [vmem:[#allocation111_spill] sm:$0xff] %v8793_v19  ;;  %16313 = vst [vmem:[#allocation112_spill] sm:$0xff] %v8795_v1 }
 0x24e   : > { %1215 = vbcast.lane.b32.xlu1 %v8386_v5, 312  ;;  %1211 = vbcast.lane.b32.xlu0 %v8386_v5, 304 }
 0x250   : > { %v8809_v19 = vpop.permute.xlu1 %979  ;;  %v8811_v1 = vpop.permute.xlu0 %975 }
 0x251   : > { %16315 = vst [vmem:[#allocation114_spill] sm:$0xff] %v8809_v19  ;;  %16316 = vst [vmem:[#allocation115_spill] sm:$0xff] %v8811_v1  ;;  %v8833_v1 = vrot.slane %v8429_v33, %v8324_v41  ;;  %v15980_v19 = vmov 0.0  }
 0x252   : > { %v8836_v2 = vsel %vm2591_vm9, 1.0, %v15980_v19  ;;  %1223 = vbcast.lane.b32.xlu1 %v8386_v5, 328  ;;  %1219 = vbcast.lane.b32.xlu0 %v8386_v5, 320  ;;  %v8843_v30 = vsel %vm2592_vm10, 1.0, %v15980_v19  ;;  %v8846_v31 = vsel %vm2589_vm11, 1.0, %v15980_v19  ;;  %v8853_v41 = vsel %vm2590_vm15, 1.0, %v15980_v19 }
 0x253   : > { %16321 = vst [vmem:[#allocation120_spill] sm:$0xff] %v8833_v1  ;;  %v8866_v39 = vsel %vm2595_vm2, 1.0, %v15980_v19  ;;  %v8875_v14 = vsel %vm2596_vm3, 1.0, %v15980_v19  ;;  %v8878_v15 = vsel %vm2593_vm0, 1.0, %v15980_v19  ;;  %v8887_v40 = vsel %vm2594_vm1, 1.0, %v15980_v19 }
 0x254   : > { %v8861_v21 = vpop.permute.xlu1 %990  ;;  %v8863_v33 = vpop.permute.xlu0 %986  ;;  %v8890_v42 = vsel %vm2599_vm6, 1.0, %v15980_v19  ;;  %v8893_v1 = vsel %vm2600_vm8, 1.0, %v15980_v19  ;;  %v8898_v43 = vsel %vm2597_vm14, 1.0, %v15980_v19  ;;  %v8901_v38 = vsel %vm2598_vm4, 1.0, %v15980_v19 }
 0x255   : > { %16322 = vst [vmem:[#allocation121_spill] sm:$0xff] %v8861_v21  ;;  %16323 = vst [vmem:[#allocation122_spill] sm:$0xff] %v8863_v33  ;;  %v8904_v12 = vsel %vm2603_vm5, 1.0, %v15980_v19  ;;  %vm2607_vm9 = vcmp.eq.s32.totalorder %v8484_v17, %v8233_v9  ;;  %v8913_v21 = vsel %vm2604_vm7, 1.0, %v15980_v19  ;;  %v8916_v44 = vsel %vm2601_vm12, 1.0, %v15980_v19 }
 0x256   : > { %1231 = vbcast.lane.b32.xlu1 %v8386_v5, 344  ;;  %1227 = vbcast.lane.b32.xlu0 %v8386_v5, 336  ;;  %vm2608_vm10 = vcmp.eq.s32.totalorder %v8484_v17, %v8791_v22  ;;  %vm2605_vm11 = vcmp.eq.s32.totalorder %v8486_v45, %v8233_v9  ;;  %v8923_v25 = vsel %vm2602_vm13, 1.0, %v15980_v19  ;;  %vm2606_vm15 = vcmp.eq.s32.totalorder %v8486_v45, %v8791_v22 }
 0x257   : > { %vm2611_vm2 = vcmp.eq.s32.totalorder %v8490_v46, %v8233_v9  ;;  %vm2612_vm3 = vcmp.eq.s32.totalorder %v8490_v46, %v8791_v22  ;;  %v8934_v17 = vsel %vm2607_vm9, 1.0, %v15980_v19  ;;  %vm2609_vm0 = vcmp.eq.s32.totalorder %v8492_v47, %v8233_v9 }
 0x258   : > { %v8908_v29 = vpop.permute.xlu1 %998  ;;  %v8910_v33 = vpop.permute.xlu0 %994  ;;  %vm2610_vm1 = vcmp.eq.s32.totalorder %v8492_v47, %v8791_v22  ;;  %vm2615_vm6 = vcmp.eq.s32.totalorder %v8496_v48, %v8233_v9  ;;  %v8943_v45 = vsel %vm2608_vm10, 1.0, %v15980_v19  ;;  %v8946_v46 = vsel %vm2605_vm11, 1.0, %v15980_v19 }
 0x259   : > { %16324 = vst [vmem:[#allocation123_spill] sm:$0xff] %v8908_v29  ;;  %16325 = vst [vmem:[#allocation124_spill] sm:$0xff] %v8910_v33  ;;  %vm2616_vm8 = vcmp.eq.s32.totalorder %v8496_v48, %v8791_v22  ;;  %vm2613_vm14 = vcmp.eq.s32.totalorder %v8498_v49, %v8233_v9  ;;  %v8957_v47 = vsel %vm2606_vm15, 1.0, %v15980_v19  ;;  %v8960_v32 = vsel %vm2611_vm2, 1.0, %v15980_v19 }
 0x25a   : > { %1239 = vbcast.lane.b32.xlu1 %v8386_v5, 360  ;;  %1235 = vbcast.lane.b32.xlu0 %v8386_v5, 352  ;;  %v8963_v28 = vsel %vm2612_vm3, 1.0, %v15980_v19  ;;  %vm2614_vm4 = vcmp.eq.s32.totalorder %v8498_v49, %v8791_v22  ;;  %v8968_v48 = vsel %vm2609_vm0, 1.0, %v15980_v19  ;;  %v8971_v0 = vsel %vm2610_vm1, 1.0, %v15980_v19 }
 0x25b   : > { %vm2619_vm5 = vcmp.eq.s32.totalorder %v8502_v50, %v8233_v9  ;;  %v8984_v49 = vsel %vm2613_vm14, 1.0, %v15980_v19  ;;  %vm2623_vm7 = vcmp.eq.s32.totalorder %v8508_v52, %v8233_v9  ;;  %vm2624_vm12 = vcmp.eq.s32.totalorder %v8508_v52, %v8791_v22 }
 0x25c   : > { %v8952_v33 = vpop.permute.xlu1 %1006  ;;  %v8954_v29 = vpop.permute.xlu0 %1002  ;;  %v8991_v63 = vsel %vm2614_vm4, 1.0, %v15980_v19  ;;  %vm2620_vm13 = vcmp.eq.s32.totalorder %v8502_v50, %v8791_v22  ;;  %vm2621_vm9 = vcmp.eq.s32.totalorder %v8510_v53, %v8233_v9  ;;  %vm2622_vm10 = vcmp.eq.s32.totalorder %v8510_v53, %v8791_v22 }
 0x25d   : > { %16326 = vst [vmem:[#allocation125_spill] sm:$0xff] %v8952_v33  ;;  %16327 = vst [vmem:[#allocation126_spill] sm:$0xff] %v8954_v29  ;;  %v8974_v29 = vsel %vm2615_vm6, 1.0, %v15980_v19  ;;  %v8981_v33 = vsel %vm2616_vm8, 1.0, %v15980_v19  ;;  %v9004_v35 = vsel %vm2619_vm5, 1.0, %v15980_v19  ;;  %vm2627_vm11 = vcmp.eq.s32.totalorder %v8514_v54, %v8233_v9 }
 0x25e   : > { %1247 = vbcast.lane.b32.xlu1 %v8386_v5, 376  ;;  %1243 = vbcast.lane.b32.xlu0 %v8386_v5, 368  ;;  %vm2628_vm15 = vcmp.eq.s32.totalorder %v8514_v54, %v8791_v22  ;;  %vm2625_vm2 = vcmp.eq.s32.totalorder %v8516_v55, %v8233_v9  ;;  %v6907_v52 = vsel %vm2623_vm7, 1.0, %v15980_v19  ;;  %v6908_v53 = vsel %vm2624_vm12, 1.0, %v15980_v19 }
 0x25f   : > { %vm2626_vm3 = vcmp.eq.s32.totalorder %v8516_v55, %v8791_v22  ;;  %vm2631_vm0 = vcmp.eq.s32.totalorder %v8520_v56, %v8233_v9  ;;  %v6906_v54 = vsel %vm2622_vm10, 1.0, %v15980_v19  ;;  %vm2632_vm1 = vcmp.eq.s32.totalorder %v8520_v56, %v8791_v22 }
 0x260   : > { %v8999_v5 = vpop.permute.xlu1 %1014  ;;  %v9001_v34 = vpop.permute.xlu0 %1010  ;;  %vm2629_vm6 = vcmp.eq.s32.totalorder %v8522_v57, %v8233_v9  ;;  %v6912_v36 = vsel %vm2628_vm15, 1.0, %v15980_v19  ;;  %v6909_v37 = vsel %vm2625_vm2, 1.0, %v15980_v19  ;;  %vm2630_vm8 = vcmp.eq.s32.totalorder %v8522_v57, %v8791_v22 }
 0x261   : > { %16328 = vst [vmem:[#allocation127_spill] sm:$0xff] %v8999_v5  ;;  %16329 = vst [vmem:[#allocation128_spill] sm:$0xff] %v9001_v34  ;;  %v6905_v34 = vsel %vm2621_vm9, 1.0, %v15980_v19  ;;  %v6911_v5 = vsel %vm2627_vm11, 1.0, %v15980_v19  ;;  %v9036_v8 = vadd.f32 %v6907_v52, %v8836_v2  ;;  %v9039_v7 = vadd.f32 %v6908_v53, %v8843_v30 }
 0x262   : > { %1258 = vbcast.lane.b32.xlu1 %v8391_v10, 264  ;;  %1254 = vbcast.lane.b32.xlu0 %v8391_v10, 256  ;;  %v6910_v11 = vsel %vm2626_vm3, 1.0, %v15980_v19  ;;  %v6915_v27 = vsel %vm2631_vm0, 1.0, %v15980_v19  ;;  %v6916_v2 = vsel %vm2632_vm1, 1.0, %v15980_v19  ;;  %v6913_v30 = vsel %vm2629_vm6, 1.0, %v15980_v19 }
 0x263   : > { %vm2617_vm14 = vcmp.eq.s32.totalorder %v8504_v51, %v8233_v9  ;;  %v9062_v55 = vadd.f32 %v6911_v5, %v8866_v39  ;;  %v9068_v56 = vadd.f32 %v6909_v37, %v8878_v15  ;;  %v9078_v52 = vadd.f32 %v6915_v27, %v8890_v42 }
 0x264   : > { %v9031_v18 = vpop.permute.xlu1 %1022  ;;  %v9033_v26 = vpop.permute.xlu0 %1018  ;;  %vm2635_vm4 = vcmp.eq.s32.totalorder %v8526_v58, %v8233_v9  ;;  %vm2636_vm5 = vcmp.eq.s32.totalorder %v8526_v58, %v8791_v22  ;;  %v9089_v39 = vadd.f32 %v6916_v2, %v8893_v1  ;;  %v9092_v57 = vadd.f32 %v6913_v30, %v8898_v43 }
 0x265   : > { %16330 = vst [vmem:[#allocation129_spill] sm:$0xff] %v9031_v18  ;;  %16331 = vst [vmem:[#allocation130_spill] sm:$0xff] %v9033_v26  ;;  %v9050_v18 = vadd.f32 %v6905_v34, %v8846_v31  ;;  %v9053_v26 = vadd.f32 %v6906_v54, %v8853_v41  ;;  %v9065_v34 = vadd.f32 %v6912_v36, %v8875_v14  ;;  %v6914_v31 = vsel %vm2630_vm8, 1.0, %v15980_v19 }
 0x266   : > { %1266 = vbcast.lane.b32.xlu1 %v8391_v10, 280  ;;  %1262 = vbcast.lane.b32.xlu0 %v8391_v10, 272  ;;  %v9075_v41 = vadd.f32 %v6910_v11, %v8887_v40  ;;  %vm2633_vm7 = vcmp.eq.s32.totalorder %v8528_v59, %v8233_v9  ;;  %vm2634_vm12 = vcmp.eq.s32.totalorder %v8528_v59, %v8791_v22  ;;  %v9102_v58 = vsel %vm2620_vm13, 1.0, %v15980_v19 }
 0x267   : > { %v9105_v27 = vadd.f32 %v6914_v31, %v8901_v38  ;;  %vm2639_vm9 = vcmp.eq.s32.totalorder %v8532_v60, %v8233_v9  ;;  %vm2640_vm10 = vcmp.eq.s32.totalorder %v8532_v60, %v8791_v22  ;;  %v6919_v59 = vsel %vm2635_vm4, 1.0, %v15980_v19 }
 0x268   : > { %v9084_v36 = vpop.permute.xlu1 %1030  ;;  %v9086_v37 = vpop.permute.xlu0 %1026  ;;  %v6920_v11 = vsel %vm2636_vm5, 1.0, %v15980_v19  ;;  %vm2637_vm13 = vcmp.eq.s32.totalorder %v8534_v61, %v8233_v9  ;;  %vm2638_vm11 = vcmp.eq.s32.totalorder %v8534_v61, %v8791_v22  ;;  %v6917_v50 = vsel %vm2633_vm7, 1.0, %v15980_v19 }
 0x269   : > { %v6918_v1 = vsel %vm2634_vm12, 1.0, %v15980_v19  ;;  %vm2643_vm15 = vcmp.eq.s32.totalorder %v8538_v3, %v8233_v9  ;;  %vm2644_vm2 = vcmp.eq.s32.totalorder %v8538_v3, %v8791_v22  ;;  %v6923_v14 = vsel %vm2639_vm9, 1.0, %v15980_v19 }
 0x26a   : > { %1274 = vbcast.lane.b32.xlu1 %v8391_v10, 296  ;;  %1270 = vbcast.lane.b32.xlu0 %v8391_v10, 288  ;;  %v6924_v15 = vsel %vm2640_vm10, 1.0, %v15980_v19  ;;  %vm2641_vm3 = vcmp.eq.s32.totalorder %v8540_v4, %v8233_v9  ;;  %vm2642_vm0 = vcmp.eq.s32.totalorder %v8540_v4, %v8791_v22  ;;  %v9136_v61 = vadd.f32 %v6919_v59, %v8904_v12 }
 0x26b   : > { %v9139_v40 = vadd.f32 %v6920_v11, %v8913_v21  ;;  %v6921_v42 = vsel %vm2637_vm13, 1.0, %v15980_v19  ;;  %v6922_v43 = vsel %vm2638_vm11, 1.0, %v15980_v19  ;;  %vm2618_vm1 = vcmp.eq.s32.totalorder %v8504_v51, %v8791_v22 }
 0x26c   : > { %v9125_v60 = vpop.permute.xlu1 %1038  ;;  %v9127_v38 = vpop.permute.xlu0 %1034  ;;  %v9148_v5 = vadd.f32 %v6917_v50, %v8916_v44  ;;  %v9151_v12 = vadd.f32 %v6918_v1, %v8923_v25  ;;  %v6927_v4 = vsel %vm2643_vm15, 1.0, %v15980_v19  ;;  %v6928_v21 = vsel %vm2644_vm2, 1.0, %v15980_v19 }
 0x26d   : > { %v9162_v53 = vadd.f32 %v6923_v14, %v8934_v17  ;;  %v9165_v54 = vadd.f32 %v6924_v15, %v8943_v45  ;;  %v6925_v44 = vsel %vm2641_vm3, 1.0, %v15980_v19  ;;  %v6926_v25 = vsel %vm2642_vm0, 1.0, %v15980_v19 }
 0x26e   : > { %1282 = vbcast.lane.b32.xlu1 %v8391_v10, 312  ;;  %1278 = vbcast.lane.b32.xlu0 %v8391_v10, 304  ;;  %v9174_v31 = vadd.f32 %v6921_v42, %v8946_v46  ;;  %v9177_v3 = vadd.f32 %v6922_v43, %v8957_v47  ;;  %vm2647_vm6 = vcmp.eq.s32.totalorder %v8544_v62, %v8233_v9  ;;  %v6901_v17 = vsel %vm2617_vm14, 1.0, %v15980_v19 }
 0x26f   : > { %vm2648_vm8 = vcmp.eq.s32.totalorder %v8544_v62, %v8791_v22  ;;  %v9188_v45 = vadd.f32 %v6927_v4, %v8960_v32  ;;  %v9191_v46 = vadd.f32 %v6928_v21, %v8963_v28  ;;  %vm2645_vm4 = vcmp.eq.s32.totalorder %v8546_v6, %v8233_v9 }
 0x270   : > { %v9169_v2 = vpop.permute.xlu1 %1046  ;;  %v9171_v30 = vpop.permute.xlu0 %1042  ;;  %v9198_v62 = vadd.f32 %v6925_v44, %v8968_v48  ;;  %v9201_v47 = vadd.f32 %v6926_v25, %v8971_v0  ;;  %vm2646_vm14 = vcmp.eq.s32.totalorder %v8546_v6, %v8791_v22  ;;  %vm2651_vm5 = vcmp.eq.s32.totalorder %v8550_v13, %v8233_v9 }
 0x271   : > { %v6931_v32 = vsel %vm2647_vm6, 1.0, %v15980_v19  ;;  %v6932_v28 = vsel %vm2648_vm8, 1.0, %v15980_v19  ;;  %vm2652_vm7 = vcmp.eq.s32.totalorder %v8550_v13, %v8791_v22  ;;  %vm2649_vm12 = vcmp.eq.s32.totalorder %v8552_v16, %v8233_v9 }
 0x272   : > { %1290 = vbcast.lane.b32.xlu1 %v8391_v10, 328  ;;  %1286 = vbcast.lane.b32.xlu0 %v8391_v10, 320  ;;  %v6929_v59 = vsel %vm2645_vm4, 1.0, %v15980_v19  ;;  %vm2650_vm9 = vcmp.eq.s32.totalorder %v8552_v16, %v8791_v22  ;;  %vm2655_vm10 = vcmp.eq.s32.totalorder %v8556_v20, %v8233_v9  ;;  %vm2656_vm13 = vcmp.eq.s32.totalorder %v8556_v20, %v8791_v22 }
 0x273   : > { %v6930_v6 = vsel %vm2646_vm14, 1.0, %v15980_v19  ;;  %v6935_v11 = vsel %vm2651_vm5, 1.0, %v15980_v19  ;;  %vm2653_vm11 = vcmp.eq.s32.totalorder %v8558_v23, %v8233_v9  ;;  %vm2654_vm15 = vcmp.eq.s32.totalorder %v8558_v23, %v8791_v22 }
 0x274   : > { %v9213_v48 = vpop.permute.xlu1 %1057  ;;  %v9215_v0 = vpop.permute.xlu0 %1053  ;;  %v9233_v50 = vadd.f32 %v6931_v32, %v8974_v29  ;;  %v9236_v1 = vadd.f32 %v6932_v28, %v8981_v33  ;;  %v6936_v20 = vsel %vm2652_vm7, 1.0, %v15980_v19  ;;  %v6933_v14 = vsel %vm2649_vm12, 1.0, %v15980_v19  ;;  %v16332_v32 = vld [vmem:[#allocation22_spill] sm:$0xff] }
 0x275   : > { %v9247_v15 = vadd.f32 %v6929_v59, %v8984_v49  ;;  %v6934_v42 = vsel %vm2650_vm9, 1.0, %v15980_v19  ;;  %v6939_v29 = vsel %vm2655_vm10, 1.0, %v15980_v19  ;;  %v6940_v33 = vsel %vm2656_vm13, 1.0, %v15980_v19  ;;  %v16337_v59 = vld [vmem:[#allocation25_spill] sm:$0xff] }
 0x276   : > { %1298 = vbcast.lane.b32.xlu1 %v8391_v10, 344  ;;  %1294 = vbcast.lane.b32.xlu0 %v8391_v10, 336  ;;  %v9257_v13 = vadd.f32 %v6930_v6, %v8991_v63  ;;  %v9260_v21 = vadd.f32 %v6935_v11, %v9004_v35  ;;  %v6937_v16 = vsel %vm2653_vm11, 1.0, %v15980_v19  ;;  %v6938_v49 = vsel %vm2654_vm15, 1.0, %v15980_v19 }
 0x277   : > { %v6902_v44 = vsel %vm2618_vm1, 1.0, %v15980_v19  ;;  %v9275_v63 = vadd.f32 %v6936_v20, %v9102_v58  ;;  %v9277_v35 = vadd.f32 %v6933_v14, %v6901_v17  ;;  %vm2659_vm2 = vcmp.eq.s32.totalorder %v8562_v24, %v8233_v9  ;;  %v16338_v20 = vld [vmem:[#allocation26_spill] sm:$0xff] }
 0x278   : > { %v9252_v43 = vpop.permute.xlu1 %1065  ;;  %v9254_v4 = vpop.permute.xlu0 %1061  ;;  %v9283_v25 = vadd.f32 %v6934_v42, %v6902_v44  ;;  %v9286_v23 = vadd.f32 %v6939_v29, %v9036_v8  ;;  %v9289_v51 = vadd.f32 %v6940_v33, %v9039_v7  ;;  %vm2660_vm3 = vcmp.eq.s32.totalorder %v8562_v24, %v8791_v22  ;;  %v16335_v24 = vld [vmem:[#allocation23_spill] sm:$0xff] }
 0x279   : > { %v9294_v58 = vadd.f32 %v6937_v16, %v9050_v18  ;;  %v9297_v17 = vadd.f32 %v6938_v49, %v9053_v26  ;;  %vm2657_vm0 = vcmp.eq.s32.totalorder %v16332_v32, %v8233_v9  ;;  %vm2658_vm1 = vcmp.eq.s32.totalorder %v16332_v32, %v8791_v22  ;;  %v16336_v18 = vld [vmem:[#allocation24_spill] sm:$0xff] }
 0x27a   : > { %1306 = vbcast.lane.b32.xlu1 %v8391_v10, 360  ;;  %1302 = vbcast.lane.b32.xlu0 %v8391_v10, 352  ;;  %v6943_v7 = vsel %vm2659_vm2, 1.0, %v15980_v19  ;;  %vm2663_vm6 = vcmp.eq.s32.totalorder %v16335_v24, %v8233_v9  ;;  %vm2664_vm8 = vcmp.eq.s32.totalorder %v16335_v24, %v8791_v22  ;;  %vm2661_vm4 = vcmp.eq.s32.totalorder %v16336_v18, %v8233_v9 }
 0x27b   : > { %v6944_v26 = vsel %vm2660_vm3, 1.0, %v15980_v19  ;;  %vm2662_vm14 = vcmp.eq.s32.totalorder %v16336_v18, %v8791_v22  ;;  %vm2667_vm5 = vcmp.eq.s32.totalorder %v16337_v59, %v8233_v9  ;;  %vm2668_vm7 = vcmp.eq.s32.totalorder %v16337_v59, %v8791_v22 }
 0x27c   : > { %v9303_v8 = vpop.permute.xlu1 %1073  ;;  %v9305_v28 = vpop.permute.xlu0 %1069  ;;  %v6941_v6 = vsel %vm2657_vm0, 1.0, %v15980_v19  ;;  %v6942_v11 = vsel %vm2658_vm1, 1.0, %v15980_v19  ;;  %vm2665_vm12 = vcmp.eq.s32.totalorder %v16338_v20, %v8233_v9  ;;  %vm2666_vm9 = vcmp.eq.s32.totalorder %v16338_v20, %v8791_v22 }
 0x27d   : > { %16333 = vst [vmem:[#allocation22_spill] sm:$0xff] %v9303_v8  ;;  %16334 = vst [vmem:[#allocation131_spill] sm:$0xff] %v9305_v28  ;;  %v9330_v14 = vadd.f32 %v6943_v7, %v9062_v55  ;;  %v6947_v42 = vsel %vm2663_vm6, 1.0, %v15980_v19  ;;  %v6948_v29 = vsel %vm2664_vm8, 1.0, %v15980_v19  ;;  %v6945_v33 = vsel %vm2661_vm4, 1.0, %v15980_v19 }
 0x27e   : > { %1314 = vbcast.lane.b32.xlu1 %v8391_v10, 376  ;;  %1310 = vbcast.lane.b32.xlu0 %v8391_v10, 368  ;;  %v9340_v49 = vadd.f32 %v6944_v26, %v9065_v34  ;;  %v6946_v44 = vsel %vm2662_vm14, 1.0, %v15980_v19  ;;  %v6951_v55 = vsel %vm2667_vm5, 1.0, %v15980_v19  ;;  %v6952_v32 = vsel %vm2668_vm7, 1.0, %v15980_v19  ;;  %v16341_v26 = vld [vmem:[#allocation9_spill] sm:$0xff] }
 0x27f   : > { %v9355_v7 = vadd.f32 %v6941_v6, %v9068_v56  ;;  %v9358_v34 = vadd.f32 %v6942_v11, %v9075_v41  ;;  %v6949_v24 = vsel %vm2665_vm12, 1.0, %v15980_v19  ;;  %v6950_v18 = vsel %vm2666_vm9, 1.0, %v15980_v19  ;;  %v16342_v41 = vld [vmem:[#allocation27_spill] sm:$0xff] }
 0x280   : > { %v9335_v10 = vpop.permute.xlu1 %1081  ;;  %v9337_v16 = vpop.permute.xlu0 %1077  ;;  %v9365_v20 = vadd.f32 %v6947_v42, %v9078_v52  ;;  %v9368_v59 = vadd.f32 %v6948_v29, %v9089_v39  ;;  %v9371_v56 = vadd.f32 %v6945_v33, %v9092_v57  ;;  %vm2671_vm10 = vcmp.eq.s32.totalorder %v16342_v41, %v8233_v9  ;;  %v16347_v29 = vld [vmem:[#allocation29_spill] sm:$0xff]  ;;  %v16349_v33 = vld [vmem:[#allocation31_spill] sm:$0xff] }
 0x281   : > { %16339 = vst [vmem:[#allocation23_spill] sm:$0xff] %v9335_v10  ;;  %16340 = vst [vmem:[#allocation24_spill] sm:$0xff] %v9337_v16  ;;  %v9376_v6 = vadd.f32 %v6946_v44, %v9105_v27  ;;  %v9379_v11 = vadd.f32 %v6951_v55, %v9136_v61  ;;  %v9382_v19 = vadd.f32 %v6952_v32, %v9139_v40  ;;  %v16345_v27 = vld [vmem:[#allocation28_spill] sm:$0xff]  ;;  %v16346_v61 = vmov 0.0  }
 0x282   : > { %1325 = vbcast.lane.b32.xlu1 %v16341_v26, 264  ;;  %1321 = vbcast.lane.b32.xlu0 %v16341_v26, 256  ;;  %vm2672_vm13 = vcmp.eq.s32.totalorder %v16342_v41, %v8791_v22  ;;  %v9391_v57 = vadd.f32 %v6949_v24, %v9148_v5  ;;  %v9394_v42 = vadd.f32 %v6950_v18, %v9151_v12  ;;  %v6955_v40 = vsel %vm2671_vm10, 1.0, %v16346_v61  ;;  %v16348_v5 = vld [vmem:[#allocation30_spill] sm:$0xff]  ;;  %v16350_v32 = vld [vmem:[#allocation32_spill] sm:$0xff] }
 0x283   : > { %vm2669_vm11 = vcmp.eq.s32.totalorder %v16345_v27, %v8233_v9  ;;  %vm2670_vm15 = vcmp.eq.s32.totalorder %v16345_v27, %v8791_v22  ;;  %vm2675_vm2 = vcmp.eq.s32.totalorder %v16347_v29, %v8233_v9  ;;  %vm2676_vm3 = vcmp.eq.s32.totalorder %v16347_v29, %v8791_v22 }
 0x284   : > { %v9386_v52 = vpop.permute.xlu1 %1089  ;;  %v9388_v39 = vpop.permute.xlu0 %1085  ;;  %vm2673_vm0 = vcmp.eq.s32.totalorder %v16348_v5, %v8233_v9  ;;  %v6956_v12 = vsel %vm2672_vm13, 1.0, %v16346_v61  ;;  %vm2674_vm1 = vcmp.eq.s32.totalorder %v16348_v5, %v8791_v22  ;;  %vm2679_vm6 = vcmp.eq.s32.totalorder %v16349_v33, %v8233_v9 }
 0x285   : > { %16343 = vst [vmem:[#allocation25_spill] sm:$0xff] %v9386_v52  ;;  %16344 = vst [vmem:[#allocation26_spill] sm:$0xff] %v9388_v39  ;;  %vm2680_vm8 = vcmp.eq.s32.totalorder %v16349_v33, %v8791_v22  ;;  %v6953_v44 = vsel %vm2669_vm11, 1.0, %v16346_v61  ;;  %v6954_v55 = vsel %vm2670_vm15, 1.0, %v16346_v61  ;;  %vm2677_vm4 = vcmp.eq.s32.totalorder %v16350_v32, %v8233_v9 }
 0x286   : > { %1333 = vbcast.lane.b32.xlu1 %v16341_v26, 280  ;;  %1329 = vbcast.lane.b32.xlu0 %v16341_v26, 272  ;;  %vm2678_vm14 = vcmp.eq.s32.totalorder %v16350_v32, %v8791_v22  ;;  %v9427_v41 = vadd.f32 %v6955_v40, %v9162_v53  ;;  %v6959_v27 = vsel %vm2675_vm2, 1.0, %v16346_v61  ;;  %v6960_v33 = vsel %vm2676_vm3, 1.0, %v16346_v61 }
 0x287   : > { %v6958_v53 = vsel %vm2674_vm1, 1.0, %v16346_v61  ;;  %v6963_v40 = vsel %vm2679_vm6, 1.0, %v16346_v61  ;;  %v6964_v39 = vsel %vm2680_vm8, 1.0, %v16346_v61  ;;  %v9450_v29 = vadd.f32 %v6953_v44, %v9174_v31 }
 0x288   : > { %v9422_v24 = vpop.permute.xlu1 %1097  ;;  %v9424_v18 = vpop.permute.xlu0 %1093  ;;  %v9453_v52 = vadd.f32 %v6954_v55, %v9177_v3  ;;  %v6962_v5 = vsel %vm2678_vm14, 1.0, %v16346_v61  ;;  %v9467_v16 = vadd.f32 %v6960_v33, %v9191_v46  ;;  %v16353_v3 = vld [vmem:[#allocation33_spill] sm:$0xff]  ;;  %v9479_v10 = vadd.f32 %v6958_v53, %v9201_v47  ;;  %v16362_v53 = vld [vmem:[#allocation38_spill] sm:$0xff] }
 0x289   : > { %16351 = vst [vmem:[#allocation9_spill] sm:$0xff] %v9422_v24  ;;  %16352 = vst [vmem:[#allocation27_spill] sm:$0xff] %v9424_v18  ;;  %v6957_v24 = vsel %vm2673_vm0, 1.0, %v16346_v61  ;;  %v9442_v18 = vadd.f32 %v6956_v12, %v9165_v54  ;;  %v6961_v54 = vsel %vm2677_vm4, 1.0, %v16346_v61  ;;  %v9464_v12 = vadd.f32 %v6959_v27, %v9188_v45 }
 0x28a   : > { %1341 = vbcast.lane.b32.xlu1 %v16341_v26, 296  ;;  %1337 = vbcast.lane.b32.xlu0 %v16341_v26, 288  ;;  %v9470_v31 = vadd.f32 %v6957_v24, %v9198_v62  ;;  %vm2683_vm5 = vcmp.eq.s32.totalorder %v16353_v3, %v8233_v9  ;;  %v9482_v32 = vadd.f32 %v6963_v40, %v9233_v50  ;;  %v16356_v24 = vld [vmem:[#allocation34_spill] sm:$0xff]  ;;  %v16357_v50 = vld [vmem:[#allocation35_spill] sm:$0xff] }
 0x28b   : > { %v9485_v45 = vadd.f32 %v6964_v39, %v9236_v1  ;;  %vm2684_vm7 = vcmp.eq.s32.totalorder %v16353_v3, %v8791_v22  ;;  %v9490_v46 = vadd.f32 %v6961_v54, %v9247_v15  ;;  %v9493_v62 = vadd.f32 %v6962_v5, %v9257_v13  ;;  %v16358_v15 = vld [vmem:[#allocation36_spill] sm:$0xff]  ;;  %v16359_v13 = vld [vmem:[#allocation37_spill] sm:$0xff] }
 0x28c   : > { %v9474_v44 = vpop.permute.xlu1 %1105  ;;  %v9476_v55 = vpop.permute.xlu0 %1101  ;;  %vm2681_vm12 = vcmp.eq.s32.totalorder %v16356_v24, %v8233_v9  ;;  %v6967_v47 = vsel %vm2683_vm5, 1.0, %v16346_v61  ;;  %vm2682_vm9 = vcmp.eq.s32.totalorder %v16356_v24, %v8791_v22  ;;  %vm2687_vm10 = vcmp.eq.s32.totalorder %v16357_v50, %v8233_v9 }
 0x28d   : > { %16354 = vst [vmem:[#allocation28_spill] sm:$0xff] %v9474_v44  ;;  %16355 = vst [vmem:[#allocation29_spill] sm:$0xff] %v9476_v55  ;;  %vm2688_vm13 = vcmp.eq.s32.totalorder %v16357_v50, %v8791_v22  ;;  %v6968_v1 = vsel %vm2684_vm7, 1.0, %v16346_v61  ;;  %vm2685_vm11 = vcmp.eq.s32.totalorder %v16358_v15, %v8233_v9  ;;  %vm2686_vm15 = vcmp.eq.s32.totalorder %v16358_v15, %v8791_v22 }
 0x28e   : > { %1349 = vbcast.lane.b32.xlu1 %v16341_v26, 312  ;;  %1345 = vbcast.lane.b32.xlu0 %v16341_v26, 304  ;;  %vm2691_vm2 = vcmp.eq.s32.totalorder %v16359_v13, %v8233_v9  ;;  %v6965_v33 = vsel %vm2681_vm12, 1.0, %v16346_v61  ;;  %vm2692_vm3 = vcmp.eq.s32.totalorder %v16359_v13, %v8791_v22  ;;  %vm2689_vm0 = vcmp.eq.s32.totalorder %v16362_v53, %v8233_v9 }
 0x28f   : > { %vm2690_vm1 = vcmp.eq.s32.totalorder %v16362_v53, %v8791_v22  ;;  %v9525_v40 = vadd.f32 %v6967_v47, %v9260_v21  ;;  %v6966_v54 = vsel %vm2682_vm9, 1.0, %v16346_v61  ;;  %v6971_v5 = vsel %vm2687_vm10, 1.0, %v16346_v61 }
 0x290   : > { %v9513_v39 = vpop.permute.xlu1 %1113  ;;  %v9515_v27 = vpop.permute.xlu0 %1109  ;;  %v6972_v3 = vsel %vm2688_vm13, 1.0, %v16346_v61  ;;  %v9533_v24 = vadd.f32 %v6968_v1, %v9275_v63  ;;  %v6969_v50 = vsel %vm2685_vm11, 1.0, %v16346_v61  ;;  %v6970_v21 = vsel %vm2686_vm15, 1.0, %v16346_v61 }
 0x291   : > { %16360 = vst [vmem:[#allocation30_spill] sm:$0xff] %v9513_v39  ;;  %16361 = vst [vmem:[#allocation31_spill] sm:$0xff] %v9515_v27  ;;  %v6975_v47 = vsel %vm2691_vm2, 1.0, %v16346_v61  ;;  %v9548_v53 = vadd.f32 %v6965_v33, %v9277_v35  ;;  %v6976_v63 = vsel %vm2692_vm3, 1.0, %v16346_v61  ;;  %v6973_v1 = vsel %vm2689_vm0, 1.0, %v16346_v61  ;;  %v16365_v35 = vld [vmem:[#allocation39_spill] sm:$0xff] }
 0x292   : > { %1357 = vbcast.lane.b32.xlu1 %v16341_v26, 328  ;;  %1353 = vbcast.lane.b32.xlu0 %v16341_v26, 320  ;;  %v6974_v27 = vsel %vm2690_vm1, 1.0, %v16346_v61  ;;  %v9558_v15 = vadd.f32 %v6966_v54, %v9283_v25  ;;  %v9561_v44 = vadd.f32 %v6971_v5, %v9286_v23  ;;  %v9564_v13 = vadd.f32 %v6972_v3, %v9289_v51  ;;  %v16372_v5 = vld [vmem:[#allocation44_spill] sm:$0xff] }
 0x293   : > { %vm2695_vm6 = vcmp.eq.s32.totalorder %v16365_v35, %v8233_v9  ;;  %v9569_v33 = vadd.f32 %v6969_v50, %v9294_v58  ;;  %v9572_v28 = vadd.f32 %v6970_v21, %v9297_v17  ;;  %v9580_v25 = vadd.f32 %v6976_v63, %v9340_v49  ;;  %v16366_v17 = vld [vmem:[#allocation40_spill] sm:$0xff] }
 0x294   : > { %v9553_v39 = vpop.permute.xlu1 %1124  ;;  %v9555_v55 = vpop.permute.xlu0 %1120  ;;  %v9583_v23 = vadd.f32 %v6973_v1, %v9355_v7  ;;  %v9586_v51 = vadd.f32 %v6974_v27, %v9358_v34  ;;  %vm2696_vm8 = vcmp.eq.s32.totalorder %v16365_v35, %v8791_v22  ;;  %v6979_v58 = vsel %vm2695_vm6, 1.0, %v16346_v61  ;;  %v16370_v34 = vld [vmem:[#allocation42_spill] sm:$0xff]  ;;  %v16371_v27 = vld [vmem:[#allocation43_spill] sm:$0xff] }
 0x295   : > { %16363 = vst [vmem:[#allocation32_spill] sm:$0xff] %v9553_v39  ;;  %16364 = vst [vmem:[#allocation33_spill] sm:$0xff] %v9555_v55  ;;  %v9575_v55 = vadd.f32 %v6975_v47, %v9330_v14  ;;  %vm2693_vm4 = vcmp.eq.s32.totalorder %v16366_v17, %v8233_v9  ;;  %vm2694_vm14 = vcmp.eq.s32.totalorder %v16366_v17, %v8791_v22  ;;  %v16367_v14 = vld [vmem:[#allocation41_spill] sm:$0xff]  ;;  %v6980_v54 = vsel %vm2696_vm8, 1.0, %v16346_v61 }
 0x296   : > { %1365 = vbcast.lane.b32.xlu1 %v16341_v26, 344  ;;  %1361 = vbcast.lane.b32.xlu0 %v16341_v26, 336  ;;  %vm2699_vm5 = vcmp.eq.s32.totalorder %v16367_v14, %v8233_v9  ;;  %vm2700_vm7 = vcmp.eq.s32.totalorder %v16367_v14, %v8791_v22  ;;  %vm2697_vm12 = vcmp.eq.s32.totalorder %v16370_v34, %v8233_v9  ;;  %v6977_v50 = vsel %vm2693_vm4, 1.0, %v16346_v61 }
 0x297   : > { %vm2698_vm9 = vcmp.eq.s32.totalorder %v16370_v34, %v8791_v22  ;;  %vm2703_vm10 = vcmp.eq.s32.totalorder %v16371_v27, %v8233_v9  ;;  %vm2704_vm13 = vcmp.eq.s32.totalorder %v16371_v27, %v8791_v22  ;;  %vm2701_vm11 = vcmp.eq.s32.totalorder %v16372_v5, %v8233_v9 }
 0x298   : > { %v9597_v49 = vpop.permute.xlu1 %1132  ;;  %v9599_v7 = vpop.permute.xlu0 %1128  ;;  %vm2702_vm15 = vcmp.eq.s32.totalorder %v16372_v5, %v8791_v22  ;;  %v9619_v3 = vadd.f32 %v6979_v58, %v9365_v20  ;;  %v6978_v21 = vsel %vm2694_vm14, 1.0, %v16346_v61  ;;  %v6983_v47 = vsel %vm2699_vm5, 1.0, %v16346_v61 }
 0x299   : > { %16368 = vst [vmem:[#allocation34_spill] sm:$0xff] %v9597_v49  ;;  %16369 = vst [vmem:[#allocation35_spill] sm:$0xff] %v9599_v7  ;;  %v6984_v63 = vsel %vm2700_vm7, 1.0, %v16346_v61  ;;  %v6981_v20 = vsel %vm2697_vm12, 1.0, %v16346_v61  ;;  %v6982_v1 = vsel %vm2698_vm9, 1.0, %v16346_v61  ;;  %v6987_v35 = vsel %vm2703_vm10, 1.0, %v16346_v61 }
 0x29a   : > { %1373 = vbcast.lane.b32.xlu1 %v16341_v26, 360  ;;  %1369 = vbcast.lane.b32.xlu0 %v16341_v26, 352  ;;  %v9642_v17 = vadd.f32 %v6980_v54, %v9368_v59  ;;  %v6988_v14 = vsel %vm2704_vm13, 1.0, %v16346_v61  ;;  %v6985_v7 = vsel %vm2701_vm11, 1.0, %v16346_v61  ;;  %v9660_v59 = vadd.f32 %v6978_v21, %v9376_v6  ;;  %v16383_v21 = vld [vmem:[#allocation50_spill] sm:$0xff] }
 0x29b   : > { %v9663_v54 = vadd.f32 %v6983_v47, %v9379_v11  ;;  %v9668_v27 = vadd.f32 %v6984_v63, %v9382_v19  ;;  %v9671_v49 = vadd.f32 %v6981_v20, %v9391_v57  ;;  %v9674_v5 = vadd.f32 %v6982_v1, %v9394_v42  ;;  %v16375_v19 = vld [vmem:[#allocation45_spill] sm:$0xff]  ;;  %v16378_v42 = vld [vmem:[#allocation46_spill] sm:$0xff] }
 0x29c   : > { %v9637_v58 = vpop.permute.xlu1 %1140  ;;  %v9639_v34 = vpop.permute.xlu0 %1136  ;;  %v9680_v6 = vadd.f32 %v6988_v14, %v9442_v18  ;;  %v9683_v11 = vadd.f32 %v6985_v7, %v9450_v29  ;;  %vm2707_vm2 = vcmp.eq.s32.totalorder %v16375_v19, %v8233_v9  ;;  %vm2708_vm3 = vcmp.eq.s32.totalorder %v16375_v19, %v8791_v22  ;;  %v16379_v18 = vld [vmem:[#allocation47_spill] sm:$0xff]  ;;  %v16382_v7 = vld [vmem:[#allocation49_spill] sm:$0xff] }
 0x29d   : > { %16373 = vst [vmem:[#allocation36_spill] sm:$0xff] %v9637_v58  ;;  %16374 = vst [vmem:[#allocation37_spill] sm:$0xff] %v9639_v34  ;;  %v6986_v58 = vsel %vm2702_vm15, 1.0, %v16346_v61  ;;  %v9657_v34 = vadd.f32 %v6977_v50, %v9371_v56  ;;  %v9677_v56 = vadd.f32 %v6987_v35, %v9427_v41  ;;  %vm2705_vm0 = vcmp.eq.s32.totalorder %v16378_v42, %v8233_v9  ;;  %v16381_v41 = vld [vmem:[#allocation10_spill] sm:$0xff] }
 0x29e   : > { %1381 = vbcast.lane.b32.xlu1 %v16341_v26, 376  ;;  %1377 = vbcast.lane.b32.xlu0 %v16341_v26, 368  ;;  %v9686_v26 = vadd.f32 %v6986_v58, %v9453_v52  ;;  %vm2706_vm1 = vcmp.eq.s32.totalorder %v16378_v42, %v8791_v22  ;;  %vm2711_vm6 = vcmp.eq.s32.totalorder %v16379_v18, %v8233_v9  ;;  %v16380_v52 = vld [vmem:[#allocation48_spill] sm:$0xff]  ;;  %v6991_v29 = vsel %vm2707_vm2, 1.0, %v16346_v61 }
 0x29f   : > { %vm2712_vm8 = vcmp.eq.s32.totalorder %v16379_v18, %v8791_v22  ;;  %vm2709_vm4 = vcmp.eq.s32.totalorder %v16380_v52, %v8233_v9  ;;  %vm2710_vm14 = vcmp.eq.s32.totalorder %v16380_v52, %v8791_v22  ;;  %vm2715_vm5 = vcmp.eq.s32.totalorder %v16382_v7, %v8233_v9 }
 0x2a0   : > { %v9690_v57 = vpop.permute.xlu1 %1148  ;;  %v9692_v50 = vpop.permute.xlu0 %1144  ;;  %vm2716_vm7 = vcmp.eq.s32.totalorder %v16382_v7, %v8791_v22  ;;  %vm2713_vm12 = vcmp.eq.s32.totalorder %v16383_v21, %v8233_v9  ;;  %v6992_v47 = vsel %vm2708_vm3, 1.0, %v16346_v61  ;;  %v6989_v63 = vsel %vm2705_vm0, 1.0, %v16346_v61 }
 0x2a1   : > { %16376 = vst [vmem:[#allocation38_spill] sm:$0xff] %v9690_v57  ;;  %16377 = vst [vmem:[#allocation39_spill] sm:$0xff] %v9692_v50  ;;  %v6990_v20 = vsel %vm2706_vm1, 1.0, %v16346_v61  ;;  %v6995_v1 = vsel %vm2711_vm6, 1.0, %v16346_v61  ;;  %v6996_v14 = vsel %vm2712_vm8, 1.0, %v16346_v61  ;;  %v6993_v19 = vsel %vm2709_vm4, 1.0, %v16346_v61 }
 0x2a2   : > { %1392 = vbcast.lane.b32.xlu1 %v16381_v41, 264  ;;  %1388 = vbcast.lane.b32.xlu0 %v16381_v41, 256  ;;  %v6994_v42 = vsel %vm2710_vm14, 1.0, %v16346_v61  ;;  %vm2714_vm9 = vcmp.eq.s32.totalorder %v16383_v21, %v8791_v22  ;;  %v9731_v18 = vadd.f32 %v6991_v29, %v9464_v12  ;;  %v6999_v52 = vsel %vm2715_vm5, 1.0, %v16346_v61 }
 0x2a3   : > { %v7000_v7 = vsel %vm2716_vm7, 1.0, %v16346_v61  ;;  %v9742_v50 = vadd.f32 %v6989_v63, %v9470_v31  ;;  %v9745_v21 = vadd.f32 %v6990_v20, %v9479_v10  ;;  %v9748_v12 = vadd.f32 %v6995_v1, %v9482_v32  ;;  %v16392_v20 = vld [vmem:[#allocation55_spill] sm:$0xff] }
 0x2a4   : > { %v9721_v35 = vpop.permute.xlu1 %1156  ;;  %v9723_v58 = vpop.permute.xlu0 %1152  ;;  %v9751_v29 = vadd.f32 %v6996_v14, %v9485_v45  ;;  %v9754_v57 = vadd.f32 %v6993_v19, %v9490_v46  ;;  %v9757_v39 = vadd.f32 %v6994_v42, %v9493_v62  ;;  %v9765_v10 = vadd.f32 %v6999_v52, %v9525_v40  ;;  %v16388_v46 = vld [vmem:[#allocation51_spill] sm:$0xff]  ;;  %v16389_v62 = vld [vmem:[#allocation52_spill] sm:$0xff] }
 0x2a5   : > { %16384 = vst [vmem:[#allocation40_spill] sm:$0xff] %v9721_v35  ;;  %16385 = vst [vmem:[#allocation41_spill] sm:$0xff] %v9723_v58  ;;  %v6997_v35 = vsel %vm2713_vm12, 1.0, %v16346_v61  ;;  %v9739_v58 = vadd.f32 %v6992_v47, %v9467_v16  ;;  %v6998_v16 = vsel %vm2714_vm9, 1.0, %v16346_v61  ;;  %v9768_v32 = vadd.f32 %v7000_v7, %v9533_v24  ;;  %v16390_v24 = vld [vmem:[#allocation53_spill] sm:$0xff]  ;;  %v16395_v42 = vld [vmem:[#allocation56_spill] sm:$0xff] }
 0x2a6   : > { %1400 = vbcast.lane.b32.xlu1 %v16381_v41, 280  ;;  %1396 = vbcast.lane.b32.xlu0 %v16381_v41, 272  ;;  %v9771_v45 = vadd.f32 %v6997_v35, %v9548_v53  ;;  %vm2719_vm10 = vcmp.eq.s32.totalorder %v16388_v46, %v8233_v9  ;;  %vm2720_vm13 = vcmp.eq.s32.totalorder %v16388_v46, %v8791_v22  ;;  %v16391_v53 = vld [vmem:[#allocation54_spill] sm:$0xff] }
 0x2a7   : > { %vm2717_vm11 = vcmp.eq.s32.totalorder %v16389_v62, %v8233_v9  ;;  %vm2718_vm15 = vcmp.eq.s32.totalorder %v16389_v62, %v8791_v22  ;;  %v9784_v40 = vadd.f32 %v6998_v16, %v9558_v15  ;;  %vm2723_vm2 = vcmp.eq.s32.totalorder %v16390_v24, %v8233_v9 }
 0x2a8   : > { %v9760_v47 = vpop.permute.xlu1 %1164  ;;  %v9762_v31 = vpop.permute.xlu0 %1160  ;;  %vm2724_vm3 = vcmp.eq.s32.totalorder %v16390_v24, %v8791_v22  ;;  %vm2721_vm0 = vcmp.eq.s32.totalorder %v16391_v53, %v8233_v9  ;;  %v7003_v63 = vsel %vm2719_vm10, 1.0, %v16346_v61  ;;  %vm2722_vm1 = vcmp.eq.s32.totalorder %v16391_v53, %v8791_v22 }
 0x2a9   : > { %16386 = vst [vmem:[#allocation42_spill] sm:$0xff] %v9760_v47  ;;  %16387 = vst [vmem:[#allocation43_spill] sm:$0xff] %v9762_v31  ;;  %vm2727_vm6 = vcmp.eq.s32.totalorder %v16392_v20, %v8233_v9  ;;  %vm2728_vm8 = vcmp.eq.s32.totalorder %v16392_v20, %v8791_v22  ;;  %v7004_v35 = vsel %vm2720_vm13, 1.0, %v16346_v61  ;;  %v7001_v14 = vsel %vm2717_vm11, 1.0, %v16346_v61 }
 0x2aa   : > { %1408 = vbcast.lane.b32.xlu1 %v16381_v41, 296  ;;  %1404 = vbcast.lane.b32.xlu0 %v16381_v41, 288  ;;  %v7002_v19 = vsel %vm2718_vm15, 1.0, %v16346_v61  ;;  %vm2725_vm4 = vcmp.eq.s32.totalorder %v16395_v42, %v8233_v9  ;;  %v7007_v52 = vsel %vm2723_vm2, 1.0, %v16346_v61  ;;  %v7008_v7 = vsel %vm2724_vm3, 1.0, %v16346_v61 }
 0x2ab   : > { %v7005_v16 = vsel %vm2721_vm0, 1.0, %v16346_v61  ;;  %vm2726_vm14 = vcmp.eq.s32.totalorder %v16395_v42, %v8791_v22  ;;  %v9816_v46 = vadd.f32 %v7003_v63, %v9561_v44  ;;  %v7006_v62 = vsel %vm2722_vm1, 1.0, %v16346_v61 }
 0x2ac   : > { %v9799_v15 = vpop.permute.xlu1 %1172  ;;  %v9801_v1 = vpop.permute.xlu0 %1168  ;;  %v7011_v24 = vsel %vm2727_vm6, 1.0, %v16346_v61  ;;  %v9834_v44 = vadd.f32 %v7001_v14, %v9569_v33  ;;  %v9837_v63 = vadd.f32 %v7002_v19, %v9572_v28  ;;  %v7009_v53 = vsel %vm2725_vm4, 1.0, %v16346_v61  ;;  %v16403_v14 = vld [vmem:[#allocation60_spill] sm:$0xff] }
 0x2ad   : > { %16393 = vst [vmem:[#allocation44_spill] sm:$0xff] %v9799_v15  ;;  %16394 = vst [vmem:[#allocation45_spill] sm:$0xff] %v9801_v1  ;;  %v7012_v1 = vsel %vm2728_vm8, 1.0, %v16346_v61  ;;  %v9831_v15 = vadd.f32 %v7004_v35, %v9564_v13  ;;  %v9845_v8 = vadd.f32 %v7007_v52, %v9575_v55  ;;  %v9848_v20 = vadd.f32 %v7008_v7, %v9580_v25  ;;  %v16405_v7 = vld [vmem:[#allocation62_spill] sm:$0xff] }
 0x2ae   : > { %1416 = vbcast.lane.b32.xlu1 %v16381_v41, 312  ;;  %1412 = vbcast.lane.b32.xlu0 %v16381_v41, 304  ;;  %v9851_v13 = vadd.f32 %v7005_v16, %v9583_v23  ;;  %v7010_v28 = vsel %vm2726_vm14, 1.0, %v16346_v61  ;;  %v9858_v33 = vadd.f32 %v7006_v62, %v9586_v51  ;;  %v9861_v35 = vadd.f32 %v7011_v24, %v9619_v3  ;;  %v16398_v23 = vld [vmem:[#allocation57_spill] sm:$0xff]  ;;  %v16399_v51 = vld [vmem:[#allocation58_spill] sm:$0xff] }
 0x2af   : > { %v9864_v55 = vadd.f32 %v7012_v1, %v9642_v17  ;;  %v9869_v25 = vadd.f32 %v7009_v53, %v9657_v34  ;;  %vm2731_vm5 = vcmp.eq.s32.totalorder %v16398_v23, %v8233_v9  ;;  %vm2732_vm7 = vcmp.eq.s32.totalorder %v16398_v23, %v8791_v22  ;;  %v16400_v17 = vld [vmem:[#allocation59_spill] sm:$0xff] }
 0x2b0   : > { %v9840_v31 = vpop.permute.xlu1 %1180  ;;  %v9842_v47 = vpop.permute.xlu0 %1176  ;;  %vm2729_vm12 = vcmp.eq.s32.totalorder %v16399_v51, %v8233_v9  ;;  %v9878_v3 = vadd.f32 %v7010_v28, %v9660_v59  ;;  %vm2730_vm9 = vcmp.eq.s32.totalorder %v16399_v51, %v8791_v22  ;;  %vm2735_vm10 = vcmp.eq.s32.totalorder %v16400_v17, %v8233_v9  ;;  %v16404_v59 = vld [vmem:[#allocation61_spill] sm:$0xff] }
 0x2b1   : > { %16396 = vst [vmem:[#allocation46_spill] sm:$0xff] %v9840_v31  ;;  %16397 = vst [vmem:[#allocation47_spill] sm:$0xff] %v9842_v47  ;;  %vm2736_vm13 = vcmp.eq.s32.totalorder %v16400_v17, %v8791_v22  ;;  %vm2733_vm11 = vcmp.eq.s32.totalorder %v16403_v14, %v8233_v9  ;;  %vm2734_vm15 = vcmp.eq.s32.totalorder %v16403_v14, %v8791_v22  ;;  %v7015_v19 = vsel %vm2731_vm5, 1.0, %v16346_v61 }
 0x2b2   : > { %1424 = vbcast.lane.b32.xlu1 %v16381_v41, 328  ;;  %1420 = vbcast.lane.b32.xlu0 %v16381_v41, 320  ;;  %vm2739_vm2 = vcmp.eq.s32.totalorder %v16404_v59, %v8233_v9  ;;  %vm2740_vm3 = vcmp.eq.s32.totalorder %v16404_v59, %v8791_v22  ;;  %v7016_v42 = vsel %vm2732_vm7, 1.0, %v16346_v61  ;;  %v7013_v52 = vsel %vm2729_vm12, 1.0, %v16346_v61 }
 0x2b3   : > { %vm2737_vm0 = vcmp.eq.s32.totalorder %v16405_v7, %v8233_v9  ;;  %v7014_v16 = vsel %vm2730_vm9, 1.0, %v16346_v61  ;;  %v7019_v62 = vsel %vm2735_vm10, 1.0, %v16346_v61  ;;  %v7020_v24 = vsel %vm2736_vm13, 1.0, %v16346_v61 }
 0x2b4   : > { %v9886_v34 = vpop.permute.xlu1 %1191  ;;  %v9888_v1 = vpop.permute.xlu0 %1187  ;;  %vm2738_vm1 = vcmp.eq.s32.totalorder %v16405_v7, %v8791_v22  ;;  %v7017_v53 = vsel %vm2733_vm11, 1.0, %v16346_v61  ;;  %v7018_v28 = vsel %vm2734_vm15, 1.0, %v16346_v61  ;;  %v7023_v23 = vsel %vm2739_vm2, 1.0, %v16346_v61 }
 0x2b5   : > { %16401 = vst [vmem:[#allocation48_spill] sm:$0xff] %v9886_v34  ;;  %16402 = vst [vmem:[#allocation10_spill] sm:$0xff] %v9888_v1  ;;  %v7024_v51 = vsel %vm2740_vm3, 1.0, %v16346_v61  ;;  %v9919_v59 = vadd.f32 %v7015_v19, %v9663_v54  ;;  %v9922_v1 = vadd.f32 %v7016_v42, %v9668_v27  ;;  %v9925_v34 = vadd.f32 %v7013_v52, %v9671_v49  ;;  %v16407_v42 = vld [vmem:[#allocation63_spill] sm:$0xff] }
 0x2b6   : > { %1432 = vbcast.lane.b32.xlu1 %v16381_v41, 344  ;;  %1428 = vbcast.lane.b32.xlu0 %v16381_v41, 336  ;;  %v7021_v47 = vsel %vm2737_vm0, 1.0, %v16346_v61  ;;  %v9932_v31 = vadd.f32 %v7014_v16, %v9674_v5  ;;  %v9938_v54 = vadd.f32 %v7020_v24, %v9680_v6  ;;  %v7022_v27 = vsel %vm2738_vm1, 1.0, %v16346_v61 }
 0x2b7   : > { %v9944_v49 = vadd.f32 %v7017_v53, %v9683_v11  ;;  %v9947_v19 = vadd.f32 %v7018_v28, %v9686_v26  ;;  %v9950_v5 = vadd.f32 %v7023_v23, %v9731_v18  ;;  %v9956_v6 = vadd.f32 %v7021_v47, %v9742_v50  ;;  %v16408_v11 = vld [vmem:[#allocation64_spill] sm:$0xff]  ;;  %v16411_v50 = vld [vmem:[#allocation65_spill] sm:$0xff]  ;;  %v16413_v47 = vld [vmem:[#allocation67_spill] sm:$0xff] }
 0x2b8   : > { %v9914_v17 = vpop.permute.xlu1 %1199  ;;  %v9916_v14 = vpop.permute.xlu0 %1195  ;;  %vm2743_vm6 = vcmp.eq.s32.totalorder %v16407_v42, %v8233_v9  ;;  %vm2744_vm8 = vcmp.eq.s32.totalorder %v16407_v42, %v8791_v22  ;;  %vm2741_vm4 = vcmp.eq.s32.totalorder %v16408_v11, %v8233_v9  ;;  %v9969_v18 = vadd.f32 %v7022_v27, %v9745_v21  ;;  %v16414_v28 = vld [vmem:[#allocation68_spill] sm:$0xff] }
 0x2b9   : > { %16406 = vst [vmem:[#allocation49_spill] sm:$0xff] %v9914_v17  ;;  %v9935_v17 = vadd.f32 %v7019_v62, %v9677_v56  ;;  %v9953_v56 = vadd.f32 %v7024_v51, %v9739_v58  ;;  %vm2742_vm14 = vcmp.eq.s32.totalorder %v16408_v11, %v8791_v22  ;;  %vm2747_vm5 = vcmp.eq.s32.totalorder %v16411_v50, %v8233_v9  ;;  %v16412_v58 = vld [vmem:[#allocation66_spill] sm:$0xff] }
 0x2ba   : > { %1440 = vbcast.lane.b32.xlu1 %v16381_v41, 360  ;;  %1436 = vbcast.lane.b32.xlu0 %v16381_v41, 352  ;;  %vm2748_vm7 = vcmp.eq.s32.totalorder %v16411_v50, %v8791_v22  ;;  %vm2745_vm12 = vcmp.eq.s32.totalorder %v16412_v58, %v8233_v9  ;;  %vm2746_vm9 = vcmp.eq.s32.totalorder %v16412_v58, %v8791_v22  ;;  %v7027_v21 = vsel %vm2743_vm6, 1.0, %v16346_v61 }
 0x2bb   : > { %vm2751_vm10 = vcmp.eq.s32.totalorder %v16413_v47, %v8233_v9  ;;  %v7028_v7 = vsel %vm2744_vm8, 1.0, %v16346_v61  ;;  %v7025_v16 = vsel %vm2741_vm4, 1.0, %v16346_v61  ;;  %vm2752_vm13 = vcmp.eq.s32.totalorder %v16413_v47, %v8791_v22 }
 0x2bc   : > { %v9964_v26 = vpop.permute.xlu1 %1207  ;;  %v9966_v52 = vpop.permute.xlu0 %1203  ;;  %v7026_v62 = vsel %vm2742_vm14, 1.0, %v16346_v61  ;;  %v7031_v24 = vsel %vm2747_vm5, 1.0, %v16346_v61  ;;  %v7032_v53 = vsel %vm2748_vm7, 1.0, %v16346_v61  ;;  %vm2749_vm11 = vcmp.eq.s32.totalorder %v16414_v28, %v8233_v9 }
 0x2bd   : > { %16409 = vst [vmem:[#allocation50_spill] sm:$0xff] %v9964_v26  ;;  %16410 = vst [vmem:[#allocation51_spill] sm:$0xff] %v9966_v52  ;;  %v7029_v51 = vsel %vm2745_vm12, 1.0, %v16346_v61  ;;  %v7030_v27 = vsel %vm2746_vm9, 1.0, %v16346_v61  ;;  %v7035_v42 = vsel %vm2751_vm10, 1.0, %v16346_v61  ;;  %vm2750_vm15 = vcmp.eq.s32.totalorder %v16414_v28, %v8791_v22 }
 0x2be   : > { %1448 = vbcast.lane.b32.xlu1 %v16381_v41, 376  ;;  %1444 = vbcast.lane.b32.xlu0 %v16381_v41, 368  ;;  %v10005_v11 = vadd.f32 %v7027_v21, %v9748_v12  ;;  %v10008_v50 = vadd.f32 %v7028_v7, %v9751_v29  ;;  %v10011_v58 = vadd.f32 %v7025_v16, %v9754_v57  ;;  %v7036_v47 = vsel %vm2752_vm13, 1.0, %v16346_v61 }
 0x2bf   : > { %v10020_v52 = vadd.f32 %v7031_v24, %v9765_v10  ;;  %v10023_v12 = vadd.f32 %v7032_v53, %v9768_v32  ;;  %v7033_v57 = vsel %vm2749_vm11, 1.0, %v16346_v61  ;;  %v10030_v29 = vadd.f32 %v7029_v51, %v9771_v45  ;;  %v16421_v45 = vld [vmem:[#allocation70_spill] sm:$0xff]  ;;  %v16423_v24 = vld [vmem:[#allocation72_spill] sm:$0xff]  ;;  %v16424_v51 = vld [vmem:[#allocation73_spill] sm:$0xff] }
 0x2c0   : > { %v9995_v23 = vpop.permute.xlu1 %1215  ;;  %v9997_v41 = vpop.permute.xlu0 %1211  ;;  %v10033_v21 = vadd.f32 %v7030_v27, %v9784_v40  ;;  %v7034_v10 = vsel %vm2750_vm15, 1.0, %v16346_v61  ;;  %v10044_v16 = vadd.f32 %v7036_v47, %v9831_v15  ;;  %vm2753_vm0 = vcmp.eq.s32.totalorder %v16421_v45, %v8233_v9 }
 0x2c1   : > { %16415 = vst [vmem:[#allocation52_spill] sm:$0xff] %v9995_v23  ;;  %16416 = vst [vmem:[#allocation53_spill] sm:$0xff] %v9997_v41  ;;  %v16417_v41 = vld [vmem:[#allocation11_spill] sm:$0xff]  ;;  %v10017_v23 = vadd.f32 %v7026_v62, %v9757_v39  ;;  %v10036_v39 = vadd.f32 %v7035_v42, %v9816_v46  ;;  %v16420_v62 = vld [vmem:[#allocation69_spill] sm:$0xff]  ;;  %v10053_v40 = vadd.f32 %v7033_v57, %v9834_v44  ;;  %v7037_v28 = vsel %vm2753_vm0, 1.0, %v16346_v61 }
 0x2c2   : > { %1459 = vbcast.lane.b32.xlu1 %v16417_v41, 264  ;;  %1455 = vbcast.lane.b32.xlu0 %v16417_v41, 256  ;;  %vm2755_vm2 = vcmp.eq.s32.totalorder %v16420_v62, %v8233_v9  ;;  %vm2756_vm3 = vcmp.eq.s32.totalorder %v16420_v62, %v8791_v22  ;;  %vm2754_vm1 = vcmp.eq.s32.totalorder %v16421_v45, %v8791_v22  ;;  %v16422_v46 = vld [vmem:[#allocation71_spill] sm:$0xff]  ;;  %v16427_v57 = vld [vmem:[#allocation74_spill] sm:$0xff] }
 0x2c3   : > { %vm2759_vm6 = vcmp.eq.s32.totalorder %v16422_v46, %v8233_v9  ;;  %v10062_v15 = vadd.f32 %v7034_v10, %v9837_v63  ;;  %vm2760_vm8 = vcmp.eq.s32.totalorder %v16422_v46, %v8791_v22  ;;  %vm2757_vm4 = vcmp.eq.s32.totalorder %v16423_v24, %v8233_v9 }
 0x2c4   : > { %v10039_v7 = vpop.permute.xlu1 %1223  ;;  %v10041_v32 = vpop.permute.xlu0 %1219  ;;  %vm2758_vm14 = vcmp.eq.s32.totalorder %v16423_v24, %v8791_v22  ;;  %v7039_v44 = vsel %vm2755_vm2, 1.0, %v16346_v61  ;;  %v7040_v53 = vsel %vm2756_vm3, 1.0, %v16346_v61  ;;  %vm2763_vm5 = vcmp.eq.s32.totalorder %v16424_v51, %v8233_v9 }
 0x2c5   : > { %16418 = vst [vmem:[#allocation54_spill] sm:$0xff] %v10039_v7  ;;  %16419 = vst [vmem:[#allocation55_spill] sm:$0xff] %v10041_v32  ;;  %v7038_v42 = vsel %vm2754_vm1, 1.0, %v16346_v61  ;;  %v7043_v47 = vsel %vm2759_vm6, 1.0, %v16346_v61  ;;  %vm2764_vm7 = vcmp.eq.s32.totalorder %v16424_v51, %v8791_v22  ;;  %vm2761_vm12 = vcmp.eq.s32.totalorder %v16427_v57, %v8233_v9 }
 0x2c6   : > { %1467 = vbcast.lane.b32.xlu1 %v16417_v41, 280  ;;  %1463 = vbcast.lane.b32.xlu0 %v16417_v41, 272  ;;  %v7044_v10 = vsel %vm2760_vm8, 1.0, %v16346_v61  ;;  %v7041_v62 = vsel %vm2757_vm4, 1.0, %v16346_v61  ;;  %v7042_v45 = vsel %vm2758_vm14, 1.0, %v16346_v61  ;;  %vm2762_vm9 = vcmp.eq.s32.totalorder %v16427_v57, %v8791_v22 }
 0x2c7   : > { %v10093_v46 = vadd.f32 %v7039_v44, %v9845_v8  ;;  %v10096_v24 = vadd.f32 %v7040_v53, %v9848_v20  ;;  %v10106_v32 = vadd.f32 %v7038_v42, %v9858_v33  ;;  %v10109_v7 = vadd.f32 %v7043_v47, %v9861_v35  ;;  %v16430_v42 = vld [vmem:[#allocation75_spill] sm:$0xff] }
 0x2c8   : > { %v10075_v63 = vpop.permute.xlu1 %1231  ;;  %v10077_v27 = vpop.permute.xlu0 %1227  ;;  %v7048_v8 = vsel %vm2764_vm7, 1.0, %v16346_v61  ;;  %v7045_v44 = vsel %vm2761_vm12, 1.0, %v16346_v61  ;;  %v10124_v33 = vadd.f32 %v7042_v45, %v9878_v3  ;;  %v7046_v35 = vsel %vm2762_vm9, 1.0, %v16346_v61  ;;  %v16431_v3 = vld [vmem:[#allocation76_spill] sm:$0xff] }
 0x2c9   : > { %16425 = vst [vmem:[#allocation56_spill] sm:$0xff] %v10075_v63  ;;  %16426 = vst [vmem:[#allocation57_spill] sm:$0xff] %v10077_v27  ;;  %v10099_v27 = vadd.f32 %v7037_v28, %v9851_v13  ;;  %v7047_v63 = vsel %vm2763_vm5, 1.0, %v16346_v61  ;;  %v10118_v13 = vadd.f32 %v7044_v10, %v9864_v55  ;;  %v10121_v28 = vadd.f32 %v7041_v62, %v9869_v25 }
 0x2ca   : > { %1475 = vbcast.lane.b32.xlu1 %v16417_v41, 296  ;;  %1471 = vbcast.lane.b32.xlu0 %v16417_v41, 288  ;;  %v10131_v51 = vadd.f32 %v7047_v63, %v9919_v59  ;;  %vm2767_vm10 = vcmp.eq.s32.totalorder %v16430_v42, %v8233_v9  ;;  %vm2768_vm13 = vcmp.eq.s32.totalorder %v16430_v42, %v8791_v22  ;;  %v16432_v63 = vld [vmem:[#allocation77_spill] sm:$0xff] }
 0x2cb   : > { %v10140_v55 = vadd.f32 %v7048_v8, %v9922_v1  ;;  %v10143_v25 = vadd.f32 %v7045_v44, %v9925_v34  ;;  %vm2765_vm11 = vcmp.eq.s32.totalorder %v16431_v3, %v8233_v9  ;;  %vm2766_vm15 = vcmp.eq.s32.totalorder %v16431_v3, %v8791_v22  ;;  %v16433_v1 = vld [vmem:[#allocation78_spill] sm:$0xff]  ;;  %v16437_v8 = vld [vmem:[#allocation80_spill] sm:$0xff] }
 0x2cc   : > { %v10113_v20 = vpop.permute.xlu1 %1239  ;;  %v10115_v53 = vpop.permute.xlu0 %1235  ;;  %v10150_v59 = vadd.f32 %v7046_v35, %v9932_v31  ;;  %vm2771_vm2 = vcmp.eq.s32.totalorder %v16432_v63, %v8233_v9  ;;  %vm2772_vm3 = vcmp.eq.s32.totalorder %v16432_v63, %v8791_v22  ;;  %vm2769_vm0 = vcmp.eq.s32.totalorder %v16433_v1, %v8233_v9  ;;  %v16436_v31 = vld [vmem:[#allocation79_spill] sm:$0xff] }
 0x2cd   : > { %16428 = vst [vmem:[#allocation58_spill] sm:$0xff] %v10113_v20  ;;  %16429 = vst [vmem:[#allocation59_spill] sm:$0xff] %v10115_v53  ;;  %v7051_v57 = vsel %vm2767_vm10, 1.0, %v16346_v61  ;;  %v7052_v10 = vsel %vm2768_vm13, 1.0, %v16346_v61  ;;  %vm2770_vm1 = vcmp.eq.s32.totalorder %v16433_v1, %v8791_v22  ;;  %vm2775_vm6 = vcmp.eq.s32.totalorder %v16436_v31, %v8233_v9 }
 0x2ce   : > { %1483 = vbcast.lane.b32.xlu1 %v16417_v41, 312  ;;  %1479 = vbcast.lane.b32.xlu0 %v16417_v41, 304  ;;  %v7049_v62 = vsel %vm2765_vm11, 1.0, %v16346_v61  ;;  %v7050_v45 = vsel %vm2766_vm15, 1.0, %v16346_v61  ;;  %vm2776_vm8 = vcmp.eq.s32.totalorder %v16436_v31, %v8791_v22  ;;  %vm2773_vm4 = vcmp.eq.s32.totalorder %v16437_v8, %v8233_v9 }
 0x2cf   : > { %v7055_v44 = vsel %vm2771_vm2, 1.0, %v16346_v61  ;;  %v7056_v35 = vsel %vm2772_vm3, 1.0, %v16346_v61  ;;  %v7053_v42 = vsel %vm2769_vm0, 1.0, %v16346_v61  ;;  %vm2774_vm14 = vcmp.eq.s32.totalorder %v16437_v8, %v8791_v22  ;;  %v16444_v8 = vld [vmem:[#allocation83_spill] sm:$0xff] }
 0x2d0   : > { %v10158_v34 = vpop.permute.xlu1 %1247  ;;  %v10160_v47 = vpop.permute.xlu0 %1243  ;;  %v10182_v3 = vadd.f32 %v7051_v57, %v9935_v17  ;;  %v10185_v63 = vadd.f32 %v7052_v10, %v9938_v54  ;;  %v7054_v1 = vsel %vm2770_vm1, 1.0, %v16346_v61  ;;  %v10194_v20 = vadd.f32 %v7049_v62, %v9944_v49 }
 0x2d1   : > { %16434 = vst [vmem:[#allocation60_spill] sm:$0xff] %v10158_v34  ;;  %16435 = vst [vmem:[#allocation61_spill] sm:$0xff] %v10160_v47  ;;  %v7059_v47 = vsel %vm2775_vm6, 1.0, %v16346_v61  ;;  %v10197_v26 = vadd.f32 %v7050_v45, %v9947_v19  ;;  %v7060_v17 = vsel %vm2776_vm8, 1.0, %v16346_v61  ;;  %v7057_v54 = vsel %vm2773_vm4, 1.0, %v16346_v61  ;;  %v16441_v45 = vld [vmem:[#allocation82_spill] sm:$0xff] }
 0x2d2   : > { %1491 = vbcast.lane.b32.xlu1 %v16417_v41, 328  ;;  %1487 = vbcast.lane.b32.xlu0 %v16417_v41, 320  ;;  %v10208_v57 = vadd.f32 %v7055_v44, %v9950_v5  ;;  %v10211_v10 = vadd.f32 %v7056_v35, %v9953_v56  ;;  %v10214_v49 = vadd.f32 %v7053_v42, %v9956_v6  ;;  %v7058_v19 = vsel %vm2774_vm14, 1.0, %v16346_v61  ;;  %v16440_v5 = vld [vmem:[#allocation81_spill] sm:$0xff] }
 0x2d3   : > { %v10220_v31 = vadd.f32 %v7054_v1, %v9969_v18  ;;  %v10223_v62 = vadd.f32 %v7059_v47, %v10005_v11  ;;  %vm2779_vm5 = vcmp.eq.s32.totalorder %v16440_v5, %v8233_v9  ;;  %vm2780_vm7 = vcmp.eq.s32.totalorder %v16440_v5, %v8791_v22  ;;  %v16446_v35 = vld [vmem:[#allocation85_spill] sm:$0xff]  ;;  %v16447_v1 = vld [vmem:[#allocation86_spill] sm:$0xff] }
 0x2d4   : > { %v10189_v34 = vpop.permute.xlu1 %1258  ;;  %v10191_v53 = vpop.permute.xlu0 %1254  ;;  %v10230_v56 = vadd.f32 %v7060_v17, %v10008_v50  ;;  %v10233_v6 = vadd.f32 %v7057_v54, %v10011_v58  ;;  %vm2777_vm12 = vcmp.eq.s32.totalorder %v16441_v45, %v8233_v9  ;;  %vm2778_vm9 = vcmp.eq.s32.totalorder %v16441_v45, %v8791_v22  ;;  %v16445_v50 = vld [vmem:[#allocation84_spill] sm:$0xff] }
 0x2d5   : > { %16438 = vst [vmem:[#allocation62_spill] sm:$0xff] %v10189_v34  ;;  %16439 = vst [vmem:[#allocation63_spill] sm:$0xff] %v10191_v53  ;;  %v10244_v47 = vadd.f32 %v7058_v19, %v10017_v23  ;;  %vm2783_vm10 = vcmp.eq.s32.totalorder %v16444_v8, %v8233_v9  ;;  %vm2784_vm13 = vcmp.eq.s32.totalorder %v16444_v8, %v8791_v22  ;;  %v7063_v58 = vsel %vm2779_vm5, 1.0, %v16346_v61 }
 0x2d6   : > { %1499 = vbcast.lane.b32.xlu1 %v16417_v41, 344  ;;  %1495 = vbcast.lane.b32.xlu0 %v16417_v41, 336  ;;  %vm2781_vm11 = vcmp.eq.s32.totalorder %v16445_v50, %v8233_v9  ;;  %v7064_v44 = vsel %vm2780_vm7, 1.0, %v16346_v61  ;;  %vm2782_vm15 = vcmp.eq.s32.totalorder %v16445_v50, %v8791_v22  ;;  %vm2787_vm2 = vcmp.eq.s32.totalorder %v16446_v35, %v8233_v9 }
 0x2d7   : > { %v7061_v23 = vsel %vm2777_vm12, 1.0, %v16346_v61  ;;  %v7062_v42 = vsel %vm2778_vm9, 1.0, %v16346_v61  ;;  %vm2788_vm3 = vcmp.eq.s32.totalorder %v16446_v35, %v8791_v22  ;;  %vm2785_vm0 = vcmp.eq.s32.totalorder %v16447_v1, %v8233_v9 }
 0x2d8   : > { %v10239_v18 = vpop.permute.xlu1 %1266  ;;  %v10241_v11 = vpop.permute.xlu0 %1262  ;;  %v7067_v17 = vsel %vm2783_vm10, 1.0, %v16346_v61  ;;  %v7068_v54 = vsel %vm2784_vm13, 1.0, %v16346_v61  ;;  %v7065_v19 = vsel %vm2781_vm11, 1.0, %v16346_v61  ;;  %vm2786_vm1 = vcmp.eq.s32.totalorder %v16447_v1, %v8791_v22 }
 0x2d9   : > { %16442 = vst [vmem:[#allocation64_spill] sm:$0xff] %v10239_v18  ;;  %16443 = vst [vmem:[#allocation65_spill] sm:$0xff] %v10241_v11  ;;  %v10276_v8 = vadd.f32 %v7063_v58, %v10020_v52  ;;  %v10279_v11 = vadd.f32 %v7064_v44, %v10023_v12  ;;  %v7066_v18 = vsel %vm2782_vm15, 1.0, %v16346_v61  ;;  %v7071_v53 = vsel %vm2787_vm2, 1.0, %v16346_v61 }
 0x2da   : > { %1507 = vbcast.lane.b32.xlu1 %v16417_v41, 360  ;;  %1503 = vbcast.lane.b32.xlu0 %v16417_v41, 352  ;;  %v7072_v52 = vsel %vm2788_vm3, 1.0, %v16346_v61  ;;  %v7069_v12 = vsel %vm2785_vm0, 1.0, %v16346_v61  ;;  %v10300_v50 = vadd.f32 %v7067_v17, %v10036_v39  ;;  %v10303_v58 = vadd.f32 %v7068_v54, %v10044_v16  ;;  %v16457_v17 = vld [vmem:[#allocation91_spill] sm:$0xff] }
 0x2db   : > { %v10313_v44 = vadd.f32 %v7066_v18, %v10062_v15  ;;  %v10316_v35 = vadd.f32 %v7071_v53, %v10093_v46  ;;  %v16453_v15 = vld [vmem:[#allocation88_spill] sm:$0xff]  ;;  %v16454_v53 = vld [vmem:[#allocation89_spill] sm:$0xff]  ;;  %vm2799_vm10 = vcmp.eq.s32.totalorder %v16457_v17, %v8233_v9  ;;  %vm2800_vm13 = vcmp.eq.s32.totalorder %v16457_v17, %v8791_v22 }
 0x2dc   : > { %v10271_v5 = vpop.permute.xlu1 %1274  ;;  %v10273_v45 = vpop.permute.xlu0 %1270  ;;  %vm2789_vm4 = vcmp.eq.s32.totalorder %v16453_v15, %v8233_v9  ;;  %vm2790_vm14 = vcmp.eq.s32.totalorder %v16453_v15, %v8791_v22  ;;  %vm2795_vm5 = vcmp.eq.s32.totalorder %v16454_v53, %v8233_v9  ;;  %vm2796_vm7 = vcmp.eq.s32.totalorder %v16454_v53, %v8791_v22 }
 0x2dd   : > { %16448 = vst [vmem:[#allocation66_spill] sm:$0xff] %v10271_v5  ;;  %16449 = vst [vmem:[#allocation67_spill] sm:$0xff] %v10273_v45  ;;  %v10290_v5 = vadd.f32 %v7061_v23, %v10030_v29  ;;  %v10293_v45 = vadd.f32 %v7062_v42, %v10033_v21  ;;  %v10306_v29 = vadd.f32 %v7065_v19, %v10053_v40  ;;  %v7070_v21 = vsel %vm2786_vm1, 1.0, %v16346_v61  ;;  %v16456_v42 = vld [vmem:[#allocation90_spill] sm:$0xff] }
 0x2de   : > { %1515 = vbcast.lane.b32.xlu1 %v16417_v41, 376  ;;  %1511 = vbcast.lane.b32.xlu0 %v16417_v41, 368  ;;  %v16450_v41 = vld [vmem:[#allocation87_spill] sm:$0xff]  ;;  %v10327_v40 = vadd.f32 %v7072_v52, %v10096_v24  ;;  %v10330_v23 = vadd.f32 %v7069_v12, %v10099_v27  ;;  %v10337_v46 = vadd.f32 %v7070_v21, %v10106_v32  ;;  %v16455_v24 = vld [vmem:[#allocation113_spill] sm:$0xff]  ;;  %v7073_v32 = vsel %vm2789_vm4, 1.0, %v16346_v61  ;;  %v16460_v21 = vld [vmem:[#allocation92_spill] sm:$0xff] }
 0x2df   : > { %vm2791_vm6 = vcmp.eq.s32.totalorder %v16450_v41, %v8233_v9  ;;  %vm2792_vm8 = vcmp.eq.s32.totalorder %v16450_v41, %v8791_v22  ;;  %vm2793_vm12 = vcmp.eq.s32.totalorder %v16456_v42, %v8233_v9  ;;  %vm2794_vm9 = vcmp.eq.s32.totalorder %v16456_v42, %v8791_v22 }
 0x2e0   : > { %v10322_v39 = vpop.permute.xlu1 %1282  ;;  %v10324_v16 = vpop.permute.xlu0 %1278  ;;  %v7075_v27 = vsel %vm2791_vm6, 1.0, %v16346_v61  ;;  %v7076_v18 = vsel %vm2792_vm8, 1.0, %v16346_v61  ;;  %v7074_v1 = vsel %vm2790_vm14, 1.0, %v16346_v61  ;;  %v7079_v52 = vsel %vm2795_vm5, 1.0, %v16346_v61 }
 0x2e1   : > { %16451 = vst [vmem:[#allocation68_spill] sm:$0xff] %v10322_v39  ;;  %16452 = vst [vmem:[#allocation11_spill] sm:$0xff] %v10324_v16  ;;  %v7080_v12 = vsel %vm2796_vm7, 1.0, %v16346_v61  ;;  %vm2797_vm11 = vcmp.eq.s32.totalorder %v16460_v21, %v8233_v9  ;;  %vm2798_vm15 = vcmp.eq.s32.totalorder %v16460_v21, %v8791_v22  ;;  %v10368_v41 = vadd.f32 %v7075_v27, %v10109_v7 }
 0x2e2   : > { %1526 = vbcast.lane.b32.xlu1 %v16455_v24, 264  ;;  %1522 = vbcast.lane.b32.xlu0 %v16455_v24, 256  ;;  %v10371_v15 = vadd.f32 %v7076_v18, %v10118_v13  ;;  %v7077_v53 = vsel %vm2793_vm12, 1.0, %v16346_v61  ;;  %v7078_v42 = vsel %vm2794_vm9, 1.0, %v16346_v61  ;;  %v7083_v7 = vsel %vm2799_vm10, 1.0, %v16346_v61 }
 0x2e3   : > { %v7084_v13 = vsel %vm2800_vm13, 1.0, %v16346_v61  ;;  %v10392_v27 = vadd.f32 %v7079_v52, %v10131_v51  ;;  %v10395_v18 = vadd.f32 %v7080_v12, %v10140_v55  ;;  %v10404_v21 = vadd.f32 %v7077_v53, %v10143_v25  ;;  %v16463_v51 = vld [vmem:[#allocation93_spill] sm:$0xff]  ;;  %v16464_v12 = vld [vmem:[#allocation94_spill] sm:$0xff] }
 0x2e4   : > { %v10357_v54 = vpop.permute.xlu1 %1290  ;;  %v10359_v19 = vpop.permute.xlu0 %1286  ;;  %v10407_v17 = vadd.f32 %v7078_v42, %v10150_v59  ;;  %vm2803_vm2 = vcmp.eq.s32.totalorder %v16463_v51, %v8233_v9  ;;  %vm2804_vm3 = vcmp.eq.s32.totalorder %v16463_v51, %v8791_v22  ;;  %v10414_v55 = vadd.f32 %v7083_v7, %v10182_v3  ;;  %v16465_v3 = vld [vmem:[#allocation95_spill] sm:$0xff]  ;;  %v16466_v42 = vld [vmem:[#allocation96_spill] sm:$0xff]  ;;  %v16470_v51 = vld [vmem:[#allocation98_spill] sm:$0xff] }
 0x2e5   : > { %16458 = vst [vmem:[#allocation69_spill] sm:$0xff] %v10357_v54  ;;  %16459 = vst [vmem:[#allocation70_spill] sm:$0xff] %v10359_v19  ;;  %v10378_v19 = vadd.f32 %v7073_v32, %v10121_v28  ;;  %v10381_v54 = vadd.f32 %v7074_v1, %v10124_v33  ;;  %v7081_v28 = vsel %vm2797_vm11, 1.0, %v16346_v61  ;;  %v7082_v33 = vsel %vm2798_vm15, 1.0, %v16346_v61 }
 0x2e6   : > { %1534 = vbcast.lane.b32.xlu1 %v16455_v24, 280  ;;  %1530 = vbcast.lane.b32.xlu0 %v16455_v24, 272  ;;  %v10417_v52 = vadd.f32 %v7084_v13, %v10185_v63  ;;  %vm2801_vm0 = vcmp.eq.s32.totalorder %v16464_v12, %v8233_v9  ;;  %v10424_v25 = vadd.f32 %v7081_v28, %v10194_v20  ;;  %v7087_v63 = vsel %vm2803_vm2, 1.0, %v16346_v61  ;;  %v16469_v13 = vld [vmem:[#allocation97_spill] sm:$0xff] }
 0x2e7   : > { %v10427_v59 = vadd.f32 %v7082_v33, %v10197_v26  ;;  %vm2802_vm1 = vcmp.eq.s32.totalorder %v16464_v12, %v8791_v22  ;;  %vm2807_vm6 = vcmp.eq.s32.totalorder %v16465_v3, %v8233_v9  ;;  %v7088_v53 = vsel %vm2804_vm3, 1.0, %v16346_v61 }
 0x2e8   : > { %v10399_v32 = vpop.permute.xlu1 %1298  ;;  %v10401_v1 = vpop.permute.xlu0 %1294  ;;  %vm2808_vm8 = vcmp.eq.s32.totalorder %v16465_v3, %v8791_v22  ;;  %vm2805_vm4 = vcmp.eq.s32.totalorder %v16466_v42, %v8233_v9  ;;  %v7085_v7 = vsel %vm2801_vm0, 1.0, %v16346_v61  ;;  %vm2806_vm14 = vcmp.eq.s32.totalorder %v16466_v42, %v8791_v22 }
 0x2e9   : > { %16461 = vst [vmem:[#allocation71_spill] sm:$0xff] %v10399_v32  ;;  %16462 = vst [vmem:[#allocation72_spill] sm:$0xff] %v10401_v1  ;;  %vm2811_vm5 = vcmp.eq.s32.totalorder %v16469_v13, %v8233_v9  ;;  %vm2812_vm7 = vcmp.eq.s32.totalorder %v16469_v13, %v8791_v22  ;;  %v7086_v28 = vsel %vm2802_vm1, 1.0, %v16346_v61  ;;  %v7091_v33 = vsel %vm2807_vm6, 1.0, %v16346_v61 }
 0x2ea   : > { %1542 = vbcast.lane.b32.xlu1 %v16455_v24, 296  ;;  %1538 = vbcast.lane.b32.xlu0 %v16455_v24, 288  ;;  %vm2809_vm12 = vcmp.eq.s32.totalorder %v16470_v51, %v8233_v9  ;;  %vm2810_vm9 = vcmp.eq.s32.totalorder %v16470_v51, %v8791_v22  ;;  %v10459_v12 = vadd.f32 %v7087_v63, %v10208_v57  ;;  %v7092_v13 = vsel %vm2808_vm8, 1.0, %v16346_v61  ;;  %v16479_v51 = vld [vmem:[#allocation103_spill] sm:$0xff] }
 0x2eb   : > { %v10473_v1 = vadd.f32 %v7085_v7, %v10214_v49  ;;  %v7090_v32 = vsel %vm2806_vm14, 1.0, %v16346_v61  ;;  %v7095_v57 = vsel %vm2811_vm5, 1.0, %v16346_v61  ;;  %v10483_v3 = vadd.f32 %v7086_v28, %v10220_v31  ;;  %v16473_v31 = vld [vmem:[#allocation99_spill] sm:$0xff] }
 0x2ec   : > { %v10439_v20 = vpop.permute.xlu1 %1306  ;;  %v10441_v26 = vpop.permute.xlu0 %1302  ;;  %v10486_v16 = vadd.f32 %v7091_v33, %v10223_v62  ;;  %v7093_v49 = vsel %vm2809_vm12, 1.0, %v16346_v61  ;;  %v7094_v42 = vsel %vm2810_vm9, 1.0, %v16346_v61  ;;  %v10497_v7 = vadd.f32 %v7092_v13, %v10230_v56 }
 0x2ed   : > { %16467 = vst [vmem:[#allocation73_spill] sm:$0xff] %v10439_v20  ;;  %16468 = vst [vmem:[#allocation74_spill] sm:$0xff] %v10441_v26  ;;  %v10462_v26 = vadd.f32 %v7088_v53, %v10211_v10  ;;  %v7089_v20 = vsel %vm2805_vm4, 1.0, %v16346_v61  ;;  %v7096_v10 = vsel %vm2812_vm7, 1.0, %v16346_v61  ;;  %vm2815_vm10 = vcmp.eq.s32.totalorder %v16473_v31, %v8233_v9 }
 0x2ee   : > { %1550 = vbcast.lane.b32.xlu1 %v16455_v24, 312  ;;  %1546 = vbcast.lane.b32.xlu0 %v16455_v24, 304  ;;  %v10507_v62 = vadd.f32 %v7090_v32, %v10244_v47  ;;  %v10510_v28 = vadd.f32 %v7095_v57, %v10276_v8  ;;  %v10513_v33 = vadd.f32 %v7096_v10, %v10279_v11  ;;  %v7099_v11 = vsel %vm2815_vm10, 1.0, %v16346_v61  ;;  %v16477_v32 = vld [vmem:[#allocation101_spill] sm:$0xff]  ;;  %v16480_v10 = vld [vmem:[#allocation104_spill] sm:$0xff] }
 0x2ef   : > { %vm2816_vm13 = vcmp.eq.s32.totalorder %v16473_v31, %v8791_v22  ;;  %v10518_v56 = vadd.f32 %v7093_v49, %v10290_v5  ;;  %vm2819_vm2 = vcmp.eq.s32.totalorder %v16477_v32, %v8233_v9  ;;  %vm2820_vm3 = vcmp.eq.s32.totalorder %v16477_v32, %v8791_v22  ;;  %v16478_v5 = vld [vmem:[#allocation102_spill] sm:$0xff] }
 0x2f0   : > { %v10478_v63 = vpop.permute.xlu1 %1314  ;;  %v10480_v53 = vpop.permute.xlu0 %1310  ;;  %vm2817_vm0 = vcmp.eq.s32.totalorder %v16478_v5, %v8233_v9  ;;  %vm2818_vm1 = vcmp.eq.s32.totalorder %v16478_v5, %v8791_v22  ;;  %vm2823_vm6 = vcmp.eq.s32.totalorder %v16479_v51, %v8233_v9  ;;  %vm2824_vm8 = vcmp.eq.s32.totalorder %v16479_v51, %v8791_v22 }
 0x2f1   : > { %16471 = vst [vmem:[#allocation75_spill] sm:$0xff] %v10478_v63  ;;  %16472 = vst [vmem:[#allocation76_spill] sm:$0xff] %v10480_v53  ;;  %v10500_v53 = vadd.f32 %v7089_v20, %v10233_v6  ;;  %v10521_v6 = vadd.f32 %v7094_v42, %v10293_v45  ;;  %v16474_v20 = vld [vmem:[#allocation100_spill] sm:$0xff]  ;;  %v7100_v45 = vsel %vm2816_vm13, 1.0, %v16346_v61  ;;  %vm2821_vm4 = vcmp.eq.s32.totalorder %v16480_v10, %v8233_v9 }
 0x2f2   : > { %1558 = vbcast.lane.b32.xlu1 %v16455_v24, 328  ;;  %1554 = vbcast.lane.b32.xlu0 %v16455_v24, 320  ;;  %vm2813_vm11 = vcmp.eq.s32.totalorder %v16474_v20, %v8233_v9  ;;  %vm2814_vm15 = vcmp.eq.s32.totalorder %v16474_v20, %v8791_v22  ;;  %vm2822_vm14 = vcmp.eq.s32.totalorder %v16480_v10, %v8791_v22  ;;  %v7103_v42 = vsel %vm2819_vm2, 1.0, %v16346_v61 }
 0x2f3   : > { %v7097_v13 = vsel %vm2813_vm11, 1.0, %v16346_v61  ;;  %v7098_v57 = vsel %vm2814_vm15, 1.0, %v16346_v61  ;;  %v10554_v49 = vadd.f32 %v7099_v11, %v10300_v50  ;;  %v7104_v31 = vsel %vm2820_vm3, 1.0, %v16346_v61 }
 0x2f4   : > { %v10527_v47 = vpop.permute.xlu1 %1325  ;;  %v10529_v8 = vpop.permute.xlu0 %1321  ;;  %v7101_v20 = vsel %vm2817_vm0, 1.0, %v16346_v61  ;;  %v7102_v10 = vsel %vm2818_vm1, 1.0, %v16346_v61  ;;  %v7107_v50 = vsel %vm2823_vm6, 1.0, %v16346_v61  ;;  %v7108_v11 = vsel %vm2824_vm8, 1.0, %v16346_v61 }
 0x2f5   : > { %16475 = vst [vmem:[#allocation77_spill] sm:$0xff] %v10527_v47  ;;  %16476 = vst [vmem:[#allocation78_spill] sm:$0xff] %v10529_v8  ;;  %v10564_v47 = vadd.f32 %v7100_v45, %v10303_v58  ;;  %v10582_v58 = vadd.f32 %v7098_v57, %v10313_v44  ;;  %v7105_v45 = vsel %vm2821_vm4, 1.0, %v16346_v61  ;;  %v7106_v5 = vsel %vm2822_vm14, 1.0, %v16346_v61  ;;  %v16483_v44 = vld [vmem:[#allocation105_spill] sm:$0xff] }
 0x2f6   : > { %1566 = vbcast.lane.b32.xlu1 %v16455_v24, 344  ;;  %1562 = vbcast.lane.b32.xlu0 %v16455_v24, 336  ;;  %v10592_v51 = vadd.f32 %v7104_v31, %v10327_v40  ;;  %vm2827_vm5 = vcmp.eq.s32.totalorder %v16483_v44, %v8233_v9  ;;  %v10603_v57 = vadd.f32 %v7107_v50, %v10368_v41  ;;  %v16489_v31 = vld [vmem:[#allocation109_spill] sm:$0xff]  ;;  %v16490_v50 = vld [vmem:[#allocation110_spill] sm:$0xff] }
 0x2f7   : > { %v10606_v63 = vadd.f32 %v7108_v11, %v10371_v15  ;;  %vm2828_vm7 = vcmp.eq.s32.totalorder %v16483_v44, %v8791_v22  ;;  %v7111_v41 = vsel %vm2827_vm5, 1.0, %v16346_v61  ;;  %v16487_v15 = vld [vmem:[#allocation107_spill] sm:$0xff]  ;;  %vm2835_vm2 = vcmp.eq.s32.totalorder %v16489_v31, %v8233_v9 }
 0x2f8   : > { %v10559_v32 = vpop.permute.xlu1 %1333  ;;  %v10561_v8 = vpop.permute.xlu0 %1329  ;;  %vm2831_vm10 = vcmp.eq.s32.totalorder %v16487_v15, %v8233_v9  ;;  %vm2832_vm13 = vcmp.eq.s32.totalorder %v16487_v15, %v8791_v22  ;;  %vm2836_vm3 = vcmp.eq.s32.totalorder %v16489_v31, %v8791_v22  ;;  %vm2833_vm0 = vcmp.eq.s32.totalorder %v16490_v50, %v8233_v9 }
 0x2f9   : > { %16481 = vst [vmem:[#allocation79_spill] sm:$0xff] %v10559_v32  ;;  %16482 = vst [vmem:[#allocation80_spill] sm:$0xff] %v10561_v8  ;;  %v10579_v8 = vadd.f32 %v7097_v13, %v10306_v29  ;;  %v10589_v32 = vadd.f32 %v7103_v42, %v10316_v35  ;;  %v10595_v29 = vadd.f32 %v7101_v20, %v10330_v23  ;;  %v7116_v44 = vsel %vm2832_vm13, 1.0, %v16346_v61 }
 0x2fa   : > { %1574 = vbcast.lane.b32.xlu1 %v16455_v24, 360  ;;  %1570 = vbcast.lane.b32.xlu0 %v16455_v24, 352  ;;  %v10600_v13 = vadd.f32 %v7102_v10, %v10337_v46  ;;  %v10615_v23 = vadd.f32 %v7105_v45, %v10378_v19  ;;  %v10618_v42 = vadd.f32 %v7106_v5, %v10381_v54  ;;  %v16486_v46 = vld [vmem:[#allocation106_spill] sm:$0xff]  ;;  %v16488_v19 = vld [vmem:[#allocation108_spill] sm:$0xff]  ;;  %v7112_v54 = vsel %vm2828_vm7, 1.0, %v16346_v61 }
 0x2fb   : > { %vm2825_vm12 = vcmp.eq.s32.totalorder %v16486_v46, %v8233_v9  ;;  %vm2826_vm9 = vcmp.eq.s32.totalorder %v16486_v46, %v8791_v22  ;;  %vm2829_vm11 = vcmp.eq.s32.totalorder %v16488_v19, %v8233_v9  ;;  %vm2830_vm15 = vcmp.eq.s32.totalorder %v16488_v19, %v8791_v22 }
 0x2fc   : > { %v10610_v35 = vpop.permute.xlu1 %1341  ;;  %v10612_v40 = vpop.permute.xlu0 %1337  ;;  %v7109_v20 = vsel %vm2825_vm12, 1.0, %v16346_v61  ;;  %v7110_v10 = vsel %vm2826_vm9, 1.0, %v16346_v61  ;;  %vm2834_vm1 = vcmp.eq.s32.totalorder %v16490_v50, %v8791_v22  ;;  %v10651_v45 = vadd.f32 %v7111_v41, %v10392_v27 }
 0x2fd   : > { %16484 = vst [vmem:[#allocation81_spill] sm:$0xff] %v10610_v35  ;;  %16485 = vst [vmem:[#allocation82_spill] sm:$0xff] %v10612_v40  ;;  %v7115_v5 = vsel %vm2831_vm10, 1.0, %v16346_v61  ;;  %v7113_v46 = vsel %vm2829_vm11, 1.0, %v16346_v61  ;;  %v10666_v31 = vadd.f32 %v7112_v54, %v10395_v18  ;;  %v7114_v27 = vsel %vm2830_vm15, 1.0, %v16346_v61 }
 0x2fe   : > { %1582 = vbcast.lane.b32.xlu1 %v16455_v24, 376  ;;  %1578 = vbcast.lane.b32.xlu0 %v16455_v24, 368  ;;  %v7119_v41 = vsel %vm2835_vm2, 1.0, %v16346_v61  ;;  %v10674_v15 = vadd.f32 %v7109_v20, %v10404_v21  ;;  %v10677_v40 = vadd.f32 %v7110_v10, %v10407_v17  ;;  %v7117_v18 = vsel %vm2833_vm0, 1.0, %v16346_v61  ;;  %v16494_v17 = vld [vmem:[#allocation111_spill] sm:$0xff] }
 0x2ff   : > { %v7118_v19 = vsel %vm2834_vm1, 1.0, %v16346_v61  ;;  %v10688_v54 = vadd.f32 %v7115_v5, %v10414_v55  ;;  %v10691_v35 = vadd.f32 %v7116_v44, %v10417_v52  ;;  %v10694_v21 = vadd.f32 %v7113_v46, %v10424_v25  ;;  %v16497_v5 = vld [vmem:[#allocation112_spill] sm:$0xff] }
 0x300   : > { %v10646_v24 = vpop.permute.xlu1 %1349  ;;  %v10648_v11 = vpop.permute.xlu0 %1345  ;;  %vm2839_vm6 = vcmp.eq.s32.totalorder %v16494_v17, %v8233_v9  ;;  %v10703_v39 = vadd.f32 %v7114_v27, %v10427_v59  ;;  %v10706_v50 = vadd.f32 %v7119_v41, %v10459_v12  ;;  %vm2840_vm8 = vcmp.eq.s32.totalorder %v16494_v17, %v8791_v22  ;;  %v16499_v12 = vld [vmem:[#allocation115_spill] sm:$0xff]  ;;  %v16503_v27 = vld [vmem:[#allocation122_spill] sm:$0xff] }
 0x301   : > { %16491 = vst [vmem:[#allocation83_spill] sm:$0xff] %v10646_v24  ;;  %16492 = vst [vmem:[#allocation84_spill] sm:$0xff] %v10648_v11  ;;  %v7120_v11 = vsel %vm2836_vm3, 1.0, %v16346_v61  ;;  %v16493_v24 = vld [vmem:[#allocation116_spill] sm:$0xff]  ;;  %v10714_v52 = vadd.f32 %v7117_v18, %v10473_v1  ;;  %v10717_v25 = vadd.f32 %v7118_v19, %v10483_v3  ;;  %vm2837_vm4 = vcmp.eq.s32.totalorder %v16497_v5, %v8233_v9  ;;  %v16500_v3 = vld [vmem:[#allocation121_spill] sm:$0xff] }
 0x302   : > { %1593 = vbcast.lane.b32.xlu1 %v16493_v24, 264  ;;  %1589 = vbcast.lane.b32.xlu0 %v16493_v24, 256  ;;  %v10709_v55 = vadd.f32 %v7120_v11, %v10462_v26  ;;  %v7123_v59 = vsel %vm2839_vm6, 1.0, %v16346_v61  ;;  %vm2838_vm14 = vcmp.eq.s32.totalorder %v16497_v5, %v8791_v22  ;;  %v16498_v26 = vld [vmem:[#allocation114_spill] sm:$0xff]  ;;  %v7124_v1 = vsel %vm2840_vm8, 1.0, %v16346_v61 }
 0x303   : > { %vm2843_vm5 = vcmp.eq.s32.totalorder %v16498_v26, %v8233_v9  ;;  %vm2844_vm7 = vcmp.eq.s32.totalorder %v16498_v26, %v8791_v22  ;;  %vm2841_vm12 = vcmp.eq.s32.totalorder %v16499_v12, %v8233_v9  ;;  %vm2842_vm9 = vcmp.eq.s32.totalorder %v16499_v12, %v8791_v22 }
 0x304   : > { %v10698_v20 = vpop.permute.xlu1 %1357  ;;  %v10700_v10 = vpop.permute.xlu0 %1353  ;;  %vm2847_vm10 = vcmp.eq.s32.totalorder %v16500_v3, %v8233_v9  ;;  %v7121_v46 = vsel %vm2837_vm4, 1.0, %v16346_v61  ;;  %vm2848_vm13 = vcmp.eq.s32.totalorder %v16500_v3, %v8791_v22  ;;  %vm2845_vm11 = vcmp.eq.s32.totalorder %v16503_v27, %v8233_v9 }
 0x305   : > { %16495 = vst [vmem:[#allocation85_spill] sm:$0xff] %v10698_v20  ;;  %16496 = vst [vmem:[#allocation86_spill] sm:$0xff] %v10700_v10  ;;  %vm2846_vm15 = vcmp.eq.s32.totalorder %v16503_v27, %v8791_v22  ;;  %v10749_v41 = vadd.f32 %v7123_v59, %v10486_v16  ;;  %v7122_v18 = vsel %vm2838_vm14, 1.0, %v16346_v61  ;;  %v7127_v19 = vsel %vm2843_vm5, 1.0, %v16346_v61 }
 0x306   : > { %1601 = vbcast.lane.b32.xlu1 %v16493_v24, 280  ;;  %1597 = vbcast.lane.b32.xlu0 %v16493_v24, 272  ;;  %v7128_v17 = vsel %vm2844_vm7, 1.0, %v16346_v61  ;;  %v10757_v5 = vadd.f32 %v7124_v1, %v10497_v7  ;;  %v7125_v26 = vsel %vm2841_vm12, 1.0, %v16346_v61  ;;  %v7126_v16 = vsel %vm2842_vm9, 1.0, %v16346_v61 }
 0x307   : > { %v7131_v59 = vsel %vm2847_vm10, 1.0, %v16346_v61  ;;  %v10772_v27 = vadd.f32 %v7121_v46, %v10500_v53  ;;  %v7132_v7 = vsel %vm2848_vm13, 1.0, %v16346_v61  ;;  %v7129_v1 = vsel %vm2845_vm11, 1.0, %v16346_v61  ;;  %v16505_v53 = vld [vmem:[#allocation123_spill] sm:$0xff] }
 0x308   : > { %v10737_v11 = vpop.permute.xlu1 %1365  ;;  %v10739_v44 = vpop.permute.xlu0 %1361  ;;  %v10782_v12 = vadd.f32 %v7122_v18, %v10507_v62  ;;  %v10785_v20 = vadd.f32 %v7127_v19, %v10510_v28  ;;  %v10788_v3 = vadd.f32 %v7128_v17, %v10513_v33  ;;  %vm2851_vm2 = vcmp.eq.s32.totalorder %v16505_v53, %v8233_v9  ;;  %v16512_v19 = vld [vmem:[#allocation128_spill] sm:$0xff] }
 0x309   : > { %16501 = vst [vmem:[#allocation87_spill] sm:$0xff] %v10737_v11  ;;  %16502 = vst [vmem:[#allocation88_spill] sm:$0xff] %v10739_v44  ;;  %v7130_v44 = vsel %vm2846_vm15, 1.0, %v16346_v61  ;;  %v10793_v46 = vadd.f32 %v7125_v26, %v10518_v56  ;;  %v10796_v34 = vadd.f32 %v7126_v16, %v10521_v6  ;;  %v10804_v62 = vadd.f32 %v7132_v7, %v10564_v47  ;;  %v16506_v6 = vld [vmem:[#allocation124_spill] sm:$0xff]  ;;  %v16507_v47 = vld [vmem:[#allocation125_spill] sm:$0xff] }
 0x30a   : > { %1609 = vbcast.lane.b32.xlu1 %v16493_v24, 296  ;;  %1605 = vbcast.lane.b32.xlu0 %v16493_v24, 288  ;;  %v10807_v28 = vadd.f32 %v7129_v1, %v10579_v8  ;;  %v10810_v33 = vadd.f32 %v7130_v44, %v10582_v58  ;;  %vm2852_vm3 = vcmp.eq.s32.totalorder %v16505_v53, %v8791_v22  ;;  %v7135_v56 = vsel %vm2851_vm2, 1.0, %v16346_v61  ;;  %v16510_v58 = vld [vmem:[#allocation126_spill] sm:$0xff]  ;;  %v16511_v44 = vld [vmem:[#allocation127_spill] sm:$0xff] }
 0x30b   : > { %vm2849_vm0 = vcmp.eq.s32.totalorder %v16506_v6, %v8233_v9  ;;  %vm2850_vm1 = vcmp.eq.s32.totalorder %v16506_v6, %v8791_v22  ;;  %vm2855_vm6 = vcmp.eq.s32.totalorder %v16507_v47, %v8233_v9  ;;  %vm2856_vm8 = vcmp.eq.s32.totalorder %v16507_v47, %v8791_v22 }
 0x30c   : > { %v10777_v11 = vpop.permute.xlu1 %1373  ;;  %v10779_v10 = vpop.permute.xlu0 %1369  ;;  %vm2853_vm4 = vcmp.eq.s32.totalorder %v16510_v58, %v8233_v9  ;;  %vm2854_vm14 = vcmp.eq.s32.totalorder %v16510_v58, %v8791_v22  ;;  %vm2859_vm5 = vcmp.eq.s32.totalorder %v16511_v44, %v8233_v9  ;;  %v7136_v18 = vsel %vm2852_vm3, 1.0, %v16346_v61 }
 0x30d   : > { %16504 = vst [vmem:[#allocation89_spill] sm:$0xff] %v10779_v10  ;;  %v10799_v10 = vadd.f32 %v7131_v59, %v10554_v49  ;;  %vm2860_vm7 = vcmp.eq.s32.totalorder %v16511_v44, %v8791_v22  ;;  %vm2857_vm12 = vcmp.eq.s32.totalorder %v16512_v19, %v8233_v9  ;;  %vm2858_vm9 = vcmp.eq.s32.totalorder %v16512_v19, %v8791_v22 }
 0x30e   : > { %1617 = vbcast.lane.b32.xlu1 %v16493_v24, 312  ;;  %1613 = vbcast.lane.b32.xlu0 %v16493_v24, 304  ;;  %v10843_v17 = vadd.f32 %v7135_v56, %v10589_v32  ;;  %v7133_v26 = vsel %vm2849_vm0, 1.0, %v16346_v61  ;;  %v7134_v16 = vsel %vm2850_vm1, 1.0, %v16346_v61  ;;  %v7139_v59 = vsel %vm2855_vm6, 1.0, %v16346_v61 }
 0x30f   : > { %v7140_v7 = vsel %vm2856_vm8, 1.0, %v16346_v61  ;;  %v7137_v32 = vsel %vm2853_vm4, 1.0, %v16346_v61  ;;  %v7138_v1 = vsel %vm2854_vm14, 1.0, %v16346_v61  ;;  %v7143_v53 = vsel %vm2859_vm5, 1.0, %v16346_v61 }
 0x310   : > { %v10821_v49 = vpop.permute.xlu1 %1381  ;;  %v10823_v8 = vpop.permute.xlu0 %1377  ;;  %v10866_v6 = vadd.f32 %v7136_v18, %v10592_v51  ;;  %v7144_v47 = vsel %vm2860_vm7, 1.0, %v16346_v61  ;;  %v10884_v51 = vadd.f32 %v7134_v16, %v10600_v13  ;;  %v10887_v18 = vadd.f32 %v7139_v59, %v10603_v57 }
 0x311   : > { %16508 = vst [vmem:[#allocation113_spill] sm:$0xff] %v10821_v49  ;;  %16509 = vst [vmem:[#allocation90_spill] sm:$0xff] %v10823_v8  ;;  %v7141_v8 = vsel %vm2857_vm12, 1.0, %v16346_v61  ;;  %v10892_v44 = vadd.f32 %v7140_v7, %v10606_v63  ;;  %v10895_v49 = vadd.f32 %v7137_v32, %v10615_v23  ;;  %v10898_v19 = vadd.f32 %v7138_v1, %v10618_v42  ;;  %v16515_v63 = vld [vmem:[#allocation129_spill] sm:$0xff]  ;;  %v16516_v42 = vld [vmem:[#allocation130_spill] sm:$0xff] }
 0x312   : > { %1625 = vbcast.lane.b32.xlu1 %v16493_v24, 328  ;;  %1621 = vbcast.lane.b32.xlu0 %v16493_v24, 320  ;;  %v10904_v13 = vadd.f32 %v7144_v47, %v10666_v31  ;;  %v10907_v57 = vadd.f32 %v7141_v8, %v10674_v15  ;;  %vm2863_vm10 = vcmp.eq.s32.totalorder %v16515_v63, %v8233_v9 }
 0x313   : > { %vm2864_vm13 = vcmp.eq.s32.totalorder %v16515_v63, %v8791_v22  ;;  %vm2861_vm11 = vcmp.eq.s32.totalorder %v16516_v42, %v8233_v9  ;;  %vm2862_vm15 = vcmp.eq.s32.totalorder %v16516_v42, %v8791_v22  ;;  %vm2867_vm2 = vcmp.eq.s32.totalorder %v9084_v36, %v8233_v9 }
 0x314   : > { %v10861_v56 = vpop.permute.xlu1 %1392  ;;  %v10863_v58 = vpop.permute.xlu0 %1388  ;;  %vm2868_vm3 = vcmp.eq.s32.totalorder %v9084_v36, %v8791_v22  ;;  %vm2865_vm0 = vcmp.eq.s32.totalorder %v9086_v37, %v8233_v9  ;;  %vm2866_vm1 = vcmp.eq.s32.totalorder %v9086_v37, %v8791_v22  ;;  %vm2871_vm6 = vcmp.eq.s32.totalorder %v9125_v60, %v8233_v9 }
 0x315   : > { %16513 = vst [vmem:[#allocation91_spill] sm:$0xff] %v10861_v56  ;;  %16514 = vst [vmem:[#allocation92_spill] sm:$0xff] %v10863_v58  ;;  %v7142_v56 = vsel %vm2858_vm9, 1.0, %v16346_v61  ;;  %v10881_v58 = vadd.f32 %v7133_v26, %v10595_v29  ;;  %v10901_v29 = vadd.f32 %v7143_v53, %v10651_v45  ;;  %vm2872_vm8 = vcmp.eq.s32.totalorder %v9125_v60, %v8791_v22 }
 0x316   : > { %1633 = vbcast.lane.b32.xlu1 %v16493_v24, 344  ;;  %1629 = vbcast.lane.b32.xlu0 %v16493_v24, 336  ;;  %v10910_v26 = vadd.f32 %v7142_v56, %v10677_v40  ;;  %v7147_v40 = vsel %vm2863_vm10, 1.0, %v16346_v61  ;;  %vm2869_vm4 = vcmp.eq.s32.totalorder %v9127_v38, %v8233_v9  ;;  %v7148_v36 = vsel %vm2864_vm13, 1.0, %v16346_v61 }
 0x317   : > { %v7145_v45 = vsel %vm2861_vm11, 1.0, %v16346_v61  ;;  %v7146_v37 = vsel %vm2862_vm15, 1.0, %v16346_v61  ;;  %v7151_v31 = vsel %vm2867_vm2, 1.0, %v16346_v61  ;;  %v7152_v59 = vsel %vm2868_vm3, 1.0, %v16346_v61 }
 0x318   : > { %v10914_v23 = vpop.permute.xlu1 %1400  ;;  %v10916_v16 = vpop.permute.xlu0 %1396  ;;  %v7149_v7 = vsel %vm2865_vm0, 1.0, %v16346_v61  ;;  %v7150_v60 = vsel %vm2866_vm1, 1.0, %v16346_v61  ;;  %vm2870_vm14 = vcmp.eq.s32.totalorder %v9127_v38, %v8791_v22  ;;  %v10955_v32 = vadd.f32 %v7147_v40, %v10688_v54 }
 0x319   : > { %v7155_v1 = vsel %vm2871_vm6, 1.0, %v16346_v61  ;;  %v7156_v53 = vsel %vm2872_vm8, 1.0, %v16346_v61  ;;  %v7153_v56 = vsel %vm2869_vm4, 1.0, %v16346_v61  ;;  %v10963_v47 = vadd.f32 %v7148_v36, %v10691_v35 }
 0x31a   : > { %1641 = vbcast.lane.b32.xlu1 %v16493_v24, 360  ;;  %1637 = vbcast.lane.b32.xlu0 %v16493_v24, 352  ;;  %v10966_v63 = vadd.f32 %v7145_v45, %v10694_v21  ;;  %v10969_v38 = vadd.f32 %v7146_v37, %v10703_v39  ;;  %v10972_v54 = vadd.f32 %v7151_v31, %v10706_v50  ;;  %v7154_v35 = vsel %vm2870_vm14, 1.0, %v16346_v61 }
 0x31b   : > { %v10975_v42 = vadd.f32 %v7152_v59, %v10709_v55  ;;  %v10978_v40 = vadd.f32 %v7149_v7, %v10714_v52  ;;  %v10989_v39 = vadd.f32 %v7155_v1, %v10749_v41  ;;  %v10992_v50 = vadd.f32 %v7156_v53, %v10757_v5  ;;  %v16517_v52 = vld [vmem:[#allocation117_spill] sm:$0xff] }
 0x31c   : > { %v10945_v15 = vpop.permute.xlu1 %1408  ;;  %v10947_v8 = vpop.permute.xlu0 %1404  ;;  %v10995_v55 = vadd.f32 %v7153_v56, %v10772_v27  ;;  %vm2875_vm5 = vcmp.eq.s32.totalorder %v9169_v2, %v8233_v9  ;;  %vm2876_vm7 = vcmp.eq.s32.totalorder %v9169_v2, %v8791_v22  ;;  %vm2873_vm12 = vcmp.eq.s32.totalorder %v9171_v30, %v8233_v9 }
 0x31d   : > { %vm2874_vm9 = vcmp.eq.s32.totalorder %v9171_v30, %v8791_v22  ;;  %vm2879_vm10 = vcmp.eq.s32.totalorder %v9213_v48, %v8233_v9  ;;  %vm2880_vm13 = vcmp.eq.s32.totalorder %v9213_v48, %v8791_v22  ;;  %vm2877_vm11 = vcmp.eq.s32.totalorder %v9215_v0, %v8233_v9 }
 0x31e   : > { %1649 = vbcast.lane.b32.xlu1 %v16493_v24, 376  ;;  %1645 = vbcast.lane.b32.xlu0 %v16493_v24, 368  ;;  %v10981_v24 = vadd.f32 %v7150_v60, %v10717_v25  ;;  %v11008_v25 = vadd.f32 %v7154_v35, %v10782_v12  ;;  %v7159_v2 = vsel %vm2875_vm5, 1.0, %v16346_v61  ;;  %vm2878_vm15 = vcmp.eq.s32.totalorder %v9215_v0, %v8791_v22 }
 0x31f   : > { %vm2883_vm2 = vcmp.eq.s32.totalorder %v9252_v43, %v8233_v9  ;;  %vm2884_vm3 = vcmp.eq.s32.totalorder %v9252_v43, %v8791_v22  ;;  %v7160_v48 = vsel %vm2876_vm7, 1.0, %v16346_v61  ;;  %v7157_v5 = vsel %vm2873_vm12, 1.0, %v16346_v61 }
 0x320   : > { %v10984_v36 = vpop.permute.xlu1 %1416  ;;  %v10986_v21 = vpop.permute.xlu0 %1412  ;;  %v7158_v27 = vsel %vm2874_vm9, 1.0, %v16346_v61  ;;  %vm2881_vm0 = vcmp.eq.s32.totalorder %v9254_v4, %v8233_v9  ;;  %v7163_v12 = vsel %vm2879_vm10, 1.0, %v16346_v61  ;;  %v7164_v45 = vsel %vm2880_vm13, 1.0, %v16346_v61 }
 0x321   : > { %v7161_v37 = vsel %vm2877_vm11, 1.0, %v16346_v61  ;;  %vm2882_vm1 = vcmp.eq.s32.totalorder %v9254_v4, %v8791_v22  ;;  %v11040_v31 = vadd.f32 %v7159_v2, %v10785_v20  ;;  %v7162_v59 = vsel %vm2878_vm15, 1.0, %v16346_v61  ;;  %v16521_v4 = vld [vmem:[#allocation131_spill] sm:$0xff] }
 0x322   : > { %1660 = vbcast.lane.b32.xlu1 %v16517_v52, 264  ;;  %1656 = vbcast.lane.b32.xlu0 %v16517_v52, 256  ;;  %v7167_v7 = vsel %vm2883_vm2, 1.0, %v16346_v61  ;;  %v7168_v60 = vsel %vm2884_vm3, 1.0, %v16346_v61  ;;  %v11055_v1 = vadd.f32 %v7160_v48, %v10788_v3  ;;  %v11058_v20 = vadd.f32 %v7157_v5, %v10793_v46  ;;  %v16525_v5 = vld [vmem:[#allocation24_spill] sm:$0xff] }
 0x323   : > { %v11061_v53 = vadd.f32 %v7158_v27, %v10796_v34  ;;  %v7165_v0 = vsel %vm2881_vm0, 1.0, %v16346_v61  ;;  %v11069_v2 = vadd.f32 %v7163_v12, %v10799_v10  ;;  %v11072_v43 = vadd.f32 %v7164_v45, %v10804_v62 }
 0x324   : > { %v11023_v30 = vpop.permute.xlu1 %1424  ;;  %v11025_v41 = vpop.permute.xlu0 %1420  ;;  %v11075_v3 = vadd.f32 %v7161_v37, %v10807_v28  ;;  %v7166_v34 = vsel %vm2882_vm1, 1.0, %v16346_v61  ;;  %v11082_v46 = vadd.f32 %v7162_v59, %v10810_v33  ;;  %v11085_v48 = vadd.f32 %v7167_v7, %v10843_v17  ;;  %v16520_v28 = vld [vmem:[#allocation22_spill] sm:$0xff]  ;;  %v16522_v17 = vld [vmem:[#allocation23_spill] sm:$0xff] }
 0x325   : > { %v11088_v10 = vadd.f32 %v7168_v60, %v10866_v6  ;;  %v11093_v62 = vadd.f32 %v7165_v0, %v10881_v58  ;;  %vm2887_vm6 = vcmp.eq.s32.totalorder %v16520_v28, %v8233_v9  ;;  %vm2888_vm8 = vcmp.eq.s32.totalorder %v16520_v28, %v8791_v22  ;;  %v16527_v37 = vld [vmem:[#allocation26_spill] sm:$0xff] }
 0x326   : > { %1668 = vbcast.lane.b32.xlu1 %v16517_v52, 280  ;;  %1664 = vbcast.lane.b32.xlu0 %v16517_v52, 272  ;;  %vm2885_vm4 = vcmp.eq.s32.totalorder %v16521_v4, %v8233_v9  ;;  %v11102_v33 = vadd.f32 %v7166_v34, %v10884_v51  ;;  %vm2886_vm14 = vcmp.eq.s32.totalorder %v16521_v4, %v8791_v22  ;;  %v16526_v51 = vld [vmem:[#allocation25_spill] sm:$0xff]  ;;  %v7171_v27 = vsel %vm2887_vm6, 1.0, %v16346_v61 }
 0x327   : > { %vm2891_vm5 = vcmp.eq.s32.totalorder %v16522_v17, %v8233_v9  ;;  %vm2892_vm7 = vcmp.eq.s32.totalorder %v16522_v17, %v8791_v22  ;;  %vm2889_vm12 = vcmp.eq.s32.totalorder %v16525_v5, %v8233_v9  ;;  %vm2890_vm9 = vcmp.eq.s32.totalorder %v16525_v5, %v8791_v22 }
 0x328   : > { %v11064_v56 = vpop.permute.xlu1 %1432  ;;  %v11066_v35 = vpop.permute.xlu0 %1428  ;;  %vm2895_vm10 = vcmp.eq.s32.totalorder %v16526_v51, %v8233_v9  ;;  %vm2896_vm13 = vcmp.eq.s32.totalorder %v16526_v51, %v8791_v22  ;;  %v7172_v12 = vsel %vm2888_vm8, 1.0, %v16346_v61  ;;  %v7169_v45 = vsel %vm2885_vm4, 1.0, %v16346_v61 }
 0x329   : > { %16518 = vst [vmem:[#allocation93_spill] sm:$0xff] %v11064_v56  ;;  %16519 = vst [vmem:[#allocation94_spill] sm:$0xff] %v11066_v35  ;;  %vm2893_vm11 = vcmp.eq.s32.totalorder %v16527_v37, %v8233_v9  ;;  %v7170_v59 = vsel %vm2886_vm14, 1.0, %v16346_v61  ;;  %v7175_v7 = vsel %vm2891_vm5, 1.0, %v16346_v61  ;;  %v7176_v60 = vsel %vm2892_vm7, 1.0, %v16346_v61 }
 0x32a   : > { %1676 = vbcast.lane.b32.xlu1 %v16517_v52, 296  ;;  %1672 = vbcast.lane.b32.xlu0 %v16517_v52, 288  ;;  %vm2894_vm15 = vcmp.eq.s32.totalorder %v16527_v37, %v8791_v22  ;;  %v7173_v0 = vsel %vm2889_vm12, 1.0, %v16346_v61  ;;  %v7174_v34 = vsel %vm2890_vm9, 1.0, %v16346_v61  ;;  %v7179_v28 = vsel %vm2895_vm10, 1.0, %v16346_v61 }
 0x32b   : > { %v7180_v4 = vsel %vm2896_vm13, 1.0, %v16346_v61  ;;  %v11143_v51 = vadd.f32 %v7171_v27, %v10887_v18  ;;  %v7177_v35 = vsel %vm2893_vm11, 1.0, %v16346_v61  ;;  %v11156_v56 = vadd.f32 %v7170_v59, %v10898_v19 }
 0x32c   : > { %v11110_v58 = vpop.permute.xlu1 %1440  ;;  %v11112_v6 = vpop.permute.xlu0 %1436  ;;  %v11162_v18 = vadd.f32 %v7176_v60, %v10904_v13  ;;  %v11171_v27 = vadd.f32 %v7174_v34, %v10910_v26  ;;  %v11174_v19 = vadd.f32 %v7179_v28, %v10955_v32  ;;  %v11180_v13 = vadd.f32 %v7177_v35, %v10966_v63  ;;  %v16534_v63 = vld [vmem:[#allocation29_spill] sm:$0xff]  ;;  %v16535_v35 = vld [vmem:[#allocation30_spill] sm:$0xff]  ;;  %v16536_v34 = vld [vmem:[#allocation31_spill] sm:$0xff] }
 0x32d   : > { %16523 = vst [vmem:[#allocation95_spill] sm:$0xff] %v11110_v58  ;;  %16524 = vst [vmem:[#allocation96_spill] sm:$0xff] %v11112_v6  ;;  %v11146_v6 = vadd.f32 %v7172_v12, %v10892_v44  ;;  %v11149_v58 = vadd.f32 %v7169_v45, %v10895_v49  ;;  %v7178_v44 = vsel %vm2894_vm15, 1.0, %v16346_v61  ;;  %v11168_v49 = vadd.f32 %v7173_v0, %v10907_v57  ;;  %v16529_v12 = vld [vmem:[#allocation9_spill] sm:$0xff]  ;;  %v16530_v57 = vld [vmem:[#allocation27_spill] sm:$0xff] }
 0x32e   : > { %1684 = vbcast.lane.b32.xlu1 %v16517_v52, 312  ;;  %1680 = vbcast.lane.b32.xlu0 %v16517_v52, 304  ;;  %vm2899_vm2 = vcmp.eq.s32.totalorder %v16529_v12, %v8233_v9  ;;  %vm2900_vm3 = vcmp.eq.s32.totalorder %v16529_v12, %v8791_v22  ;;  %vm2897_vm0 = vcmp.eq.s32.totalorder %v16530_v57, %v8233_v9 }
 0x32f   : > { %v11193_v32 = vadd.f32 %v7178_v44, %v10969_v38  ;;  %vm2898_vm1 = vcmp.eq.s32.totalorder %v16530_v57, %v8791_v22  ;;  %vm2901_vm4 = vcmp.eq.s32.totalorder %v16534_v63, %v8233_v9  ;;  %vm2902_vm14 = vcmp.eq.s32.totalorder %v16534_v63, %v8791_v22 }
 0x330   : > { %v11138_v17 = vpop.permute.xlu1 %1448  ;;  %v11140_v5 = vpop.permute.xlu0 %1444  ;;  %vm2907_vm5 = vcmp.eq.s32.totalorder %v16535_v35, %v8233_v9  ;;  %v7183_v38 = vsel %vm2899_vm2, 1.0, %v16346_v61  ;;  %v7184_v37 = vsel %vm2900_vm3, 1.0, %v16346_v61  ;;  %v7181_v59 = vsel %vm2897_vm0, 1.0, %v16346_v61 }
 0x331   : > { %16528 = vst [vmem:[#allocation97_spill] sm:$0xff] %v11138_v17  ;;  %v11159_v17 = vadd.f32 %v7175_v7, %v10901_v29  ;;  %v11177_v29 = vadd.f32 %v7180_v4, %v10963_v47  ;;  %v16533_v47 = vld [vmem:[#allocation28_spill] sm:$0xff]  ;;  %vm2908_vm7 = vcmp.eq.s32.totalorder %v16535_v35, %v8791_v22  ;;  %v7182_v7 = vsel %vm2898_vm1, 1.0, %v16346_v61 }
 0x332   : > { %1692 = vbcast.lane.b32.xlu1 %v16517_v52, 328  ;;  %1688 = vbcast.lane.b32.xlu0 %v16517_v52, 320  ;;  %vm2903_vm6 = vcmp.eq.s32.totalorder %v16533_v47, %v8233_v9  ;;  %vm2904_vm8 = vcmp.eq.s32.totalorder %v16533_v47, %v8791_v22  ;;  %vm2905_vm12 = vcmp.eq.s32.totalorder %v16536_v34, %v8233_v9  ;;  %v7185_v44 = vsel %vm2901_vm4, 1.0, %v16346_v61 }
 0x333   : > { %v7187_v60 = vsel %vm2903_vm6, 1.0, %v16346_v61  ;;  %v7188_v0 = vsel %vm2904_vm8, 1.0, %v16346_v61  ;;  %v7186_v12 = vsel %vm2902_vm14, 1.0, %v16346_v61  ;;  %v7191_v57 = vsel %vm2907_vm5, 1.0, %v16346_v61 }
 0x334   : > { %v11188_v26 = vpop.permute.xlu1 %1459  ;;  %v11190_v45 = vpop.permute.xlu0 %1455  ;;  %vm2906_vm9 = vcmp.eq.s32.totalorder %v16536_v34, %v8791_v22  ;;  %v11229_v47 = vadd.f32 %v7183_v38, %v10972_v54  ;;  %v11232_v63 = vadd.f32 %v7184_v37, %v10975_v42  ;;  %v11235_v35 = vadd.f32 %v7181_v59, %v10978_v40 }
 0x335   : > { %16531 = vst [vmem:[#allocation98_spill] sm:$0xff] %v11188_v26  ;;  %16532 = vst [vmem:[#allocation99_spill] sm:$0xff] %v11190_v45  ;;  %v7192_v45 = vsel %vm2908_vm7, 1.0, %v16346_v61  ;;  %v11241_v26 = vadd.f32 %v7182_v7, %v10981_v24  ;;  %v11247_v54 = vadd.f32 %v7188_v0, %v10992_v50  ;;  %v7189_v42 = vsel %vm2905_vm12, 1.0, %v16346_v61  ;;  %v16541_v7 = vld [vmem:[#allocation32_spill] sm:$0xff] }
 0x336   : > { %1700 = vbcast.lane.b32.xlu1 %v16517_v52, 344  ;;  %1696 = vbcast.lane.b32.xlu0 %v16517_v52, 336  ;;  %v11254_v40 = vadd.f32 %v7185_v44, %v10995_v55  ;;  %v11257_v38 = vadd.f32 %v7186_v12, %v11008_v25  ;;  %v11260_v24 = vadd.f32 %v7191_v57, %v11040_v31  ;;  %v16542_v55 = vld [vmem:[#allocation33_spill] sm:$0xff]  ;;  %v16543_v31 = vld [vmem:[#allocation34_spill] sm:$0xff] }
 0x337   : > { %v11268_v59 = vadd.f32 %v7192_v45, %v11055_v1  ;;  %vm2911_vm10 = vcmp.eq.s32.totalorder %v16541_v7, %v8233_v9  ;;  %vm2912_vm13 = vcmp.eq.s32.totalorder %v16541_v7, %v8791_v22  ;;  %vm2909_vm11 = vcmp.eq.s32.totalorder %v16542_v55, %v8233_v9  ;;  %v16544_v45 = vld [vmem:[#allocation35_spill] sm:$0xff]  ;;  %v16548_v57 = vld [vmem:[#allocation37_spill] sm:$0xff] }
 0x338   : > { %v11219_v28 = vpop.permute.xlu1 %1467  ;;  %v11221_v4 = vpop.permute.xlu0 %1463  ;;  %v11277_v25 = vadd.f32 %v7189_v42, %v11058_v20  ;;  %vm2910_vm15 = vcmp.eq.s32.totalorder %v16542_v55, %v8791_v22  ;;  %vm2915_vm2 = vcmp.eq.s32.totalorder %v16543_v31, %v8233_v9  ;;  %vm2916_vm3 = vcmp.eq.s32.totalorder %v16543_v31, %v8791_v22  ;;  %v16549_v55 = vld [vmem:[#allocation12_spill] sm:$0xff] }
 0x339   : > { %16537 = vst [vmem:[#allocation100_spill] sm:$0xff] %v11219_v28  ;;  %16538 = vst [vmem:[#allocation101_spill] sm:$0xff] %v11221_v4  ;;  %v11244_v4 = vadd.f32 %v7187_v60, %v10989_v39  ;;  %v7190_v39 = vsel %vm2906_vm9, 1.0, %v16346_v61  ;;  %vm2913_vm0 = vcmp.eq.s32.totalorder %v16544_v45, %v8233_v9  ;;  %vm2914_vm1 = vcmp.eq.s32.totalorder %v16544_v45, %v8791_v22 }
 0x33a   : > { %1708 = vbcast.lane.b32.xlu1 %v16517_v52, 360  ;;  %1704 = vbcast.lane.b32.xlu0 %v16517_v52, 352  ;;  %v11286_v1 = vadd.f32 %v7190_v39, %v11061_v53  ;;  %v7195_v20 = vsel %vm2911_vm10, 1.0, %v16346_v61  ;;  %v7196_v60 = vsel %vm2912_vm13, 1.0, %v16346_v61  ;;  %v7193_v0 = vsel %vm2909_vm11, 1.0, %v16346_v61 }
 0x33b   : > { %v7194_v44 = vsel %vm2910_vm15, 1.0, %v16346_v61  ;;  %v7199_v12 = vsel %vm2915_vm2, 1.0, %v16346_v61  ;;  %vm2917_vm4 = vcmp.eq.s32.totalorder %v16548_v57, %v8233_v9  ;;  %v7200_v42 = vsel %vm2916_vm3, 1.0, %v16346_v61 }
 0x33c   : > { %v11263_v37 = vpop.permute.xlu1 %1475  ;;  %v11265_v50 = vpop.permute.xlu0 %1471  ;;  %v7197_v39 = vsel %vm2913_vm0, 1.0, %v16346_v61  ;;  %v7198_v7 = vsel %vm2914_vm1, 1.0, %v16346_v61  ;;  %vm2918_vm14 = vcmp.eq.s32.totalorder %v16548_v57, %v8791_v22  ;;  %v11317_v31 = vadd.f32 %v7195_v20, %v11069_v2 }
 0x33d   : > { %16539 = vst [vmem:[#allocation102_spill] sm:$0xff] %v11263_v37  ;;  %16540 = vst [vmem:[#allocation103_spill] sm:$0xff] %v11265_v50  ;;  %v11320_v45 = vadd.f32 %v7196_v60, %v11072_v43  ;;  %v11330_v50 = vadd.f32 %v7194_v44, %v11082_v46  ;;  %v11333_v37 = vadd.f32 %v7199_v12, %v11085_v48  ;;  %v7201_v20 = vsel %vm2917_vm4, 1.0, %v16346_v61  ;;  %v16552_v44 = vld [vmem:[#allocation38_spill] sm:$0xff] }
 0x33e   : > { %1716 = vbcast.lane.b32.xlu1 %v16517_v52, 376  ;;  %1712 = vbcast.lane.b32.xlu0 %v16517_v52, 368  ;;  %v16545_v52 = vld [vmem:[#allocation36_spill] sm:$0xff]  ;;  %v11348_v46 = vadd.f32 %v7198_v7, %v11102_v33  ;;  %v7202_v48 = vsel %vm2918_vm14, 1.0, %v16346_v61  ;;  %vm2923_vm5 = vcmp.eq.s32.totalorder %v16552_v44, %v8233_v9  ;;  %vm2924_vm7 = vcmp.eq.s32.totalorder %v16552_v44, %v8791_v22  ;;  %v16553_v33 = vld [vmem:[#allocation39_spill] sm:$0xff] }
 0x33f   : > { %vm2919_vm6 = vcmp.eq.s32.totalorder %v16545_v52, %v8233_v9  ;;  %vm2920_vm8 = vcmp.eq.s32.totalorder %v16545_v52, %v8791_v22  ;;  %vm2921_vm12 = vcmp.eq.s32.totalorder %v16553_v33, %v8233_v9  ;;  %vm2922_vm9 = vcmp.eq.s32.totalorder %v16553_v33, %v8791_v22 }
 0x340   : > { %v11299_v53 = vpop.permute.xlu1 %1483  ;;  %v11301_v34 = vpop.permute.xlu0 %1479  ;;  %v7204_v2 = vsel %vm2920_vm8, 1.0, %v16346_v61  ;;  %v7207_v57 = vsel %vm2923_vm5, 1.0, %v16346_v61  ;;  %v7206_v7 = vsel %vm2922_vm9, 1.0, %v16346_v61 }
 0x341   : > { %16546 = vst [vmem:[#allocation104_spill] sm:$0xff] %v11299_v53  ;;  %16547 = vst [vmem:[#allocation105_spill] sm:$0xff] %v11301_v34  ;;  %v11323_v34 = vadd.f32 %v7193_v0, %v11075_v3  ;;  %v7203_v53 = vsel %vm2919_vm6, 1.0, %v16346_v61  ;;  %v11342_v3 = vadd.f32 %v7200_v42, %v11088_v10  ;;  %v11345_v0 = vadd.f32 %v7197_v39, %v11093_v62 }
 0x342   : > { %1727 = vbcast.lane.b32.xlu1 %v16549_v55, 264  ;;  %1723 = vbcast.lane.b32.xlu0 %v16549_v55, 256  ;;  %v11355_v52 = vadd.f32 %v7203_v53, %v11143_v51  ;;  %v11364_v10 = vadd.f32 %v7204_v2, %v11146_v6  ;;  %v11367_v62 = vadd.f32 %v7201_v20, %v11149_v58  ;;  %v16554_v53 = vld [vmem:[#allocation40_spill] sm:$0xff]  ;;  %v16555_v6 = vld [vmem:[#allocation41_spill] sm:$0xff]  ;;  %v7208_v42 = vsel %vm2924_vm7, 1.0, %v16346_v61  ;;  %v16559_v2 = vld [vmem:[#allocation43_spill] sm:$0xff] }
 0x343   : > { %v11374_v51 = vadd.f32 %v7202_v48, %v11156_v56  ;;  %vm2927_vm10 = vcmp.eq.s32.totalorder %v16554_v53, %v8233_v9  ;;  %vm2928_vm13 = vcmp.eq.s32.totalorder %v16554_v53, %v8791_v22  ;;  %vm2925_vm11 = vcmp.eq.s32.totalorder %v16555_v6, %v8233_v9  ;;  %v16558_v56 = vld [vmem:[#allocation42_spill] sm:$0xff] }
 0x344   : > { %v11337_v43 = vpop.permute.xlu1 %1491  ;;  %v11339_v60 = vpop.permute.xlu0 %1487  ;;  %vm2926_vm15 = vcmp.eq.s32.totalorder %v16555_v6, %v8791_v22  ;;  %vm2931_vm2 = vcmp.eq.s32.totalorder %v16558_v56, %v8233_v9  ;;  %v7205_v39 = vsel %vm2921_vm12, 1.0, %v16346_v61  ;;  %vm2932_vm3 = vcmp.eq.s32.totalorder %v16558_v56, %v8791_v22 }
 0x345   : > { %16550 = vst [vmem:[#allocation106_spill] sm:$0xff] %v11337_v43  ;;  %16551 = vst [vmem:[#allocation107_spill] sm:$0xff] %v11339_v60  ;;  %vm2929_vm0 = vcmp.eq.s32.totalorder %v16559_v2, %v8233_v9  ;;  %v7211_v20 = vsel %vm2927_vm10, 1.0, %v16346_v61  ;;  %v7212_v48 = vsel %vm2928_vm13, 1.0, %v16346_v61  ;;  %v7209_v44 = vsel %vm2925_vm11, 1.0, %v16346_v61 }
 0x346   : > { %1735 = vbcast.lane.b32.xlu1 %v16549_v55, 280  ;;  %1731 = vbcast.lane.b32.xlu0 %v16549_v55, 272  ;;  %vm2930_vm1 = vcmp.eq.s32.totalorder %v16559_v2, %v8791_v22  ;;  %v11406_v33 = vadd.f32 %v7207_v57, %v11159_v17  ;;  %v11409_v53 = vadd.f32 %v7208_v42, %v11162_v18  ;;  %v7210_v6 = vsel %vm2926_vm15, 1.0, %v16346_v61  ;;  %v16565_v2 = vld [vmem:[#allocation46_spill] sm:$0xff] }
 0x347   : > { %v11418_v43 = vadd.f32 %v7205_v39, %v11168_v49  ;;  %v11421_v28 = vadd.f32 %v7206_v7, %v11171_v27  ;;  %v7216_v17 = vsel %vm2932_vm3, 1.0, %v16346_v61  ;;  %v7213_v18 = vsel %vm2929_vm0, 1.0, %v16346_v61  ;;  %v16562_v7 = vld [vmem:[#allocation45_spill] sm:$0xff] }
 0x348   : > { %v11382_v58 = vpop.permute.xlu1 %1499  ;;  %v11384_v12 = vpop.permute.xlu0 %1495  ;;  %v11432_v57 = vadd.f32 %v7211_v20, %v11174_v19  ;;  %v11435_v42 = vadd.f32 %v7212_v48, %v11177_v29  ;;  %v11438_v49 = vadd.f32 %v7209_v44, %v11180_v13  ;;  %v7214_v27 = vsel %vm2930_vm1, 1.0, %v16346_v61  ;;  %v16561_v19 = vld [vmem:[#allocation44_spill] sm:$0xff] }
 0x349   : > { %16556 = vst [vmem:[#allocation108_spill] sm:$0xff] %v11382_v58  ;;  %16557 = vst [vmem:[#allocation109_spill] sm:$0xff] %v11384_v12  ;;  %v7215_v12 = vsel %vm2931_vm2, 1.0, %v16346_v61  ;;  %v11444_v56 = vadd.f32 %v7210_v6, %v11193_v32  ;;  %vm2935_vm6 = vcmp.eq.s32.totalorder %v16561_v19, %v8233_v9  ;;  %vm2936_vm8 = vcmp.eq.s32.totalorder %v16561_v19, %v8791_v22  ;;  %v16567_v48 = vld [vmem:[#allocation48_spill] sm:$0xff]  ;;  %v16568_v6 = vld [vmem:[#allocation10_spill] sm:$0xff] }
 0x34a   : > { %1743 = vbcast.lane.b32.xlu1 %v16549_v55, 296  ;;  %1739 = vbcast.lane.b32.xlu0 %v16549_v55, 288  ;;  %v11447_v39 = vadd.f32 %v7215_v12, %v11229_v47  ;;  %v11454_v29 = vadd.f32 %v7216_v17, %v11232_v63  ;;  %v11457_v13 = vadd.f32 %v7213_v18, %v11235_v35  ;;  %v16566_v63 = vld [vmem:[#allocation47_spill] sm:$0xff]  ;;  %v7219_v35 = vsel %vm2935_vm6, 1.0, %v16346_v61 }
 0x34b   : > { %vm2933_vm4 = vcmp.eq.s32.totalorder %v16562_v7, %v8233_v9  ;;  %vm2934_vm14 = vcmp.eq.s32.totalorder %v16562_v7, %v8791_v22  ;;  %v11468_v12 = vadd.f32 %v7214_v27, %v11241_v26  ;;  %vm2939_vm5 = vcmp.eq.s32.totalorder %v16565_v2, %v8233_v9 }
 0x34c   : > { %v11413_v58 = vpop.permute.xlu1 %1507  ;;  %v11415_v60 = vpop.permute.xlu0 %1503  ;;  %vm2940_vm7 = vcmp.eq.s32.totalorder %v16565_v2, %v8791_v22  ;;  %vm2937_vm12 = vcmp.eq.s32.totalorder %v16566_v63, %v8233_v9  ;;  %v7220_v20 = vsel %vm2936_vm8, 1.0, %v16346_v61  ;;  %vm2938_vm9 = vcmp.eq.s32.totalorder %v16566_v63, %v8791_v22 }
 0x34d   : > { %16560 = vst [vmem:[#allocation110_spill] sm:$0xff] %v11415_v60  ;;  %vm2943_vm10 = vcmp.eq.s32.totalorder %v16567_v48, %v8233_v9  ;;  %v7217_v26 = vsel %vm2933_vm4, 1.0, %v16346_v61  ;;  %v7218_v44 = vsel %vm2934_vm14, 1.0, %v16346_v61  ;;  %vm2944_vm13 = vcmp.eq.s32.totalorder %v16567_v48, %v8791_v22 }
 0x34e   : > { %1751 = vbcast.lane.b32.xlu1 %v16549_v55, 312  ;;  %1747 = vbcast.lane.b32.xlu0 %v16549_v55, 304  ;;  %vm2941_vm11 = vcmp.eq.s32.totalorder %v16568_v6, %v8233_v9  ;;  %v7223_v17 = vsel %vm2939_vm5, 1.0, %v16346_v61  ;;  %v7224_v18 = vsel %vm2940_vm7, 1.0, %v16346_v61  ;;  %v7221_v27 = vsel %vm2937_vm12, 1.0, %v16346_v61 }
 0x34f   : > { %vm2942_vm15 = vcmp.eq.s32.totalorder %v16568_v6, %v8791_v22  ;;  %v11500_v2 = vadd.f32 %v7219_v35, %v11244_v4  ;;  %v7227_v60 = vsel %vm2943_vm10, 1.0, %v16346_v61  ;;  %v7228_v4 = vsel %vm2944_vm13, 1.0, %v16346_v61 }
 0x350   : > { %v11463_v32 = vpop.permute.xlu1 %1515  ;;  %v11465_v47 = vpop.permute.xlu0 %1511  ;;  %v11524_v63 = vadd.f32 %v7223_v17, %v11260_v24  ;;  %v11527_v35 = vadd.f32 %v7224_v18, %v11268_v59  ;;  %v11540_v48 = vadd.f32 %v7227_v60, %v11317_v31  ;;  %v16571_v24 = vld [vmem:[#allocation49_spill] sm:$0xff]  ;;  %vm2945_vm0 = vcmp.eq.s32.totalorder %v9916_v14, %v8233_v9  ;;  %v16574_v31 = vld [vmem:[#allocation50_spill] sm:$0xff]  ;;  %v16575_v60 = vld [vmem:[#allocation51_spill] sm:$0xff] }
 0x351   : > { %16563 = vst [vmem:[#allocation116_spill] sm:$0xff] %v11463_v32  ;;  %16564 = vst [vmem:[#allocation111_spill] sm:$0xff] %v11465_v47  ;;  %v11503_v47 = vadd.f32 %v7220_v20, %v11247_v54  ;;  %v7222_v32 = vsel %vm2938_vm9, 1.0, %v16346_v61  ;;  %v7225_v54 = vsel %vm2941_vm11, 1.0, %v16346_v61  ;;  %vm2947_vm2 = vcmp.eq.s32.totalorder %v16571_v24, %v8233_v9 }
 0x352   : > { %1759 = vbcast.lane.b32.xlu1 %v16549_v55, 328  ;;  %1755 = vbcast.lane.b32.xlu0 %v16549_v55, 320  ;;  %v11537_v20 = vadd.f32 %v7222_v32, %v11286_v1  ;;  %vm2948_vm3 = vcmp.eq.s32.totalorder %v16571_v24, %v8791_v22  ;;  %vm2946_vm1 = vcmp.eq.s32.totalorder %v9916_v14, %v8791_v22  ;;  %v7229_v14 = vsel %vm2945_vm0, 1.0, %v16346_v61  ;;  %v16576_v32 = vld [vmem:[#allocation52_spill] sm:$0xff] }
 0x353   : > { %vm2951_vm6 = vcmp.eq.s32.totalorder %v16574_v31, %v8233_v9  ;;  %vm2952_vm8 = vcmp.eq.s32.totalorder %v16574_v31, %v8791_v22  ;;  %vm2949_vm4 = vcmp.eq.s32.totalorder %v16575_v60, %v8233_v9  ;;  %vm2950_vm14 = vcmp.eq.s32.totalorder %v16575_v60, %v8791_v22 }
 0x354   : > { %v11495_v19 = vpop.permute.xlu1 %1526  ;;  %v11497_v7 = vpop.permute.xlu0 %1522  ;;  %vm2955_vm5 = vcmp.eq.s32.totalorder %v16576_v32, %v8233_v9  ;;  %vm2956_vm7 = vcmp.eq.s32.totalorder %v16576_v32, %v8791_v22  ;;  %v7235_v18 = vsel %vm2951_vm6, 1.0, %v16346_v61  ;;  %v7233_v24 = vsel %vm2949_vm4, 1.0, %v16346_v61 }
 0x355   : > { %16569 = vst [vmem:[#allocation112_spill] sm:$0xff] %v11495_v19  ;;  %16570 = vst [vmem:[#allocation114_spill] sm:$0xff] %v11497_v7  ;;  %v11514_v19 = vadd.f32 %v7217_v26, %v11254_v40  ;;  %v11517_v7 = vadd.f32 %v7218_v44, %v11257_v38  ;;  %v11530_v40 = vadd.f32 %v7221_v27, %v11277_v25  ;;  %v7226_v38 = vsel %vm2942_vm15, 1.0, %v16346_v61 }
 0x356   : > { %1767 = vbcast.lane.b32.xlu1 %v16549_v55, 344  ;;  %1763 = vbcast.lane.b32.xlu0 %v16549_v55, 336  ;;  %v11551_v26 = vadd.f32 %v7228_v4, %v11320_v45  ;;  %v11554_v44 = vadd.f32 %v7225_v54, %v11323_v34  ;;  %v11561_v1 = vadd.f32 %v7226_v38, %v11330_v50  ;;  %v7231_v34 = vsel %vm2947_vm2, 1.0, %v16346_v61  ;;  %v16579_v4 = vld [vmem:[#allocation53_spill] sm:$0xff] }
 0x357   : > { %v7232_v45 = vsel %vm2948_vm3, 1.0, %v16346_v61  ;;  %v7230_v50 = vsel %vm2946_vm1, 1.0, %v16346_v61  ;;  %v7236_v27 = vsel %vm2952_vm8, 1.0, %v16346_v61  ;;  %vm2953_vm12 = vcmp.eq.s32.totalorder %v16579_v4, %v8233_v9 }
 0x358   : > { %v11546_v59 = vpop.permute.xlu1 %1534  ;;  %v11548_v25 = vpop.permute.xlu0 %1530  ;;  %vm2954_vm9 = vcmp.eq.s32.totalorder %v16579_v4, %v8791_v22  ;;  %v11592_v54 = vadd.f32 %v7231_v34, %v11333_v37  ;;  %v11595_v38 = vadd.f32 %v7232_v45, %v11342_v3  ;;  %v7234_v31 = vsel %vm2950_vm14, 1.0, %v16346_v61 }
 0x359   : > { %16572 = vst [vmem:[#allocation115_spill] sm:$0xff] %v11546_v59  ;;  %16573 = vst [vmem:[#allocation121_spill] sm:$0xff] %v11548_v25  ;;  %v11602_v60 = vadd.f32 %v7229_v14, %v11345_v0  ;;  %v7239_v37 = vsel %vm2955_vm5, 1.0, %v16346_v61  ;;  %v7240_v3 = vsel %vm2956_vm7, 1.0, %v16346_v61  ;;  %v11616_v34 = vadd.f32 %v7235_v18, %v11355_v52  ;;  %v16582_v52 = vld [vmem:[#allocation54_spill] sm:$0xff] }
 0x35a   : > { %1775 = vbcast.lane.b32.xlu1 %v16549_v55, 360  ;;  %1771 = vbcast.lane.b32.xlu0 %v16549_v55, 352  ;;  %v7237_v0 = vsel %vm2953_vm12, 1.0, %v16346_v61  ;;  %v11631_v32 = vadd.f32 %v7234_v31, %v11374_v51  ;;  %vm2959_vm10 = vcmp.eq.s32.totalorder %v16582_v52, %v8233_v9  ;;  %vm2960_vm13 = vcmp.eq.s32.totalorder %v16582_v52, %v8791_v22  ;;  %v16586_v31 = vld [vmem:[#allocation57_spill] sm:$0xff]  ;;  %v16590_v52 = vld [vmem:[#allocation59_spill] sm:$0xff] }
 0x35b   : > { %v11641_v18 = vadd.f32 %v7240_v3, %v11409_v53  ;;  %v11648_v51 = vadd.f32 %v7237_v0, %v11418_v43  ;;  %v7243_v53 = vsel %vm2959_vm10, 1.0, %v16346_v61  ;;  %vm2961_vm0 = vcmp.eq.s32.totalorder %v16586_v31, %v8233_v9  ;;  %v16589_v3 = vld [vmem:[#allocation58_spill] sm:$0xff] }
 0x35c   : > { %v11581_v6 = vpop.permute.xlu1 %1542  ;;  %v11583_v17 = vpop.permute.xlu0 %1538  ;;  %vm2962_vm1 = vcmp.eq.s32.totalorder %v16586_v31, %v8791_v22  ;;  %vm2967_vm6 = vcmp.eq.s32.totalorder %v16589_v3, %v8233_v9  ;;  %vm2968_vm8 = vcmp.eq.s32.totalorder %v16589_v3, %v8791_v22  ;;  %vm2965_vm4 = vcmp.eq.s32.totalorder %v16590_v52, %v8233_v9 }
 0x35d   : > { %16577 = vst [vmem:[#allocation122_spill] sm:$0xff] %v11581_v6  ;;  %16578 = vst [vmem:[#allocation123_spill] sm:$0xff] %v11583_v17  ;;  %v11605_v17 = vadd.f32 %v7230_v50, %v11348_v46  ;;  %v7238_v46 = vsel %vm2954_vm9, 1.0, %v16346_v61  ;;  %v11628_v50 = vadd.f32 %v7233_v24, %v11367_v62  ;;  %v16584_v62 = vld [vmem:[#allocation13_spill] sm:$0xff]  ;;  %v7244_v24 = vsel %vm2960_vm13, 1.0, %v16346_v61 }
 0x35e   : > { %1783 = vbcast.lane.b32.xlu1 %v16549_v55, 376  ;;  %1779 = vbcast.lane.b32.xlu0 %v16549_v55, 368  ;;  %v11619_v55 = vadd.f32 %v7236_v27, %v11364_v10  ;;  %v11638_v10 = vadd.f32 %v7239_v37, %v11406_v33  ;;  %v16583_v27 = vld [vmem:[#allocation55_spill] sm:$0xff]  ;;  %v11651_v4 = vadd.f32 %v7238_v46, %v11421_v28  ;;  %v16585_v33 = vld [vmem:[#allocation56_spill] sm:$0xff] }
 0x35f   : > { %vm2957_vm11 = vcmp.eq.s32.totalorder %v16583_v27, %v8233_v9  ;;  %vm2958_vm15 = vcmp.eq.s32.totalorder %v16583_v27, %v8791_v22  ;;  %vm2963_vm2 = vcmp.eq.s32.totalorder %v16585_v33, %v8233_v9  ;;  %vm2964_vm3 = vcmp.eq.s32.totalorder %v16585_v33, %v8791_v22 }
 0x360   : > { %v11623_v45 = vpop.permute.xlu1 %1550  ;;  %v11625_v14 = vpop.permute.xlu0 %1546  ;;  %v7241_v37 = vsel %vm2957_vm11, 1.0, %v16346_v61  ;;  %v7242_v0 = vsel %vm2958_vm15, 1.0, %v16346_v61  ;;  %v7247_v46 = vsel %vm2963_vm2, 1.0, %v16346_v61  ;;  %vm2966_vm14 = vcmp.eq.s32.totalorder %v16590_v52, %v8791_v22  ;;  %v16599_v52 = vld [vmem:[#allocation64_spill] sm:$0xff] }
 0x361   : > { %16580 = vst [vmem:[#allocation124_spill] sm:$0xff] %v11623_v45  ;;  %16581 = vst [vmem:[#allocation125_spill] sm:$0xff] %v11625_v14  ;;  %v11683_v27 = vadd.f32 %v7243_v53, %v11432_v57  ;;  %v7248_v3 = vsel %vm2964_vm3, 1.0, %v16346_v61  ;;  %v11697_v14 = vadd.f32 %v7241_v37, %v11438_v49  ;;  %v7246_v45 = vsel %vm2962_vm1, 1.0, %v16346_v61 }
 0x362   : > { %1794 = vbcast.lane.b32.xlu1 %v16584_v62, 264  ;;  %1790 = vbcast.lane.b32.xlu0 %v16584_v62, 256  ;;  %v7251_v57 = vsel %vm2967_vm6, 1.0, %v16346_v61  ;;  %v11707_v33 = vadd.f32 %v7242_v0, %v11444_v56  ;;  %v11710_v6 = vadd.f32 %v7247_v46, %v11447_v39  ;;  %v7249_v49 = vsel %vm2965_vm4, 1.0, %v16346_v61  ;;  %v16593_v56 = vld [vmem:[#allocation60_spill] sm:$0xff] }
 0x363   : > { %v7250_v31 = vsel %vm2966_vm14, 1.0, %v16346_v61  ;;  %v11721_v37 = vadd.f32 %v7248_v3, %v11454_v29  ;;  %vm2971_vm5 = vcmp.eq.s32.totalorder %v16593_v56, %v8233_v9  ;;  %v11731_v39 = vadd.f32 %v7246_v45, %v11468_v12  ;;  %v16597_v45 = vld [vmem:[#allocation62_spill] sm:$0xff] }
 0x364   : > { %v11663_v43 = vpop.permute.xlu1 %1558  ;;  %v11665_v28 = vpop.permute.xlu0 %1554  ;;  %v11734_v0 = vadd.f32 %v7251_v57, %v11500_v2  ;;  %vm2972_vm7 = vcmp.eq.s32.totalorder %v16593_v56, %v8791_v22  ;;  %v11742_v29 = vadd.f32 %v7249_v49, %v11514_v19  ;;  %vm2975_vm10 = vcmp.eq.s32.totalorder %v16597_v45, %v8233_v9  ;;  %v16598_v19 = vld [vmem:[#allocation63_spill] sm:$0xff] }
 0x365   : > { %16587 = vst [vmem:[#allocation126_spill] sm:$0xff] %v11663_v43  ;;  %16588 = vst [vmem:[#allocation127_spill] sm:$0xff] %v11665_v28  ;;  %v11686_v28 = vadd.f32 %v7244_v24, %v11435_v42  ;;  %v7245_v43 = vsel %vm2961_vm0, 1.0, %v16346_v61  ;;  %v7252_v42 = vsel %vm2968_vm8, 1.0, %v16346_v61  ;;  %vm2976_vm13 = vcmp.eq.s32.totalorder %v16597_v45, %v8791_v22 }
 0x366   : > { %1802 = vbcast.lane.b32.xlu1 %v16584_v62, 280  ;;  %1798 = vbcast.lane.b32.xlu0 %v16584_v62, 272  ;;  %v11737_v46 = vadd.f32 %v7252_v42, %v11503_v47  ;;  %v7255_v47 = vsel %vm2971_vm5, 1.0, %v16346_v61  ;;  %vm2973_vm11 = vcmp.eq.s32.totalorder %v16598_v19, %v8233_v9  ;;  %vm2974_vm15 = vcmp.eq.s32.totalorder %v16598_v19, %v8791_v22  ;;  %v16600_v42 = vld [vmem:[#allocation65_spill] sm:$0xff] }
 0x367   : > { %vm2979_vm2 = vcmp.eq.s32.totalorder %v16599_v52, %v8233_v9  ;;  %vm2980_vm3 = vcmp.eq.s32.totalorder %v16599_v52, %v8791_v22  ;;  %vm2977_vm0 = vcmp.eq.s32.totalorder %v16600_v42, %v8233_v9  ;;  %vm2978_vm1 = vcmp.eq.s32.totalorder %v16600_v42, %v8791_v22 }
 0x368   : > { %v11702_v53 = vpop.permute.xlu1 %1566  ;;  %v11704_v24 = vpop.permute.xlu0 %1562  ;;  %v11778_v49 = vadd.f32 %v7255_v47, %v11524_v63  ;;  %v7260_v56 = vsel %vm2976_vm13, 1.0, %v16346_v61  ;;  %v7258_v42 = vsel %vm2974_vm15, 1.0, %v16346_v61  ;;  %v7263_v63 = vsel %vm2979_vm2, 1.0, %v16346_v61 }
 0x369   : > { %16591 = vst [vmem:[#allocation128_spill] sm:$0xff] %v11702_v53  ;;  %16592 = vst [vmem:[#allocation129_spill] sm:$0xff] %v11704_v24  ;;  %v11724_v24 = vadd.f32 %v7245_v43, %v11457_v13  ;;  %v11745_v13 = vadd.f32 %v7250_v31, %v11517_v7  ;;  %v16594_v43 = vld [vmem:[#allocation61_spill] sm:$0xff]  ;;  %v7256_v7 = vsel %vm2972_vm7, 1.0, %v16346_v61  ;;  %v7259_v31 = vsel %vm2975_vm10, 1.0, %v16346_v61 }
 0x36a   : > { %1810 = vbcast.lane.b32.xlu1 %v16584_v62, 296  ;;  %1806 = vbcast.lane.b32.xlu0 %v16584_v62, 288  ;;  %vm2969_vm12 = vcmp.eq.s32.totalorder %v16594_v43, %v8233_v9  ;;  %vm2970_vm9 = vcmp.eq.s32.totalorder %v16594_v43, %v8791_v22  ;;  %v7257_v43 = vsel %vm2973_vm11, 1.0, %v16346_v61  ;;  %v7264_v47 = vsel %vm2980_vm3, 1.0, %v16346_v61 }
 0x36b   : > { %v7253_v3 = vsel %vm2969_vm12, 1.0, %v16346_v61  ;;  %v7254_v57 = vsel %vm2970_vm9, 1.0, %v16346_v61  ;;  %v7262_v19 = vsel %vm2978_vm1, 1.0, %v16346_v61  ;;  %v11816_v52 = vadd.f32 %v7260_v56, %v11551_v26  ;;  %v16609_v56 = vld [vmem:[#allocation69_spill] sm:$0xff] }
 0x36c   : > { %v11751_v12 = vpop.permute.xlu1 %1574  ;;  %v11753_v2 = vpop.permute.xlu0 %1570  ;;  %v11830_v53 = vadd.f32 %v7264_v47, %v11595_v38  ;;  %v16607_v38 = vld [vmem:[#allocation68_spill] sm:$0xff]  ;;  %vm2991_vm10 = vcmp.eq.s32.totalorder %v16609_v56, %v8233_v9  ;;  %vm2992_vm13 = vcmp.eq.s32.totalorder %v16609_v56, %v8791_v22 }
 0x36d   : > { %16595 = vst [vmem:[#allocation130_spill] sm:$0xff] %v11751_v12  ;;  %16596 = vst [vmem:[#allocation117_spill] sm:$0xff] %v11753_v2  ;;  %v11788_v12 = vadd.f32 %v7256_v7, %v11527_v35  ;;  %v11806_v35 = vadd.f32 %v7254_v57, %v11537_v20  ;;  %v7261_v7 = vsel %vm2977_vm0, 1.0, %v16346_v61  ;;  %v16603_v20 = vld [vmem:[#allocation66_spill] sm:$0xff]  ;;  %v11827_v57 = vadd.f32 %v7263_v63, %v11592_v54 }
 0x36e   : > { %1818 = vbcast.lane.b32.xlu1 %v16584_v62, 312  ;;  %1814 = vbcast.lane.b32.xlu0 %v16584_v62, 304  ;;  %vm2983_vm6 = vcmp.eq.s32.totalorder %v16603_v20, %v8233_v9  ;;  %vm2984_vm8 = vcmp.eq.s32.totalorder %v16603_v20, %v8791_v22  ;;  %vm2987_vm5 = vcmp.eq.s32.totalorder %v16607_v38, %v8233_v9  ;;  %v16610_v63 = vld [vmem:[#allocation70_spill] sm:$0xff] }
 0x36f   : > { %v7267_v54 = vsel %vm2983_vm6, 1.0, %v16346_v61  ;;  %vm2988_vm7 = vcmp.eq.s32.totalorder %v16607_v38, %v8791_v22  ;;  %vm2989_vm11 = vcmp.eq.s32.totalorder %v16610_v63, %v8233_v9  ;;  %vm2990_vm15 = vcmp.eq.s32.totalorder %v16610_v63, %v8791_v22 }
 0x370   : > { %v11783_v45 = vpop.permute.xlu1 %1582  ;;  %v11785_v2 = vpop.permute.xlu0 %1578  ;;  %v7271_v20 = vsel %vm2987_vm5, 1.0, %v16346_v61 }
 0x371   : > { %16601 = vst [vmem:[#allocation22_spill] sm:$0xff] %v11783_v45  ;;  %16602 = vst [vmem:[#allocation131_spill] sm:$0xff] %v11785_v2  ;;  %v11803_v2 = vadd.f32 %v7253_v3, %v11530_v40  ;;  %v11813_v45 = vadd.f32 %v7259_v31, %v11540_v48  ;;  %v11819_v40 = vadd.f32 %v7257_v43, %v11554_v44 }
 0x372   : > { %1826 = vbcast.lane.b32.xlu1 %v16584_v62, 328  ;;  %1822 = vbcast.lane.b32.xlu0 %v16584_v62, 320  ;;  %v11824_v3 = vadd.f32 %v7258_v42, %v11561_v1  ;;  %v11839_v44 = vadd.f32 %v7261_v7, %v11602_v60  ;;  %v11842_v31 = vadd.f32 %v7262_v19, %v11605_v17  ;;  %v16606_v1 = vld [vmem:[#allocation67_spill] sm:$0xff]  ;;  %v7268_v17 = vsel %vm2984_vm8, 1.0, %v16346_v61 }
 0x373   : > { %vm2981_vm4 = vcmp.eq.s32.totalorder %v16606_v1, %v8233_v9  ;;  %vm2982_vm14 = vcmp.eq.s32.totalorder %v16606_v1, %v8791_v22  ;;  %v16608_v60 = vld [vmem:[#allocation11_spill] sm:$0xff]  ;;  %v11875_v19 = vadd.f32 %v7267_v54, %v11616_v34  ;;  %v7272_v1 = vsel %vm2988_vm7, 1.0, %v16346_v61 }
 0x374   : > { %v11834_v48 = vpop.permute.xlu1 %1593  ;;  %v11836_v26 = vpop.permute.xlu0 %1589  ;;  %vm2985_vm12 = vcmp.eq.s32.totalorder %v16608_v60, %v8233_v9  ;;  %vm2986_vm9 = vcmp.eq.s32.totalorder %v16608_v60, %v8791_v22  ;;  %v7265_v43 = vsel %vm2981_vm4, 1.0, %v16346_v61  ;;  %v7266_v42 = vsel %vm2982_vm14, 1.0, %v16346_v61 }
 0x375   : > { %16604 = vst [vmem:[#allocation23_spill] sm:$0xff] %v11834_v48  ;;  %16605 = vst [vmem:[#allocation24_spill] sm:$0xff] %v11836_v26  ;;  %v7269_v56 = vsel %vm2985_vm12, 1.0, %v16346_v61  ;;  %v11890_v26 = vadd.f32 %v7268_v17, %v11619_v55  ;;  %v7270_v34 = vsel %vm2986_vm9, 1.0, %v16346_v61  ;;  %v7275_v54 = vsel %vm2991_vm10, 1.0, %v16346_v61 }
 0x376   : > { %1834 = vbcast.lane.b32.xlu1 %v16584_v62, 344  ;;  %1830 = vbcast.lane.b32.xlu0 %v16584_v62, 336  ;;  %v7276_v48 = vsel %vm2992_vm13, 1.0, %v16346_v61  ;;  %v11898_v38 = vadd.f32 %v7265_v43, %v11628_v50  ;;  %v7273_v55 = vsel %vm2989_vm11, 1.0, %v16346_v61  ;;  %v7274_v60 = vsel %vm2990_vm15, 1.0, %v16346_v61 }
 0x377   : > { %v11912_v17 = vadd.f32 %v7271_v20, %v11638_v10  ;;  %v11918_v50 = vadd.f32 %v7269_v56, %v11648_v51  ;;  %v11927_v25 = vadd.f32 %v7270_v34, %v11651_v4  ;;  %v11930_v63 = vadd.f32 %v7275_v54, %v11683_v27  ;;  %v16616_v20 = vld [vmem:[#allocation72_spill] sm:$0xff]  ;;  %v16618_v27 = vld [vmem:[#allocation74_spill] sm:$0xff] }
 0x378   : > { %v11870_v47 = vpop.permute.xlu1 %1601  ;;  %v11872_v7 = vpop.permute.xlu0 %1597  ;;  %v11933_v10 = vadd.f32 %v7276_v48, %v11686_v28  ;;  %v11941_v51 = vadd.f32 %v7274_v60, %v11707_v33  ;;  %vm2993_vm0 = vcmp.eq.s32.totalorder %v16616_v20, %v8233_v9  ;;  %vm2994_vm1 = vcmp.eq.s32.totalorder %v16616_v20, %v8791_v22  ;;  %v16617_v28 = vld [vmem:[#allocation73_spill] sm:$0xff]  ;;  %v16622_v56 = vld [vmem:[#allocation76_spill] sm:$0xff] }
 0x379   : > { %16611 = vst [vmem:[#allocation25_spill] sm:$0xff] %v11870_v47  ;;  %16612 = vst [vmem:[#allocation26_spill] sm:$0xff] %v11872_v7  ;;  %v11901_v7 = vadd.f32 %v7266_v42, %v11631_v32  ;;  %v11915_v47 = vadd.f32 %v7272_v1, %v11641_v18  ;;  %v16613_v32 = vld [vmem:[#allocation71_spill] sm:$0xff]  ;;  %v11938_v18 = vadd.f32 %v7273_v55, %v11697_v14  ;;  %v7277_v1 = vsel %vm2993_vm0, 1.0, %v16346_v61 }
 0x37a   : > { %1842 = vbcast.lane.b32.xlu1 %v16584_v62, 360  ;;  %1838 = vbcast.lane.b32.xlu0 %v16584_v62, 352  ;;  %vm2995_vm2 = vcmp.eq.s32.totalorder %v16613_v32, %v8233_v9  ;;  %vm2996_vm3 = vcmp.eq.s32.totalorder %v16613_v32, %v8791_v22  ;;  %vm2999_vm6 = vcmp.eq.s32.totalorder %v16617_v28, %v8233_v9  ;;  %v7278_v54 = vsel %vm2994_vm1, 1.0, %v16346_v61  ;;  %v16623_v32 = vld [vmem:[#allocation14_spill] sm:$0xff] }
 0x37b   : > { %v7279_v4 = vsel %vm2995_vm2, 1.0, %v16346_v61  ;;  %vm3000_vm8 = vcmp.eq.s32.totalorder %v16617_v28, %v8791_v22  ;;  %v7280_v14 = vsel %vm2996_vm3, 1.0, %v16346_v61  ;;  %vm2997_vm4 = vcmp.eq.s32.totalorder %v16618_v27, %v8233_v9 }
 0x37c   : > { %v11922_v43 = vpop.permute.xlu1 %1609  ;;  %v11924_v42 = vpop.permute.xlu0 %1605  ;;  %vm2998_vm14 = vcmp.eq.s32.totalorder %v16618_v27, %v8791_v22  ;;  %vm3001_vm12 = vcmp.eq.s32.totalorder %v16622_v56, %v8233_v9  ;;  %vm3002_vm9 = vcmp.eq.s32.totalorder %v16622_v56, %v8791_v22  ;;  %v11973_v34 = vadd.f32 %v7279_v4, %v11710_v6 }
 0x37d   : > { %16614 = vst [vmem:[#allocation9_spill] sm:$0xff] %v11922_v43  ;;  %16615 = vst [vmem:[#allocation27_spill] sm:$0xff] %v11924_v42  ;;  %v7283_v55 = vsel %vm2999_vm6, 1.0, %v16346_v61  ;;  %v7284_v60 = vsel %vm3000_vm8, 1.0, %v16346_v61  ;;  %v11981_v20 = vadd.f32 %v7280_v14, %v11721_v37  ;;  %v7281_v28 = vsel %vm2997_vm4, 1.0, %v16346_v61 }
 0x37e   : > { %1850 = vbcast.lane.b32.xlu1 %v16584_v62, 376  ;;  %1846 = vbcast.lane.b32.xlu0 %v16584_v62, 368  ;;  %v16619_v62 = vld [vmem:[#allocation75_spill] sm:$0xff]  ;;  %v7282_v6 = vsel %vm2998_vm14, 1.0, %v16346_v61  ;;  %v11996_v56 = vadd.f32 %v7277_v1, %v11724_v24  ;;  %v7285_v14 = vsel %vm3001_vm12, 1.0, %v16346_v61  ;;  %v12006_v27 = vadd.f32 %v7278_v54, %v11731_v39  ;;  %v16626_v24 = vld [vmem:[#allocation77_spill] sm:$0xff] }
 0x37f   : > { %vm3003_vm5 = vcmp.eq.s32.totalorder %v16619_v62, %v8233_v9  ;;  %vm3004_vm7 = vcmp.eq.s32.totalorder %v16619_v62, %v8791_v22  ;;  %v12009_v43 = vadd.f32 %v7283_v55, %v11734_v0  ;;  %v12012_v62 = vadd.f32 %v7284_v60, %v11737_v46  ;;  %v16633_v55 = vld [vmem:[#allocation82_spill] sm:$0xff] }
 0x380   : > { %v11961_v33 = vpop.permute.xlu1 %1617  ;;  %v11963_v48 = vpop.permute.xlu0 %1613  ;;  %v7287_v4 = vsel %vm3003_vm5, 1.0, %v16346_v61  ;;  %v7288_v37 = vsel %vm3004_vm7, 1.0, %v16346_v61  ;;  %vm3007_vm10 = vcmp.eq.s32.totalorder %v16626_v24, %v8233_v9  ;;  %v12017_v1 = vadd.f32 %v7281_v28, %v11742_v29 }
 0x381   : > { %16620 = vst [vmem:[#allocation28_spill] sm:$0xff] %v11961_v33  ;;  %16621 = vst [vmem:[#allocation29_spill] sm:$0xff] %v11963_v48  ;;  %v7286_v48 = vsel %vm3002_vm9, 1.0, %v16346_v61  ;;  %v12020_v59 = vadd.f32 %v7282_v6, %v11745_v13  ;;  %v12028_v39 = vadd.f32 %v7288_v37, %v11788_v12  ;;  %v12031_v0 = vadd.f32 %v7285_v14, %v11803_v2  ;;  %v16627_v13 = vld [vmem:[#allocation78_spill] sm:$0xff]  ;;  %v16628_v12 = vld [vmem:[#allocation79_spill] sm:$0xff] }
 0x382   : > { %1861 = vbcast.lane.b32.xlu1 %v16623_v32, 264  ;;  %1857 = vbcast.lane.b32.xlu0 %v16623_v32, 256  ;;  %v12034_v46 = vadd.f32 %v7286_v48, %v11806_v35  ;;  %vm3008_vm13 = vcmp.eq.s32.totalorder %v16626_v24, %v8791_v22  ;;  %v7291_v29 = vsel %vm3007_vm10, 1.0, %v16346_v61  ;;  %vm3005_vm11 = vcmp.eq.s32.totalorder %v16627_v13, %v8233_v9  ;;  %v16631_v35 = vld [vmem:[#allocation80_spill] sm:$0xff]  ;;  %v16632_v48 = vld [vmem:[#allocation81_spill] sm:$0xff] }
 0x383   : > { %vm3006_vm15 = vcmp.eq.s32.totalorder %v16627_v13, %v8791_v22  ;;  %vm3011_vm2 = vcmp.eq.s32.totalorder %v16628_v12, %v8233_v9  ;;  %vm3012_vm3 = vcmp.eq.s32.totalorder %v16628_v12, %v8791_v22  ;;  %vm3009_vm0 = vcmp.eq.s32.totalorder %v16631_v35, %v8233_v9 }
 0x384   : > { %v12001_v33 = vpop.permute.xlu1 %1625  ;;  %v12003_v42 = vpop.permute.xlu0 %1621  ;;  %vm3010_vm1 = vcmp.eq.s32.totalorder %v16631_v35, %v8791_v22  ;;  %vm3015_vm6 = vcmp.eq.s32.totalorder %v16632_v48, %v8233_v9  ;;  %v7292_v54 = vsel %vm3008_vm13, 1.0, %v16346_v61  ;;  %vm3016_vm8 = vcmp.eq.s32.totalorder %v16632_v48, %v8791_v22 }
 0x385   : > { %16624 = vst [vmem:[#allocation30_spill] sm:$0xff] %v12001_v33  ;;  %16625 = vst [vmem:[#allocation31_spill] sm:$0xff] %v12003_v42  ;;  %v12023_v42 = vadd.f32 %v7287_v4, %v11778_v49  ;;  %vm3013_vm4 = vcmp.eq.s32.totalorder %v16633_v55, %v8233_v9  ;;  %vm3014_vm14 = vcmp.eq.s32.totalorder %v16633_v55, %v8791_v22  ;;  %v7289_v28 = vsel %vm3005_vm11, 1.0, %v16346_v61 }
 0x386   : > { %1869 = vbcast.lane.b32.xlu1 %v16623_v32, 280  ;;  %1865 = vbcast.lane.b32.xlu0 %v16623_v32, 272  ;;  %v12067_v60 = vadd.f32 %v7291_v29, %v11813_v45  ;;  %v7290_v6 = vsel %vm3006_vm15, 1.0, %v16346_v61  ;;  %v7295_v4 = vsel %vm3011_vm2, 1.0, %v16346_v61  ;;  %v7296_v37 = vsel %vm3012_vm3, 1.0, %v16346_v61 }
 0x387   : > { %v7293_v45 = vsel %vm3009_vm0, 1.0, %v16346_v61  ;;  %v7294_v14 = vsel %vm3010_vm1, 1.0, %v16346_v61  ;;  %v7299_v24 = vsel %vm3015_vm6, 1.0, %v16346_v61  ;;  %v12090_v13 = vadd.f32 %v7292_v54, %v11816_v52 }
 0x388   : > { %v12045_v49 = vpop.permute.xlu1 %1633  ;;  %v12047_v2 = vpop.permute.xlu0 %1629  ;;  %v7300_v12 = vsel %vm3016_vm8, 1.0, %v16346_v61  ;;  %v12108_v52 = vadd.f32 %v7290_v6, %v11824_v3  ;;  %v12111_v54 = vadd.f32 %v7295_v4, %v11827_v57  ;;  %v12116_v48 = vadd.f32 %v7296_v37, %v11830_v53  ;;  %v16636_v53 = vld [vmem:[#allocation83_spill] sm:$0xff] }
 0x389   : > { %16629 = vst [vmem:[#allocation32_spill] sm:$0xff] %v12045_v49  ;;  %16630 = vst [vmem:[#allocation33_spill] sm:$0xff] %v12047_v2  ;;  %v7297_v2 = vsel %vm3013_vm4, 1.0, %v16346_v61  ;;  %v12119_v49 = vadd.f32 %v7293_v45, %v11839_v44  ;;  %v12122_v55 = vadd.f32 %v7294_v14, %v11842_v31  ;;  %v12128_v3 = vadd.f32 %v7300_v12, %v11890_v26  ;;  %v16639_v31 = vld [vmem:[#allocation84_spill] sm:$0xff]  ;;  %v16640_v26 = vld [vmem:[#allocation85_spill] sm:$0xff] }
 0x38a   : > { %1877 = vbcast.lane.b32.xlu1 %v16623_v32, 296  ;;  %1873 = vbcast.lane.b32.xlu0 %v16623_v32, 288  ;;  %v12131_v57 = vadd.f32 %v7297_v2, %v11898_v38  ;;  %vm3019_vm5 = vcmp.eq.s32.totalorder %v16636_v53, %v8233_v9  ;;  %vm3020_vm7 = vcmp.eq.s32.totalorder %v16636_v53, %v8791_v22  ;;  %v16642_v38 = vld [vmem:[#allocation87_spill] sm:$0xff]  ;;  %v16643_v2 = vld [vmem:[#allocation88_spill] sm:$0xff] }
 0x38b   : > { %vm3017_vm12 = vcmp.eq.s32.totalorder %v16639_v31, %v8233_v9  ;;  %vm3018_vm9 = vcmp.eq.s32.totalorder %v16639_v31, %v8791_v22  ;;  %vm3023_vm10 = vcmp.eq.s32.totalorder %v16640_v26, %v8233_v9  ;;  %vm3024_vm13 = vcmp.eq.s32.totalorder %v16640_v26, %v8791_v22 }
 0x38c   : > { %v12085_v29 = vpop.permute.xlu1 %1641  ;;  %v12087_v35 = vpop.permute.xlu0 %1637  ;;  %vm3027_vm2 = vcmp.eq.s32.totalorder %v16642_v38, %v8233_v9  ;;  %vm3028_vm3 = vcmp.eq.s32.totalorder %v16642_v38, %v8791_v22  ;;  %vm3025_vm0 = vcmp.eq.s32.totalorder %v16643_v2, %v8233_v9  ;;  %v7304_v4 = vsel %vm3020_vm7, 1.0, %v16346_v61 }
 0x38d   : > { %16634 = vst [vmem:[#allocation34_spill] sm:$0xff] %v12085_v29  ;;  %16635 = vst [vmem:[#allocation35_spill] sm:$0xff] %v12087_v35  ;;  %v7298_v29 = vsel %vm3014_vm14, 1.0, %v16346_v61  ;;  %v12105_v35 = vadd.f32 %v7289_v28, %v11819_v40  ;;  %v12125_v40 = vadd.f32 %v7299_v24, %v11875_v19  ;;  %v7303_v19 = vsel %vm3019_vm5, 1.0, %v16346_v61 }
 0x38e   : > { %1885 = vbcast.lane.b32.xlu1 %v16623_v32, 312  ;;  %1881 = vbcast.lane.b32.xlu0 %v16623_v32, 304  ;;  %v12134_v28 = vadd.f32 %v7298_v29, %v11901_v7  ;;  %v16641_v7 = vld [vmem:[#allocation86_spill] sm:$0xff]  ;;  %v7301_v37 = vsel %vm3017_vm12, 1.0, %v16346_v61  ;;  %v7302_v45 = vsel %vm3018_vm9, 1.0, %v16346_v61  ;;  %v7307_v14 = vsel %vm3023_vm10, 1.0, %v16346_v61 }
 0x38f   : > { %vm3021_vm11 = vcmp.eq.s32.totalorder %v16641_v7, %v8233_v9  ;;  %vm3022_vm15 = vcmp.eq.s32.totalorder %v16641_v7, %v8791_v22  ;;  %v7308_v12 = vsel %vm3024_vm13, 1.0, %v16346_v61  ;;  %vm3026_vm1 = vcmp.eq.s32.totalorder %v16643_v2, %v8791_v22 }
 0x390   : > { %v12138_v44 = vpop.permute.xlu1 %1649  ;;  %v12140_v6 = vpop.permute.xlu0 %1645  ;;  %v7305_v53 = vsel %vm3021_vm11, 1.0, %v16346_v61  ;;  %v7306_v31 = vsel %vm3022_vm15, 1.0, %v16346_v61  ;;  %v12179_v26 = vadd.f32 %v7303_v19, %v11912_v17  ;;  %v7311_v7 = vsel %vm3027_vm2, 1.0, %v16346_v61 }
 0x391   : > { %16637 = vst [vmem:[#allocation36_spill] sm:$0xff] %v12138_v44  ;;  %16638 = vst [vmem:[#allocation37_spill] sm:$0xff] %v12140_v6  ;;  %v7312_v38 = vsel %vm3028_vm3, 1.0, %v16346_v61  ;;  %v12190_v6 = vadd.f32 %v7301_v37, %v11918_v50  ;;  %v12193_v2 = vadd.f32 %v7302_v45, %v11927_v25  ;;  %v12196_v17 = vadd.f32 %v7307_v14, %v11930_v63 }
 0x392   : > { %1893 = vbcast.lane.b32.xlu1 %v16623_v32, 328  ;;  %1889 = vbcast.lane.b32.xlu0 %v16623_v32, 320  ;;  %v12199_v19 = vadd.f32 %v7308_v12, %v11933_v10  ;;  %v12202_v44 = vadd.f32 %v7305_v53, %v11938_v18  ;;  %v12205_v33 = vadd.f32 %v7306_v31, %v11941_v51  ;;  %v16647_v18 = vld [vmem:[#allocation89_spill] sm:$0xff]  ;;  %v16653_v12 = vld [vmem:[#allocation92_spill] sm:$0xff] }
 0x393   : > { %v12213_v25 = vadd.f32 %v7311_v7, %v11973_v34  ;;  %v12216_v63 = vadd.f32 %v7312_v38, %v11981_v20  ;;  %vm3031_vm6 = vcmp.eq.s32.totalorder %v10777_v11, %v8233_v9  ;;  %vm3032_vm8 = vcmp.eq.s32.totalorder %v10777_v11, %v8791_v22  ;;  %v16648_v34 = vld [vmem:[#allocation113_spill] sm:$0xff]  ;;  %v16649_v11 = vld [vmem:[#allocation90_spill] sm:$0xff] }
 0x394   : > { %v12169_v24 = vpop.permute.xlu1 %1660  ;;  %v12171_v29 = vpop.permute.xlu0 %1656  ;;  %vm3029_vm4 = vcmp.eq.s32.totalorder %v16647_v18, %v8233_v9  ;;  %vm3030_vm14 = vcmp.eq.s32.totalorder %v16647_v18, %v8791_v22  ;;  %vm3035_vm5 = vcmp.eq.s32.totalorder %v16648_v34, %v8233_v9  ;;  %vm3036_vm7 = vcmp.eq.s32.totalorder %v16648_v34, %v8791_v22 }
 0x395   : > { %16644 = vst [vmem:[#allocation12_spill] sm:$0xff] %v12169_v24  ;;  %16645 = vst [vmem:[#allocation38_spill] sm:$0xff] %v12171_v29  ;;  %v7309_v24 = vsel %vm3025_vm0, 1.0, %v16346_v61  ;;  %v12187_v29 = vadd.f32 %v7304_v4, %v11915_v47  ;;  %v7310_v47 = vsel %vm3026_vm1, 1.0, %v16346_v61  ;;  %vm3033_vm12 = vcmp.eq.s32.totalorder %v16649_v11, %v8233_v9 }
 0x396   : > { %1901 = vbcast.lane.b32.xlu1 %v16623_v32, 344  ;;  %1897 = vbcast.lane.b32.xlu0 %v16623_v32, 336  ;;  %v12219_v10 = vadd.f32 %v7309_v24, %v11996_v56  ;;  %v12232_v51 = vadd.f32 %v7310_v47, %v12006_v27  ;;  %v7315_v20 = vsel %vm3031_vm6, 1.0, %v16346_v61  ;;  %vm3034_vm9 = vcmp.eq.s32.totalorder %v16649_v11, %v8791_v22  ;;  %v16650_v56 = vld [vmem:[#allocation91_spill] sm:$0xff] }
 0x397   : > { %vm3039_vm10 = vcmp.eq.s32.totalorder %v16650_v56, %v8233_v9  ;;  %vm3040_vm13 = vcmp.eq.s32.totalorder %v16650_v56, %v8791_v22  ;;  %v7316_v45 = vsel %vm3032_vm8, 1.0, %v16346_v61  ;;  %v7313_v14 = vsel %vm3029_vm4, 1.0, %v16346_v61 }
 0x398   : > { %v12208_v4 = vpop.permute.xlu1 %1668  ;;  %v12210_v50 = vpop.permute.xlu0 %1664  ;;  %v7314_v24 = vsel %vm3030_vm14, 1.0, %v16346_v61  ;;  %vm3037_vm11 = vcmp.eq.s32.totalorder %v16653_v12, %v8233_v9  ;;  %v7319_v53 = vsel %vm3035_vm5, 1.0, %v16346_v61  ;;  %v7320_v31 = vsel %vm3036_vm7, 1.0, %v16346_v61 }
 0x399   : > { %16646 = vst [vmem:[#allocation39_spill] sm:$0xff] %v12210_v50  ;;  %v7317_v7 = vsel %vm3033_vm12, 1.0, %v16346_v61  ;;  %vm3038_vm15 = vcmp.eq.s32.totalorder %v16653_v12, %v8791_v22  ;;  %v12264_v38 = vadd.f32 %v7315_v20, %v12009_v43  ;;  %v7318_v47 = vsel %vm3034_vm9, 1.0, %v16346_v61 }
 0x39a   : > { %1909 = vbcast.lane.b32.xlu1 %v16623_v32, 360  ;;  %1905 = vbcast.lane.b32.xlu0 %v16623_v32, 352  ;;  %v7323_v18 = vsel %vm3039_vm10, 1.0, %v16346_v61  ;;  %v7324_v34 = vsel %vm3040_vm13, 1.0, %v16346_v61  ;;  %v12282_v43 = vadd.f32 %v7313_v14, %v12017_v1  ;;  %v12285_v20 = vadd.f32 %v7314_v24, %v12020_v59  ;;  %v16656_v14 = vld [vmem:[#allocation15_spill] sm:$0xff] }
 0x39b   : > { %v7321_v11 = vsel %vm3037_vm11, 1.0, %v16346_v61  ;;  %v12293_v50 = vadd.f32 %v7319_v53, %v12023_v42  ;;  %v12296_v56 = vadd.f32 %v7320_v31, %v12028_v39  ;;  %v7322_v59 = vsel %vm3038_vm15, 1.0, %v16346_v61 }
 0x39c   : > { %v12247_v27 = vpop.permute.xlu1 %1676  ;;  %v12249_v37 = vpop.permute.xlu0 %1672  ;;  %v12306_v1 = vadd.f32 %v7318_v47, %v12034_v46  ;;  %v12312_v42 = vadd.f32 %v7324_v34, %v12090_v13  ;;  %v12317_v39 = vadd.f32 %v7321_v11, %v12105_v35  ;;  %vm3043_vm2 = vcmp.eq.s32.totalorder %v10914_v23, %v8233_v9 }
 0x39d   : > { %16651 = vst [vmem:[#allocation40_spill] sm:$0xff] %v12247_v27  ;;  %16652 = vst [vmem:[#allocation41_spill] sm:$0xff] %v12249_v37  ;;  %vm3044_vm3 = vcmp.eq.s32.totalorder %v10914_v23, %v8791_v22  ;;  %vm3041_vm0 = vcmp.eq.s32.totalorder %v10916_v16, %v8233_v9  ;;  %vm3042_vm1 = vcmp.eq.s32.totalorder %v10916_v16, %v8791_v22  ;;  %v7327_v23 = vsel %vm3043_vm2, 1.0, %v16346_v61 }
 0x39e   : > { %1917 = vbcast.lane.b32.xlu1 %v16623_v32, 376  ;;  %1913 = vbcast.lane.b32.xlu0 %v16623_v32, 368  ;;  %v12279_v32 = vadd.f32 %v7316_v45, %v12012_v62  ;;  %v12299_v62 = vadd.f32 %v7317_v7, %v12031_v0  ;;  %v12309_v45 = vadd.f32 %v7323_v18, %v12067_v60  ;;  %v7328_v16 = vsel %vm3044_vm3, 1.0, %v16346_v61 }
 0x39f   : > { %16655 = vst [vmem:[#allocation43_spill] sm:$0xff] %v12312_v42  ;;  %16657 = vst [vmem:[#allocation44_spill] sm:$0xff] %v12317_v39  ;;  %v12326_v0 = vadd.f32 %v7322_v59, %v12108_v52  ;;  %vm3047_vm6 = vcmp.eq.s32.totalorder %v10945_v15, %v8233_v9  ;;  %vm3048_vm8 = vcmp.eq.s32.totalorder %v10945_v15, %v8791_v22  ;;  %v7325_v15 = vsel %vm3041_vm0, 1.0, %v16346_v61 }
 0x3a0   : > { %v12288_v37 = vpop.permute.xlu1 %1684  ;;  %v12290_v27 = vpop.permute.xlu0 %1680  ;;  %16654 = vst [vmem:[#allocation42_spill] sm:$0xff] %v12309_v45  ;;  %vm3045_vm4 = vcmp.eq.s32.totalorder %v10947_v8, %v8233_v9  ;;  %vm3046_vm14 = vcmp.eq.s32.totalorder %v10947_v8, %v8791_v22  ;;  %vm3051_vm5 = vcmp.eq.s32.totalorder %v10984_v36, %v8233_v9  ;;  %vm3052_vm7 = vcmp.eq.s32.totalorder %v10984_v36, %v8791_v22 }
 0x3a1   : > { %16658 = vst [vmem:[#allocation45_spill] sm:$0xff] %v12326_v0  ;;  %vm3049_vm12 = vcmp.eq.s32.totalorder %v10986_v21, %v8233_v9  ;;  %v7326_v8 = vsel %vm3042_vm1, 1.0, %v16346_v61  ;;  %v7331_v35 = vsel %vm3047_vm6, 1.0, %v16346_v61  ;;  %v7332_v13 = vsel %vm3048_vm8, 1.0, %v16346_v61 }
 0x3a2   : > { %1928 = vbcast.lane.b32.xlu1 %v16656_v14, 264  ;;  %1924 = vbcast.lane.b32.xlu0 %v16656_v14, 256  ;;  %vm3050_vm9 = vcmp.eq.s32.totalorder %v10986_v21, %v8791_v22  ;;  %v7329_v36 = vsel %vm3045_vm4, 1.0, %v16346_v61  ;;  %v7330_v52 = vsel %vm3046_vm14, 1.0, %v16346_v61  ;;  %v7335_v24 = vsel %vm3051_vm5, 1.0, %v16346_v61 }
 0x3a3   : > { %v7336_v12 = vsel %vm3052_vm7, 1.0, %v16346_v61  ;;  %v12367_v7 = vadd.f32 %v7327_v23, %v12111_v54  ;;  %v12370_v47 = vadd.f32 %v7328_v16, %v12116_v48  ;;  %v12373_v18 = vadd.f32 %v7325_v15, %v12119_v49 }
 0x3a4   : > { %v12334_v46 = vpop.permute.xlu1 %1692  ;;  %v12336_v60 = vpop.permute.xlu0 %1688  ;;  %v7333_v34 = vsel %vm3049_vm12, 1.0, %v16346_v61  ;;  %v12380_v11 = vadd.f32 %v7326_v8, %v12122_v55  ;;  %v12383_v59 = vadd.f32 %v7331_v35, %v12125_v40  ;;  %v12386_v54 = vadd.f32 %v7332_v13, %v12128_v3  ;;  %v16663_v13 = vld [vmem:[#allocation96_spill] sm:$0xff] }
 0x3a5   : > { %v7334_v48 = vsel %vm3050_vm9, 1.0, %v16346_v61  ;;  %v12392_v49 = vadd.f32 %v7329_v36, %v12131_v57  ;;  %v12395_v21 = vadd.f32 %v7330_v52, %v12134_v28  ;;  %v12398_v55 = vadd.f32 %v7335_v24, %v12179_v26 }
 0x3a6   : > { %1936 = vbcast.lane.b32.xlu1 %v16656_v14, 280  ;;  %1932 = vbcast.lane.b32.xlu0 %v16656_v14, 272  ;;  %v12401_v40 = vadd.f32 %v7336_v12, %v12187_v29  ;;  %v12404_v3 = vadd.f32 %v7333_v34, %v12190_v6  ;;  %vm3055_vm10 = vcmp.eq.s32.totalorder %v11023_v30, %v8233_v9  ;;  %v16659_v6 = vld [vmem:[#allocation93_spill] sm:$0xff]  ;;  %v16661_v29 = vld [vmem:[#allocation95_spill] sm:$0xff] }
 0x3a7   : > { %vm3056_vm13 = vcmp.eq.s32.totalorder %v11023_v30, %v8791_v22  ;;  %vm3053_vm11 = vcmp.eq.s32.totalorder %v11025_v41, %v8233_v9  ;;  %v12417_v26 = vadd.f32 %v7334_v48, %v12193_v2  ;;  %vm3054_vm15 = vcmp.eq.s32.totalorder %v11025_v41, %v8791_v22  ;;  %v16660_v30 = vld [vmem:[#allocation94_spill] sm:$0xff]  ;;  %v16662_v2 = vld [vmem:[#allocation16_spill] sm:$0xff] }
 0x3a8   : > { %v12362_v53 = vpop.permute.xlu1 %1700  ;;  %v12364_v31 = vpop.permute.xlu0 %1696  ;;  %vm3059_vm2 = vcmp.eq.s32.totalorder %v16659_v6, %v8233_v9  ;;  %vm3060_vm3 = vcmp.eq.s32.totalorder %v16659_v6, %v8791_v22  ;;  %vm3057_vm0 = vcmp.eq.s32.totalorder %v16660_v30, %v8233_v9  ;;  %vm3058_vm1 = vcmp.eq.s32.totalorder %v16660_v30, %v8791_v22 }
 0x3a9   : > { %vm3063_vm6 = vcmp.eq.s32.totalorder %v16661_v29, %v8233_v9  ;;  %v7339_v41 = vsel %vm3055_vm10, 1.0, %v16346_v61  ;;  %v7340_v23 = vsel %vm3056_vm13, 1.0, %v16346_v61  ;;  %v7337_v16 = vsel %vm3053_vm11, 1.0, %v16346_v61 }
 0x3aa   : > { %1984 = vbcast.lane.b32.xlu1 %v16656_v14, 376  ;;  %1980 = vbcast.lane.b32.xlu0 %v16656_v14, 368  ;;  %vm3064_vm8 = vcmp.eq.s32.totalorder %v16661_v29, %v8791_v22  ;;  %v7338_v15 = vsel %vm3054_vm15, 1.0, %v16346_v61  ;;  %v7343_v8 = vsel %vm3059_vm2, 1.0, %v16346_v61  ;;  %v7344_v35 = vsel %vm3060_vm3, 1.0, %v16346_v61 }
 0x3ab   : > { %vm3061_vm4 = vcmp.eq.s32.totalorder %v16663_v13, %v8233_v9  ;;  %v7341_v24 = vsel %vm3057_vm0, 1.0, %v16346_v61  ;;  %v7342_v12 = vsel %vm3058_vm1, 1.0, %v16346_v61  ;;  %v7347_v34 = vsel %vm3063_vm6, 1.0, %v16346_v61 }
 0x3ac   : > { %v12412_v57 = vpop.permute.xlu1 %1708  ;;  %v12414_v28 = vpop.permute.xlu0 %1704  ;;  %vm3062_vm14 = vcmp.eq.s32.totalorder %v16663_v13, %v8791_v22  ;;  %v12453_v48 = vadd.f32 %v7339_v41, %v12196_v17  ;;  %v12456_v6 = vadd.f32 %v7340_v23, %v12199_v19  ;;  %v12459_v30 = vadd.f32 %v7337_v16, %v12202_v44  ;;  %v16670_v13 = vld [vmem:[#allocation102_spill] sm:$0xff] }
 0x3ad   : > { %v7348_v29 = vsel %vm3064_vm8, 1.0, %v16346_v61  ;;  %v12465_v0 = vadd.f32 %v7338_v15, %v12205_v33  ;;  %v12468_v39 = vadd.f32 %v7343_v8, %v12213_v25  ;;  %v12471_v17 = vadd.f32 %v7344_v35, %v12216_v63  ;;  %v16666_v15 = vld [vmem:[#allocation97_spill] sm:$0xff] }
 0x3ae   : > { %2051 = vbcast.lane.b32.xlu1 %v16662_v2, 376  ;;  %2047 = vbcast.lane.b32.xlu0 %v16662_v2, 368  ;;  %v7345_v44 = vsel %vm3061_vm4, 1.0, %v16346_v61  ;;  %v12478_v19 = vadd.f32 %v7341_v24, %v12219_v10  ;;  %v12481_v41 = vadd.f32 %v7342_v12, %v12232_v51  ;;  %v12484_v33 = vadd.f32 %v7347_v34, %v12264_v38  ;;  %v16667_v51 = vld [vmem:[#allocation100_spill] sm:$0xff]  ;;  %v16668_v38 = vld [vmem:[#allocation118_spill] sm:$0xff]  ;;  %v16669_v8 = vld [vmem:[#allocation101_spill] sm:$0xff] }
 0x3af   : > { %v7346_v25 = vsel %vm3062_vm14, 1.0, %v16346_v61  ;;  %v12492_v16 = vadd.f32 %v7348_v29, %v12279_v32  ;;  %vm3067_vm5 = vcmp.eq.s32.totalorder %v16666_v15, %v8233_v9  ;;  %vm3068_vm7 = vcmp.eq.s32.totalorder %v16666_v15, %v8791_v22  ;;  %v16673_v29 = vld [vmem:[#allocation103_spill] sm:$0xff] }
 0x3b0   : > { %v12443_v36 = vpop.permute.xlu1 %1716  ;;  %v12445_v52 = vpop.permute.xlu0 %1712  ;;  %vm3065_vm12 = vcmp.eq.s32.totalorder %v11140_v5, %v8233_v9  ;;  %v12501_v10 = vadd.f32 %v7345_v44, %v12282_v43  ;;  %vm3066_vm9 = vcmp.eq.s32.totalorder %v11140_v5, %v8791_v22  ;;  %vm3075_vm10 = vcmp.eq.s32.totalorder %v16667_v51, %v8233_v9 }
 0x3b1   : > { %v12510_v32 = vadd.f32 %v7346_v25, %v12285_v20  ;;  %vm3076_vm13 = vcmp.eq.s32.totalorder %v16667_v51, %v8791_v22  ;;  %vm3073_vm11 = vcmp.eq.s32.totalorder %v16669_v8, %v8233_v9  ;;  %vm3074_vm15 = vcmp.eq.s32.totalorder %v16669_v8, %v8791_v22 }
 0x3b2   : > { %1976 = vbcast.lane.b32.xlu1 %v16656_v14, 360  ;;  %1972 = vbcast.lane.b32.xlu0 %v16656_v14, 352  ;;  %v7351_v5 = vsel %vm3067_vm5, 1.0, %v16346_v61  ;;  %v7352_v43 = vsel %vm3068_vm7, 1.0, %v16346_v61  ;;  %v7349_v35 = vsel %vm3065_vm12, 1.0, %v16346_v61  ;;  %vm3079_vm2 = vcmp.eq.s32.totalorder %v16670_v13, %v8233_v9 }
 0x3b3   : > { %v7350_v12 = vsel %vm3066_vm9, 1.0, %v16346_v61  ;;  %v7359_v34 = vsel %vm3075_vm10, 1.0, %v16346_v61  ;;  %vm3080_vm3 = vcmp.eq.s32.totalorder %v16670_v13, %v8791_v22  ;;  %vm3077_vm0 = vcmp.eq.s32.totalorder %v16673_v29, %v8233_v9 }
 0x3b4   : > { %v12487_v23 = vpop.permute.xlu1 %1727  ;;  %v12489_v63 = vpop.permute.xlu0 %1723  ;;  %v7360_v44 = vsel %vm3076_vm13, 1.0, %v16346_v61  ;;  %v7357_v25 = vsel %vm3073_vm11, 1.0, %v16346_v61  ;;  %v7358_v15 = vsel %vm3074_vm15, 1.0, %v16346_v61  ;;  %vm3078_vm1 = vcmp.eq.s32.totalorder %v16673_v29, %v8791_v22 }
 0x3b5   : > { %16664 = vst [vmem:[#allocation46_spill] sm:$0xff] %v12487_v23  ;;  %16665 = vst [vmem:[#allocation47_spill] sm:$0xff] %v12489_v63  ;;  %v12541_v51 = vadd.f32 %v7351_v5, %v12293_v50  ;;  %v12544_v8 = vadd.f32 %v7352_v43, %v12296_v56  ;;  %v12547_v63 = vadd.f32 %v7349_v35, %v12299_v62  ;;  %v7363_v23 = vsel %vm3079_vm2, 1.0, %v16346_v61 }
 0x3b6   : > { %2118 = vbcast.lane.b32.xlu1 %v16668_v38, 376  ;;  %2114 = vbcast.lane.b32.xlu0 %v16668_v38, 368  ;;  %v12554_v42 = vadd.f32 %v7350_v12, %v12306_v1  ;;  %v12557_v45 = vadd.f32 %v7359_v34, %v12367_v7  ;;  %v7364_v50 = vsel %vm3080_vm3, 1.0, %v16346_v61  ;;  %v7361_v5 = vsel %vm3077_vm0, 1.0, %v16346_v61  ;;  %v16676_v12 = vld [vmem:[#allocation104_spill] sm:$0xff]  ;;  %v16678_v34 = vld [vmem:[#allocation105_spill] sm:$0xff] }
 0x3b7   : > { %v12566_v62 = vadd.f32 %v7360_v44, %v12370_v47  ;;  %v12569_v35 = vadd.f32 %v7357_v25, %v12373_v18  ;;  %v12572_v1 = vadd.f32 %v7358_v15, %v12380_v11  ;;  %v7362_v7 = vsel %vm3078_vm1, 1.0, %v16346_v61  ;;  %v16677_v47 = vld [vmem:[#allocation119_spill] sm:$0xff] }
 0x3b8   : > { %v12523_v20 = vpop.permute.xlu1 %1735  ;;  %v12525_v24 = vpop.permute.xlu0 %1731  ;;  %v12579_v13 = vadd.f32 %v7363_v23, %v12383_v59  ;;  %vm3083_vm6 = vcmp.eq.s32.totalorder %v16676_v12, %v8233_v9  ;;  %vm3084_vm8 = vcmp.eq.s32.totalorder %v16676_v12, %v8791_v22  ;;  %v12588_v18 = vadd.f32 %v7364_v50, %v12386_v54  ;;  %v16679_v23 = vld [vmem:[#allocation106_spill] sm:$0xff]  ;;  %v16680_v54 = vld [vmem:[#allocation107_spill] sm:$0xff] }
 0x3b9   : > { %16671 = vst [vmem:[#allocation48_spill] sm:$0xff] %v12523_v20  ;;  %16672 = vst [vmem:[#allocation10_spill] sm:$0xff] %v12525_v24  ;;  %v12591_v11 = vadd.f32 %v7361_v5, %v12392_v49  ;;  %vm3081_vm4 = vcmp.eq.s32.totalorder %v16678_v34, %v8233_v9  ;;  %vm3082_vm14 = vcmp.eq.s32.totalorder %v16678_v34, %v8791_v22  ;;  %v7367_v44 = vsel %vm3083_vm6, 1.0, %v16346_v61  ;;  %v16684_v5 = vld [vmem:[#allocation109_spill] sm:$0xff] }
 0x3ba   : > { %2043 = vbcast.lane.b32.xlu1 %v16662_v2, 360  ;;  %2039 = vbcast.lane.b32.xlu0 %v16662_v2, 352  ;;  %v12598_v59 = vadd.f32 %v7362_v7, %v12395_v21  ;;  %vm3087_vm5 = vcmp.eq.s32.totalorder %v16679_v23, %v8233_v9  ;;  %vm3088_vm7 = vcmp.eq.s32.totalorder %v16679_v23, %v8791_v22  ;;  %v7368_v25 = vsel %vm3084_vm8, 1.0, %v16346_v61  ;;  %v16683_v21 = vld [vmem:[#allocation108_spill] sm:$0xff] }
 0x3bb   : > { %vm3085_vm12 = vcmp.eq.s32.totalorder %v16680_v54, %v8233_v9  ;;  %vm3086_vm9 = vcmp.eq.s32.totalorder %v16680_v54, %v8791_v22  ;;  %vm3091_vm10 = vcmp.eq.s32.totalorder %v16683_v21, %v8233_v9  ;;  %v7365_v15 = vsel %vm3081_vm4, 1.0, %v16346_v61 }
 0x3bc   : > { %v12561_v56 = vpop.permute.xlu1 %1743  ;;  %v12563_v43 = vpop.permute.xlu0 %1739  ;;  %v7366_v50 = vsel %vm3082_vm14, 1.0, %v16346_v61  ;;  %vm3092_vm13 = vcmp.eq.s32.totalorder %v16683_v21, %v8791_v22  ;;  %vm3089_vm11 = vcmp.eq.s32.totalorder %v16684_v5, %v8233_v9  ;;  %v7371_v7 = vsel %vm3087_vm5, 1.0, %v16346_v61 }
 0x3bd   : > { %16674 = vst [vmem:[#allocation49_spill] sm:$0xff] %v12561_v56  ;;  %16675 = vst [vmem:[#allocation50_spill] sm:$0xff] %v12563_v43  ;;  %v7372_v12 = vsel %vm3088_vm7, 1.0, %v16346_v61  ;;  %v7369_v34 = vsel %vm3085_vm12, 1.0, %v16346_v61  ;;  %vm3090_vm15 = vcmp.eq.s32.totalorder %v16684_v5, %v8791_v22  ;;  %v12630_v23 = vadd.f32 %v7367_v44, %v12398_v55 }
 0x3be   : > { %2185 = vbcast.lane.b32.xlu1 %v16677_v47, 376  ;;  %2181 = vbcast.lane.b32.xlu0 %v16677_v47, 368  ;;  %v12633_v54 = vadd.f32 %v7368_v25, %v12401_v40  ;;  %v12642_v24 = vadd.f32 %v7365_v15, %v12404_v3  ;;  %v12645_v20 = vadd.f32 %v7366_v50, %v12417_v26  ;;  %v7376_v55 = vsel %vm3092_vm13, 1.0, %v16346_v61  ;;  %v16692_v50 = vld [vmem:[#allocation115_spill] sm:$0xff] }
 0x3bf   : > { %v7373_v40 = vsel %vm3089_vm11, 1.0, %v16346_v61  ;;  %v12656_v44 = vadd.f32 %v7371_v7, %v12453_v48  ;;  %v12659_v25 = vadd.f32 %v7372_v12, %v12456_v6  ;;  %v12662_v3 = vadd.f32 %v7369_v34, %v12459_v30  ;;  %v16687_v30 = vld [vmem:[#allocation110_spill] sm:$0xff]  ;;  %v16694_v12 = vld [vmem:[#allocation121_spill] sm:$0xff] }
 0x3c0   : > { %v12606_v49 = vpop.permute.xlu1 %1751  ;;  %v12608_v29 = vpop.permute.xlu0 %1747  ;;  %v7374_v26 = vsel %vm3090_vm15, 1.0, %v16346_v61  ;;  %vm3095_vm2 = vcmp.eq.s32.totalorder %v11413_v58, %v8233_v9  ;;  %vm3096_vm3 = vcmp.eq.s32.totalorder %v11413_v58, %v8791_v22  ;;  %v12678_v48 = vadd.f32 %v7376_v55, %v12471_v17  ;;  %v16690_v58 = vld [vmem:[#allocation116_spill] sm:$0xff]  ;;  %v16691_v17 = vld [vmem:[#allocation111_spill] sm:$0xff] }
 0x3c1   : > { %16681 = vst [vmem:[#allocation51_spill] sm:$0xff] %v12606_v49  ;;  %16682 = vst [vmem:[#allocation52_spill] sm:$0xff] %v12608_v29  ;;  %v7370_v29 = vsel %vm3086_vm9, 1.0, %v16346_v61  ;;  %v7375_v49 = vsel %vm3091_vm10, 1.0, %v16346_v61  ;;  %v12681_v6 = vadd.f32 %v7373_v40, %v12478_v19  ;;  %vm3093_vm0 = vcmp.eq.s32.totalorder %v16687_v30, %v8233_v9 }
 0x3c2   : > { %1968 = vbcast.lane.b32.xlu1 %v16656_v14, 344  ;;  %1964 = vbcast.lane.b32.xlu0 %v16656_v14, 336  ;;  %v12668_v21 = vadd.f32 %v7370_v29, %v12465_v0  ;;  %v12671_v15 = vadd.f32 %v7375_v49, %v12468_v39  ;;  %vm3094_vm1 = vcmp.eq.s32.totalorder %v16687_v30, %v8791_v22  ;;  %v7379_v19 = vsel %vm3095_vm2, 1.0, %v16346_v61 }
 0x3c3   : > { %v12692_v49 = vadd.f32 %v7374_v26, %v12481_v41  ;;  %vm3099_vm6 = vcmp.eq.s32.totalorder %v16690_v58, %v8233_v9  ;;  %vm3100_vm8 = vcmp.eq.s32.totalorder %v16690_v58, %v8791_v22  ;;  %vm3097_vm4 = vcmp.eq.s32.totalorder %v16691_v17, %v8233_v9  ;;  %v16693_v41 = vld [vmem:[#allocation120_spill] sm:$0xff] }
 0x3c4   : > { %v12637_v43 = vpop.permute.xlu1 %1759  ;;  %v12639_v56 = vpop.permute.xlu0 %1755  ;;  %v7380_v29 = vsel %vm3096_vm3, 1.0, %v16346_v61  ;;  %vm3098_vm14 = vcmp.eq.s32.totalorder %v16691_v17, %v8791_v22  ;;  %vm3107_vm5 = vcmp.eq.s32.totalorder %v16692_v50, %v8233_v9  ;;  %v7377_v5 = vsel %vm3093_vm0, 1.0, %v16346_v61 }
 0x3c5   : > { %16685 = vst [vmem:[#allocation53_spill] sm:$0xff] %v12637_v43  ;;  %16686 = vst [vmem:[#allocation54_spill] sm:$0xff] %v12639_v56  ;;  %v7378_v7 = vsel %vm3094_vm1, 1.0, %v16346_v61  ;;  %vm3108_vm7 = vcmp.eq.s32.totalorder %v16692_v50, %v8791_v22  ;;  %vm3105_vm12 = vcmp.eq.s32.totalorder %v16694_v12, %v8233_v9  ;;  %v7383_v34 = vsel %vm3099_vm6, 1.0, %v16346_v61 }
 0x3c6   : > { %2110 = vbcast.lane.b32.xlu1 %v16668_v38, 360  ;;  %2106 = vbcast.lane.b32.xlu0 %v16668_v38, 352  ;;  %v7384_v55 = vsel %vm3100_vm8, 1.0, %v16346_v61  ;;  %v7381_v40 = vsel %vm3097_vm4, 1.0, %v16346_v61  ;;  %vm3106_vm9 = vcmp.eq.s32.totalorder %v16694_v12, %v8791_v22  ;;  %v12724_v58 = vadd.f32 %v7379_v19, %v12484_v33 }
 0x3c7   : > { %v7391_v56 = vsel %vm3107_vm5, 1.0, %v16346_v61  ;;  %v7392_v33 = vsel %vm3108_vm7, 1.0, %v16346_v61  ;;  %v12748_v17 = vadd.f32 %v7383_v34, %v12541_v51  ;;  %v12751_v19 = vadd.f32 %v7384_v55, %v12544_v8  ;;  %v16697_v51 = vld [vmem:[#allocation122_spill] sm:$0xff] }
 0x3c8   : > { %v12687_v39 = vpop.permute.xlu1 %1767  ;;  %v12689_v0 = vpop.permute.xlu0 %1763  ;;  %v12764_v50 = vadd.f32 %v7391_v56, %v12557_v45  ;;  %vm3111_vm10 = vcmp.eq.s32.totalorder %v16697_v51, %v8233_v9  ;;  %vm3112_vm13 = vcmp.eq.s32.totalorder %v16697_v51, %v8791_v22  ;;  %v16701_v56 = vld [vmem:[#allocation124_spill] sm:$0xff]  ;;  %v16703_v34 = vld [vmem:[#allocation126_spill] sm:$0xff] }
 0x3c9   : > { %16688 = vst [vmem:[#allocation55_spill] sm:$0xff] %v12687_v39  ;;  %16689 = vst [vmem:[#allocation13_spill] sm:$0xff] %v12689_v0  ;;  %v12727_v0 = vadd.f32 %v7380_v29, %v12492_v16  ;;  %v7382_v39 = vsel %vm3098_vm14, 1.0, %v16346_v61  ;;  %v7389_v16 = vsel %vm3105_vm12, 1.0, %v16346_v61  ;;  %vm3115_vm2 = vcmp.eq.s32.totalorder %v16701_v56, %v8233_v9 }
 0x3ca   : > { %2252 = vbcast.lane.b32.xlu1 %v16693_v41, 376  ;;  %2248 = vbcast.lane.b32.xlu0 %v16693_v41, 368  ;;  %v12761_v29 = vadd.f32 %v7382_v39, %v12554_v42  ;;  %v16700_v42 = vld [vmem:[#allocation123_spill] sm:$0xff]  ;;  %vm3116_vm3 = vcmp.eq.s32.totalorder %v16701_v56, %v8791_v22  ;;  %v16702_v39 = vld [vmem:[#allocation125_spill] sm:$0xff]  ;;  %vm3119_vm6 = vcmp.eq.s32.totalorder %v16703_v34, %v8233_v9 }
 0x3cb   : > { %vm3109_vm11 = vcmp.eq.s32.totalorder %v16700_v42, %v8233_v9  ;;  %vm3110_vm15 = vcmp.eq.s32.totalorder %v16700_v42, %v8791_v22  ;;  %vm3113_vm0 = vcmp.eq.s32.totalorder %v16702_v39, %v8233_v9  ;;  %vm3114_vm1 = vcmp.eq.s32.totalorder %v16702_v39, %v8791_v22 }
 0x3cc   : > { %v12719_v26 = vpop.permute.xlu1 %1775  ;;  %v12721_v30 = vpop.permute.xlu0 %1771  ;;  %v7394_v12 = vsel %vm3110_vm15, 1.0, %v16346_v61  ;;  %vm3120_vm8 = vcmp.eq.s32.totalorder %v16703_v34, %v8791_v22  ;;  %v7397_v56 = vsel %vm3113_vm0, 1.0, %v16346_v61  ;;  %v7398_v39 = vsel %vm3114_vm1, 1.0, %v16346_v61 }
 0x3cd   : > { %16695 = vst [vmem:[#allocation56_spill] sm:$0xff] %v12719_v26  ;;  %16696 = vst [vmem:[#allocation57_spill] sm:$0xff] %v12721_v30  ;;  %v12738_v26 = vadd.f32 %v7377_v5, %v12501_v10  ;;  %v12741_v30 = vadd.f32 %v7378_v7, %v12510_v32  ;;  %v12754_v10 = vadd.f32 %v7381_v40, %v12547_v63  ;;  %v7390_v32 = vsel %vm3106_vm9, 1.0, %v16346_v61 }
 0x3ce   : > { %2035 = vbcast.lane.b32.xlu1 %v16662_v2, 344  ;;  %2031 = vbcast.lane.b32.xlu0 %v16662_v2, 336  ;;  %v12775_v5 = vadd.f32 %v7392_v33, %v12566_v62  ;;  %v12778_v7 = vadd.f32 %v7389_v16, %v12569_v35  ;;  %v12785_v45 = vadd.f32 %v7390_v32, %v12572_v1  ;;  %v7395_v62 = vsel %vm3111_vm10, 1.0, %v16346_v61  ;;  %v16706_v32 = vld [vmem:[#allocation127_spill] sm:$0xff] }
 0x3cf   : > { %v7396_v35 = vsel %vm3112_vm13, 1.0, %v16346_v61  ;;  %v7393_v1 = vsel %vm3109_vm11, 1.0, %v16346_v61  ;;  %v7399_v33 = vsel %vm3115_vm2, 1.0, %v16346_v61  ;;  %v7400_v16 = vsel %vm3116_vm3, 1.0, %v16346_v61 }
 0x3d0   : > { %v12770_v8 = vpop.permute.xlu1 %1783  ;;  %v12772_v63 = vpop.permute.xlu0 %1779  ;;  %vm3117_vm4 = vcmp.eq.s32.totalorder %v16706_v32, %v8233_v9  ;;  %vm3118_vm14 = vcmp.eq.s32.totalorder %v16706_v32, %v8791_v22  ;;  %v12816_v51 = vadd.f32 %v7395_v62, %v12579_v13  ;;  %v12819_v42 = vadd.f32 %v7396_v35, %v12588_v18 }
 0x3d1   : > { %16698 = vst [vmem:[#allocation58_spill] sm:$0xff] %v12770_v8  ;;  %16699 = vst [vmem:[#allocation59_spill] sm:$0xff] %v12772_v63  ;;  %v12829_v63 = vadd.f32 %v7394_v12, %v12598_v59  ;;  %v7403_v13 = vsel %vm3119_vm6, 1.0, %v16346_v61  ;;  %v7404_v18 = vsel %vm3120_vm8, 1.0, %v16346_v61  ;;  %v12840_v62 = vadd.f32 %v7399_v33, %v12630_v23  ;;  %v16710_v23 = vld [vmem:[#allocation128_spill] sm:$0xff] }
 0x3d2   : > { %2177 = vbcast.lane.b32.xlu1 %v16677_v47, 360  ;;  %2173 = vbcast.lane.b32.xlu0 %v16677_v47, 352  ;;  %v12843_v35 = vadd.f32 %v7400_v16, %v12633_v54  ;;  %v7402_v59 = vsel %vm3118_vm14, 1.0, %v16346_v61  ;;  %v12852_v32 = vadd.f32 %v7397_v56, %v12642_v24  ;;  %v12855_v34 = vadd.f32 %v7398_v39, %v12645_v20  ;;  %v16711_v16 = vld [vmem:[#allocation129_spill] sm:$0xff] }
 0x3d3   : > { %vm3123_vm5 = vcmp.eq.s32.totalorder %v16710_v23, %v8233_v9  ;;  %vm3124_vm7 = vcmp.eq.s32.totalorder %v16710_v23, %v8791_v22  ;;  %v12862_v54 = vadd.f32 %v7403_v13, %v12656_v44  ;;  %v12865_v33 = vadd.f32 %v7404_v18, %v12659_v25  ;;  %v16712_v44 = vld [vmem:[#allocation130_spill] sm:$0xff]  ;;  %v16713_v39 = vld [vmem:[#allocation117_spill] sm:$0xff]  ;;  %v16717_v23 = vld [vmem:[#allocation131_spill] sm:$0xff] }
 0x3d4   : > { %v12805_v55 = vpop.permute.xlu1 %1794  ;;  %v12807_v40 = vpop.permute.xlu0 %1790  ;;  %vm3121_vm12 = vcmp.eq.s32.totalorder %v16711_v16, %v8233_v9  ;;  %v12875_v24 = vadd.f32 %v7402_v59, %v12668_v21  ;;  %vm3122_vm9 = vcmp.eq.s32.totalorder %v16711_v16, %v8791_v22  ;;  %vm3127_vm10 = vcmp.eq.s32.totalorder %v16712_v44, %v8233_v9  ;;  %v16716_v18 = vld [vmem:[#allocation22_spill] sm:$0xff] }
 0x3d5   : > { %16704 = vst [vmem:[#allocation60_spill] sm:$0xff] %v12805_v55  ;;  %16705 = vst [vmem:[#allocation61_spill] sm:$0xff] %v12807_v40  ;;  %v16707_v40 = vld [vmem:[#allocation17_spill] sm:$0xff]  ;;  %v12826_v55 = vadd.f32 %v7393_v1, %v12591_v11  ;;  %v7401_v11 = vsel %vm3117_vm4, 1.0, %v16346_v61  ;;  %v7407_v25 = vsel %vm3123_vm5, 1.0, %v16346_v61  ;;  %v7408_v56 = vsel %vm3124_vm7, 1.0, %v16346_v61 }
 0x3d6   : > { %2319 = vbcast.lane.b32.xlu1 %v16707_v40, 376  ;;  %2315 = vbcast.lane.b32.xlu0 %v16707_v40, 368  ;;  %v12872_v20 = vadd.f32 %v7401_v11, %v12662_v3  ;;  %vm3128_vm13 = vcmp.eq.s32.totalorder %v16712_v44, %v8791_v22  ;;  %vm3125_vm11 = vcmp.eq.s32.totalorder %v16713_v39, %v8233_v9  ;;  %v7405_v13 = vsel %vm3121_vm12, 1.0, %v16346_v61 }
 0x3d7   : > { %vm3126_vm15 = vcmp.eq.s32.totalorder %v16713_v39, %v8791_v22  ;;  %vm3131_vm2 = vcmp.eq.s32.totalorder %v16716_v18, %v8233_v9  ;;  %vm3132_vm3 = vcmp.eq.s32.totalorder %v16716_v18, %v8791_v22  ;;  %v7406_v11 = vsel %vm3122_vm9, 1.0, %v16346_v61 }
 0x3d8   : > { %v12847_v1 = vpop.permute.xlu1 %1802  ;;  %v12849_v12 = vpop.permute.xlu0 %1798  ;;  %v7411_v59 = vsel %vm3127_vm10, 1.0, %v16346_v61  ;;  %vm3129_vm0 = vcmp.eq.s32.totalorder %v16717_v23, %v8233_v9  ;;  %vm3130_vm1 = vcmp.eq.s32.totalorder %v16717_v23, %v8791_v22  ;;  %v12907_v16 = vadd.f32 %v7407_v25, %v12671_v15  ;;  %v16726_v23 = vld [vmem:[#allocation28_spill] sm:$0xff] }
 0x3d9   : > { %16708 = vst [vmem:[#allocation62_spill] sm:$0xff] %v12847_v1  ;;  %16709 = vst [vmem:[#allocation63_spill] sm:$0xff] %v12849_v12  ;;  %v7412_v18 = vsel %vm3128_vm13, 1.0, %v16346_v61  ;;  %v12921_v12 = vadd.f32 %v7405_v13, %v12681_v6  ;;  %v7410_v1 = vsel %vm3126_vm15, 1.0, %v16346_v61  ;;  %v7415_v15 = vsel %vm3131_vm2, 1.0, %v16346_v61 }
 0x3da   : > { %1960 = vbcast.lane.b32.xlu1 %v16656_v14, 328  ;;  %1956 = vbcast.lane.b32.xlu0 %v16656_v14, 320  ;;  %v12931_v44 = vadd.f32 %v7406_v11, %v12692_v49  ;;  %v12934_v8 = vadd.f32 %v7411_v59, %v12724_v58  ;;  %v7413_v6 = vsel %vm3129_vm0, 1.0, %v16346_v61  ;;  %v7414_v39 = vsel %vm3130_vm1, 1.0, %v16346_v61  ;;  %v16720_v49 = vld [vmem:[#allocation25_spill] sm:$0xff] }
 0x3db   : > { %v12945_v13 = vadd.f32 %v7412_v18, %v12727_v0  ;;  %vm3139_vm6 = vcmp.eq.s32.totalorder %v16720_v49, %v8233_v9  ;;  %v12955_v58 = vadd.f32 %v7410_v1, %v12741_v30  ;;  %v12958_v11 = vadd.f32 %v7415_v15, %v12748_v17  ;;  %v16724_v1 = vld [vmem:[#allocation9_spill] sm:$0xff]  ;;  %v16727_v18 = vld [vmem:[#allocation18_spill] sm:$0xff] }
 0x3dc   : > { %v12887_v3 = vpop.permute.xlu1 %1810  ;;  %v12889_v21 = vpop.permute.xlu0 %1806  ;;  %vm3140_vm8 = vcmp.eq.s32.totalorder %v16720_v49, %v8791_v22  ;;  %v12966_v0 = vadd.f32 %v7413_v6, %v12754_v10  ;;  %vm3143_vm5 = vcmp.eq.s32.totalorder %v16724_v1, %v8233_v9  ;;  %vm3144_vm7 = vcmp.eq.s32.totalorder %v16724_v1, %v8791_v22  ;;  %v16725_v10 = vld [vmem:[#allocation27_spill] sm:$0xff]  ;;  %v16728_v6 = vld [vmem:[#allocation29_spill] sm:$0xff] }
 0x3dd   : > { %16714 = vst [vmem:[#allocation64_spill] sm:$0xff] %v12887_v3  ;;  %16715 = vst [vmem:[#allocation65_spill] sm:$0xff] %v12889_v21  ;;  %v12910_v21 = vadd.f32 %v7408_v56, %v12678_v48  ;;  %v7409_v3 = vsel %vm3125_vm11, 1.0, %v16346_v61  ;;  %v7416_v48 = vsel %vm3132_vm3, 1.0, %v16346_v61  ;;  %vm3141_vm12 = vcmp.eq.s32.totalorder %v16725_v10, %v8233_v9 }
 0x3de   : > { %2102 = vbcast.lane.b32.xlu1 %v16668_v38, 344  ;;  %2098 = vbcast.lane.b32.xlu0 %v16668_v38, 336  ;;  %v12961_v59 = vadd.f32 %v7416_v48, %v12751_v19  ;;  %v7423_v19 = vsel %vm3139_vm6, 1.0, %v16346_v61  ;;  %vm3142_vm9 = vcmp.eq.s32.totalorder %v16725_v10, %v8791_v22  ;;  %vm3147_vm10 = vcmp.eq.s32.totalorder %v16726_v23, %v8233_v9 }
 0x3df   : > { %vm3148_vm13 = vcmp.eq.s32.totalorder %v16726_v23, %v8791_v22  ;;  %vm3145_vm11 = vcmp.eq.s32.totalorder %v16728_v6, %v8233_v9  ;;  %vm3146_vm15 = vcmp.eq.s32.totalorder %v16728_v6, %v8791_v22  ;;  %v7427_v49 = vsel %vm3143_vm5, 1.0, %v16346_v61 }
 0x3e0   : > { %v12926_v25 = vpop.permute.xlu1 %1818  ;;  %v12928_v56 = vpop.permute.xlu0 %1814  ;;  %v7425_v1 = vsel %vm3141_vm12, 1.0, %v16346_v61  ;;  %v7426_v6 = vsel %vm3142_vm9, 1.0, %v16346_v61  ;;  %v7430_v10 = vsel %vm3146_vm15, 1.0, %v16346_v61 }
 0x3e1   : > { %16718 = vst [vmem:[#allocation66_spill] sm:$0xff] %v12926_v25  ;;  %16719 = vst [vmem:[#allocation67_spill] sm:$0xff] %v12928_v56  ;;  %v12948_v56 = vadd.f32 %v7409_v3, %v12738_v26  ;;  %v12969_v26 = vadd.f32 %v7414_v39, %v12761_v29  ;;  %v16721_v3 = vld [vmem:[#allocation26_spill] sm:$0xff]  ;;  %v7424_v29 = vsel %vm3140_vm8, 1.0, %v16346_v61  ;;  %v13002_v39 = vadd.f32 %v7423_v19, %v12764_v50 }
 0x3e2   : > { %2244 = vbcast.lane.b32.xlu1 %v16693_v41, 360  ;;  %2240 = vbcast.lane.b32.xlu0 %v16693_v41, 352  ;;  %vm3137_vm4 = vcmp.eq.s32.totalorder %v16721_v3, %v8233_v9  ;;  %vm3138_vm14 = vcmp.eq.s32.totalorder %v16721_v3, %v8791_v22  ;;  %v7428_v3 = vsel %vm3144_vm7, 1.0, %v16346_v61  ;;  %v13012_v25 = vadd.f32 %v7424_v29, %v12775_v5 }
 0x3e3   : > { %v7421_v15 = vsel %vm3137_vm4, 1.0, %v16346_v61  ;;  %v7422_v48 = vsel %vm3138_vm14, 1.0, %v16346_v61  ;;  %v7431_v50 = vsel %vm3147_vm10, 1.0, %v16346_v61  ;;  %v7432_v19 = vsel %vm3148_vm13, 1.0, %v16346_v61 }
 0x3e4   : > { %v12975_v30 = vpop.permute.xlu1 %1826  ;;  %v12977_v17 = vpop.permute.xlu0 %1822  ;;  %v13030_v5 = vadd.f32 %v7422_v48, %v12785_v45  ;;  %v7429_v29 = vsel %vm3145_vm11, 1.0, %v16346_v61  ;;  %v13040_v23 = vadd.f32 %v7428_v3, %v12819_v42  ;;  %v16731_v45 = vld [vmem:[#allocation30_spill] sm:$0xff]  ;;  %v13051_v48 = vadd.f32 %v7431_v50, %v12840_v62  ;;  %v16738_v50 = vld [vmem:[#allocation35_spill] sm:$0xff] }
 0x3e5   : > { %16722 = vst [vmem:[#allocation68_spill] sm:$0xff] %v12975_v30  ;;  %16723 = vst [vmem:[#allocation11_spill] sm:$0xff] %v12977_v17  ;;  %vm3151_vm2 = vcmp.eq.s32.totalorder %v16731_v45, %v8233_v9  ;;  %v13054_v43 = vadd.f32 %v7432_v19, %v12843_v35  ;;  %vm3152_vm3 = vcmp.eq.s32.totalorder %v16731_v45, %v8791_v22  ;;  %v16735_v35 = vld [vmem:[#allocation32_spill] sm:$0xff]  ;;  %v16737_v3 = vld [vmem:[#allocation34_spill] sm:$0xff] }
 0x3e6   : > { %2386 = vbcast.lane.b32.xlu1 %v16727_v18, 376  ;;  %2382 = vbcast.lane.b32.xlu0 %v16727_v18, 368  ;;  %v7435_v62 = vsel %vm3151_vm2, 1.0, %v16346_v61  ;;  %vm3155_vm6 = vcmp.eq.s32.totalorder %v16735_v35, %v8233_v9  ;;  %vm3156_vm8 = vcmp.eq.s32.totalorder %v16735_v35, %v8791_v22  ;;  %vm3159_vm5 = vcmp.eq.s32.totalorder %v16737_v3, %v8233_v9 }
 0x3e7   : > { %vm3160_vm7 = vcmp.eq.s32.totalorder %v16737_v3, %v8791_v22  ;;  %vm3157_vm12 = vcmp.eq.s32.totalorder %v16738_v50, %v8233_v9  ;;  %vm3158_vm9 = vcmp.eq.s32.totalorder %v16738_v50, %v8791_v22  ;;  %v7439_v45 = vsel %vm3155_vm6, 1.0, %v16346_v61 }
 0x3e8   : > { %v13007_v17 = vpop.permute.xlu1 %1834  ;;  %v13009_v30 = vpop.permute.xlu0 %1830  ;;  %vm3171_vm2 = vcmp.eq.s32.totalorder %v12208_v4, %v8233_v9 }
 0x3e9   : > { %16729 = vst [vmem:[#allocation69_spill] sm:$0xff] %v13007_v17  ;;  %16730 = vst [vmem:[#allocation70_spill] sm:$0xff] %v13009_v30  ;;  %v13027_v30 = vadd.f32 %v7421_v15, %v12778_v7  ;;  %v13037_v17 = vadd.f32 %v7427_v49, %v12816_v51  ;;  %v13043_v7 = vadd.f32 %v7425_v1, %v12826_v55 }
 0x3ea   : > { %2027 = vbcast.lane.b32.xlu1 %v16662_v2, 328  ;;  %2023 = vbcast.lane.b32.xlu0 %v16662_v2, 320  ;;  %v13048_v15 = vadd.f32 %v7426_v6, %v12829_v63  ;;  %v13063_v55 = vadd.f32 %v7429_v29, %v12852_v32  ;;  %v13066_v49 = vadd.f32 %v7430_v10, %v12855_v34  ;;  %v16734_v63 = vld [vmem:[#allocation31_spill] sm:$0xff]  ;;  %v16736_v32 = vld [vmem:[#allocation33_spill] sm:$0xff]  ;;  %v7436_v34 = vsel %vm3152_vm3, 1.0, %v16346_v61 }
 0x3eb   : > { %vm3149_vm0 = vcmp.eq.s32.totalorder %v16734_v63, %v8233_v9  ;;  %vm3150_vm1 = vcmp.eq.s32.totalorder %v16734_v63, %v8791_v22  ;;  %vm3153_vm4 = vcmp.eq.s32.totalorder %v16736_v32, %v8233_v9  ;;  %vm3154_vm14 = vcmp.eq.s32.totalorder %v16736_v32, %v8791_v22 }
 0x3ec   : > { %v13058_v51 = vpop.permute.xlu1 %1842  ;;  %v13060_v42 = vpop.permute.xlu0 %1838  ;;  %v7433_v1 = vsel %vm3149_vm0, 1.0, %v16346_v61  ;;  %v7434_v6 = vsel %vm3150_vm1, 1.0, %v16346_v61  ;;  %v13099_v10 = vadd.f32 %v7435_v62, %v12862_v54  ;;  %v7440_v63 = vsel %vm3156_vm8, 1.0, %v16346_v61 }
 0x3ed   : > { %16732 = vst [vmem:[#allocation71_spill] sm:$0xff] %v13058_v51  ;;  %16733 = vst [vmem:[#allocation72_spill] sm:$0xff] %v13060_v42  ;;  %v7437_v3 = vsel %vm3153_vm4, 1.0, %v16346_v61  ;;  %v7438_v54 = vsel %vm3154_vm14, 1.0, %v16346_v61  ;;  %v7443_v62 = vsel %vm3159_vm5, 1.0, %v16346_v61  ;;  %v13122_v35 = vadd.f32 %v7433_v1, %v12872_v20 }
 0x3ee   : > { %2169 = vbcast.lane.b32.xlu1 %v16677_v47, 344  ;;  %2165 = vbcast.lane.b32.xlu0 %v16677_v47, 336  ;;  %v13125_v42 = vadd.f32 %v7434_v6, %v12875_v24  ;;  %v7442_v32 = vsel %vm3158_vm9, 1.0, %v16346_v61  ;;  %v13139_v51 = vadd.f32 %v7440_v63, %v12910_v21  ;;  %v13142_v20 = vadd.f32 %v7437_v3, %v12921_v12  ;;  %v16741_v24 = vld [vmem:[#allocation36_spill] sm:$0xff] }
 0x3ef   : > { %vm3163_vm10 = vcmp.eq.s32.totalorder %v16741_v24, %v8233_v9  ;;  %v13154_v50 = vadd.f32 %v7443_v62, %v12934_v8  ;;  %vm3164_vm13 = vcmp.eq.s32.totalorder %v16741_v24, %v8791_v22  ;;  %v13165_v21 = vadd.f32 %v7442_v32, %v12955_v58  ;;  %v16747_v58 = vld [vmem:[#allocation40_spill] sm:$0xff] }
 0x3f0   : > { %v13094_v19 = vpop.permute.xlu1 %1850  ;;  %v13096_v29 = vpop.permute.xlu0 %1846  ;;  %v7447_v8 = vsel %vm3163_vm10, 1.0, %v16346_v61  ;;  %vm3172_vm3 = vcmp.eq.s32.totalorder %v12208_v4, %v8791_v22  ;;  %vm3175_vm6 = vcmp.eq.s32.totalorder %v16747_v58, %v8233_v9  ;;  %vm3176_vm8 = vcmp.eq.s32.totalorder %v16747_v58, %v8791_v22  ;;  %v16750_v4 = vld [vmem:[#allocation41_spill] sm:$0xff] }
 0x3f1   : > { %16739 = vst [vmem:[#allocation73_spill] sm:$0xff] %v13094_v19  ;;  %16740 = vst [vmem:[#allocation74_spill] sm:$0xff] %v13096_v29  ;;  %v13114_v29 = vadd.f32 %v7436_v34, %v12865_v33  ;;  %v7444_v19 = vsel %vm3160_vm7, 1.0, %v16346_v61  ;;  %v7441_v33 = vsel %vm3157_vm12, 1.0, %v16346_v61  ;;  %v13136_v34 = vadd.f32 %v7439_v45, %v12907_v16  ;;  %v16744_v45 = vld [vmem:[#allocation37_spill] sm:$0xff] }
 0x3f2   : > { %2311 = vbcast.lane.b32.xlu1 %v16707_v40, 360  ;;  %2307 = vbcast.lane.b32.xlu0 %v16707_v40, 352  ;;  %v13151_v40 = vadd.f32 %v7438_v54, %v12931_v44  ;;  %v13157_v16 = vadd.f32 %v7444_v19, %v12945_v13  ;;  %v13162_v12 = vadd.f32 %v7441_v33, %v12948_v56  ;;  %v16745_v44 = vld [vmem:[#allocation19_spill] sm:$0xff]  ;;  %v7448_v56 = vsel %vm3164_vm13, 1.0, %v16346_v61 }
 0x3f3   : > { %vm3161_vm11 = vcmp.eq.s32.totalorder %v16744_v45, %v8233_v9  ;;  %vm3162_vm15 = vcmp.eq.s32.totalorder %v16744_v45, %v8791_v22  ;;  %v16746_v13 = vld [vmem:[#allocation39_spill] sm:$0xff]  ;;  %vm3173_vm4 = vcmp.eq.s32.totalorder %v16750_v4, %v8233_v9  ;;  %vm3174_vm14 = vcmp.eq.s32.totalorder %v16750_v4, %v8791_v22 }
 0x3f4   : > { %v13146_v1 = vpop.permute.xlu1 %1861  ;;  %v13148_v6 = vpop.permute.xlu0 %1857  ;;  %vm3169_vm0 = vcmp.eq.s32.totalorder %v16746_v13, %v8233_v9  ;;  %vm3170_vm1 = vcmp.eq.s32.totalorder %v16746_v13, %v8791_v22  ;;  %v7445_v3 = vsel %vm3161_vm11, 1.0, %v16346_v61  ;;  %v13197_v54 = vadd.f32 %v7447_v8, %v12958_v11 }
 0x3f5   : > { %16742 = vst [vmem:[#allocation75_spill] sm:$0xff] %v13146_v1  ;;  %16743 = vst [vmem:[#allocation76_spill] sm:$0xff] %v13148_v6  ;;  %v7446_v62 = vsel %vm3162_vm15, 1.0, %v16346_v61  ;;  %v7455_v33 = vsel %vm3171_vm2, 1.0, %v16346_v61  ;;  %v7456_v32 = vsel %vm3172_vm3, 1.0, %v16346_v61  ;;  %v13205_v24 = vadd.f32 %v7448_v56, %v12961_v59 }
 0x3f6   : > { %2453 = vbcast.lane.b32.xlu1 %v16745_v44, 376  ;;  %2449 = vbcast.lane.b32.xlu0 %v16745_v44, 368  ;;  %v7453_v45 = vsel %vm3169_vm0, 1.0, %v16346_v61  ;;  %v7454_v11 = vsel %vm3170_vm1, 1.0, %v16346_v61  ;;  %v7459_v8 = vsel %vm3175_vm6, 1.0, %v16346_v61  ;;  %v13220_v4 = vadd.f32 %v7445_v3, %v12966_v0 }
 0x3f7   : > { %v7460_v59 = vsel %vm3176_vm8, 1.0, %v16346_v61  ;;  %v7457_v56 = vsel %vm3173_vm4, 1.0, %v16346_v61  ;;  %v7458_v6 = vsel %vm3174_vm14, 1.0, %v16346_v61  ;;  %v13230_v13 = vadd.f32 %v7446_v62, %v12969_v26 }
 0x3f8   : > { %v13185_v19 = vpop.permute.xlu1 %1869  ;;  %v13187_v63 = vpop.permute.xlu0 %1865  ;;  %v13236_v58 = vadd.f32 %v7456_v32, %v13012_v25  ;;  %vm3179_vm5 = vcmp.eq.s32.totalorder %v12288_v37, %v8233_v9  ;;  %v13241_v0 = vadd.f32 %v7453_v45, %v13027_v30  ;;  %v13244_v3 = vadd.f32 %v7454_v11, %v13030_v5 }
 0x3f9   : > { %16748 = vst [vmem:[#allocation14_spill] sm:$0xff] %v13185_v19  ;;  %16749 = vst [vmem:[#allocation77_spill] sm:$0xff] %v13187_v63  ;;  %v13233_v19 = vadd.f32 %v7455_v33, %v13002_v39  ;;  %v13252_v26 = vadd.f32 %v7460_v59, %v13040_v23  ;;  %v13255_v25 = vadd.f32 %v7457_v56, %v13043_v7  ;;  %v7463_v30 = vsel %vm3179_vm5, 1.0, %v16346_v61 }
 0x3fa   : > { %1952 = vbcast.lane.b32.xlu1 %v16656_v14, 312  ;;  %1948 = vbcast.lane.b32.xlu0 %v16656_v14, 304  ;;  %v13258_v39 = vadd.f32 %v7458_v6, %v13048_v15  ;;  %vm3180_vm7 = vcmp.eq.s32.totalorder %v12288_v37, %v8791_v22  ;;  %vm3177_vm12 = vcmp.eq.s32.totalorder %v12290_v27, %v8233_v9 }
 0x3fb   : > { %vm3178_vm9 = vcmp.eq.s32.totalorder %v12290_v27, %v8791_v22  ;;  %vm3183_vm10 = vcmp.eq.s32.totalorder %v12334_v46, %v8233_v9  ;;  %vm3184_vm13 = vcmp.eq.s32.totalorder %v12334_v46, %v8791_v22  ;;  %vm3181_vm11 = vcmp.eq.s32.totalorder %v12336_v60, %v8233_v9 }
 0x3fc   : > { %v13225_v1 = vpop.permute.xlu1 %1877  ;;  %v13227_v63 = vpop.permute.xlu0 %1873  ;;  %vm3182_vm15 = vcmp.eq.s32.totalorder %v12336_v60, %v8791_v22  ;;  %vm3187_vm2 = vcmp.eq.s32.totalorder %v12362_v53, %v8233_v9  ;;  %v7464_v37 = vsel %vm3180_vm7, 1.0, %v16346_v61  ;;  %vm3188_vm3 = vcmp.eq.s32.totalorder %v12362_v53, %v8791_v22 }
 0x3fd   : > { %16751 = vst [vmem:[#allocation78_spill] sm:$0xff] %v13227_v63  ;;  %v13247_v63 = vadd.f32 %v7459_v8, %v13037_v17  ;;  %vm3185_vm0 = vcmp.eq.s32.totalorder %v12364_v31, %v8233_v9  ;;  %vm3186_vm1 = vcmp.eq.s32.totalorder %v12364_v31, %v8791_v22  ;;  %v13291_v60 = vadd.f32 %v7463_v30, %v13051_v48 }
 0x3fe   : > { %2094 = vbcast.lane.b32.xlu1 %v16668_v38, 328  ;;  %2090 = vbcast.lane.b32.xlu0 %v16668_v38, 320  ;;  %v7461_v23 = vsel %vm3177_vm12, 1.0, %v16346_v61  ;;  %v7462_v7 = vsel %vm3178_vm9, 1.0, %v16346_v61  ;;  %v7467_v15 = vsel %vm3183_vm10, 1.0, %v16346_v61  ;;  %v7468_v6 = vsel %vm3184_vm13, 1.0, %v16346_v61 }
 0x3ff   : > { %v7465_v48 = vsel %vm3181_vm11, 1.0, %v16346_v61  ;;  %v7466_v62 = vsel %vm3182_vm15, 1.0, %v16346_v61  ;;  %v7471_v33 = vsel %vm3187_vm2, 1.0, %v16346_v61  ;;  %v13314_v27 = vadd.f32 %v7464_v37, %v13054_v43 }
 0x400   : > { %v13269_v17 = vpop.permute.xlu1 %1885  ;;  %v13271_v5 = vpop.permute.xlu0 %1881  ;;  %v7472_v46 = vsel %vm3188_vm3, 1.0, %v16346_v61  ;;  %v7469_v11 = vsel %vm3185_vm0, 1.0, %v16346_v61  ;;  %v7470_v8 = vsel %vm3186_vm1, 1.0, %v16346_v61  ;;  %v13329_v59 = vadd.f32 %v7461_v23, %v13063_v55 }
 0x401   : > { %v13332_v43 = vadd.f32 %v7462_v7, %v13066_v49  ;;  %v13335_v56 = vadd.f32 %v7467_v15, %v13099_v10  ;;  %v13340_v53 = vadd.f32 %v7468_v6, %v13114_v29  ;;  %v13343_v30 = vadd.f32 %v7465_v48, %v13122_v35 }
 0x402   : > { %2236 = vbcast.lane.b32.xlu1 %v16693_v41, 344  ;;  %2232 = vbcast.lane.b32.xlu0 %v16693_v41, 336  ;;  %v13346_v31 = vadd.f32 %v7466_v62, %v13125_v42  ;;  %v13349_v55 = vadd.f32 %v7471_v33, %v13136_v34  ;;  %v13352_v49 = vadd.f32 %v7472_v46, %v13139_v51 }
 0x403   : > { %v13355_v10 = vadd.f32 %v7469_v11, %v13142_v20  ;;  %v13358_v37 = vadd.f32 %v7470_v8, %v13151_v40  ;;  %vm3191_vm6 = vcmp.eq.s32.totalorder %v12412_v57, %v8233_v9  ;;  %vm3192_vm8 = vcmp.eq.s32.totalorder %v12412_v57, %v8791_v22  ;;  %v16753_v40 = vld [vmem:[#allocation20_spill] sm:$0xff] }
 0x404   : > { %v13309_v32 = vpop.permute.xlu1 %1893  ;;  %v13311_v45 = vpop.permute.xlu0 %1889  ;;  %vm3189_vm4 = vcmp.eq.s32.totalorder %v12414_v28, %v8233_v9  ;;  %vm3190_vm14 = vcmp.eq.s32.totalorder %v12414_v28, %v8791_v22  ;;  %vm3195_vm5 = vcmp.eq.s32.totalorder %v12443_v36, %v8233_v9  ;;  %vm3196_vm7 = vcmp.eq.s32.totalorder %v12443_v36, %v8791_v22  ;;  %v16754_v28 = vld [vmem:[#allocation48_spill] sm:$0xff]  ;;  %v16755_v36 = vld [vmem:[#allocation10_spill] sm:$0xff] }
 0x405   : > { %vm3193_vm12 = vcmp.eq.s32.totalorder %v12445_v52, %v8233_v9  ;;  %vm3194_vm9 = vcmp.eq.s32.totalorder %v12445_v52, %v8791_v22  ;;  %v7475_v57 = vsel %vm3191_vm6, 1.0, %v16346_v61  ;;  %vm3203_vm10 = vcmp.eq.s32.totalorder %v16754_v28, %v8233_v9 }
 0x406   : > { %2378 = vbcast.lane.b32.xlu1 %v16727_v18, 360  ;;  %2374 = vbcast.lane.b32.xlu0 %v16727_v18, 352  ;;  %vm3204_vm13 = vcmp.eq.s32.totalorder %v16754_v28, %v8791_v22  ;;  %vm3201_vm11 = vcmp.eq.s32.totalorder %v16755_v36, %v8233_v9  ;;  %v7476_v51 = vsel %vm3192_vm8, 1.0, %v16346_v61  ;;  %v7473_v42 = vsel %vm3189_vm4, 1.0, %v16346_v61 }
 0x407   : > { %v7474_v52 = vsel %vm3190_vm14, 1.0, %v16346_v61  ;;  %v7479_v34 = vsel %vm3195_vm5, 1.0, %v16346_v61  ;;  %v7480_v7 = vsel %vm3196_vm7, 1.0, %v16346_v61  ;;  %v7477_v15 = vsel %vm3193_vm12, 1.0, %v16346_v61 }
 0x408   : > { %v13362_v29 = vpop.permute.xlu1 %1901  ;;  %v13364_v35 = vpop.permute.xlu0 %1897  ;;  %v7478_v6 = vsel %vm3194_vm9, 1.0, %v16346_v61  ;;  %vm3202_vm15 = vcmp.eq.s32.totalorder %v16755_v36, %v8791_v22  ;;  %v13403_v48 = vadd.f32 %v7475_v57, %v13154_v50  ;;  %v7487_v62 = vsel %vm3203_vm10, 1.0, %v16346_v61 }
 0x409   : > { %16752 = vst [vmem:[#allocation79_spill] sm:$0xff] %v13364_v35  ;;  %v7488_v33 = vsel %vm3204_vm13, 1.0, %v16346_v61  ;;  %v7485_v46 = vsel %vm3201_vm11, 1.0, %v16346_v61  ;;  %v13411_v11 = vadd.f32 %v7476_v51, %v13157_v16  ;;  %v13414_v8 = vadd.f32 %v7473_v42, %v13162_v12 }
 0x40a   : > { %2520 = vbcast.lane.b32.xlu1 %v16753_v40, 376  ;;  %2516 = vbcast.lane.b32.xlu0 %v16753_v40, 368  ;;  %v13417_v28 = vadd.f32 %v7474_v52, %v13165_v21  ;;  %v13420_v50 = vadd.f32 %v7479_v34, %v13197_v54  ;;  %v13423_v57 = vadd.f32 %v7480_v7, %v13205_v24  ;;  %v7486_v16 = vsel %vm3202_vm15, 1.0, %v16346_v61  ;;  %v16764_v52 = vld [vmem:[#allocation53_spill] sm:$0xff] }
 0x40b   : > { %v13426_v36 = vadd.f32 %v7477_v15, %v13220_v4  ;;  %v13437_v21 = vadd.f32 %v7487_v62, %v13233_v19  ;;  %v13440_v54 = vadd.f32 %v7488_v33, %v13236_v58  ;;  %v13443_v24 = vadd.f32 %v7485_v46, %v13241_v0  ;;  %v16760_v4 = vld [vmem:[#allocation49_spill] sm:$0xff]  ;;  %v16762_v58 = vld [vmem:[#allocation51_spill] sm:$0xff]  ;;  %v16763_v0 = vld [vmem:[#allocation52_spill] sm:$0xff] }
 0x40c   : > { %v13393_v20 = vpop.permute.xlu1 %1909  ;;  %v13395_v23 = vpop.permute.xlu0 %1905  ;;  %vm3207_vm2 = vcmp.eq.s32.totalorder %v16760_v4, %v8233_v9  ;;  %vm3208_vm3 = vcmp.eq.s32.totalorder %v16760_v4, %v8791_v22  ;;  %v13456_v19 = vadd.f32 %v7486_v16, %v13244_v3  ;;  %vm3211_vm6 = vcmp.eq.s32.totalorder %v16762_v58, %v8233_v9  ;;  %v16767_v62 = vld [vmem:[#allocation54_spill] sm:$0xff]  ;;  %v16768_v4 = vld [vmem:[#allocation17_spill] sm:$0xff] }
 0x40d   : > { %16756 = vst [vmem:[#allocation80_spill] sm:$0xff] %v13393_v20  ;;  %16757 = vst [vmem:[#allocation81_spill] sm:$0xff] %v13395_v23  ;;  %v13429_v23 = vadd.f32 %v7478_v6, %v13230_v13  ;;  %v16761_v13 = vld [vmem:[#allocation50_spill] sm:$0xff]  ;;  %vm3212_vm8 = vcmp.eq.s32.totalorder %v16762_v58, %v8791_v22  ;;  %vm3209_vm4 = vcmp.eq.s32.totalorder %v16763_v0, %v8233_v9  ;;  %v7491_v42 = vsel %vm3207_vm2, 1.0, %v16346_v61 }
 0x40e   : > { %2019 = vbcast.lane.b32.xlu1 %v16662_v2, 312  ;;  %2015 = vbcast.lane.b32.xlu0 %v16662_v2, 304  ;;  %vm3205_vm0 = vcmp.eq.s32.totalorder %v16761_v13, %v8233_v9  ;;  %vm3206_vm1 = vcmp.eq.s32.totalorder %v16761_v13, %v8791_v22  ;;  %vm3210_vm14 = vcmp.eq.s32.totalorder %v16763_v0, %v8791_v22  ;;  %v7492_v7 = vsel %vm3208_vm3, 1.0, %v16346_v61 }
 0x40f   : > { %vm3215_vm5 = vcmp.eq.s32.totalorder %v16764_v52, %v8233_v9  ;;  %vm3216_vm7 = vcmp.eq.s32.totalorder %v16764_v52, %v8791_v22  ;;  %v7489_v15 = vsel %vm3205_vm0, 1.0, %v16346_v61  ;;  %v7490_v6 = vsel %vm3206_vm1, 1.0, %v16346_v61 }
 0x410   : > { %v13432_v51 = vpop.permute.xlu1 %1917  ;;  %v13434_v12 = vpop.permute.xlu0 %1913  ;;  %vm3213_vm12 = vcmp.eq.s32.totalorder %v16767_v62, %v8233_v9  ;;  %v7495_v33 = vsel %vm3211_vm6, 1.0, %v16346_v61  ;;  %v7496_v46 = vsel %vm3212_vm8, 1.0, %v16346_v61  ;;  %v7493_v16 = vsel %vm3209_vm4, 1.0, %v16346_v61 }
 0x411   : > { %16758 = vst [vmem:[#allocation82_spill] sm:$0xff] %v13432_v51  ;;  %16759 = vst [vmem:[#allocation83_spill] sm:$0xff] %v13434_v12  ;;  %vm3214_vm9 = vcmp.eq.s32.totalorder %v16767_v62, %v8791_v22  ;;  %v13488_v13 = vadd.f32 %v7491_v42, %v13247_v63  ;;  %v7494_v58 = vsel %vm3210_vm14, 1.0, %v16346_v61  ;;  %v13504_v12 = vadd.f32 %v7492_v7, %v13252_v26 }
 0x412   : > { %2161 = vbcast.lane.b32.xlu1 %v16677_v47, 328  ;;  %2157 = vbcast.lane.b32.xlu0 %v16677_v47, 320  ;;  %v13507_v63 = vadd.f32 %v7489_v15, %v13255_v25  ;;  %v13510_v0 = vadd.f32 %v7490_v6, %v13258_v39  ;;  %v7497_v42 = vsel %vm3213_vm12, 1.0, %v16346_v61  ;;  %v13522_v52 = vadd.f32 %v7495_v33, %v13291_v60 }
 0x413   : > { %v13525_v26 = vadd.f32 %v7496_v46, %v13314_v27  ;;  %v13528_v25 = vadd.f32 %v7493_v16, %v13329_v59  ;;  %v7498_v39 = vsel %vm3214_vm9, 1.0, %v16346_v61  ;;  %v13535_v7 = vadd.f32 %v7494_v58, %v13332_v43  ;;  %v16771_v59 = vld [vmem:[#allocation55_spill] sm:$0xff]  ;;  %v16772_v43 = vld [vmem:[#allocation13_spill] sm:$0xff] }
 0x414   : > { %v13471_v3 = vpop.permute.xlu1 %1928  ;;  %v13473_v34 = vpop.permute.xlu0 %1924  ;;  %v13546_v27 = vadd.f32 %v7497_v42, %v13343_v30  ;;  %vm3219_vm10 = vcmp.eq.s32.totalorder %v16771_v59, %v8233_v9  ;;  %vm3220_vm13 = vcmp.eq.s32.totalorder %v16771_v59, %v8791_v22  ;;  %vm3217_vm11 = vcmp.eq.s32.totalorder %v16772_v43, %v8233_v9  ;;  %v16778_v46 = vld [vmem:[#allocation59_spill] sm:$0xff]  ;;  %v16779_v16 = vld [vmem:[#allocation21_spill] sm:$0xff] }
 0x415   : > { %16765 = vst [vmem:[#allocation84_spill] sm:$0xff] %v13471_v3  ;;  %16766 = vst [vmem:[#allocation85_spill] sm:$0xff] %v13473_v34  ;;  %v7499_v34 = vsel %vm3215_vm5, 1.0, %v16346_v61  ;;  %v7500_v3 = vsel %vm3216_vm7, 1.0, %v16346_v61  ;;  %vm3218_vm15 = vcmp.eq.s32.totalorder %v16772_v43, %v8791_v22  ;;  %v7503_v6 = vsel %vm3219_vm10, 1.0, %v16346_v61 }
 0x416   : > { %2303 = vbcast.lane.b32.xlu1 %v16768_v4, 344  ;;  %2299 = vbcast.lane.b32.xlu0 %v16768_v4, 336  ;;  %v13538_v15 = vadd.f32 %v7499_v34, %v13335_v56  ;;  %v13541_v60 = vadd.f32 %v7500_v3, %v13340_v53  ;;  %v13555_v56 = vadd.f32 %v7498_v39, %v13346_v31  ;;  %v16773_v53 = vld [vmem:[#allocation56_spill] sm:$0xff]  ;;  %v16776_v34 = vld [vmem:[#allocation57_spill] sm:$0xff]  ;;  %v16777_v31 = vld [vmem:[#allocation58_spill] sm:$0xff]  ;;  %v7504_v62 = vsel %vm3220_vm13, 1.0, %v16346_v61 }
 0x417   : > { %vm3223_vm2 = vcmp.eq.s32.totalorder %v16773_v53, %v8233_v9  ;;  %vm3224_vm3 = vcmp.eq.s32.totalorder %v16773_v53, %v8791_v22  ;;  %vm3221_vm0 = vcmp.eq.s32.totalorder %v16776_v34, %v8233_v9  ;;  %vm3222_vm1 = vcmp.eq.s32.totalorder %v16776_v34, %v8791_v22 }
 0x418   : > { %v13513_v51 = vpop.permute.xlu1 %1936  ;;  %v13515_v20 = vpop.permute.xlu0 %1932  ;;  %vm3227_vm6 = vcmp.eq.s32.totalorder %v16777_v31, %v8233_v9  ;;  %vm3228_vm8 = vcmp.eq.s32.totalorder %v16777_v31, %v8791_v22  ;;  %v7501_v33 = vsel %vm3217_vm11, 1.0, %v16346_v61  ;;  %vm3225_vm4 = vcmp.eq.s32.totalorder %v16778_v46, %v8233_v9 }
 0x419   : > { %16769 = vst [vmem:[#allocation86_spill] sm:$0xff] %v13513_v51  ;;  %16770 = vst [vmem:[#allocation87_spill] sm:$0xff] %v13515_v20  ;;  %v7502_v58 = vsel %vm3218_vm15, 1.0, %v16346_v61  ;;  %v7507_v42 = vsel %vm3223_vm2, 1.0, %v16346_v61  ;;  %v7508_v39 = vsel %vm3224_vm3, 1.0, %v16346_v61  ;;  %vm3226_vm14 = vcmp.eq.s32.totalorder %v16778_v46, %v8791_v22 }
 0x41a   : > { %2445 = vbcast.lane.b32.xlu1 %v16745_v44, 360  ;;  %2441 = vbcast.lane.b32.xlu0 %v16745_v44, 352  ;;  %v7505_v59 = vsel %vm3221_vm0, 1.0, %v16346_v61  ;;  %v7506_v43 = vsel %vm3222_vm1, 1.0, %v16346_v61  ;;  %v7511_v53 = vsel %vm3227_vm6, 1.0, %v16346_v61  ;;  %v7512_v34 = vsel %vm3228_vm8, 1.0, %v16346_v61 }
 0x41b   : > { %v13596_v51 = vadd.f32 %v7503_v6, %v13349_v55  ;;  %v13609_v35 = vadd.f32 %v7502_v58, %v13358_v37  ;;  %v13615_v55 = vadd.f32 %v7508_v39, %v13411_v11  ;;  %v13624_v6 = vadd.f32 %v7506_v43, %v13417_v28 }
 0x41c   : > { %v13563_v30 = vpop.permute.xlu1 %1984  ;;  %v13565_v3 = vpop.permute.xlu0 %1980  ;;  %v13627_v37 = vadd.f32 %v7511_v53, %v13420_v50 }
 0x41d   : > { %16774 = vst [vmem:[#allocation88_spill] sm:$0xff] %v13563_v30  ;;  %16775 = vst [vmem:[#allocation89_spill] sm:$0xff] %v13565_v3  ;;  %v13599_v3 = vadd.f32 %v7504_v62, %v13352_v49  ;;  %v13602_v30 = vadd.f32 %v7501_v33, %v13355_v10  ;;  %v7510_v49 = vsel %vm3226_vm14, 1.0, %v16346_v61  ;;  %v13621_v10 = vadd.f32 %v7505_v59, %v13414_v8  ;;  %v16781_v62 = vld [vmem:[#allocation62_spill] sm:$0xff]  ;;  %v16786_v59 = vld [vmem:[#allocation67_spill] sm:$0xff] }
 0x41e   : > { %2587 = vbcast.lane.b32.xlu1 %v16779_v16, 376  ;;  %2583 = vbcast.lane.b32.xlu0 %v16779_v16, 368  ;;  %v7509_v16 = vsel %vm3225_vm4, 1.0, %v16346_v61  ;;  %vm3235_vm5 = vcmp.eq.s32.totalorder %v16781_v62, %v8233_v9  ;;  %vm3236_vm7 = vcmp.eq.s32.totalorder %v16781_v62, %v8791_v22  ;;  %v13646_v50 = vadd.f32 %v7510_v49, %v13429_v23  ;;  %v16785_v33 = vld [vmem:[#allocation66_spill] sm:$0xff] }
 0x41f   : > { %v13633_v11 = vadd.f32 %v7509_v16, %v13426_v36  ;;  %v16784_v36 = vld [vmem:[#allocation65_spill] sm:$0xff]  ;;  %vm3243_vm2 = vcmp.eq.s32.totalorder %v16785_v33, %v8233_v9  ;;  %v7519_v23 = vsel %vm3235_vm5, 1.0, %v16346_v61  ;;  %v7520_v46 = vsel %vm3236_vm7, 1.0, %v16346_v61 }
 0x420   : > { %v13591_v31 = vpop.permute.xlu1 %2051  ;;  %v13593_v20 = vpop.permute.xlu0 %2047  ;;  %vm3237_vm11 = vcmp.eq.s32.totalorder %v16784_v36, %v8233_v9  ;;  %vm3238_vm15 = vcmp.eq.s32.totalorder %v16784_v36, %v8791_v22  ;;  %vm3244_vm3 = vcmp.eq.s32.totalorder %v16785_v33, %v8791_v22  ;;  %vm3241_vm0 = vcmp.eq.s32.totalorder %v16786_v59, %v8233_v9 }
 0x421   : > { %16780 = vst [vmem:[#allocation113_spill] sm:$0xff] %v13591_v31  ;;  %v13612_v31 = vadd.f32 %v7507_v42, %v13403_v48  ;;  %v13630_v48 = vadd.f32 %v7512_v34, %v13423_v57  ;;  %v16783_v57 = vld [vmem:[#allocation64_spill] sm:$0xff]  ;;  %v7521_v34 = vsel %vm3237_vm11, 1.0, %v16346_v61  ;;  %v7522_v49 = vsel %vm3238_vm15, 1.0, %v16346_v61 }
 0x422   : > { %1944 = vbcast.lane.b32.xlu1 %v16656_v14, 296  ;;  %1940 = vbcast.lane.b32.xlu0 %v16656_v14, 288  ;;  %v16782_v14 = vld [vmem:[#allocation63_spill] sm:$0xff]  ;;  %vm3239_vm10 = vcmp.eq.s32.totalorder %v16783_v57, %v8233_v9  ;;  %vm3240_vm13 = vcmp.eq.s32.totalorder %v16783_v57, %v8791_v22  ;;  %v7527_v62 = vsel %vm3243_vm2, 1.0, %v16346_v61  ;;  %vm3242_vm1 = vcmp.eq.s32.totalorder %v16786_v59, %v8791_v22 }
 0x423   : > { %vm3233_vm12 = vcmp.eq.s32.totalorder %v16782_v14, %v8233_v9  ;;  %vm3234_vm9 = vcmp.eq.s32.totalorder %v16782_v14, %v8791_v22  ;;  %v7523_v42 = vsel %vm3239_vm10, 1.0, %v16346_v61  ;;  %v7524_v39 = vsel %vm3240_vm13, 1.0, %v16346_v61 }
 0x424   : > { %v13641_v8 = vpop.permute.xlu1 %1976  ;;  %v13643_v28 = vpop.permute.xlu0 %1972  ;;  %v7517_v16 = vsel %vm3233_vm12, 1.0, %v16346_v61  ;;  %v7518_v58 = vsel %vm3234_vm9, 1.0, %v16346_v61  ;;  %v13682_v14 = vadd.f32 %v7519_v23, %v13437_v21  ;;  %v13685_v57 = vadd.f32 %v7520_v46, %v13440_v54 }
 0x425   : > { %v13688_v36 = vadd.f32 %v7517_v16, %v13443_v24  ;;  %v7528_v33 = vsel %vm3244_vm3, 1.0, %v16346_v61  ;;  %v13700_v21 = vadd.f32 %v7524_v39, %v13504_v12  ;;  %v7525_v54 = vsel %vm3241_vm0, 1.0, %v16346_v61 }
 0x426   : > { %2086 = vbcast.lane.b32.xlu1 %v16668_v38, 312  ;;  %2082 = vbcast.lane.b32.xlu0 %v16668_v38, 304  ;;  %v13707_v24 = vadd.f32 %v7521_v34, %v13507_v63  ;;  %v13710_v23 = vadd.f32 %v7522_v49, %v13510_v0  ;;  %v13721_v16 = vadd.f32 %v7528_v33, %v13525_v26  ;;  %v16792_v63 = vld [vmem:[#allocation11_spill] sm:$0xff] }
 0x427   : > { %vm3245_vm4 = vcmp.eq.s32.totalorder %v16792_v63, %v8233_v9  ;;  %v13730_v0 = vadd.f32 %v7525_v54, %v13528_v25  ;;  %vm3246_vm14 = vcmp.eq.s32.totalorder %v16792_v63, %v8791_v22  ;;  %v16795_v34 = vld [vmem:[#allocation71_spill] sm:$0xff]  ;;  %v16798_v54 = vld [vmem:[#allocation72_spill] sm:$0xff] }
 0x428   : > { %v13672_v43 = vpop.permute.xlu1 %2118  ;;  %v13674_v53 = vpop.permute.xlu0 %2114  ;;  %v7529_v59 = vsel %vm3245_vm4, 1.0, %v16346_v61  ;;  %vm3255_vm10 = vcmp.eq.s32.totalorder %v16795_v34, %v8233_v9  ;;  %vm3256_vm13 = vcmp.eq.s32.totalorder %v16795_v34, %v8791_v22  ;;  %vm3253_vm11 = vcmp.eq.s32.totalorder %v16798_v54, %v8233_v9 }
 0x429   : > { %16787 = vst [vmem:[#allocation90_spill] sm:$0xff] %v13672_v43  ;;  %16788 = vst [vmem:[#allocation91_spill] sm:$0xff] %v13674_v53  ;;  %v13694_v53 = vadd.f32 %v7518_v58, %v13456_v19  ;;  %v13697_v43 = vadd.f32 %v7523_v42, %v13488_v13  ;;  %v13713_v19 = vadd.f32 %v7527_v62, %v13522_v52  ;;  %v7526_v13 = vsel %vm3242_vm1, 1.0, %v16346_v61  ;;  %v16791_v58 = vld [vmem:[#allocation68_spill] sm:$0xff]  ;;  %v16793_v52 = vld [vmem:[#allocation69_spill] sm:$0xff] }
 0x42a   : > { %2228 = vbcast.lane.b32.xlu1 %v16693_v41, 328  ;;  %2224 = vbcast.lane.b32.xlu0 %v16693_v41, 320  ;;  %vm3247_vm6 = vcmp.eq.s32.totalorder %v16791_v58, %v8233_v9  ;;  %vm3248_vm8 = vcmp.eq.s32.totalorder %v16791_v58, %v8791_v22  ;;  %vm3251_vm5 = vcmp.eq.s32.totalorder %v16793_v52, %v8233_v9  ;;  %v16794_v42 = vld [vmem:[#allocation70_spill] sm:$0xff]  ;;  %v7530_v62 = vsel %vm3246_vm14, 1.0, %v16346_v61 }
 0x42b   : > { %v13739_v26 = vadd.f32 %v7526_v13, %v13535_v7  ;;  %vm3252_vm7 = vcmp.eq.s32.totalorder %v16793_v52, %v8791_v22  ;;  %vm3249_vm12 = vcmp.eq.s32.totalorder %v16794_v42, %v8233_v9  ;;  %vm3250_vm9 = vcmp.eq.s32.totalorder %v16794_v42, %v8791_v22 }
 0x42c   : > { %v13716_v46 = vpop.permute.xlu1 %2043  ;;  %v13718_v12 = vpop.permute.xlu0 %2039  ;;  %v7531_v25 = vsel %vm3247_vm6, 1.0, %v16346_v61  ;;  %v7532_v39 = vsel %vm3248_vm8, 1.0, %v16346_v61  ;;  %v7535_v33 = vsel %vm3251_vm5, 1.0, %v16346_v61  ;;  %v7536_v13 = vsel %vm3252_vm7, 1.0, %v16346_v61 }
 0x42d   : > { %16789 = vst [vmem:[#allocation92_spill] sm:$0xff] %v13716_v46  ;;  %16790 = vst [vmem:[#allocation15_spill] sm:$0xff] %v13718_v12  ;;  %v7533_v58 = vsel %vm3249_vm12, 1.0, %v16346_v61  ;;  %v7534_v63 = vsel %vm3250_vm9, 1.0, %v16346_v61  ;;  %vm3254_vm15 = vcmp.eq.s32.totalorder %v16798_v54, %v8791_v22  ;;  %v13770_v52 = vadd.f32 %v7531_v25, %v13538_v15 }
 0x42e   : > { %2370 = vbcast.lane.b32.xlu1 %v16727_v18, 344  ;;  %2366 = vbcast.lane.b32.xlu0 %v16727_v18, 336  ;;  %v13773_v42 = vadd.f32 %v7532_v39, %v13541_v60  ;;  %v13783_v12 = vadd.f32 %v7530_v62, %v13555_v56  ;;  %v13786_v46 = vadd.f32 %v7535_v33, %v13596_v51  ;;  %v7540_v15 = vsel %vm3256_vm13, 1.0, %v16346_v61  ;;  %v16800_v62 = vld [vmem:[#allocation73_spill] sm:$0xff] }
 0x42f   : > { %v7537_v25 = vsel %vm3253_vm11, 1.0, %v16346_v61  ;;  %v13801_v56 = vadd.f32 %v7534_v63, %v13609_v35  ;;  %v7538_v51 = vsel %vm3254_vm15, 1.0, %v16346_v61  ;;  %vm3259_vm2 = vcmp.eq.s32.totalorder %v16800_v62, %v8233_v9  ;;  %v16806_v63 = vld [vmem:[#allocation78_spill] sm:$0xff] }
 0x430   : > { %v13752_v7 = vpop.permute.xlu1 %2185  ;;  %v13754_v49 = vpop.permute.xlu0 %2181  ;;  %vm3260_vm3 = vcmp.eq.s32.totalorder %v16800_v62, %v8791_v22  ;;  %v13817_v35 = vadd.f32 %v7540_v15, %v13615_v55  ;;  %v16803_v55 = vld [vmem:[#allocation77_spill] sm:$0xff]  ;;  %v7543_v54 = vsel %vm3259_vm2, 1.0, %v16346_v61  ;;  %vm3271_vm5 = vcmp.eq.s32.totalorder %v13225_v1, %v8233_v9 }
 0x431   : > { %16796 = vst [vmem:[#allocation93_spill] sm:$0xff] %v13752_v7  ;;  %16797 = vst [vmem:[#allocation94_spill] sm:$0xff] %v13754_v49  ;;  %v13776_v49 = vadd.f32 %v7529_v59, %v13546_v27  ;;  %v7539_v7 = vsel %vm3255_vm10, 1.0, %v16346_v61  ;;  %v13795_v27 = vadd.f32 %v7536_v13, %v13599_v3  ;;  %v13798_v59 = vadd.f32 %v7533_v58, %v13602_v30  ;;  %v16801_v3 = vld [vmem:[#allocation74_spill] sm:$0xff] }
 0x432   : > { %2512 = vbcast.lane.b32.xlu1 %v16753_v40, 360  ;;  %2508 = vbcast.lane.b32.xlu0 %v16753_v40, 352  ;;  %v13808_v34 = vadd.f32 %v7539_v7, %v13612_v31  ;;  %v13820_v30 = vadd.f32 %v7537_v25, %v13621_v10  ;;  %vm3257_vm0 = vcmp.eq.s32.totalorder %v16801_v3, %v8233_v9  ;;  %v16802_v7 = vld [vmem:[#allocation14_spill] sm:$0xff]  ;;  %v7544_v13 = vsel %vm3260_vm3, 1.0, %v16346_v61 }
 0x433   : > { %vm3258_vm1 = vcmp.eq.s32.totalorder %v16801_v3, %v8791_v22  ;;  %v13827_v31 = vadd.f32 %v7538_v51, %v13624_v6  ;;  %vm3267_vm6 = vcmp.eq.s32.totalorder %v16802_v7, %v8233_v9  ;;  %vm3268_vm8 = vcmp.eq.s32.totalorder %v16802_v7, %v8791_v22 }
 0x434   : > { %v13790_v60 = vpop.permute.xlu1 %1968  ;;  %v13792_v39 = vpop.permute.xlu0 %1964  ;;  %vm3265_vm4 = vcmp.eq.s32.totalorder %v16803_v55, %v8233_v9  ;;  %vm3266_vm14 = vcmp.eq.s32.totalorder %v16803_v55, %v8791_v22  ;;  %v7541_v6 = vsel %vm3257_vm0, 1.0, %v16346_v61  ;;  %v7542_v58 = vsel %vm3258_vm1, 1.0, %v16346_v61 }
 0x435   : > { %16799 = vst [vmem:[#allocation95_spill] sm:$0xff] %v13792_v39  ;;  %vm3272_vm7 = vcmp.eq.s32.totalorder %v13225_v1, %v8791_v22  ;;  %vm3269_vm12 = vcmp.eq.s32.totalorder %v16806_v63, %v8233_v9  ;;  %v7551_v15 = vsel %vm3267_vm6, 1.0, %v16346_v61  ;;  %v7552_v25 = vsel %vm3268_vm8, 1.0, %v16346_v61 }
 0x436   : > { %2011 = vbcast.lane.b32.xlu1 %v16662_v2, 296  ;;  %2007 = vbcast.lane.b32.xlu0 %v16662_v2, 288  ;;  %v7549_v51 = vsel %vm3265_vm4, 1.0, %v16346_v61  ;;  %vm3270_vm9 = vcmp.eq.s32.totalorder %v16806_v63, %v8791_v22  ;;  %v13859_v62 = vadd.f32 %v7543_v54, %v13627_v37  ;;  %v13862_v3 = vadd.f32 %v7544_v13, %v13630_v48 }
 0x437   : > { %v7550_v7 = vsel %vm3266_vm14, 1.0, %v16346_v61  ;;  %v7555_v55 = vsel %vm3271_vm5, 1.0, %v16346_v61  ;;  %v13871_v39 = vadd.f32 %v7541_v6, %v13633_v11  ;;  %v7556_v37 = vsel %vm3272_vm7, 1.0, %v16346_v61 }
 0x438   : > { %v13835_v10 = vpop.permute.xlu1 %2110  ;;  %v13837_v33 = vpop.permute.xlu0 %2106  ;;  %v7553_v48 = vsel %vm3269_vm12, 1.0, %v16346_v61  ;;  %v13885_v54 = vadd.f32 %v7551_v15, %v13682_v14  ;;  %v13888_v13 = vadd.f32 %v7552_v25, %v13685_v57  ;;  %v13891_v11 = vadd.f32 %v7549_v51, %v13688_v36 }
 0x439   : > { %16804 = vst [vmem:[#allocation16_spill] sm:$0xff] %v13835_v10  ;;  %16805 = vst [vmem:[#allocation96_spill] sm:$0xff] %v13837_v33  ;;  %v13897_v1 = vadd.f32 %v7550_v7, %v13694_v53  ;;  %v13900_v6 = vadd.f32 %v7555_v55, %v13697_v43  ;;  %vm3275_vm10 = vcmp.eq.s32.totalorder %v13269_v17, %v8233_v9 }
 0x43a   : > { %2153 = vbcast.lane.b32.xlu1 %v16677_v47, 312  ;;  %2149 = vbcast.lane.b32.xlu0 %v16677_v47, 304  ;;  %v13874_v47 = vadd.f32 %v7542_v58, %v13646_v50  ;;  %16807 = vst [vmem:[#allocation97_spill] sm:$0xff] %v13885_v54  ;;  %16808 = vst [vmem:[#allocation100_spill] sm:$0xff] %v13888_v13  ;;  %v7554_v50 = vsel %vm3270_vm9, 1.0, %v16346_v61  ;;  %vm3276_vm13 = vcmp.eq.s32.totalorder %v13269_v17, %v8791_v22 }
 0x43b   : > { %16809 = vst [vmem:[#allocation118_spill] sm:$0xff] %v13891_v11  ;;  %16810 = vst [vmem:[#allocation101_spill] sm:$0xff] %v13897_v1  ;;  %v13907_v14 = vadd.f32 %v7556_v37, %v13700_v21  ;;  %v13910_v57 = vadd.f32 %v7553_v48, %v13707_v24  ;;  %vm3273_vm11 = vcmp.eq.s32.totalorder %v13271_v5, %v8233_v9  ;;  %v7559_v17 = vsel %vm3275_vm10, 1.0, %v16346_v61  ;;  %v16815_v24 = vld [vmem:[#allocation79_spill] sm:$0xff] }
 0x43c   : > { %v13866_v33 = vpop.permute.xlu1 %2252  ;;  %v13868_v10 = vpop.permute.xlu0 %2248  ;;  %16811 = vst [vmem:[#allocation102_spill] sm:$0xff] %v13900_v6  ;;  %vm3274_vm15 = vcmp.eq.s32.totalorder %v13271_v5, %v8791_v22  ;;  %v13921_v36 = vadd.f32 %v7554_v50, %v13710_v23  ;;  %vm3279_vm2 = vcmp.eq.s32.totalorder %v13309_v32, %v8233_v9  ;;  %vm3280_vm3 = vcmp.eq.s32.totalorder %v13309_v32, %v8791_v22 }
 0x43d   : > { %16812 = vst [vmem:[#allocation103_spill] sm:$0xff] %v13907_v14  ;;  %16813 = vst [vmem:[#allocation104_spill] sm:$0xff] %v13910_v57  ;;  %vm3277_vm0 = vcmp.eq.s32.totalorder %v13311_v45, %v8233_v9  ;;  %v7560_v5 = vsel %vm3276_vm13, 1.0, %v16346_v61  ;;  %vm3278_vm1 = vcmp.eq.s32.totalorder %v13311_v45, %v8791_v22  ;;  %vm3283_vm6 = vcmp.eq.s32.totalorder %v13362_v29, %v8233_v9 }
 0x43e   : > { %2295 = vbcast.lane.b32.xlu1 %v16768_v4, 328  ;;  %2291 = vbcast.lane.b32.xlu0 %v16768_v4, 320  ;;  %16814 = vst [vmem:[#allocation105_spill] sm:$0xff] %v13921_v36  ;;  %v7557_v21 = vsel %vm3273_vm11, 1.0, %v16346_v61  ;;  %v7558_v32 = vsel %vm3274_vm15, 1.0, %v16346_v61  ;;  %vm3284_vm8 = vcmp.eq.s32.totalorder %v13362_v29, %v8791_v22  ;;  %vm3281_vm4 = vcmp.eq.s32.totalorder %v16815_v24, %v8233_v9  ;;  %v16827_v36 = vld [vmem:[#allocation113_spill] sm:$0xff] }
 0x43f   : > { %v7563_v23 = vsel %vm3279_vm2, 1.0, %v16346_v61  ;;  %v7564_v58 = vsel %vm3280_vm3, 1.0, %v16346_v61  ;;  %v7561_v63 = vsel %vm3277_vm0, 1.0, %v16346_v61  ;;  %vm3282_vm14 = vcmp.eq.s32.totalorder %v16815_v24, %v8791_v22 }
 0x440   : > { %v13916_v43 = vpop.permute.xlu1 %2035  ;;  %v13918_v53 = vpop.permute.xlu0 %2031  ;;  %v13953_v51 = vadd.f32 %v7559_v17, %v13713_v19  ;;  %v13956_v7 = vadd.f32 %v7560_v5, %v13721_v16  ;;  %v7562_v55 = vsel %vm3278_vm1, 1.0, %v16346_v61  ;;  %v7567_v37 = vsel %vm3283_vm6, 1.0, %v16346_v61  ;;  %v16820_v17 = vld [vmem:[#allocation21_spill] sm:$0xff] }
 0x441   : > { %v13967_v48 = vadd.f32 %v7557_v21, %v13730_v0  ;;  %v13970_v50 = vadd.f32 %v7558_v32, %v13739_v26  ;;  %v7568_v19 = vsel %vm3284_vm8, 1.0, %v16346_v61  ;;  %v7565_v16 = vsel %vm3281_vm4, 1.0, %v16346_v61 }
 0x442   : > { %2437 = vbcast.lane.b32.xlu1 %v16745_v44, 344  ;;  %2433 = vbcast.lane.b32.xlu0 %v16745_v44, 336  ;;  %16816 = vst [vmem:[#allocation106_spill] sm:$0xff] %v13953_v51  ;;  %16817 = vst [vmem:[#allocation107_spill] sm:$0xff] %v13956_v7  ;;  %v13977_v45 = vadd.f32 %v7563_v23, %v13770_v52  ;;  %v13980_v29 = vadd.f32 %v7564_v58, %v13773_v42  ;;  %v7566_v26 = vsel %vm3282_vm14, 1.0, %v16346_v61  ;;  %v16821_v52 = vld [vmem:[#allocation80_spill] sm:$0xff] }
 0x443   : > { %16818 = vst [vmem:[#allocation108_spill] sm:$0xff] %v13967_v48  ;;  %16819 = vst [vmem:[#allocation109_spill] sm:$0xff] %v13970_v50  ;;  %v13983_v0 = vadd.f32 %v7561_v63, %v13776_v49  ;;  %v13990_v5 = vadd.f32 %v7562_v55, %v13783_v12  ;;  %v13993_v21 = vadd.f32 %v7567_v37, %v13786_v46  ;;  %v16822_v12 = vld [vmem:[#allocation81_spill] sm:$0xff]  ;;  %v16823_v23 = vld [vmem:[#allocation82_spill] sm:$0xff] }
 0x444   : > { %v13948_v15 = vpop.permute.xlu1 %2177  ;;  %v13950_v25 = vpop.permute.xlu0 %2173  ;;  %vm3287_vm5 = vcmp.eq.s32.totalorder %v16821_v52, %v8233_v9  ;;  %vm3288_vm7 = vcmp.eq.s32.totalorder %v16821_v52, %v8791_v22  ;;  %v14004_v32 = vadd.f32 %v7568_v19, %v13795_v27  ;;  %v14007_v24 = vadd.f32 %v7565_v16, %v13798_v59  ;;  %v16824_v58 = vld [vmem:[#allocation83_spill] sm:$0xff]  ;;  %v16825_v55 = vld [vmem:[#allocation88_spill] sm:$0xff]  ;;  %v16826_v52 = vld [vmem:[#allocation89_spill] sm:$0xff] }
 0x445   : > { %vm3285_vm12 = vcmp.eq.s32.totalorder %v16822_v12, %v8233_v9  ;;  %vm3286_vm9 = vcmp.eq.s32.totalorder %v16822_v12, %v8791_v22  ;;  %v14014_v46 = vadd.f32 %v7566_v26, %v13801_v56  ;;  %vm3291_vm10 = vcmp.eq.s32.totalorder %v16823_v23, %v8233_v9  ;;  %v16839_v51 = vld [vmem:[#allocation16_spill] sm:$0xff] }
 0x446   : > { %2579 = vbcast.lane.b32.xlu1 %v16820_v17, 360  ;;  %2575 = vbcast.lane.b32.xlu0 %v16820_v17, 352  ;;  %vm3292_vm13 = vcmp.eq.s32.totalorder %v16823_v23, %v8791_v22  ;;  %v7571_v27 = vsel %vm3287_vm5, 1.0, %v16346_v61  ;;  %v7572_v59 = vsel %vm3288_vm7, 1.0, %v16346_v61  ;;  %vm3289_vm11 = vcmp.eq.s32.totalorder %v16824_v58, %v8233_v9 }
 0x447   : > { %vm3290_vm15 = vcmp.eq.s32.totalorder %v16824_v58, %v8791_v22  ;;  %v7569_v56 = vsel %vm3285_vm12, 1.0, %v16346_v61  ;;  %v7570_v63 = vsel %vm3286_vm9, 1.0, %v16346_v61  ;;  %vm3323_vm2 = vcmp.eq.s32.totalorder %v16825_v55, %v8233_v9 }
 0x448   : > { %v13999_v42 = vpop.permute.xlu1 %2319  ;;  %v14001_v49 = vpop.permute.xlu0 %2315  ;;  %vm3324_vm3 = vcmp.eq.s32.totalorder %v16825_v55, %v8791_v22  ;;  %v7575_v16 = vsel %vm3291_vm10, 1.0, %v16346_v61  ;;  %v7576_v26 = vsel %vm3292_vm13, 1.0, %v16346_v61  ;;  %vm3321_vm0 = vcmp.eq.s32.totalorder %v16826_v52, %v8233_v9 }
 0x449   : > { %vm3322_vm1 = vcmp.eq.s32.totalorder %v16826_v52, %v8791_v22  ;;  %v6487_v12 = vadd.f32 %v7571_v27, %v13808_v34  ;;  %v6518_v23 = vadd.f32 %v7572_v59, %v13817_v35  ;;  %v7573_v58 = vsel %vm3289_vm11, 1.0, %v16346_v61 }
 0x44a   : > { %2078 = vbcast.lane.b32.xlu1 %v16668_v38, 296  ;;  %2074 = vbcast.lane.b32.xlu0 %v16668_v38, 288  ;;  %v7574_v1 = vsel %vm3290_vm15, 1.0, %v16346_v61  ;;  %v6425_v11 = vadd.f32 %v7569_v56, %v13820_v30  ;;  %v6456_v13 = vadd.f32 %v7570_v63, %v13827_v31  ;;  %v7607_v52 = vsel %vm3323_vm2, 1.0, %v16346_v61 }
 0x44b   : > { %v7608_v34 = vsel %vm3324_vm3, 1.0, %v16346_v61  ;;  %v6611_v35 = vadd.f32 %v7575_v16, %v13859_v62  ;;  %v6642_v27 = vadd.f32 %v7576_v26, %v13862_v3  ;;  %v7605_v59 = vsel %vm3321_vm0, 1.0, %v16346_v61 }
 0x44c   : > { %v14034_v37 = vpop.permute.xlu1 %1960  ;;  %v14036_v19 = vpop.permute.xlu0 %1956  ;;  %v7606_v30 = vsel %vm3322_vm1, 1.0, %v16346_v61  ;;  %v6549_v63 = vadd.f32 %v7573_v58, %v13871_v39  ;;  %v6580_v54 = vadd.f32 %v7574_v1, %v13874_v47  ;;  %vm3355_vm6 = vcmp.eq.s32.totalorder %v16827_v36, %v8233_v9 }
 0x44d   : > { %vm3356_vm8 = vcmp.eq.s32.totalorder %v16827_v36, %v8791_v22  ;;  %v6612_v62 = vadd.f32 %v7607_v52, %v6611_v35  ;;  %v6643_v3 = vadd.f32 %v7608_v34, %v6642_v27  ;;  %vm3353_vm4 = vcmp.eq.s32.totalorder %v13593_v20, %v8233_v9  ;;  %v16829_v52 = vld [vmem:[#allocation91_spill] sm:$0xff] }
 0x44e   : > { %2220 = vbcast.lane.b32.xlu1 %v16693_v41, 312  ;;  %2216 = vbcast.lane.b32.xlu0 %v16693_v41, 304  ;;  %v6550_v55 = vadd.f32 %v7605_v59, %v6549_v63  ;;  %v6581_v16 = vadd.f32 %v7606_v30, %v6580_v54  ;;  %vm3354_vm14 = vcmp.eq.s32.totalorder %v13593_v20, %v8791_v22  ;;  %v7639_v47 = vsel %vm3355_vm6, 1.0, %v16346_v61  ;;  %v16828_v20 = vld [vmem:[#allocation90_spill] sm:$0xff] }
 0x44f   : > { %vm3319_vm5 = vcmp.eq.s32.totalorder %v13641_v8, %v8233_v9  ;;  %v7640_v39 = vsel %vm3356_vm8, 1.0, %v16346_v61  ;;  %vm3320_vm7 = vcmp.eq.s32.totalorder %v13641_v8, %v8791_v22  ;;  %vm3317_vm12 = vcmp.eq.s32.totalorder %v13643_v28, %v8233_v9 }
 0x450   : > { %v14064_v56 = vpop.permute.xlu1 %2102  ;;  %v14066_v31 = vpop.permute.xlu0 %2098  ;;  %v7637_v54 = vsel %vm3353_vm4, 1.0, %v16346_v61  ;;  %vm3318_vm9 = vcmp.eq.s32.totalorder %v13643_v28, %v8791_v22  ;;  %vm3387_vm10 = vcmp.eq.s32.totalorder %v16828_v20, %v8233_v9  ;;  %vm3388_vm13 = vcmp.eq.s32.totalorder %v16828_v20, %v8791_v22 }
 0x451   : > { %v7638_v26 = vsel %vm3354_vm14, 1.0, %v16346_v61  ;;  %v7603_v58 = vsel %vm3319_vm5, 1.0, %v16346_v61  ;;  %vm3385_vm11 = vcmp.eq.s32.totalorder %v16829_v52, %v8233_v9  ;;  %vm3386_vm15 = vcmp.eq.s32.totalorder %v16829_v52, %v8791_v22  ;;  %v16831_v52 = vld [vmem:[#allocation15_spill] sm:$0xff] }
 0x452   : > { %2362 = vbcast.lane.b32.xlu1 %v16727_v18, 328  ;;  %2358 = vbcast.lane.b32.xlu0 %v16727_v18, 320  ;;  %v6613_v34 = vadd.f32 %v7639_v47, %v6612_v62  ;;  %v6644_v35 = vadd.f32 %v7640_v39, %v6643_v3  ;;  %v7604_v27 = vsel %vm3320_vm7, 1.0, %v16346_v61  ;;  %v7601_v59 = vsel %vm3317_vm12, 1.0, %v16346_v61 }
 0x453   : > { %v6551_v30 = vadd.f32 %v7637_v54, %v6550_v55  ;;  %v7602_v63 = vsel %vm3318_vm9, 1.0, %v16346_v61  ;;  %v7671_v20 = vsel %vm3387_vm10, 1.0, %v16346_v61  ;;  %v7672_v57 = vsel %vm3388_vm13, 1.0, %v16346_v61  ;;  %v16830_v54 = vld [vmem:[#allocation92_spill] sm:$0xff] }
 0x454   : > { %v14088_v1 = vpop.permute.xlu1 %2244  ;;  %v14090_v36 = vpop.permute.xlu0 %2240  ;;  %v6582_v3 = vadd.f32 %v7638_v26, %v6581_v16  ;;  %v6488_v47 = vadd.f32 %v7603_v58, %v6487_v12  ;;  %v7669_v8 = vsel %vm3385_vm11, 1.0, %v16346_v61  ;;  %v7670_v28 = vsel %vm3386_vm15, 1.0, %v16346_v61 }
 0x455   : > { %v6519_v55 = vadd.f32 %v7604_v27, %v6518_v23  ;;  %v6426_v39 = vadd.f32 %v7601_v59, %v6425_v11  ;;  %vm3351_vm2 = vcmp.eq.s32.totalorder %v16830_v54, %v8233_v9  ;;  %v6457_v12 = vadd.f32 %v7602_v63, %v6456_v13  ;;  %v16832_v13 = vld [vmem:[#allocation93_spill] sm:$0xff]  ;;  %v16835_v63 = vld [vmem:[#allocation95_spill] sm:$0xff] }
 0x456   : > { %2504 = vbcast.lane.b32.xlu1 %v16753_v40, 344  ;;  %2500 = vbcast.lane.b32.xlu0 %v16753_v40, 336  ;;  %v6614_v16 = vadd.f32 %v7671_v20, %v6613_v34  ;;  %v6645_v26 = vadd.f32 %v7672_v57, %v6644_v35  ;;  %vm3352_vm3 = vcmp.eq.s32.totalorder %v16830_v54, %v8791_v22  ;;  %v7635_v27 = vsel %vm3351_vm2, 1.0, %v16346_v61  ;;  %v16833_v57 = vld [vmem:[#allocation94_spill] sm:$0xff]  ;;  %v16834_v35 = vld [vmem:[#allocation119_spill] sm:$0xff] }
 0x457   : > { %v6552_v58 = vadd.f32 %v7669_v8, %v6551_v30  ;;  %v6583_v6 = vadd.f32 %v7670_v28, %v6582_v3  ;;  %vm3349_vm0 = vcmp.eq.s32.totalorder %v16831_v52, %v8233_v9  ;;  %vm3350_vm1 = vcmp.eq.s32.totalorder %v16831_v52, %v8791_v22 }
 0x458   : > { %v14118_v14 = vpop.permute.xlu1 %2386  ;;  %v14120_v62 = vpop.permute.xlu0 %2382  ;;  %vm3419_vm6 = vcmp.eq.s32.totalorder %v16832_v13, %v8233_v9  ;;  %vm3420_vm8 = vcmp.eq.s32.totalorder %v16832_v13, %v8791_v22  ;;  %vm3417_vm4 = vcmp.eq.s32.totalorder %v16833_v57, %v8233_v9  ;;  %v7636_v34 = vsel %vm3352_vm3, 1.0, %v16346_v61 }
 0x459   : > { %vm3418_vm14 = vcmp.eq.s32.totalorder %v16833_v57, %v8791_v22  ;;  %vm3315_vm5 = vcmp.eq.s32.totalorder %v13790_v60, %v8233_v9  ;;  %vm3316_vm7 = vcmp.eq.s32.totalorder %v13790_v60, %v8791_v22  ;;  %v7633_v59 = vsel %vm3349_vm0, 1.0, %v16346_v61  ;;  %v16838_v57 = vld [vmem:[#allocation98_spill] sm:$0xff] }
 0x45a   : > { %2003 = vbcast.lane.b32.xlu1 %v16662_v2, 280  ;;  %1999 = vbcast.lane.b32.xlu0 %v16662_v2, 272  ;;  %v7634_v30 = vsel %vm3350_vm1, 1.0, %v16346_v61  ;;  %vm3313_vm12 = vcmp.eq.s32.totalorder %v16835_v63, %v8233_v9  ;;  %vm3314_vm9 = vcmp.eq.s32.totalorder %v16835_v63, %v8791_v22  ;;  %v6489_v20 = vadd.f32 %v7635_v27, %v6488_v47 }
 0x45b   : > { %v7703_v3 = vsel %vm3419_vm6, 1.0, %v16346_v61  ;;  %v7704_v8 = vsel %vm3420_vm8, 1.0, %v16346_v61  ;;  %v7701_v28 = vsel %vm3417_vm4, 1.0, %v16346_v61  ;;  %v6520_v13 = vadd.f32 %v7636_v34, %v6519_v55 }
 0x45c   : > { %v14140_v11 = vpop.permute.xlu1 %2027  ;;  %v14142_v23 = vpop.permute.xlu0 %2023  ;;  %v7702_v50 = vsel %vm3418_vm14, 1.0, %v16346_v61  ;;  %v7599_v47 = vsel %vm3315_vm5, 1.0, %v16346_v61  ;;  %v7600_v27 = vsel %vm3316_vm7, 1.0, %v16346_v61  ;;  %v6427_v63 = vadd.f32 %v7633_v59, %v6426_v39 }
 0x45d   : > { %v7598_v55 = vsel %vm3314_vm9, 1.0, %v16346_v61  ;;  %vm3071_vm10 = vcmp.eq.s32.totalorder %v16838_v57, %v8233_v9  ;;  %v6615_v34 = vadd.f32 %v7703_v3, %v6614_v16  ;;  %v6646_v48 = vadd.f32 %v7704_v8, %v6645_v26  ;;  %v16840_v26 = vld [vmem:[#allocation96_spill] sm:$0xff] }
 0x45e   : > { %2145 = vbcast.lane.b32.xlu1 %v16834_v35, 296  ;;  %2141 = vbcast.lane.b32.xlu0 %v16834_v35, 288  ;;  %v6553_v7 = vadd.f32 %v7701_v28, %v6552_v58  ;;  %vm3383_vm13 = vcmp.eq.s32.totalorder %v16839_v51, %v8233_v9  ;;  %v6584_v60 = vadd.f32 %v7702_v50, %v6583_v6 }
 0x45f   : > { %v6364_v39 = vadd.f32 %v7599_v47, %v13993_v21  ;;  %vm3384_vm11 = vcmp.eq.s32.totalorder %v16839_v51, %v8791_v22  ;;  %v6333_v16 = vadd.f32 %v7598_v55, %v14014_v46  ;;  %vm3381_vm15 = vcmp.eq.s32.totalorder %v16840_v26, %v8233_v9 }
 0x460   : > { %v14169_v54 = vpop.permute.xlu1 %2169  ;;  %v14171_v52 = vpop.permute.xlu0 %2165  ;;  %vm3382_vm2 = vcmp.eq.s32.totalorder %v16840_v26, %v8791_v22  ;;  %v7667_v6 = vsel %vm3383_vm13, 1.0, %v16346_v61  ;;  %vm3451_vm3 = vcmp.eq.s32.totalorder %v13866_v33, %v8233_v9  ;;  %vm3452_vm0 = vcmp.eq.s32.totalorder %v13866_v33, %v8791_v22 }
 0x461   : > { %16836 = vst [vmem:[#allocation110_spill] sm:$0xff] %v14169_v54  ;;  %16837 = vst [vmem:[#allocation116_spill] sm:$0xff] %v14171_v52  ;;  %v6458_v54 = vadd.f32 %v7634_v30, %v6457_v12  ;;  %v7597_v52 = vsel %vm3313_vm12, 1.0, %v16346_v61  ;;  %v6395_v12 = vadd.f32 %v7600_v27, %v14004_v32  ;;  %vm3449_vm1 = vcmp.eq.s32.totalorder %v13868_v10, %v8233_v9 }
 0x462   : > { %2287 = vbcast.lane.b32.xlu1 %v16768_v4, 312  ;;  %2283 = vbcast.lane.b32.xlu0 %v16768_v4, 304  ;;  %v6302_v4 = vadd.f32 %v7597_v52, %v14007_v24  ;;  %v7668_v51 = vsel %vm3384_vm11, 1.0, %v16346_v61  ;;  %vm3450_vm6 = vcmp.eq.s32.totalorder %v13868_v10, %v8791_v22  ;;  %vm3347_vm8 = vcmp.eq.s32.totalorder %v13916_v43, %v8233_v9 }
 0x463   : > { %vm3348_vm4 = vcmp.eq.s32.totalorder %v13916_v43, %v8791_v22  ;;  %v7665_v50 = vsel %vm3381_vm15, 1.0, %v16346_v61  ;;  %v7666_v21 = vsel %vm3382_vm2, 1.0, %v16346_v61  ;;  %vm3345_vm14 = vcmp.eq.s32.totalorder %v13918_v53, %v8233_v9 }
 0x464   : > { %v14197_v59 = vpop.permute.xlu1 %2311  ;;  %v14199_v30 = vpop.permute.xlu0 %2307  ;;  %vm3346_vm5 = vcmp.eq.s32.totalorder %v13918_v53, %v8791_v22  ;;  %v6490_v46 = vadd.f32 %v7667_v6, %v6489_v20  ;;  %v7735_v43 = vsel %vm3451_vm3, 1.0, %v16346_v61  ;;  %v7736_v58 = vsel %vm3452_vm0, 1.0, %v16346_v61 }
 0x465   : > { %v7733_v3 = vsel %vm3449_vm1, 1.0, %v16346_v61  ;;  %v6521_v8 = vadd.f32 %v7668_v51, %v6520_v13  ;;  %v7734_v28 = vsel %vm3450_vm6, 1.0, %v16346_v61  ;;  %v7631_v20 = vsel %vm3347_vm8, 1.0, %v16346_v61 }
 0x466   : > { %2429 = vbcast.lane.b32.xlu1 %v16745_v44, 328  ;;  %2425 = vbcast.lane.b32.xlu0 %v16745_v44, 320  ;;  %v7632_v52 = vsel %vm3348_vm4, 1.0, %v16346_v61  ;;  %vm3072_vm7 = vcmp.eq.s32.totalorder %v16838_v57, %v8791_v22  ;;  %v6428_v33 = vadd.f32 %v7665_v50, %v6427_v63  ;;  %v6459_v47 = vadd.f32 %v7666_v21, %v6458_v54  ;;  %v16842_v21 = vld [vmem:[#allocation99_spill] sm:$0xff] }
 0x467   : > { %v7629_v10 = vsel %vm3345_vm14, 1.0, %v16346_v61  ;;  %v7630_v13 = vsel %vm3346_vm5, 1.0, %v16346_v61  ;;  %v6616_v27 = vadd.f32 %v7735_v43, %v6615_v34  ;;  %v6647_v55 = vadd.f32 %v7736_v58, %v6646_v48 }
 0x468   : > { %v14229_v32 = vpop.permute.xlu1 %2453  ;;  %v14231_v24 = vpop.permute.xlu0 %2449  ;;  %v6554_v26 = vadd.f32 %v7733_v3, %v6553_v7  ;;  %vm3415_vm12 = vcmp.eq.s32.totalorder %v13948_v15, %v8233_v9  ;;  %v6585_v54 = vadd.f32 %v7734_v28, %v6584_v60  ;;  %v14266_v51 = vadd.f32 %v7631_v20, %v6364_v39 }
 0x469   : > { %v14268_v50 = vadd.f32 %v7632_v52, %v6395_v12  ;;  %vm3416_vm9 = vcmp.eq.s32.totalorder %v13948_v15, %v8791_v22  ;;  %v14276_v53 = vsel %vm3071_vm10, 1.0, %v16346_v61  ;;  %v14278_v7 = vadd.f32 %v7629_v10, %v6302_v4 }
 0x46a   : > { %2571 = vbcast.lane.b32.xlu1 %v16820_v17, 344  ;;  %2567 = vbcast.lane.b32.xlu0 %v16820_v17, 336  ;;  %16841 = vst [vmem:[#allocation111_spill] sm:$0xff] %v14276_v53  ;;  %v14280_v48 = vadd.f32 %v7630_v13, %v6333_v16  ;;  %vm3413_vm13 = vcmp.eq.s32.totalorder %v13950_v25, %v8233_v9  ;;  %v7699_v34 = vsel %vm3415_vm12, 1.0, %v16346_v61  ;;  %v7700_v4 = vsel %vm3416_vm9, 1.0, %v16346_v61 }
 0x46b   : > { %vm3414_vm11 = vcmp.eq.s32.totalorder %v13950_v25, %v8791_v22  ;;  %vm3483_vm10 = vcmp.eq.s32.totalorder %v13999_v42, %v8233_v9  ;;  %vm3484_vm15 = vcmp.eq.s32.totalorder %v13999_v42, %v8791_v22  ;;  %vm3481_vm2 = vcmp.eq.s32.totalorder %v14001_v49, %v8233_v9 }
 0x46c   : > { %v14262_v6 = vpop.permute.xlu1 %1952  ;;  %v14264_v63 = vpop.permute.xlu0 %1948  ;;  %vm3482_vm3 = vcmp.eq.s32.totalorder %v14001_v49, %v8791_v22  ;;  %vm3311_vm0 = vcmp.eq.s32.totalorder %v14034_v37, %v8233_v9  ;;  %v7697_v60 = vsel %vm3413_vm13, 1.0, %v16346_v61  ;;  %vm3312_vm1 = vcmp.eq.s32.totalorder %v14034_v37, %v8791_v22 }
 0x46d   : > { %vm3309_vm6 = vcmp.eq.s32.totalorder %v14036_v19, %v8233_v9  ;;  %vm3310_vm8 = vcmp.eq.s32.totalorder %v14036_v19, %v8791_v22  ;;  %v14311_v42 = vadd.f32 %v7699_v34, %v6490_v46  ;;  %v7698_v39 = vsel %vm3414_vm11, 1.0, %v16346_v61 }
 0x46e   : > { %2070 = vbcast.lane.b32.xlu1 %v16668_v38, 280  ;;  %2066 = vbcast.lane.b32.xlu0 %v16668_v38, 272  ;;  %v7767_v12 = vsel %vm3483_vm10, 1.0, %v16346_v61  ;;  %v7768_v16 = vsel %vm3484_vm15, 1.0, %v16346_v61  ;;  %vm3069_vm4 = vcmp.eq.s32.totalorder %v16842_v21, %v8233_v9  ;;  %v6522_v43 = vadd.f32 %v7700_v4, %v6521_v8 }
 0x46f   : > { %v7765_v19 = vsel %vm3481_vm2, 1.0, %v16346_v61  ;;  %v7766_v46 = vsel %vm3482_vm3, 1.0, %v16346_v61  ;;  %v7595_v58 = vsel %vm3311_vm0, 1.0, %v16346_v61  ;;  %v6429_v3 = vadd.f32 %v7697_v60, %v6428_v33 }
 0x470   : > { %v14300_v15 = vpop.permute.xlu1 %2094  ;;  %v14302_v25 = vpop.permute.xlu0 %2090  ;;  %v7596_v28 = vsel %vm3312_vm1, 1.0, %v16346_v61  ;;  %v7593_v8 = vsel %vm3309_vm6, 1.0, %v16346_v61  ;;  %v7594_v20 = vsel %vm3310_vm8, 1.0, %v16346_v61  ;;  %v6460_v13 = vadd.f32 %v7698_v39, %v6459_v47 }
 0x471   : > { %v6617_v34 = vadd.f32 %v7767_v12, %v6616_v27  ;;  %v6648_v49 = vadd.f32 %v7768_v16, %v6647_v55  ;;  %vm3379_vm14 = vcmp.eq.s32.totalorder %v14064_v56, %v8233_v9  ;;  %v14345_v37 = vsel %vm3072_vm7, 1.0, %v16346_v61 }
 0x472   : > { %2212 = vbcast.lane.b32.xlu1 %v16693_v41, 296  ;;  %2208 = vbcast.lane.b32.xlu0 %v16693_v41, 288  ;;  %16843 = vst [vmem:[#allocation115_spill] sm:$0xff] %v14345_v37  ;;  %v6555_v33 = vadd.f32 %v7765_v19, %v6554_v26  ;;  %v6586_v4 = vadd.f32 %v7766_v46, %v6585_v54 }
 0x473   : > { %v14348_v60 = vadd.f32 %v7595_v58, %v13977_v45  ;;  %vm3070_vm5 = vcmp.eq.s32.totalorder %v16842_v21, %v8791_v22  ;;  %v14355_v47 = vadd.f32 %v7596_v28, %v13980_v29  ;;  %v14358_v27 = vadd.f32 %v7593_v8, %v13983_v0 }
 0x474   : > { %v14335_v52 = vpop.permute.xlu1 %2236  ;;  %v14337_v10 = vpop.permute.xlu0 %2232  ;;  %v14361_v57 = vadd.f32 %v7594_v20, %v13990_v5  ;;  %vm3380_vm7 = vcmp.eq.s32.totalorder %v14064_v56, %v8791_v22  ;;  %v7663_v45 = vsel %vm3379_vm14, 1.0, %v16346_v61  ;;  %vm3377_vm12 = vcmp.eq.s32.totalorder %v14066_v31, %v8233_v9 }
 0x475   : > { %vm3378_vm9 = vcmp.eq.s32.totalorder %v14066_v31, %v8791_v22  ;;  %vm3447_vm13 = vcmp.eq.s32.totalorder %v14088_v1, %v8233_v9  ;;  %vm3448_vm11 = vcmp.eq.s32.totalorder %v14088_v1, %v8791_v22  ;;  %vm3445_vm10 = vcmp.eq.s32.totalorder %v14090_v36, %v8233_v9 }
 0x476   : > { %2354 = vbcast.lane.b32.xlu1 %v16727_v18, 312  ;;  %2350 = vbcast.lane.b32.xlu0 %v16727_v18, 304  ;;  %vm3446_vm15 = vcmp.eq.s32.totalorder %v14090_v36, %v8791_v22  ;;  %vm3515_vm2 = vcmp.eq.s32.totalorder %v14118_v14, %v8233_v9  ;;  %v7664_v5 = vsel %vm3380_vm7, 1.0, %v16346_v61  ;;  %vm3516_vm3 = vcmp.eq.s32.totalorder %v14118_v14, %v8791_v22 }
 0x477   : > { %vm3513_vm0 = vcmp.eq.s32.totalorder %v14120_v62, %v8233_v9  ;;  %vm3514_vm1 = vcmp.eq.s32.totalorder %v14120_v62, %v8791_v22  ;;  %v14394_v56 = vadd.f32 %v7663_v45, %v14266_v51  ;;  %v7661_v36 = vsel %vm3377_vm12, 1.0, %v16346_v61  ;;  %v16845_v62 = vld [vmem:[#allocation112_spill] sm:$0xff] }
 0x478   : > { %v14372_v29 = vpop.permute.xlu1 %2378  ;;  %v14374_v0 = vpop.permute.xlu0 %2374  ;;  %v7662_v55 = vsel %vm3378_vm9, 1.0, %v16346_v61  ;;  %v7731_v26 = vsel %vm3447_vm13, 1.0, %v16346_v61  ;;  %v7732_v54 = vsel %vm3448_vm11, 1.0, %v16346_v61  ;;  %v7729_v51 = vsel %vm3445_vm10, 1.0, %v16346_v61 }
 0x479   : > { %v7730_v39 = vsel %vm3446_vm15, 1.0, %v16346_v61  ;;  %v7799_v12 = vsel %vm3515_vm2, 1.0, %v16346_v61  ;;  %v14417_v31 = vadd.f32 %v7664_v5, %v14268_v50  ;;  %v7800_v1 = vsel %vm3516_vm3, 1.0, %v16346_v61 }
 0x47a   : > { %2496 = vbcast.lane.b32.xlu1 %v16753_v40, 328  ;;  %2492 = vbcast.lane.b32.xlu0 %v16753_v40, 320  ;;  %v7797_v46 = vsel %vm3513_vm0, 1.0, %v16346_v61  ;;  %v7798_v58 = vsel %vm3514_vm1, 1.0, %v16346_v61  ;;  %v14435_v50 = vsel %vm3069_vm4, 1.0, %v16346_v61  ;;  %v14438_v28 = vadd.f32 %v7661_v36, %v14278_v7 }
 0x47b   : > { %16844 = vst [vmem:[#allocation120_spill] sm:$0xff] %v14435_v50  ;;  %v14441_v14 = vadd.f32 %v7662_v55, %v14280_v48  ;;  %v6492_v8 = vadd.f32 %v7731_v26, %v14311_v42  ;;  %vm3103_vm6 = vcmp.eq.s32.totalorder %v16845_v62, %v8233_v9  ;;  %v6523_v20 = vadd.f32 %v7732_v54, %v6522_v43  ;;  %v16847_v55 = vld [vmem:[#allocation17_spill] sm:$0xff] }
 0x47c   : > { %v14412_v16 = vpop.permute.xlu1 %2520  ;;  %v14414_v19 = vpop.permute.xlu0 %2516  ;;  %v6430_v45 = vadd.f32 %v7729_v51, %v6429_v3  ;;  %v6461_v5 = vadd.f32 %v7730_v39, %v6460_v13  ;;  %v6618_v37 = vadd.f32 %v7799_v12, %v6617_v34  ;;  %v6649_v50 = vadd.f32 %v7800_v1, %v6648_v49 }
 0x47d   : > { %v6556_v53 = vadd.f32 %v7797_v46, %v6555_v33  ;;  %v6587_v7 = vadd.f32 %v7798_v58, %v6586_v4  ;;  %vm3343_vm8 = vcmp.eq.s32.totalorder %v14140_v11, %v8233_v9  ;;  %vm3344_vm4 = vcmp.eq.s32.totalorder %v14140_v11, %v8791_v22 }
 0x47e   : > { %1995 = vbcast.lane.b32.xlu1 %v16662_v2, 264  ;;  %1991 = vbcast.lane.b32.xlu0 %v16662_v2, 256  ;;  %vm3341_vm14 = vcmp.eq.s32.totalorder %v14142_v23, %v8233_v9  ;;  %vm3342_vm7 = vcmp.eq.s32.totalorder %v14142_v23, %v8791_v22  ;;  %vm3479_vm12 = vcmp.eq.s32.totalorder %v14197_v59, %v8233_v9  ;;  %v14466_v2 = vsel %vm3070_vm5, 1.0, %v16346_v61 }
 0x47f   : > { %16846 = vst [vmem:[#allocation121_spill] sm:$0xff] %v14466_v2  ;;  %vm3480_vm9 = vcmp.eq.s32.totalorder %v14197_v59, %v8791_v22  ;;  %vm3477_vm13 = vcmp.eq.s32.totalorder %v14199_v30, %v8233_v9  ;;  %vm3478_vm11 = vcmp.eq.s32.totalorder %v14199_v30, %v8791_v22  ;;  %v7627_v11 = vsel %vm3343_vm8, 1.0, %v16346_v61 }
 0x480   : > { %v14450_v48 = vpop.permute.xlu1 %2019  ;;  %v14452_v42 = vpop.permute.xlu0 %2015  ;;  %vm3547_vm10 = vcmp.eq.s32.totalorder %v14229_v32, %v8233_v9  ;;  %vm3548_vm5 = vcmp.eq.s32.totalorder %v14229_v32, %v8791_v22  ;;  %vm3545_vm15 = vcmp.eq.s32.totalorder %v14231_v24, %v8233_v9  ;;  %v7628_v23 = vsel %vm3344_vm4, 1.0, %v16346_v61 }
 0x481   : > { %v7625_v59 = vsel %vm3341_vm14, 1.0, %v16346_v61  ;;  %v7626_v30 = vsel %vm3342_vm7, 1.0, %v16346_v61  ;;  %v7763_v21 = vsel %vm3479_vm12, 1.0, %v16346_v61  ;;  %v7764_v13 = vsel %vm3480_vm9, 1.0, %v16346_v61 }
 0x482   : > { %2137 = vbcast.lane.b32.xlu1 %v16834_v35, 280  ;;  %2133 = vbcast.lane.b32.xlu0 %v16834_v35, 272  ;;  %v7761_v34 = vsel %vm3477_vm13, 1.0, %v16346_v61  ;;  %v7762_v32 = vsel %vm3478_vm11, 1.0, %v16346_v61  ;;  %vm3546_vm2 = vcmp.eq.s32.totalorder %v14231_v24, %v8791_v22  ;;  %v14497_v49 = vadd.f32 %v7627_v11, %v14348_v60 }
 0x483   : > { %v7831_v33 = vsel %vm3547_vm10, 1.0, %v16346_v61  ;;  %v7832_v4 = vsel %vm3548_vm5, 1.0, %v16346_v61  ;;  %v7829_v36 = vsel %vm3545_vm15, 1.0, %v16346_v61  ;;  %v14505_v26 = vadd.f32 %v7628_v23, %v14355_v47 }
 0x484   : > { %v14487_v43 = vpop.permute.xlu1 %2161  ;;  %v14489_v3 = vpop.permute.xlu0 %2157  ;;  %v14508_v54 = vadd.f32 %v7625_v59, %v14358_v27  ;;  %v14511_v24 = vadd.f32 %v7626_v30, %v14361_v57  ;;  %v14513_v60 = vadd.f32 %v7763_v21, %v6492_v8  ;;  %v14515_v51 = vadd.f32 %v7764_v13, %v6523_v20 }
 0x485   : > { %v14517_v39 = vadd.f32 %v7761_v34, %v6430_v45  ;;  %v14519_v12 = vadd.f32 %v7762_v32, %v6461_v5  ;;  %v7830_v1 = vsel %vm3546_vm2, 1.0, %v16346_v61  ;;  %v6619_v58 = vadd.f32 %v7831_v33, %v6618_v37 }
 0x486   : > { %2279 = vbcast.lane.b32.xlu1 %v16847_v55, 296  ;;  %2275 = vbcast.lane.b32.xlu0 %v16847_v55, 288  ;;  %v6650_v27 = vadd.f32 %v7832_v4, %v6649_v50  ;;  %v6557_v11 = vadd.f32 %v7829_v36, %v6556_v53  ;;  %vm3579_vm3 = vcmp.eq.s32.totalorder %v14412_v16, %v8233_v9  ;;  %v14532_v57 = vsel %vm3103_vm6, 1.0, %v16346_v61 }
 0x487   : > { %16850 = vst [vmem:[#allocation124_spill] sm:$0xff] %v14532_v57  ;;  %vm3580_vm0 = vcmp.eq.s32.totalorder %v14412_v16, %v8791_v22  ;;  %vm3577_vm1 = vcmp.eq.s32.totalorder %v14414_v19, %v8233_v9  ;;  %vm3578_vm8 = vcmp.eq.s32.totalorder %v14414_v19, %v8791_v22  ;;  %vm3104_vm4 = vcmp.eq.s32.totalorder %v16845_v62, %v8791_v22 }
 0x488   : > { %v14522_v46 = vpop.permute.xlu1 %2303  ;;  %v14524_v47 = vpop.permute.xlu0 %2299  ;;  %vm3307_vm6 = vcmp.eq.s32.totalorder %v14262_v6, %v8233_v9  ;;  %vm3308_vm14 = vcmp.eq.s32.totalorder %v14262_v6, %v8791_v22  ;;  %vm3305_vm7 = vcmp.eq.s32.totalorder %v14264_v63, %v8233_v9  ;;  %vm3306_vm12 = vcmp.eq.s32.totalorder %v14264_v63, %v8791_v22 }
 0x489   : > { %16848 = vst [vmem:[#allocation122_spill] sm:$0xff] %v14522_v46  ;;  %16849 = vst [vmem:[#allocation123_spill] sm:$0xff] %v14524_v47  ;;  %v6588_v53 = vadd.f32 %v7830_v1, %v6587_v7  ;;  %vm3375_vm9 = vcmp.eq.s32.totalorder %v14300_v15, %v8233_v9  ;;  %vm3376_vm13 = vcmp.eq.s32.totalorder %v14300_v15, %v8791_v22  ;;  %v7863_v6 = vsel %vm3579_vm3, 1.0, %v16346_v61 }
 0x48a   : > { %2421 = vbcast.lane.b32.xlu1 %v16745_v44, 312  ;;  %2417 = vbcast.lane.b32.xlu0 %v16745_v44, 304  ;;  %vm3373_vm11 = vcmp.eq.s32.totalorder %v14302_v25, %v8233_v9  ;;  %v7864_v63 = vsel %vm3580_vm0, 1.0, %v16346_v61  ;;  %v7861_v15 = vsel %vm3577_vm1, 1.0, %v16346_v61  ;;  %v7862_v8 = vsel %vm3578_vm8, 1.0, %v16346_v61 }
 0x48b   : > { %v7591_v20 = vsel %vm3307_vm6, 1.0, %v16346_v61  ;;  %v7592_v45 = vsel %vm3308_vm14, 1.0, %v16346_v61  ;;  %v7589_v5 = vsel %vm3305_vm7, 1.0, %v16346_v61  ;;  %v7590_v7 = vsel %vm3306_vm12, 1.0, %v16346_v61 }
 0x48c   : > { %v14558_v37 = vpop.permute.xlu1 %2445  ;;  %v14560_v50 = vpop.permute.xlu0 %2441  ;;  %v7659_v16 = vsel %vm3375_vm9, 1.0, %v16346_v61  ;;  %v7660_v23 = vsel %vm3376_vm13, 1.0, %v16346_v61  ;;  %vm3374_vm10 = vcmp.eq.s32.totalorder %v14302_v25, %v8791_v22  ;;  %v7657_v19 = vsel %vm3373_vm11, 1.0, %v16346_v61 }
 0x48d   : > { %v6589_v21 = vadd.f32 %v7862_v8, %v6588_v53  ;;  %v6651_v13 = vadd.f32 %v7864_v63, %v6650_v27  ;;  %v6558_v34 = vadd.f32 %v7861_v15, %v6557_v11  ;;  %v6620_v32 = vadd.f32 %v7863_v6, %v6619_v58  ;;  %v16851_v58 = vld [vmem:[#allocation106_spill] sm:$0xff]  ;;  %v16852_v11 = vld [vmem:[#allocation107_spill] sm:$0xff]  ;;  %v16853_v6 = vld [vmem:[#allocation108_spill] sm:$0xff] }
 0x48e   : > { %2563 = vbcast.lane.b32.xlu1 %v16820_v17, 328  ;;  %2559 = vbcast.lane.b32.xlu0 %v16820_v17, 320  ;;  %v6116_v27 = vadd.f32 %v7591_v20, %v16851_v58  ;;  %v6147_v53 = vadd.f32 %v7592_v45, %v16852_v11  ;;  %v6054_v63 = vadd.f32 %v7589_v5, %v16853_v6  ;;  %v7658_v15 = vsel %vm3374_vm10, 1.0, %v16346_v61 }
 0x48f   : > { %v6242_v20 = vadd.f32 %v7659_v16, %v14497_v49  ;;  %v6273_v45 = vadd.f32 %v7660_v23, %v14505_v26  ;;  %v6180_v5 = vadd.f32 %v7657_v19, %v14508_v54  ;;  %v14621_v25 = vsel %vm3104_vm4, 1.0, %v16346_v61 }
 0x490   : > { %v2588_v59 = vpop.permute.xlu1 %2587  ;;  %v2584_v30 = vpop.permute.xlu0 %2583  ;;  %v6211_v58 = vadd.f32 %v7658_v15, %v14511_v24  ;;  %vm3339_vm0 = vcmp.eq.s32.totalorder %v14450_v48, %v8233_v9  ;;  %vm3340_vm1 = vcmp.eq.s32.totalorder %v14450_v48, %v8791_v22  ;;  %vm3337_vm8 = vcmp.eq.s32.totalorder %v14452_v42, %v8233_v9 }
 0x491   : > { %vm3611_vm5 = vcmp.eq.s32.totalorder %v2588_v59, %v8233_v9  ;;  %vm3612_vm15 = vcmp.eq.s32.totalorder %v2588_v59, %v8791_v22  ;;  %vm3609_vm2 = vcmp.eq.s32.totalorder %v2584_v30, %v8233_v9  ;;  %vm3610_vm3 = vcmp.eq.s32.totalorder %v2584_v30, %v8791_v22 }
 0x492   : > { %v7895_v33 = vsel %vm3611_vm5, 1.0, %v16346_v61  ;;  %v7896_v4 = vsel %vm3612_vm15, 1.0, %v16346_v61  ;;  %v7893_v36 = vsel %vm3609_vm2, 1.0, %v16346_v61  ;;  %v7894_v1 = vsel %vm3610_vm3, 1.0, %v16346_v61  ;;  %2062 = vbcast.lane.b32.xlu1 %v16668_v38, 264  ;;  %2058 = vbcast.lane.b32.xlu0 %v16668_v38, 256 }
 0x493   : > { %v6590_v30 = vadd.f32 %v7894_v1, %v6589_v21  ;;  %v6652_v57 = vadd.f32 %v7896_v4, %v6651_v13  ;;  %v6559_v2 = vadd.f32 %v7893_v36, %v6558_v34  ;;  %v6621_v47 = vadd.f32 %v7895_v33, %v6620_v32  ;;  %v16854_v38 = vld [vmem:[#allocation109_spill] sm:$0xff] }
 0x494   : > { %v14609_v8 = vpop.permute.xlu1 %1944  ;;  %v14611_v59 = vpop.permute.xlu0 %1940  ;;  %v6085_v46 = vadd.f32 %v7590_v7, %v16854_v38  ;;  %vm3338_vm6 = vcmp.eq.s32.totalorder %v14452_v42, %v8791_v22  ;;  %vm3407_vm4 = vcmp.eq.s32.totalorder %v14487_v43, %v8233_v9  ;;  %vm3408_vm14 = vcmp.eq.s32.totalorder %v14487_v43, %v8791_v22 }
 0x495   : > { %vm3405_vm7 = vcmp.eq.s32.totalorder %v14489_v3, %v8233_v9  ;;  %vm3406_vm12 = vcmp.eq.s32.totalorder %v14489_v3, %v8791_v22  ;;  %v6668_v62 = vpack.c.bf16 %v6652_v57, %v6590_v30  ;;  %v6667_v26 = vpack.c.bf16 %v6621_v47, %v6559_v2 }
 0x496   : > { %2204 = vbcast.lane.b32.xlu1 %v16693_v41, 280  ;;  %2200 = vbcast.lane.b32.xlu0 %v16693_v41, 272  ;;  %vm3511_vm9 = vcmp.eq.s32.totalorder %v14372_v29, %v8233_v9  ;;  %vm3512_vm13 = vcmp.eq.s32.totalorder %v14372_v29, %v8791_v22  ;;  %vm3509_vm11 = vcmp.eq.s32.totalorder %v14374_v0, %v8233_v9  ;;  %v7623_v24 = vsel %vm3339_vm0, 1.0, %v16346_v61 }
 0x497   : > { %vm3510_vm10 = vcmp.eq.s32.totalorder %v14374_v0, %v8791_v22  ;;  %v7624_v2 = vsel %vm3340_vm1, 1.0, %v16346_v61  ;;  %v7621_v29 = vsel %vm3337_vm8, 1.0, %v16346_v61  ;;  %v7622_v0 = vsel %vm3338_vm6, 1.0, %v16346_v61  ;;  %6669 = vmatprep.subr.bf16.mxu0 %v6668_v62 }
 0x498   : > { %v2087_v49 = vpop.permute.xlu1 %2086  ;;  %v2083_v54 = vpop.permute.xlu0 %2082  ;;  %v7691_v47 = vsel %vm3407_vm4, 1.0, %v16346_v61  ;;  %v7692_v48 = vsel %vm3408_vm14, 1.0, %v16346_v61  ;;  %v7689_v57 = vsel %vm3405_vm7, 1.0, %v16346_v61  ;;  %v7690_v42 = vsel %vm3406_vm12, 1.0, %v16346_v61  ;;  %6670 = vmatpush1.bf16.msra.mxu0 %v6667_v26 }
 0x499   : > { %v14684_v7 = vsel %vm3511_vm9, 1.0, %v16346_v61  ;;  %v14687_v16 = vsel %vm3512_vm13, 1.0, %v16346_v61  ;;  %v14690_v43 = vsel %vm3509_vm11, 1.0, %v16346_v61  ;;  %v14693_v23 = vsel %vm3510_vm10, 1.0, %v16346_v61 }
 0x49a   : > { %2346 = vbcast.lane.b32.xlu1 %v16727_v18, 296  ;;  %2342 = vbcast.lane.b32.xlu0 %v16727_v18, 288  ;;  %v6117_v13 = vadd.f32 %v7623_v24, %v6116_v27  ;;  %v6148_v3 = vadd.f32 %v7624_v2, %v6147_v53  ;;  %v6055_v34 = vadd.f32 %v7621_v29, %v6054_v63  ;;  %v16858_v2 = vld [vmem:[#allocation105_spill] sm:$0xff] }
 0x49b   : > { %v6086_v32 = vadd.f32 %v7622_v0, %v6085_v46  ;;  %v14696_v33 = vadd.f32 %v7691_v47, %v6242_v20  ;;  %v14698_v4 = vadd.f32 %v7692_v48, %v6273_v45  ;;  %v14700_v36 = vadd.f32 %v7689_v57, %v6180_v5 }
 0x49c   : > { %v2229_v19 = vpop.permute.xlu1 %2228  ;;  %v2225_v21 = vpop.permute.xlu0 %2224  ;;  %v14702_v1 = vadd.f32 %v7690_v42, %v6211_v58  ;;  %vm3543_vm5 = vcmp.eq.s32.totalorder %v14558_v37, %v8233_v9  ;;  %vm3544_vm15 = vcmp.eq.s32.totalorder %v14558_v37, %v8791_v22  ;;  %vm3541_vm2 = vcmp.eq.s32.totalorder %v14560_v50, %v8233_v9 }
 0x49d   : > { %vm3542_vm3 = vcmp.eq.s32.totalorder %v14560_v50, %v8791_v22  ;;  %vm3303_vm0 = vcmp.eq.s32.totalorder %v14609_v8, %v8233_v9  ;;  %vm3304_vm1 = vcmp.eq.s32.totalorder %v14609_v8, %v8791_v22  ;;  %vm3301_vm8 = vcmp.eq.s32.totalorder %v14611_v59, %v8233_v9 }
 0x49e   : > { %2488 = vbcast.lane.b32.xlu1 %v16753_v40, 312  ;;  %vm3302_vm6 = vcmp.eq.s32.totalorder %v14611_v59, %v8791_v22  ;;  %2484 = vbcast.lane.b32.xlu0 %v16753_v40, 304  ;;  %vm3371_vm4 = vcmp.eq.s32.totalorder %v2087_v49, %v8233_v9  ;;  %vm3372_vm14 = vcmp.eq.s32.totalorder %v2087_v49, %v8791_v22  ;;  %v14731_v50 = vsel %vm3543_vm5, 1.0, %v16346_v61  ;;  %v16855_v59 = vld [vmem:[#allocation102_spill] sm:$0xff]  ;;  %v16856_v49 = vld [vmem:[#allocation103_spill] sm:$0xff] }
 0x49f   : > { %vm3369_vm7 = vcmp.eq.s32.totalorder %v2083_v54, %v8233_v9  ;;  %vm3370_vm12 = vcmp.eq.s32.totalorder %v2083_v54, %v8791_v22  ;;  %v14734_v27 = vsel %vm3544_vm15, 1.0, %v16346_v61  ;;  %v14737_v11 = vsel %vm3541_vm2, 1.0, %v16346_v61  ;;  %v16857_v54 = vld [vmem:[#allocation104_spill] sm:$0xff] }
 0x4a0   : > { %v14722_v46 = vpop.permute.xlu1 %2370  ;;  %v14724_v37 = vpop.permute.xlu0 %2366  ;;  %v14740_v53 = vsel %vm3542_vm3, 1.0, %v16346_v61  ;;  %v7587_v6 = vsel %vm3303_vm0, 1.0, %v16346_v61  ;;  %v7588_v63 = vsel %vm3304_vm1, 1.0, %v16346_v61  ;;  %v7585_v15 = vsel %vm3301_vm8, 1.0, %v16346_v61 }
 0x4a1   : > { %v7586_v30 = vsel %vm3302_vm6, 1.0, %v16346_v61  ;;  %v7655_v38 = vsel %vm3371_vm4, 1.0, %v16346_v61  ;;  %v7656_v20 = vsel %vm3372_vm14, 1.0, %v16346_v61  ;;  %v7653_v45 = vsel %vm3369_vm7, 1.0, %v16346_v61 }
 0x4a2   : > { %2129 = vbcast.lane.b32.xlu1 %v16834_v35, 264  ;;  %v7654_v5 = vsel %vm3370_vm12, 1.0, %v16346_v61  ;;  %2125 = vbcast.lane.b32.xlu0 %v16834_v35, 256  ;;  %vm3439_vm9 = vcmp.eq.s32.totalorder %v2229_v19, %v8233_v9  ;;  %vm3440_vm13 = vcmp.eq.s32.totalorder %v2229_v19, %v8791_v22  ;;  %vm3437_vm11 = vcmp.eq.s32.totalorder %v2225_v21, %v8233_v9 }
 0x4a3   : > { %vm3438_vm10 = vcmp.eq.s32.totalorder %v2225_v21, %v8791_v22  ;;  %v5992_v62 = vadd.f32 %v7587_v6, %v16855_v59  ;;  %v6023_v26 = vadd.f32 %v7588_v63, %v16856_v49  ;;  %v5930_v24 = vadd.f32 %v7585_v15, %v16857_v54 }
 0x4a4   : > { %v14764_v8 = vpop.permute.xlu1 %2512  ;;  %v14766_v58 = vpop.permute.xlu0 %2508  ;;  %v5961_v35 = vadd.f32 %v7586_v30, %v16858_v2  ;;  %v6118_v29 = vadd.f32 %v7655_v38, %v6117_v13  ;;  %v6149_v0 = vadd.f32 %v7656_v20, %v6148_v3  ;;  %v6056_v47 = vadd.f32 %v7653_v45, %v6055_v34  ;;  %v16859_v45 = vld [vmem:[#allocation110_spill] sm:$0xff] }
 0x4a5   : > { %v6087_v48 = vadd.f32 %v7654_v5, %v6086_v32  ;;  %v7723_v57 = vsel %vm3439_vm9, 1.0, %v16346_v61  ;;  %v7724_v42 = vsel %vm3440_vm13, 1.0, %v16346_v61  ;;  %v7721_v19 = vsel %vm3437_vm11, 1.0, %v16346_v61 }
 0x4a6   : > { %2271 = vbcast.lane.b32.xlu1 %v16847_v55, 280  ;;  %v7722_v21 = vsel %vm3438_vm10, 1.0, %v16346_v61  ;;  %2267 = vbcast.lane.b32.xlu0 %v16847_v55, 272  ;;  %vm3411_vm0 = vcmp.eq.s32.totalorder %v16859_v45, %v8233_v9  ;;  %vm3412_vm1 = vcmp.eq.s32.totalorder %v16859_v45, %v8791_v22  ;;  %v6244_v5 = vadd.f32 %v7723_v57, %v14696_v33 }
 0x4a7   : > { %v6275_v59 = vadd.f32 %v7724_v42, %v14698_v4  ;;  %v6182_v49 = vadd.f32 %v7721_v19, %v14700_v36  ;;  %vm3575_vm7 = vcmp.eq.s32.totalorder %v14764_v8, %v8233_v9  ;;  %vm3576_vm12 = vcmp.eq.s32.totalorder %v14764_v8, %v8791_v22 }
 0x4a8   : > { %v2012_v6 = vpop.permute.xlu1 %2011  ;;  %v2008_v63 = vpop.permute.xlu0 %2007  ;;  %vm3573_vm9 = vcmp.eq.s32.totalorder %v14766_v58, %v8233_v9  ;;  %vm3574_vm13 = vcmp.eq.s32.totalorder %v14766_v58, %v8791_v22  ;;  %v14895_v8 = vsel %vm3412_vm1, 1.0, %v16346_v61 }
 0x4a9   : > { %vm3335_vm5 = vcmp.eq.s32.totalorder %v2012_v6, %v8233_v9  ;;  %vm3336_vm15 = vcmp.eq.s32.totalorder %v2012_v6, %v8791_v22  ;;  %vm3333_vm2 = vcmp.eq.s32.totalorder %v2008_v63, %v8233_v9  ;;  %vm3334_vm3 = vcmp.eq.s32.totalorder %v2008_v63, %v8791_v22 }
 0x4aa   : > { %v7619_v13 = vsel %vm3335_vm5, 1.0, %v16346_v61  ;;  %v7620_v3 = vsel %vm3336_vm15, 1.0, %v16346_v61  ;;  %v7617_v34 = vsel %vm3333_vm2, 1.0, %v16346_v61  ;;  %v7618_v32 = vsel %vm3334_vm3, 1.0, %v16346_v61  ;;  %2413 = vbcast.lane.b32.xlu1 %v16745_v44, 296  ;;  %2409 = vbcast.lane.b32.xlu0 %v16745_v44, 288 }
 0x4ab   : > { %v14791_v15 = vadd.f32 %v7619_v13, %v5992_v62  ;;  %v14793_v30 = vadd.f32 %v7620_v3, %v6023_v26  ;;  %v14795_v38 = vadd.f32 %v7617_v34, %v5930_v24  ;;  %v14797_v20 = vadd.f32 %v7618_v32, %v5961_v35 }
 0x4ac   : > { %v6213_v62 = vadd.f32 %v7722_v21, %v14702_v1  ;;  %v2154_v26 = vpop.permute.xlu1 %2153  ;;  %v2150_v54 = vpop.permute.xlu0 %2149  ;;  %v6494_v3 = vadd.f32 %v14684_v7, %v14513_v60  ;;  %v6525_v34 = vadd.f32 %v14687_v16, %v14515_v51  ;;  %v6432_v32 = vadd.f32 %v14690_v43, %v14517_v39 }
 0x4ad   : > { %vm3403_vm8 = vcmp.eq.s32.totalorder %v2154_v26, %v8233_v9  ;;  %vm3404_vm6 = vcmp.eq.s32.totalorder %v2154_v26, %v8791_v22  ;;  %vm3401_vm4 = vcmp.eq.s32.totalorder %v2150_v54, %v8233_v9  ;;  %vm3402_vm14 = vcmp.eq.s32.totalorder %v2150_v54, %v8791_v22 }
 0x4ae   : > { %v7687_v33 = vsel %vm3403_vm8, 1.0, %v16346_v61  ;;  %v7688_v4 = vsel %vm3404_vm6, 1.0, %v16346_v61  ;;  %v7685_v36 = vsel %vm3401_vm4, 1.0, %v16346_v61  ;;  %v7686_v1 = vsel %vm3402_vm14, 1.0, %v16346_v61  ;;  %2555 = vbcast.lane.b32.xlu1 %v16820_v17, 312  ;;  %2551 = vbcast.lane.b32.xlu0 %v16820_v17, 304 }
 0x4af   : > { %v14817_v24 = vadd.f32 %v7687_v33, %v6118_v29  ;;  %v14819_v2 = vadd.f32 %v7688_v4, %v6149_v0  ;;  %v14821_v35 = vadd.f32 %v7685_v36, %v6056_v47  ;;  %v14823_v57 = vadd.f32 %v7686_v1, %v6087_v48 }
 0x4b0   : > { %v2296_v29 = vpop.permute.xlu1 %2295  ;;  %v2292_v0 = vpop.permute.xlu0 %2291  ;;  %v6463_v26 = vadd.f32 %v14693_v23, %v14519_v12  ;;  %v7859_v60 = vsel %vm3575_vm7, 1.0, %v16346_v61  ;;  %v7860_v51 = vsel %vm3576_vm12, 1.0, %v16346_v61  ;;  %v7857_v39 = vsel %vm3573_vm9, 1.0, %v16346_v61 }
 0x4b1   : > { %vm3471_vm11 = vcmp.eq.s32.totalorder %v2296_v29, %v8233_v9  ;;  %vm3472_vm10 = vcmp.eq.s32.totalorder %v2296_v29, %v8791_v22  ;;  %vm3469_vm5 = vcmp.eq.s32.totalorder %v2292_v0, %v8233_v9  ;;  %vm3470_vm15 = vcmp.eq.s32.totalorder %v2292_v0, %v8791_v22 }
 0x4b2   : > { %v7755_v47 = vsel %vm3471_vm11, 1.0, %v16346_v61  ;;  %v7756_v48 = vsel %vm3472_vm10, 1.0, %v16346_v61  ;;  %v7753_v42 = vsel %vm3469_vm5, 1.0, %v16346_v61  ;;  %v7754_v19 = vsel %vm3470_vm15, 1.0, %v16346_v61  ;;  %2196 = vbcast.lane.b32.xlu1 %v16693_v41, 264  ;;  %2192 = vbcast.lane.b32.xlu0 %v16693_v41, 256 }
 0x4b3   : > { %v14843_v21 = vadd.f32 %v7755_v47, %v6244_v5  ;;  %v14845_v6 = vadd.f32 %v7756_v48, %v6275_v59  ;;  %v14847_v63 = vadd.f32 %v7753_v42, %v6182_v49  ;;  %v14849_v13 = vadd.f32 %v7754_v19, %v6213_v62 }
 0x4b4   : > { %v14860_v5 = vpop.permute.xlu1 %2437  ;;  %v14862_v59 = vpop.permute.xlu0 %2433  ;;  %v7858_v41 = vsel %vm3574_vm13, 1.0, %v16346_v61  ;;  %v6495_v12 = vadd.f32 %v14731_v50, %v6494_v3  ;;  %v6526_v7 = vadd.f32 %v14734_v27, %v6525_v34  ;;  %v6433_v16 = vadd.f32 %v14737_v11, %v6432_v32  ;;  %v16860_v50 = vld [vmem:[#allocation116_spill] sm:$0xff] }
 0x4b5   : > { %v6464_v43 = vadd.f32 %v14740_v53, %v6463_v26  ;;  %v14889_v23 = vsel %vm3411_vm0, 1.0, %v16346_v61  ;;  %vm3409_vm2 = vcmp.eq.s32.totalorder %v16860_v50, %v8233_v9  ;;  %vm3410_vm3 = vcmp.eq.s32.totalorder %v16860_v50, %v8791_v22 }
 0x4b6   : > { %2338 = vbcast.lane.b32.xlu1 %v16727_v18, 280  ;;  %v6496_v27 = vadd.f32 %v7859_v60, %v6495_v12  ;;  %v6527_v11 = vadd.f32 %v7860_v51, %v6526_v7  ;;  %v6434_v53 = vadd.f32 %v7857_v39, %v6433_v16  ;;  %2334 = vbcast.lane.b32.xlu0 %v16727_v18, 272  ;;  %v7693_v36 = vsel %vm3409_vm2, 1.0, %v16346_v61 }
 0x4b7   : > { %v6465_v58 = vadd.f32 %v7858_v41, %v6464_v43  ;;  %v7694_v1 = vsel %vm3410_vm3, 1.0, %v16346_v61  ;;  %vm3443_vm4 = vcmp.eq.s32.totalorder %v14335_v52, %v8233_v9  ;;  %vm3444_vm14 = vcmp.eq.s32.totalorder %v14335_v52, %v8791_v22 }
 0x4b8   : > { %v2580_v49 = vpop.permute.xlu1 %2579  ;;  %v2576_v62 = vpop.permute.xlu0 %2575  ;;  %vm3441_vm11 = vcmp.eq.s32.totalorder %v14337_v10, %v8233_v9  ;;  %vm3442_vm10 = vcmp.eq.s32.totalorder %v14337_v10, %v8791_v22  ;;  %v6367_v52 = vadd.f32 %v14889_v23, %v14394_v56  ;;  %v16864_v10 = vld [vmem:[#allocation123_spill] sm:$0xff] }
 0x4b9   : > { %vm3607_vm0 = vcmp.eq.s32.totalorder %v2580_v49, %v8233_v9  ;;  %vm3608_vm8 = vcmp.eq.s32.totalorder %v2580_v49, %v8791_v22  ;;  %vm3605_vm1 = vcmp.eq.s32.totalorder %v2576_v62, %v8233_v9  ;;  %vm3606_vm6 = vcmp.eq.s32.totalorder %v2576_v62, %v8791_v22 }
 0x4ba   : > { %v7891_v45 = vsel %vm3607_vm0, 1.0, %v16346_v61  ;;  %v7892_v54 = vsel %vm3608_vm8, 1.0, %v16346_v61  ;;  %v7889_v33 = vsel %vm3605_vm1, 1.0, %v16346_v61  ;;  %v7890_v4 = vsel %vm3606_vm6, 1.0, %v16346_v61  ;;  %2480 = vbcast.lane.b32.xlu1 %v16753_v40, 296  ;;  %2476 = vbcast.lane.b32.xlu0 %v16753_v40, 288 }
 0x4bb   : > { %v6497_v29 = vadd.f32 %v7891_v45, %v6496_v27  ;;  %v6528_v0 = vadd.f32 %v7892_v54, %v6527_v11  ;;  %v6435_v47 = vadd.f32 %v7889_v33, %v6434_v53  ;;  %v6466_v48 = vadd.f32 %v7890_v4, %v6465_v58  ;;  %v16861_v53 = vld [vmem:[#allocation86_spill] sm:$0xff]  ;;  %v16862_v58 = vld [vmem:[#allocation87_spill] sm:$0xff] }
 0x4bc   : > { %v2079_v42 = vpop.permute.xlu1 %2078  ;;  %v2075_v19 = vpop.permute.xlu0 %2074  ;;  %vm3299_vm0 = vcmp.eq.s32.totalorder %v16861_v53, %v8233_v9  ;;  %vm3300_vm8 = vcmp.eq.s32.totalorder %v16861_v53, %v8791_v22  ;;  %vm3297_vm1 = vcmp.eq.s32.totalorder %v16862_v58, %v8233_v9  ;;  %vm3298_vm6 = vcmp.eq.s32.totalorder %v16862_v58, %v8791_v22  ;;  %v16863_v4 = vld [vmem:[#allocation122_spill] sm:$0xff] }
 0x4bd   : > { %vm3367_vm7 = vcmp.eq.s32.totalorder %v2079_v42, %v8233_v9  ;;  %vm3368_vm12 = vcmp.eq.s32.totalorder %v2079_v42, %v8791_v22  ;;  %vm3365_vm9 = vcmp.eq.s32.totalorder %v2075_v19, %v8233_v9  ;;  %vm3366_vm13 = vcmp.eq.s32.totalorder %v2075_v19, %v8791_v22 }
 0x4be   : > { %v7651_v3 = vsel %vm3367_vm7, 1.0, %v16346_v61  ;;  %v7652_v34 = vsel %vm3368_vm12, 1.0, %v16346_v61  ;;  %v7649_v32 = vsel %vm3365_vm9, 1.0, %v16346_v61  ;;  %v7650_v26 = vsel %vm3366_vm13, 1.0, %v16346_v61  ;;  %2263 = vbcast.lane.b32.xlu1 %v16847_v55, 264  ;;  %2259 = vbcast.lane.b32.xlu0 %v16847_v55, 256 }
 0x4bf   : > { %v14934_v60 = vadd.f32 %v7651_v3, %v14791_v15  ;;  %v14937_v51 = vadd.f32 %v7652_v34, %v14793_v30  ;;  %v14940_v39 = vadd.f32 %v7649_v32, %v14795_v38  ;;  %v14943_v41 = vadd.f32 %v7650_v26, %v14797_v20 }
 0x4c0   : > { %v6666_v12 = vpack.c.bf16 %v6528_v0, %v6466_v48  ;;  %v2221_v15 = vpop.permute.xlu1 %2220  ;;  %v6665_v7 = vpack.c.bf16 %v6497_v29, %v6435_v47  ;;  %v2217_v16 = vpop.permute.xlu0 %2216  ;;  %v6398_v45 = vadd.f32 %v14895_v8, %v14417_v31  ;;  %v6305_v54 = vadd.f32 %v7693_v36, %v14438_v28 }
 0x4c1   : > { %vm3435_vm5 = vcmp.eq.s32.totalorder %v2221_v15, %v8233_v9  ;;  %vm3436_vm15 = vcmp.eq.s32.totalorder %v2221_v15, %v8791_v22  ;;  %vm3433_vm2 = vcmp.eq.s32.totalorder %v2217_v16, %v8233_v9  ;;  %vm3434_vm3 = vcmp.eq.s32.totalorder %v2217_v16, %v8791_v22 }
 0x4c2   : > { %6671 = vmatprep.subr.bf16.mxu0 %v6666_v12  ;;  %v7719_v30 = vsel %vm3435_vm5, 1.0, %v16346_v61  ;;  %v7720_v38 = vsel %vm3436_vm15, 1.0, %v16346_v61  ;;  %v7717_v20 = vsel %vm3433_vm2, 1.0, %v16346_v61  ;;  %v7718_v55 = vsel %vm3434_vm3, 1.0, %v16346_v61  ;;  %2405 = vbcast.lane.b32.xlu1 %v16745_v44, 280 }
 0x4c3   : > { %v14960_v43 = vadd.f32 %v7719_v30, %v14817_v24  ;;  %v14963_v50 = vadd.f32 %v7720_v38, %v14819_v2  ;;  %6672 = vmatpush1.bf16.msra.mxu0 %v6665_v7  ;;  %v14966_v27 = vadd.f32 %v7717_v20, %v14821_v35  ;;  %v14969_v11 = vadd.f32 %v7718_v55, %v14823_v57 }
 0x4c4   : > { %v7727_v24 = vsel %vm3443_vm4, 1.0, %v16346_v61  ;;  %v7728_v2 = vsel %vm3444_vm14, 1.0, %v16346_v61  ;;  %v7725_v35 = vsel %vm3441_vm11, 1.0, %v16346_v61  ;;  %v7726_v57 = vsel %vm3442_vm10, 1.0, %v16346_v61  ;;  %2401 = vbcast.lane.b32.xlu0 %v16745_v44, 272  ;;  %v14996_v49 = vpop.permute.xlu1 %2362  ;;  %v14998_v62 = vpop.permute.xlu0 %2358 }
 0x4c5   : > { %v6336_v33 = vadd.f32 %v7694_v1, %v14441_v14  ;;  %vm3475_vm4 = vcmp.eq.s32.totalorder %v16863_v4, %v8233_v9  ;;  %vm3476_vm14 = vcmp.eq.s32.totalorder %v16863_v4, %v8791_v22  ;;  %vm3473_vm7 = vcmp.eq.s32.totalorder %v16864_v10, %v8233_v9 }
 0x4c6   : > { %vm3474_vm12 = vcmp.eq.s32.totalorder %v16864_v10, %v8791_v22  ;;  %2547 = vbcast.lane.b32.xlu1 %v16820_v17, 296  ;;  %v6368_v56 = vadd.f32 %v7727_v24, %v6367_v52  ;;  %v6399_v31 = vadd.f32 %v7728_v2, %v6398_v45  ;;  %v6306_v23 = vadd.f32 %v7725_v35, %v6305_v54 }
 0x4c7   : > { %v6337_v28 = vadd.f32 %v7726_v57, %v6336_v33  ;;  %vm3507_vm9 = vcmp.eq.s32.totalorder %v14722_v46, %v8233_v9  ;;  %vm3508_vm13 = vcmp.eq.s32.totalorder %v14722_v46, %v8791_v22  ;;  %vm3505_vm11 = vcmp.eq.s32.totalorder %v14724_v37, %v8233_v9 }
 0x4c8   : > { %vm3506_vm10 = vcmp.eq.s32.totalorder %v14724_v37, %v8791_v22  ;;  %2543 = vbcast.lane.b32.xlu0 %v16820_v17, 288  ;;  %v15024_v14 = vpop.permute.xlu1 %2504  ;;  %v15026_v8 = vpop.permute.xlu0 %2500  ;;  %v7759_v36 = vsel %vm3475_vm4, 1.0, %v16346_v61  ;;  %v7760_v1 = vsel %vm3476_vm14, 1.0, %v16346_v61  ;;  %v7757_v29 = vsel %vm3473_vm7, 1.0, %v16346_v61 }
 0x4c9   : > { %v7758_v0 = vsel %vm3474_vm12, 1.0, %v16346_v61  ;;  %vm3539_vm5 = vcmp.eq.s32.totalorder %v14860_v5, %v8233_v9  ;;  %vm3540_vm15 = vcmp.eq.s32.totalorder %v14860_v5, %v8791_v22  ;;  %vm3537_vm2 = vcmp.eq.s32.totalorder %v14862_v59, %v8233_v9 }
 0x4ca   : > { %vm3538_vm3 = vcmp.eq.s32.totalorder %v14862_v59, %v8791_v22  ;;  %2330 = vbcast.lane.b32.xlu1 %v16727_v18, 264  ;;  %v7791_v47 = vsel %vm3507_vm9, 1.0, %v16346_v61  ;;  %v7792_v48 = vsel %vm3508_vm13, 1.0, %v16346_v61  ;;  %v7789_v42 = vsel %vm3505_vm11, 1.0, %v16346_v61 }
 0x4cb   : > { %v7790_v19 = vsel %vm3506_vm10, 1.0, %v16346_v61  ;;  %v6369_v3 = vadd.f32 %v7759_v36, %v6368_v56  ;;  %v6400_v34 = vadd.f32 %v7760_v1, %v6399_v31  ;;  %v6307_v32 = vadd.f32 %v7757_v29, %v6306_v23 }
 0x4cc   : > { %v6338_v26 = vadd.f32 %v7758_v0, %v6337_v28  ;;  %2326 = vbcast.lane.b32.xlu0 %v16727_v18, 256  ;;  %v15070_v12 = vpop.permute.xlu1 %2003  ;;  %v15072_v46 = vpop.permute.xlu0 %1999  ;;  %v7823_v15 = vsel %vm3539_vm5, 1.0, %v16346_v61  ;;  %v7824_v37 = vsel %vm3540_vm15, 1.0, %v16346_v61  ;;  %v7821_v7 = vsel %vm3537_vm2, 1.0, %v16346_v61 }
 0x4cd   : > { %v7822_v18 = vsel %vm3538_vm3, 1.0, %v16346_v61  ;;  %v6370_v16 = vadd.f32 %v7791_v47, %v6369_v3  ;;  %v6401_v30 = vadd.f32 %v7792_v48, %v6400_v34  ;;  %v6308_v38 = vadd.f32 %v7789_v42, %v6307_v32  ;;  %v16865_v42 = vld [vmem:[#allocation114_spill] sm:$0xff] }
 0x4ce   : > { %v6339_v20 = vadd.f32 %v7790_v19, %v6338_v26  ;;  %2472 = vbcast.lane.b32.xlu1 %v16753_v40, 280  ;;  %v7583_v5 = vsel %vm3299_vm0, 1.0, %v16346_v61  ;;  %v7584_v55 = vsel %vm3300_vm8, 1.0, %v16346_v61  ;;  %v7581_v59 = vsel %vm3297_vm1, 1.0, %v16346_v61  ;;  %v16867_v19 = vld [vmem:[#allocation100_spill] sm:$0xff]  ;;  %v16868_v34 = vld [vmem:[#allocation118_spill] sm:$0xff] }
 0x4cf   : > { %v7582_v24 = vsel %vm3298_vm6, 1.0, %v16346_v61  ;;  %v6371_v2 = vadd.f32 %v7823_v15, %v6370_v16  ;;  %v6402_v35 = vadd.f32 %v7824_v37, %v6401_v30  ;;  %v6309_v57 = vadd.f32 %v7821_v7, %v6308_v38  ;;  %v16869_v26 = vld [vmem:[#allocation101_spill] sm:$0xff] }
 0x4d0   : > { %v6340_v52 = vadd.f32 %v7822_v18, %v6339_v20  ;;  %2468 = vbcast.lane.b32.xlu0 %v16753_v40, 272  ;;  %v2146_v45 = vpop.permute.xlu1 %2145  ;;  %v2142_v54 = vpop.permute.xlu0 %2141  ;;  %vm3571_vm6 = vcmp.eq.s32.totalorder %v15024_v14, %v8233_v9  ;;  %vm3572_vm14 = vcmp.eq.s32.totalorder %v15024_v14, %v8791_v22  ;;  %vm3569_vm7 = vcmp.eq.s32.totalorder %v15026_v8, %v8233_v9  ;;  %v16866_v14 = vld [vmem:[#allocation97_spill] sm:$0xff] }
 0x4d1   : > { %vm3399_vm0 = vcmp.eq.s32.totalorder %v2146_v45, %v8233_v9  ;;  %vm3400_vm8 = vcmp.eq.s32.totalorder %v2146_v45, %v8791_v22  ;;  %vm3397_vm4 = vcmp.eq.s32.totalorder %v2142_v54, %v8233_v9  ;;  %vm3398_vm1 = vcmp.eq.s32.totalorder %v2142_v54, %v8791_v22 }
 0x4d2   : > { %v7683_v53 = vsel %vm3399_vm0, 1.0, %v16346_v61  ;;  %v7684_v58 = vsel %vm3400_vm8, 1.0, %v16346_v61  ;;  %v7681_v33 = vsel %vm3397_vm4, 1.0, %v16346_v61  ;;  %v7682_v4 = vsel %vm3398_vm1, 1.0, %v16346_v61  ;;  %2397 = vbcast.lane.b32.xlu1 %v16745_v44, 264 }
 0x4d3   : > { %v15118_v10 = vadd.f32 %v7683_v53, %v14934_v60  ;;  %v15121_v56 = vadd.f32 %v7684_v58, %v14937_v51  ;;  %v15124_v31 = vadd.f32 %v7681_v33, %v14940_v39  ;;  %v15127_v23 = vadd.f32 %v7682_v4, %v14943_v41 }
 0x4d4   : > { %vm3570_vm12 = vcmp.eq.s32.totalorder %v15026_v8, %v8791_v22  ;;  %2393 = vbcast.lane.b32.xlu0 %v16745_v44, 256  ;;  %v2288_v60 = vpop.permute.xlu1 %2287  ;;  %v2284_v51 = vpop.permute.xlu0 %2283  ;;  %v7855_v47 = vsel %vm3571_vm6, 1.0, %v16346_v61  ;;  %vm3101_vm5 = vcmp.eq.s32.totalorder %v16865_v42, %v8233_v9  ;;  %vm3102_vm15 = vcmp.eq.s32.totalorder %v16865_v42, %v8791_v22 }
 0x4d5   : > { %vm3467_vm9 = vcmp.eq.s32.totalorder %v2288_v60, %v8233_v9  ;;  %vm3468_vm13 = vcmp.eq.s32.totalorder %v2288_v60, %v8791_v22  ;;  %vm3465_vm11 = vcmp.eq.s32.totalorder %v2284_v51, %v8233_v9  ;;  %vm3466_vm10 = vcmp.eq.s32.totalorder %v2284_v51, %v8791_v22 }
 0x4d6   : > { %v7751_v39 = vsel %vm3467_vm9, 1.0, %v16346_v61  ;;  %v7752_v41 = vsel %vm3468_vm13, 1.0, %v16346_v61  ;;  %v7749_v28 = vsel %vm3465_vm11, 1.0, %v16346_v61  ;;  %v7750_v36 = vsel %vm3466_vm10, 1.0, %v16346_v61  ;;  %2539 = vbcast.lane.b32.xlu1 %v16820_v17, 280 }
 0x4d7   : > { %v15148_v44 = vadd.f32 %v7751_v39, %v14960_v43  ;;  %v15151_v1 = vadd.f32 %v7752_v41, %v14963_v50  ;;  %v15154_v29 = vadd.f32 %v7749_v28, %v14966_v27  ;;  %v15157_v0 = vadd.f32 %v7750_v36, %v14969_v11 }
 0x4d8   : > { %v7856_v43 = vsel %vm3572_vm14, 1.0, %v16346_v61  ;;  %v7853_v50 = vsel %vm3569_vm7, 1.0, %v16346_v61  ;;  %v7854_v27 = vsel %vm3570_vm12, 1.0, %v16346_v61  ;;  %2535 = vbcast.lane.b32.xlu0 %v16820_v17, 272  ;;  %v15176_v11 = vpop.permute.xlu1 %2429  ;;  %v15178_v48 = vpop.permute.xlu0 %2425  ;;  %vm3331_vm2 = vcmp.eq.s32.totalorder %v15070_v12, %v8233_v9 }
 0x4d9   : > { %vm3332_vm3 = vcmp.eq.s32.totalorder %v15070_v12, %v8791_v22  ;;  %vm3329_vm0 = vcmp.eq.s32.totalorder %v15072_v46, %v8233_v9  ;;  %vm3330_vm8 = vcmp.eq.s32.totalorder %v15072_v46, %v8791_v22  ;;  %v5868_v8 = vadd.f32 %v7583_v5, %v16866_v14 }
 0x4da   : > { %v5899_v3 = vadd.f32 %v7584_v55, %v16867_v19  ;;  %v5806_v32 = vadd.f32 %v7581_v59, %v16868_v34  ;;  %v5837_v15 = vadd.f32 %v7582_v24, %v16869_v26  ;;  %2464 = vbcast.lane.b32.xlu1 %v16753_v40, 264  ;;  %v6372_v37 = vadd.f32 %v7855_v47, %v6371_v2 }
 0x4db   : > { %v6403_v7 = vadd.f32 %v7856_v43, %v6402_v35  ;;  %v6310_v18 = vadd.f32 %v7853_v50, %v6309_v57  ;;  %v6341_v12 = vadd.f32 %v7854_v27, %v6340_v52  ;;  %v7615_v16 = vsel %vm3331_vm2, 1.0, %v16346_v61 }
 0x4dc   : > { %v7616_v30 = vsel %vm3332_vm3, 1.0, %v16346_v61  ;;  %v7613_v46 = vsel %vm3329_vm0, 1.0, %v16346_v61  ;;  %v7614_v38 = vsel %vm3330_vm8, 1.0, %v16346_v61  ;;  %2460 = vbcast.lane.b32.xlu0 %v16753_v40, 256  ;;  %v2572_v20 = vpop.permute.xlu1 %2571  ;;  %v2568_v5 = vpop.permute.xlu0 %2567  ;;  %v5869_v40 = vadd.f32 %v7615_v16, %v5868_v8 }
 0x4dd   : > { %vm3603_vm4 = vcmp.eq.s32.totalorder %v2572_v20, %v8233_v9  ;;  %vm3604_vm1 = vcmp.eq.s32.totalorder %v2572_v20, %v8791_v22  ;;  %vm3601_vm6 = vcmp.eq.s32.totalorder %v2568_v5, %v8233_v9  ;;  %vm3602_vm14 = vcmp.eq.s32.totalorder %v2568_v5, %v8791_v22  ;;  %v16874_v20 = vld [vmem:[#allocation44_spill] sm:$0xff] }
 0x4de   : > { %v7887_v55 = vsel %vm3603_vm4, 1.0, %v16346_v61  ;;  %v7888_v59 = vsel %vm3604_vm1, 1.0, %v16346_v61  ;;  %v7885_v24 = vsel %vm3601_vm6, 1.0, %v16346_v61  ;;  %v7886_v2 = vsel %vm3602_vm14, 1.0, %v16346_v61  ;;  %2531 = vbcast.lane.b32.xlu1 %v16820_v17, 264  ;;  %v16875_v5 = vld [vmem:[#allocation120_spill] sm:$0xff] }
 0x4df   : > { %v5900_v35 = vadd.f32 %v7616_v30, %v5899_v3  ;;  %v5807_v57 = vadd.f32 %v7613_v46, %v5806_v32  ;;  %v5838_v52 = vadd.f32 %v7614_v38, %v5837_v15  ;;  %v6373_v45 = vadd.f32 %v7887_v55, %v6372_v37  ;;  %v16872_v30 = vld [vmem:[#allocation43_spill] sm:$0xff]  ;;  %v16876_v55 = vld [vmem:[#allocation45_spill] sm:$0xff] }
 0x4e0   : > { %v6404_v54 = vadd.f32 %v7888_v59, %v6403_v7  ;;  %v6311_v53 = vadd.f32 %v7885_v24, %v6310_v18  ;;  %v6342_v58 = vadd.f32 %v7886_v2, %v6341_v12  ;;  %2527 = vbcast.lane.b32.xlu0 %v16820_v17, 256  ;;  %v2071_v33 = vpop.permute.xlu1 %2070  ;;  %v2067_v4 = vpop.permute.xlu0 %2066  ;;  %v7385_v43 = vsel %vm3101_vm5, 1.0, %v16346_v61  ;;  %v16870_v18 = vld [vmem:[#allocation42_spill] sm:$0xff]  ;;  %v16871_v12 = vld [vmem:[#allocation111_spill] sm:$0xff]  ;;  %v16877_v59 = vld [vmem:[#allocation121_spill] sm:$0xff] }
 0x4e1   : > { %vm3363_vm7 = vcmp.eq.s32.totalorder %v2071_v33, %v8233_v9  ;;  %vm3364_vm12 = vcmp.eq.s32.totalorder %v2071_v33, %v8791_v22  ;;  %vm3361_vm9 = vcmp.eq.s32.totalorder %v2067_v4, %v8233_v9  ;;  %vm3362_vm13 = vcmp.eq.s32.totalorder %v2067_v4, %v8791_v22  ;;  %v16873_v46 = vld [vmem:[#allocation115_spill] sm:$0xff] }
 0x4e2   : > { %v7647_v60 = vsel %vm3363_vm7, 1.0, %v16346_v61  ;;  %v7648_v51 = vsel %vm3364_vm12, 1.0, %v16346_v61  ;;  %v7645_v39 = vsel %vm3361_vm9, 1.0, %v16346_v61  ;;  %v7646_v41 = vsel %vm3362_vm13, 1.0, %v16346_v61 }
 0x4e3   : > { %v15220_v28 = vadd.f32 %v7647_v60, %v5869_v40  ;;  %v15222_v17 = vadd.f32 %v7648_v51, %v5900_v35  ;;  %v15224_v36 = vadd.f32 %v7645_v39, %v5807_v57  ;;  %v15226_v47 = vadd.f32 %v7646_v41, %v5838_v52  ;;  %v16880_v40 = vld [vmem:[#allocation124_spill] sm:$0xff]  ;;  %v16883_v39 = vld [vmem:[#allocation46_spill] sm:$0xff]  ;;  %v16884_v41 = vld [vmem:[#allocation47_spill] sm:$0xff] }
 0x4e4   : > { %v7386_v50 = vsel %vm3102_vm15, 1.0, %v16346_v61  ;;  %v6664_v27 = vpack.c.bf16 %v6404_v54, %v6342_v58  ;;  %v2213_v14 = vpop.permute.xlu1 %2212  ;;  %v6663_v8 = vpack.c.bf16 %v6373_v45, %v6311_v53  ;;  %v2209_v19 = vpop.permute.xlu0 %2208  ;;  %v5737_v16 = vadd.f32 %v16871_v12, %v16870_v18  ;;  %v16881_v54 = vld [vmem:[#allocation12_spill] sm:$0xff]  ;;  %v16882_v53 = vld [vmem:[#allocation38_spill] sm:$0xff] }
 0x4e5   : > { %vm3431_vm11 = vcmp.eq.s32.totalorder %v2213_v14, %v8233_v9  ;;  %vm3432_vm10 = vcmp.eq.s32.totalorder %v2213_v14, %v8791_v22  ;;  %vm3429_vm2 = vcmp.eq.s32.totalorder %v2209_v19, %v8233_v9  ;;  %vm3430_vm3 = vcmp.eq.s32.totalorder %v2209_v19, %v8791_v22 }
 0x4e6   : > { %6673 = vmatprep.subr.bf16.mxu0 %v6664_v27  ;;  %v7715_v3 = vsel %vm3431_vm11, 1.0, %v16346_v61  ;;  %v7716_v34 = vsel %vm3432_vm10, 1.0, %v16346_v61  ;;  %v7713_v42 = vsel %vm3429_vm2, 1.0, %v16346_v61  ;;  %v7714_v32 = vsel %vm3430_vm3, 1.0, %v16346_v61 }
 0x4e7   : > { %v15245_v26 = vadd.f32 %v7715_v3, %v15118_v10  ;;  %v15248_v15 = vadd.f32 %v7716_v34, %v15121_v56  ;;  %6674 = vmatpush1.bf16.msra.mxu0 %v6663_v8  ;;  %v15251_v37 = vadd.f32 %v7713_v42, %v15124_v31  ;;  %v15254_v7 = vadd.f32 %v7714_v32, %v15127_v23  ;;  %v16878_v31 = vld [vmem:[#allocation23_spill] sm:$0xff]  ;;  %v16879_v23 = vld [vmem:[#allocation24_spill] sm:$0xff] }
 0x4e8   : > { %v5768_v38 = vadd.f32 %v16873_v46, %v16872_v30  ;;  %v5675_v10 = vadd.f32 %v16875_v5, %v16874_v20  ;;  %v5706_v56 = vadd.f32 %v16877_v59, %v16876_v55  ;;  %v15264_v24 = vpop.permute.xlu1 %2354  ;;  %v15266_v2 = vpop.permute.xlu0 %2350  ;;  %vm3135_vm5 = vcmp.eq.s32.totalorder %v16878_v31, %v8233_v9 }
 0x4e9   : > { %vm3136_vm15 = vcmp.eq.s32.totalorder %v16878_v31, %v8791_v22  ;;  %vm3133_vm0 = vcmp.eq.s32.totalorder %v16879_v23, %v8233_v9  ;;  %vm3134_vm8 = vcmp.eq.s32.totalorder %v16879_v23, %v8791_v22  ;;  %v5738_v35 = vadd.f32 %v16880_v40, %v5737_v16  ;;  %v16885_v31 = vld [vmem:[#allocation60_spill] sm:$0xff] }
 0x4ea   : > { %v5769_v57 = vadd.f32 %v14621_v25, %v5768_v38  ;;  %v5676_v52 = vadd.f32 %v7385_v43, %v5675_v10  ;;  %v5707_v45 = vadd.f32 %v7386_v50, %v5706_v56  ;;  %vm3167_vm4 = vcmp.eq.s32.totalorder %v16881_v54, %v8233_v9 }
 0x4eb   : > { %vm3168_vm1 = vcmp.eq.s32.totalorder %v16881_v54, %v8791_v22  ;;  %vm3165_vm6 = vcmp.eq.s32.totalorder %v16882_v53, %v8233_v9  ;;  %vm3166_vm14 = vcmp.eq.s32.totalorder %v16882_v53, %v8791_v22  ;;  %v7419_v58 = vsel %vm3135_vm5, 1.0, %v16346_v61 }
 0x4ec   : > { %v7420_v33 = vsel %vm3136_vm15, 1.0, %v16346_v61  ;;  %v7417_v25 = vsel %vm3133_vm0, 1.0, %v16346_v61  ;;  %v7418_v4 = vsel %vm3134_vm8, 1.0, %v16346_v61  ;;  %v15290_v60 = vpop.permute.xlu1 %2496  ;;  %v15292_v51 = vpop.permute.xlu0 %2492  ;;  %vm3199_vm7 = vcmp.eq.s32.totalorder %v16883_v39, %v8233_v9 }
 0x4ed   : > { %vm3200_vm12 = vcmp.eq.s32.totalorder %v16883_v39, %v8791_v22  ;;  %vm3197_vm9 = vcmp.eq.s32.totalorder %v16884_v41, %v8233_v9  ;;  %vm3198_vm13 = vcmp.eq.s32.totalorder %v16884_v41, %v8791_v22  ;;  %v7451_v43 = vsel %vm3167_vm4, 1.0, %v16346_v61 }
 0x4ee   : > { %v7452_v50 = vsel %vm3168_vm1, 1.0, %v16346_v61  ;;  %v7449_v27 = vsel %vm3165_vm6, 1.0, %v16346_v61  ;;  %v7450_v14 = vsel %vm3166_vm14, 1.0, %v16346_v61  ;;  %v5739_v8 = vadd.f32 %v7419_v58, %v5738_v35 }
 0x4ef   : > { %v5770_v19 = vadd.f32 %v7420_v33, %v5769_v57  ;;  %v5677_v3 = vadd.f32 %v7417_v25, %v5676_v52  ;;  %v5708_v34 = vadd.f32 %v7418_v4, %v5707_v45  ;;  %v7483_v42 = vsel %vm3199_vm7, 1.0, %v16346_v61  ;;  %v16886_v25 = vld [vmem:[#allocation61_spill] sm:$0xff] }
 0x4f0   : > { %v7484_v32 = vsel %vm3200_vm12, 1.0, %v16346_v61  ;;  %v7481_v18 = vsel %vm3197_vm9, 1.0, %v16346_v61  ;;  %v7482_v12 = vsel %vm3198_vm13, 1.0, %v16346_v61  ;;  %v15310_v16 = vpop.permute.xlu1 %1995  ;;  %v15312_v30 = vpop.permute.xlu0 %1991  ;;  %v5740_v46 = vadd.f32 %v7451_v43, %v5739_v8 }
 0x4f1   : > { %v5771_v38 = vadd.f32 %v7452_v50, %v5770_v19  ;;  %v5678_v20 = vadd.f32 %v7449_v27, %v5677_v3  ;;  %v5709_v5 = vadd.f32 %v7450_v14, %v5708_v34  ;;  %vm3231_vm11 = vcmp.eq.s32.totalorder %v16885_v31, %v8233_v9 }
 0x4f2   : > { %v15314_v10 = vadd.f32 %v7483_v42, %v5740_v46  ;;  %vm3232_vm10 = vcmp.eq.s32.totalorder %v16885_v31, %v8791_v22  ;;  %vm3503_vm2 = vcmp.eq.s32.totalorder %v14996_v49, %v8233_v9  ;;  %vm3504_vm3 = vcmp.eq.s32.totalorder %v14996_v49, %v8791_v22 }
 0x4f3   : > { %v15316_v55 = vadd.f32 %v7484_v32, %v5771_v38  ;;  %v15318_v59 = vadd.f32 %v7481_v18, %v5678_v20  ;;  %v15320_v56 = vadd.f32 %v7482_v12, %v5709_v5  ;;  %vm3501_vm5 = vcmp.eq.s32.totalorder %v14998_v62, %v8233_v9  ;;  %v16887_v32 = vld [vmem:[#allocation75_spill] sm:$0xff] }
 0x4f4   : > { %vm3502_vm15 = vcmp.eq.s32.totalorder %v14998_v62, %v8791_v22  ;;  %v2138_v23 = vpop.permute.xlu1 %2137  ;;  %v2134_v40 = vpop.permute.xlu0 %2133  ;;  %vm3229_vm6 = vcmp.eq.s32.totalorder %v16886_v25, %v8233_v9  ;;  %vm3230_vm14 = vcmp.eq.s32.totalorder %v16886_v25, %v8791_v22  ;;  %vm3535_vm7 = vcmp.eq.s32.totalorder %v15176_v11, %v8233_v9 }
 0x4f5   : > { %vm3395_vm0 = vcmp.eq.s32.totalorder %v2138_v23, %v8233_v9  ;;  %vm3396_vm8 = vcmp.eq.s32.totalorder %v2138_v23, %v8791_v22  ;;  %vm3393_vm4 = vcmp.eq.s32.totalorder %v2134_v40, %v8233_v9  ;;  %vm3394_vm1 = vcmp.eq.s32.totalorder %v2134_v40, %v8791_v22 }
 0x4f6   : > { %v7679_v35 = vsel %vm3395_vm0, 1.0, %v16346_v61  ;;  %v7680_v57 = vsel %vm3396_vm8, 1.0, %v16346_v61  ;;  %v7677_v52 = vsel %vm3393_vm4, 1.0, %v16346_v61  ;;  %v7678_v45 = vsel %vm3394_vm1, 1.0, %v16346_v61 }
 0x4f7   : > { %v15343_v54 = vadd.f32 %v7679_v35, %v15220_v28  ;;  %v15346_v53 = vadd.f32 %v7680_v57, %v15222_v17  ;;  %v15349_v58 = vadd.f32 %v7677_v52, %v15224_v36  ;;  %v15352_v33 = vadd.f32 %v7678_v45, %v15226_v47  ;;  %v16888_v45 = vld [vmem:[#allocation76_spill] sm:$0xff] }
 0x4f8   : > { %vm3536_vm12 = vcmp.eq.s32.totalorder %v15176_v11, %v8791_v22  ;;  %vm3533_vm9 = vcmp.eq.s32.totalorder %v15178_v48, %v8233_v9  ;;  %vm3534_vm13 = vcmp.eq.s32.totalorder %v15178_v48, %v8791_v22  ;;  %v15366_v28 = vpop.permute.xlu1 %2279  ;;  %v15368_v17 = vpop.permute.xlu0 %2275  ;;  %v7787_v36 = vsel %vm3503_vm2, 1.0, %v16346_v61 }
 0x4f9   : > { %v7788_v11 = vsel %vm3504_vm3, 1.0, %v16346_v61  ;;  %v7785_v47 = vsel %vm3501_vm5, 1.0, %v16346_v61  ;;  %v7786_v48 = vsel %vm3502_vm15, 1.0, %v16346_v61  ;;  %vm3567_vm0 = vcmp.eq.s32.totalorder %v15290_v60, %v8233_v9 }
 0x4fa   : > { %vm3568_vm2 = vcmp.eq.s32.totalorder %v15290_v60, %v8791_v22  ;;  %vm3565_vm8 = vcmp.eq.s32.totalorder %v15292_v51, %v8233_v9  ;;  %vm3566_vm3 = vcmp.eq.s32.totalorder %v15292_v51, %v8791_v22  ;;  %v7819_v49 = vsel %vm3535_vm7, 1.0, %v16346_v61 }
 0x4fb   : > { %v7820_v4 = vsel %vm3536_vm12, 1.0, %v16346_v61  ;;  %v7817_v39 = vsel %vm3533_vm9, 1.0, %v16346_v61  ;;  %v7818_v62 = vsel %vm3534_vm13, 1.0, %v16346_v61  ;;  %v6246_v41 = vadd.f32 %v7787_v36, %v14843_v21 }
 0x4fc   : > { %v6277_v43 = vadd.f32 %v7788_v11, %v14845_v6  ;;  %v6184_v60 = vadd.f32 %v7785_v47, %v14847_v63  ;;  %v6215_v50 = vadd.f32 %v7786_v48, %v14849_v13  ;;  %v15402_v27 = vpop.permute.xlu1 %2421  ;;  %v15404_v14 = vpop.permute.xlu0 %2417  ;;  %v7851_v51 = vsel %vm3567_vm0, 1.0, %v16346_v61 }
 0x4fd   : > { %v7852_v8 = vsel %vm3568_vm2, 1.0, %v16346_v61  ;;  %v7849_v19 = vsel %vm3565_vm8, 1.0, %v16346_v61  ;;  %v7850_v3 = vsel %vm3566_vm3, 1.0, %v16346_v61  ;;  %v6247_v34 = vadd.f32 %v7819_v49, %v6246_v41 }
 0x4fe   : > { %v6278_v21 = vadd.f32 %v7820_v4, %v6277_v43  ;;  %v6185_v42 = vadd.f32 %v7817_v39, %v6184_v60  ;;  %v6216_v6 = vadd.f32 %v7818_v62, %v6215_v50  ;;  %v7515_v63 = vsel %vm3231_vm11, 1.0, %v16346_v61  ;;  %v16889_v50 = vld [vmem:[#allocation84_spill] sm:$0xff] }
 0x4ff   : > { %v7516_v13 = vsel %vm3232_vm10, 1.0, %v16346_v61  ;;  %vm3263_vm5 = vcmp.eq.s32.totalorder %v16887_v32, %v8233_v9  ;;  %vm3264_vm15 = vcmp.eq.s32.totalorder %v16887_v32, %v8791_v22  ;;  %v6248_v18 = vadd.f32 %v7851_v51, %v6247_v34  ;;  %v16890_v51 = vld [vmem:[#allocation85_spill] sm:$0xff] }
 0x500   : > { %v6279_v12 = vadd.f32 %v7852_v8, %v6278_v21  ;;  %v6186_v46 = vadd.f32 %v7849_v19, %v6185_v42  ;;  %v6217_v38 = vadd.f32 %v7850_v3, %v6216_v6  ;;  %v2564_v20 = vpop.permute.xlu1 %2563  ;;  %v2560_v5 = vpop.permute.xlu0 %2559  ;;  %v7513_v57 = vsel %vm3229_vm6, 1.0, %v16346_v61 }
 0x501   : > { %vm3599_vm4 = vcmp.eq.s32.totalorder %v2564_v20, %v8233_v9  ;;  %vm3600_vm11 = vcmp.eq.s32.totalorder %v2564_v20, %v8791_v22  ;;  %vm3597_vm1 = vcmp.eq.s32.totalorder %v2560_v5, %v8233_v9  ;;  %vm3598_vm10 = vcmp.eq.s32.totalorder %v2560_v5, %v8791_v22 }
 0x502   : > { %v7883_v31 = vsel %vm3599_vm4, 1.0, %v16346_v61  ;;  %v7884_v23 = vsel %vm3600_vm11, 1.0, %v16346_v61  ;;  %v7881_v40 = vsel %vm3597_vm1, 1.0, %v16346_v61  ;;  %v7882_v35 = vsel %vm3598_vm10, 1.0, %v16346_v61 }
 0x503   : > { %v7514_v52 = vsel %vm3230_vm14, 1.0, %v16346_v61  ;;  %vm3261_vm7 = vcmp.eq.s32.totalorder %v16888_v45, %v8233_v9  ;;  %vm3262_vm12 = vcmp.eq.s32.totalorder %v16888_v45, %v8791_v22  ;;  %v6249_v36 = vadd.f32 %v7883_v31, %v6248_v18 }
 0x504   : > { %v6280_v11 = vadd.f32 %v7884_v23, %v6279_v12  ;;  %v6187_v47 = vadd.f32 %v7881_v40, %v6186_v46  ;;  %v6218_v48 = vadd.f32 %v7882_v35, %v6217_v38  ;;  %v15442_v49 = vpop.permute.xlu1 %2062  ;;  %v15444_v4 = vpop.permute.xlu0 %2058  ;;  %v5742_v39 = vadd.f32 %v7515_v63, %v15314_v10 }
 0x505   : > { %v5773_v62 = vadd.f32 %v7516_v13, %v15316_v55  ;;  %v7547_v25 = vsel %vm3263_vm5, 1.0, %v16346_v61  ;;  %v7548_v41 = vsel %vm3264_vm15, 1.0, %v16346_v61  ;;  %v7545_v43 = vsel %vm3261_vm7, 1.0, %v16346_v61 }
 0x506   : > { %v7546_v60 = vsel %vm3262_vm12, 1.0, %v16346_v61  ;;  %vm3295_vm6 = vcmp.eq.s32.totalorder %v16889_v50, %v8233_v9  ;;  %vm3296_vm14 = vcmp.eq.s32.totalorder %v16889_v50, %v8791_v22  ;;  %v5680_v10 = vadd.f32 %v7513_v57, %v15318_v59 }
 0x507   : > { %v5711_v55 = vadd.f32 %v7514_v52, %v15320_v56  ;;  %vm3293_vm9 = vcmp.eq.s32.totalorder %v16890_v51, %v8233_v9  ;;  %vm3294_vm13 = vcmp.eq.s32.totalorder %v16890_v51, %v8791_v22  ;;  %v5743_v8 = vadd.f32 %v7547_v25, %v5742_v39 }
 0x508   : > { %v5774_v19 = vadd.f32 %v7548_v41, %v5773_v62  ;;  %v6662_v3 = vpack.c.bf16 %v6280_v11, %v6218_v48  ;;  %v15468_v34 = vpop.permute.xlu1 %2204  ;;  %v6661_v21 = vpack.c.bf16 %v6249_v36, %v6187_v47  ;;  %v15470_v42 = vpop.permute.xlu0 %2200  ;;  %v5681_v6 = vadd.f32 %v7545_v43, %v5680_v10 }
 0x509   : > { %v5712_v63 = vadd.f32 %v7546_v60, %v5711_v55  ;;  %v7579_v59 = vsel %vm3295_vm6, 1.0, %v16346_v61  ;;  %v7580_v56 = vsel %vm3296_vm14, 1.0, %v16346_v61  ;;  %v7577_v13 = vsel %vm3293_vm9, 1.0, %v16346_v61 }
 0x50a   : > { %v7578_v32 = vsel %vm3294_vm13, 1.0, %v16346_v61  ;;  %vm3499_vm0 = vcmp.eq.s32.totalorder %v15264_v24, %v8233_v9  ;;  %vm3500_vm2 = vcmp.eq.s32.totalorder %v15264_v24, %v8791_v22  ;;  %6675 = vmatprep.subr.bf16.mxu0 %v6662_v3  ;;  %vm3497_vm8 = vcmp.eq.s32.totalorder %v15266_v2, %v8233_v9 }
 0x50b   : > { %vm3498_vm3 = vcmp.eq.s32.totalorder %v15266_v2, %v8791_v22  ;;  %vm3327_vm5 = vcmp.eq.s32.totalorder %v15310_v16, %v8233_v9  ;;  %vm3328_vm15 = vcmp.eq.s32.totalorder %v15310_v16, %v8791_v22  ;;  %6676 = vmatpush1.bf16.msra.mxu0 %v6661_v21  ;;  %v5744_v18 = vadd.f32 %v7579_v59, %v5743_v8 }
 0x50c   : > { %v5775_v12 = vadd.f32 %v7580_v56, %v5774_v19  ;;  %vm3325_vm4 = vcmp.eq.s32.totalorder %v15312_v30, %v8233_v9  ;;  %vm3326_vm11 = vcmp.eq.s32.totalorder %v15312_v30, %v8791_v22  ;;  %v15492_v24 = vpop.permute.xlu1 %2346  ;;  %v5682_v46 = vadd.f32 %v7577_v13, %v5681_v6  ;;  %v15500_v40 = vpop.permute.xlu0 %2342 }
 0x50d   : > { %v5713_v38 = vadd.f32 %v7578_v32, %v5712_v63  ;;  %v7783_v2 = vsel %vm3499_vm0, 1.0, %v16346_v61  ;;  %v7784_v20 = vsel %vm3500_vm2, 1.0, %v16346_v61  ;;  %v7781_v5 = vsel %vm3497_vm8, 1.0, %v16346_v61 }
 0x50e   : > { %v7782_v16 = vsel %vm3498_vm3, 1.0, %v16346_v61  ;;  %v7611_v31 = vsel %vm3327_vm5, 1.0, %v16346_v61  ;;  %v7612_v23 = vsel %vm3328_vm15, 1.0, %v16346_v61  ;;  %v7609_v30 = vsel %vm3325_vm4, 1.0, %v16346_v61 }
 0x50f   : > { %v7610_v35 = vsel %vm3326_vm11, 1.0, %v16346_v61  ;;  %vm3463_vm1 = vcmp.eq.s32.totalorder %v15366_v28, %v8233_v9  ;;  %vm3464_vm10 = vcmp.eq.s32.totalorder %v15366_v28, %v8791_v22  ;;  %v6122_v57 = vadd.f32 %v7783_v2, %v15148_v44 }
 0x510   : > { %v6153_v52 = vadd.f32 %v7784_v20, %v15151_v1  ;;  %vm3461_vm7 = vcmp.eq.s32.totalorder %v15368_v17, %v8233_v9  ;;  %vm3462_vm12 = vcmp.eq.s32.totalorder %v15368_v17, %v8791_v22  ;;  %v15514_v45 = vpop.permute.xlu1 %2488  ;;  %v6060_v36 = vadd.f32 %v7781_v5, %v15154_v29  ;;  %v15520_v62 = vpop.permute.xlu0 %2484 }
 0x511   : > { %v6091_v11 = vadd.f32 %v7782_v16, %v15157_v0  ;;  %v5745_v47 = vadd.f32 %v7611_v31, %v5744_v18  ;;  %v5776_v48 = vadd.f32 %v7612_v23, %v5775_v12  ;;  %v5683_v39 = vadd.f32 %v7609_v30, %v5682_v46 }
 0x512   : > { %v5714_v28 = vadd.f32 %v7610_v35, %v5713_v38  ;;  %v7747_v44 = vsel %vm3463_vm1, 1.0, %v16346_v61  ;;  %v7748_v1 = vsel %vm3464_vm10, 1.0, %v16346_v61  ;;  %v7745_v25 = vsel %vm3461_vm7, 1.0, %v16346_v61 }
 0x513   : > { %v7746_v17 = vsel %vm3462_vm12, 1.0, %v16346_v61  ;;  %vm3531_vm6 = vcmp.eq.s32.totalorder %v15402_v27, %v8233_v9  ;;  %vm3532_vm14 = vcmp.eq.s32.totalorder %v15402_v27, %v8791_v22  ;;  %vm3529_vm9 = vcmp.eq.s32.totalorder %v15404_v14, %v8233_v9 }
 0x514   : > { %vm3530_vm13 = vcmp.eq.s32.totalorder %v15404_v14, %v8791_v22  ;;  %vm3359_vm0 = vcmp.eq.s32.totalorder %v15442_v49, %v8233_v9  ;;  %vm3360_vm2 = vcmp.eq.s32.totalorder %v15442_v49, %v8791_v22  ;;  %v15536_v29 = vpop.permute.xlu1 %2129  ;;  %v15539_v0 = vadd.f32 %v7747_v44, %v15245_v26  ;;  %v15556_v43 = vpop.permute.xlu0 %2125 }
 0x515   : > { %v15542_v41 = vadd.f32 %v7748_v1, %v15248_v15  ;;  %vm3357_vm8 = vcmp.eq.s32.totalorder %v15444_v4, %v8233_v9  ;;  %vm3358_vm3 = vcmp.eq.s32.totalorder %v15444_v4, %v8791_v22  ;;  %v15549_v27 = vadd.f32 %v7745_v25, %v15251_v37 }
 0x516   : > { %v15552_v14 = vadd.f32 %v7746_v17, %v15254_v7  ;;  %v7815_v49 = vsel %vm3531_vm6, 1.0, %v16346_v61  ;;  %v7816_v26 = vsel %vm3532_vm14, 1.0, %v16346_v61  ;;  %v7813_v15 = vsel %vm3529_vm9, 1.0, %v16346_v61 }
 0x517   : > { %v7814_v60 = vsel %vm3530_vm13, 1.0, %v16346_v61  ;;  %v7643_v50 = vsel %vm3359_vm0, 1.0, %v16346_v61  ;;  %v7644_v4 = vsel %vm3360_vm2, 1.0, %v16346_v61  ;;  %v7641_v37 = vsel %vm3357_vm8, 1.0, %v16346_v61 }
 0x518   : > { %v7642_v10 = vsel %vm3358_vm3, 1.0, %v16346_v61  ;;  %vm3427_vm5 = vcmp.eq.s32.totalorder %v15468_v34, %v8233_v9  ;;  %vm3428_vm15 = vcmp.eq.s32.totalorder %v15468_v34, %v8791_v22  ;;  %v15568_v7 = vpop.permute.xlu1 %2271  ;;  %v6123_v55 = vadd.f32 %v7815_v49, %v6122_v57  ;;  %v15578_v6 = vpop.permute.xlu0 %2267 }
 0x519   : > { %v6154_v51 = vadd.f32 %v7816_v26, %v6153_v52  ;;  %vm3425_vm4 = vcmp.eq.s32.totalorder %v15470_v42, %v8233_v9  ;;  %vm3426_vm11 = vcmp.eq.s32.totalorder %v15470_v42, %v8791_v22  ;;  %v6061_v8 = vadd.f32 %v7813_v15, %v6060_v36 }
 0x51a   : > { %v6092_v19 = vadd.f32 %v7814_v60, %v6091_v11  ;;  %v15574_v3 = vadd.f32 %v7643_v50, %v5745_v47  ;;  %v15576_v21 = vadd.f32 %v7644_v4, %v5776_v48  ;;  %v15580_v63 = vadd.f32 %v7641_v37, %v5683_v39 }
 0x51b   : > { %v15582_v34 = vadd.f32 %v7642_v10, %v5714_v28  ;;  %v7711_v59 = vsel %vm3427_vm5, 1.0, %v16346_v61  ;;  %v7712_v56 = vsel %vm3428_vm15, 1.0, %v16346_v61  ;;  %v7709_v13 = vsel %vm3425_vm4, 1.0, %v16346_v61 }
 0x51c   : > { %v7710_v42 = vsel %vm3426_vm11, 1.0, %v16346_v61  ;;  %vm3563_vm1 = vcmp.eq.s32.totalorder %v15514_v45, %v8233_v9  ;;  %vm3564_vm10 = vcmp.eq.s32.totalorder %v15514_v45, %v8791_v22  ;;  %v15592_v32 = vpop.permute.xlu1 %2413  ;;  %vm3495_vm7 = vcmp.eq.s32.totalorder %v15492_v24, %v8233_v9  ;;  %v15612_v46 = vpop.permute.xlu0 %2409 }
 0x51d   : > { %vm3496_vm12 = vcmp.eq.s32.totalorder %v15492_v24, %v8791_v22  ;;  %vm3561_vm6 = vcmp.eq.s32.totalorder %v15520_v62, %v8233_v9  ;;  %vm3562_vm14 = vcmp.eq.s32.totalorder %v15520_v62, %v8791_v22  ;;  %v15603_v18 = vadd.f32 %v7711_v59, %v15343_v54 }
 0x51e   : > { %v15606_v12 = vadd.f32 %v7712_v56, %v15346_v53  ;;  %vm3493_vm9 = vcmp.eq.s32.totalorder %v15500_v40, %v8233_v9  ;;  %vm3494_vm13 = vcmp.eq.s32.totalorder %v15500_v40, %v8791_v22  ;;  %v15615_v24 = vadd.f32 %v7709_v13, %v15349_v58 }
 0x51f   : > { %v15618_v38 = vadd.f32 %v7710_v42, %v15352_v33  ;;  %v7847_v54 = vsel %vm3563_vm1, 1.0, %v16346_v61  ;;  %v7848_v2 = vsel %vm3564_vm10, 1.0, %v16346_v61  ;;  %v7779_v53 = vsel %vm3495_vm7, 1.0, %v16346_v61 }
 0x520   : > { %v7780_v20 = vsel %vm3496_vm12, 1.0, %v16346_v61  ;;  %v7845_v5 = vsel %vm3561_vm6, 1.0, %v16346_v61  ;;  %v7846_v16 = vsel %vm3562_vm14, 1.0, %v16346_v61  ;;  %v2556_v31 = vpop.permute.xlu1 %2555  ;;  %v7777_v23 = vsel %vm3493_vm9, 1.0, %v16346_v61  ;;  %v2552_v57 = vpop.permute.xlu0 %2551 }
 0x521   : > { %v7778_v58 = vsel %vm3494_vm13, 1.0, %v16346_v61  ;;  %vm3595_vm0 = vcmp.eq.s32.totalorder %v2556_v31, %v8233_v9  ;;  %vm3596_vm2 = vcmp.eq.s32.totalorder %v2556_v31, %v8791_v22  ;;  %v6124_v33 = vadd.f32 %v7847_v54, %v6123_v55 }
 0x522   : > { %v6155_v40 = vadd.f32 %v7848_v2, %v6154_v51  ;;  %v7879_v30 = vsel %vm3595_vm0, 1.0, %v16346_v61  ;;  %v7880_v35 = vsel %vm3596_vm2, 1.0, %v16346_v61  ;;  %v6062_v52 = vadd.f32 %v7845_v5, %v6061_v8 }
 0x523   : > { %v6093_v45 = vadd.f32 %v7846_v16, %v6092_v19  ;;  %vm3593_vm8 = vcmp.eq.s32.totalorder %v2552_v57, %v8233_v9  ;;  %vm3594_vm3 = vcmp.eq.s32.totalorder %v2552_v57, %v8791_v22  ;;  %v6125_v36 = vadd.f32 %v7879_v30, %v6124_v33 }
 0x524   : > { %v6156_v11 = vadd.f32 %v7880_v35, %v6155_v40  ;;  %v7877_v47 = vsel %vm3593_vm8, 1.0, %v16346_v61  ;;  %v7878_v48 = vsel %vm3594_vm3, 1.0, %v16346_v61  ;;  %v2197_v39 = vpop.permute.xlu1 %2196  ;;  %vm3391_vm5 = vcmp.eq.s32.totalorder %v15536_v29, %v8233_v9  ;;  %v2193_v25 = vpop.permute.xlu0 %2192 }
 0x525   : > { %vm3392_vm15 = vcmp.eq.s32.totalorder %v15536_v29, %v8791_v22  ;;  %v6063_v28 = vadd.f32 %v7877_v47, %v6062_v52  ;;  %v6094_v44 = vadd.f32 %v7878_v48, %v6093_v45  ;;  %v5998_v1 = vadd.f32 %v7779_v53, %v15539_v0 }
 0x526   : > { %v6029_v62 = vadd.f32 %v7780_v20, %v15542_v41  ;;  %vm3389_vm4 = vcmp.eq.s32.totalorder %v15556_v43, %v8233_v9  ;;  %vm3390_vm11 = vcmp.eq.s32.totalorder %v15556_v43, %v8791_v22  ;;  %v5936_v17 = vadd.f32 %v7777_v23, %v15549_v27 }
 0x527   : > { %v5967_v49 = vadd.f32 %v7778_v58, %v15552_v14  ;;  %vm3459_vm1 = vcmp.eq.s32.totalorder %v15568_v7, %v8233_v9  ;;  %vm3460_vm10 = vcmp.eq.s32.totalorder %v15568_v7, %v8791_v22  ;;  %v7675_v29 = vsel %vm3391_vm5, 1.0, %v16346_v61 }
 0x528   : > { %v7676_v0 = vsel %vm3392_vm15, 1.0, %v16346_v61  ;;  %v6660_v41 = vpack.c.bf16 %v6156_v11, %v6094_v44  ;;  %v2339_v26 = vpop.permute.xlu1 %2338  ;;  %v6659_v15 = vpack.c.bf16 %v6125_v36, %v6063_v28  ;;  %v7673_v43 = vsel %vm3389_vm4, 1.0, %v16346_v61  ;;  %v2335_v50 = vpop.permute.xlu0 %2334 }
 0x529   : > { %v7674_v60 = vsel %vm3390_vm11, 1.0, %v16346_v61  ;;  %vm3457_vm7 = vcmp.eq.s32.totalorder %v15578_v6, %v8233_v9  ;;  %vm3458_vm12 = vcmp.eq.s32.totalorder %v15578_v6, %v8791_v22  ;;  %v7743_v27 = vsel %vm3459_vm1, 1.0, %v16346_v61 }
 0x52a   : > { %v7744_v14 = vsel %vm3460_vm10, 1.0, %v16346_v61  ;;  %vm3527_vm6 = vcmp.eq.s32.totalorder %v15592_v32, %v8233_v9  ;;  %vm3528_vm14 = vcmp.eq.s32.totalorder %v15592_v32, %v8791_v22  ;;  %6677 = vmatprep.subr.bf16.mxu0 %v6660_v41  ;;  %v5747_v4 = vadd.f32 %v7675_v29, %v15574_v3 }
 0x52b   : > { %v5778_v37 = vadd.f32 %v7676_v0, %v15576_v21  ;;  %vm3525_vm9 = vcmp.eq.s32.totalorder %v15612_v46, %v8233_v9  ;;  %vm3526_vm13 = vcmp.eq.s32.totalorder %v15612_v46, %v8791_v22  ;;  %6678 = vmatpush1.bf16.msra.mxu0 %v6659_v15  ;;  %v5685_v10 = vadd.f32 %v7673_v43, %v15580_v63 }
 0x52c   : > { %v5716_v7 = vadd.f32 %v7674_v60, %v15582_v34  ;;  %v7741_v55 = vsel %vm3457_vm7, 1.0, %v16346_v61  ;;  %v7742_v51 = vsel %vm3458_vm12, 1.0, %v16346_v61  ;;  %v2481_v8 = vpop.permute.xlu1 %2480  ;;  %v5873_v19 = vadd.f32 %v7743_v27, %v15603_v18  ;;  %v2477_v59 = vpop.permute.xlu0 %2476 }
 0x52d   : > { %v5904_v3 = vadd.f32 %v7744_v14, %v15606_v12  ;;  %v7811_v21 = vsel %vm3527_vm6, 1.0, %v16346_v61  ;;  %v7812_v6 = vsel %vm3528_vm14, 1.0, %v16346_v61  ;;  %v7809_v63 = vsel %vm3525_vm9, 1.0, %v16346_v61 }
 0x52e   : > { %v7810_v34 = vsel %vm3526_vm13, 1.0, %v16346_v61  ;;  %vm3423_vm0 = vcmp.eq.s32.totalorder %v2197_v39, %v8233_v9  ;;  %vm3424_vm2 = vcmp.eq.s32.totalorder %v2197_v39, %v8791_v22  ;;  %v15691_v56 = vadd.f32 %v7741_v55, %v15615_v24 }
 0x52f   : > { %v15694_v13 = vadd.f32 %v7742_v51, %v15618_v38  ;;  %vm3421_vm8 = vcmp.eq.s32.totalorder %v2193_v25, %v8233_v9  ;;  %vm3422_vm3 = vcmp.eq.s32.totalorder %v2193_v25, %v8791_v22  ;;  %v5999_v42 = vadd.f32 %v7811_v21, %v5998_v1 }
 0x530   : > { %v6030_v32 = vadd.f32 %v7812_v6, %v6029_v62  ;;  %vm3491_vm5 = vcmp.eq.s32.totalorder %v2339_v26, %v8233_v9  ;;  %vm3492_vm15 = vcmp.eq.s32.totalorder %v2339_v26, %v8791_v22  ;;  %v2264_v18 = vpop.permute.xlu1 %2263  ;;  %v5937_v12 = vadd.f32 %v7809_v63, %v5936_v17  ;;  %v2260_v53 = vpop.permute.xlu0 %2259 }
 0x531   : > { %v5968_v46 = vadd.f32 %v7810_v34, %v5967_v49  ;;  %v7707_v54 = vsel %vm3423_vm0, 1.0, %v16346_v61  ;;  %v7708_v24 = vsel %vm3424_vm2, 1.0, %v16346_v61  ;;  %v7705_v38 = vsel %vm3421_vm8, 1.0, %v16346_v61 }
 0x532   : > { %v7706_v2 = vsel %vm3422_vm3, 1.0, %v16346_v61  ;;  %vm3559_vm4 = vcmp.eq.s32.totalorder %v2481_v8, %v8233_v9  ;;  %vm3560_vm11 = vcmp.eq.s32.totalorder %v2481_v8, %v8791_v22  ;;  %v7775_v20 = vsel %vm3491_vm5, 1.0, %v16346_v61 }
 0x533   : > { %v7776_v5 = vsel %vm3492_vm15, 1.0, %v16346_v61  ;;  %vm3557_vm1 = vcmp.eq.s32.totalorder %v2477_v59, %v8233_v9  ;;  %vm3558_vm10 = vcmp.eq.s32.totalorder %v2477_v59, %v8791_v22  ;;  %v5748_v16 = vadd.f32 %v7707_v54, %v5747_v4 }
 0x534   : > { %v5779_v31 = vadd.f32 %v7708_v24, %v5778_v37  ;;  %vm3489_vm7 = vcmp.eq.s32.totalorder %v2335_v50, %v8233_v9  ;;  %vm3490_vm12 = vcmp.eq.s32.totalorder %v2335_v50, %v8791_v22  ;;  %v2406_v23 = vpop.permute.xlu1 %2405  ;;  %v5686_v58 = vadd.f32 %v7705_v38, %v5685_v10 }
 0x535   : > { %v5717_v33 = vadd.f32 %v7706_v2, %v5716_v7  ;;  %v7843_v40 = vsel %vm3559_vm4, 1.0, %v16346_v61  ;;  %v7844_v30 = vsel %vm3560_vm11, 1.0, %v16346_v61  ;;  %v15714_v35 = vadd.f32 %v7775_v20, %v5873_v19 }
 0x536   : > { %v15716_v57 = vadd.f32 %v7776_v5, %v5904_v3  ;;  %v7841_v52 = vsel %vm3557_vm1, 1.0, %v16346_v61  ;;  %v7842_v45 = vsel %vm3558_vm10, 1.0, %v16346_v61  ;;  %v2402_v36 = vpop.permute.xlu0 %2401  ;;  %v7773_v11 = vsel %vm3489_vm7, 1.0, %v16346_v61 }
 0x537   : > { %v7774_v47 = vsel %vm3490_vm12, 1.0, %v16346_v61  ;;  %vm3455_vm6 = vcmp.eq.s32.totalorder %v2264_v18, %v8233_v9  ;;  %vm3456_vm14 = vcmp.eq.s32.totalorder %v2264_v18, %v8791_v22  ;;  %v6000_v48 = vadd.f32 %v7843_v40, %v5999_v42 }
 0x538   : > { %v6031_v39 = vadd.f32 %v7844_v30, %v6030_v32  ;;  %vm3453_vm9 = vcmp.eq.s32.totalorder %v2260_v53, %v8233_v9  ;;  %vm3454_vm13 = vcmp.eq.s32.totalorder %v2260_v53, %v8791_v22  ;;  %v2548_v28 = vpop.permute.xlu1 %2547  ;;  %v5938_v44 = vadd.f32 %v7841_v52, %v5937_v12 }
 0x539   : > { %v5969_v1 = vadd.f32 %v7842_v45, %v5968_v46  ;;  %vm3591_vm0 = vcmp.eq.s32.totalorder %v2548_v28, %v8233_v9  ;;  %vm3592_vm2 = vcmp.eq.s32.totalorder %v2548_v28, %v8791_v22  ;;  %v7739_v62 = vsel %vm3455_vm6, 1.0, %v16346_v61 }
 0x53a   : > { %v7740_v25 = vsel %vm3456_vm14, 1.0, %v16346_v61  ;;  %v7875_v17 = vsel %vm3591_vm0, 1.0, %v16346_v61  ;;  %v7876_v49 = vsel %vm3592_vm2, 1.0, %v16346_v61  ;;  %v2544_v29 = vpop.permute.xlu0 %2543  ;;  %v7737_v0 = vsel %vm3453_vm9, 1.0, %v16346_v61 }
 0x53b   : > { %v7738_v41 = vsel %vm3454_vm13, 1.0, %v16346_v61  ;;  %vm3589_vm8 = vcmp.eq.s32.totalorder %v2544_v29, %v8233_v9  ;;  %vm3590_vm3 = vcmp.eq.s32.totalorder %v2544_v29, %v8791_v22  ;;  %v6001_v26 = vadd.f32 %v7875_v17, %v6000_v48 }
 0x53c   : > { %v6032_v15 = vadd.f32 %v7876_v49, %v6031_v39  ;;  %v7873_v43 = vsel %vm3589_vm8, 1.0, %v16346_v61  ;;  %v7874_v60 = vsel %vm3590_vm3, 1.0, %v16346_v61  ;;  %v2331_v27 = vpop.permute.xlu1 %2330  ;;  %v5812_v14 = vadd.f32 %v7773_v11, %v15691_v56 }
 0x53d   : > { %v5843_v50 = vadd.f32 %v7774_v47, %v15694_v13  ;;  %v5939_v4 = vadd.f32 %v7873_v43, %v5938_v44  ;;  %v5970_v37 = vadd.f32 %v7874_v60, %v5969_v1  ;;  %v5749_v10 = vadd.f32 %v7739_v62, %v5748_v16 }
 0x53e   : > { %v5780_v7 = vadd.f32 %v7740_v25, %v5779_v31  ;;  %vm3523_vm5 = vcmp.eq.s32.totalorder %v2406_v23, %v8233_v9  ;;  %vm3524_vm15 = vcmp.eq.s32.totalorder %v2406_v23, %v8791_v22  ;;  %v2327_v55 = vpop.permute.xlu0 %2326  ;;  %v5687_v51 = vadd.f32 %v7737_v0, %v5686_v58 }
 0x53f   : > { %v5718_v8 = vadd.f32 %v7738_v41, %v5717_v33  ;;  %vm3521_vm4 = vcmp.eq.s32.totalorder %v2402_v36, %v8233_v9  ;;  %vm3522_vm11 = vcmp.eq.s32.totalorder %v2402_v36, %v8791_v22  ;;  %vm3487_vm1 = vcmp.eq.s32.totalorder %v2331_v27, %v8233_v9 }
 0x540   : > { %vm3488_vm10 = vcmp.eq.s32.totalorder %v2331_v27, %v8791_v22  ;;  %v6658_v19 = vpack.c.bf16 %v6032_v15, %v5970_v37  ;;  %v2473_v3 = vpop.permute.xlu1 %2472  ;;  %v6657_v21 = vpack.c.bf16 %v6001_v26, %v5939_v4  ;;  %v7807_v6 = vsel %vm3523_vm5, 1.0, %v16346_v61 }
 0x541   : > { %v7808_v63 = vsel %vm3524_vm15, 1.0, %v16346_v61  ;;  %vm3485_vm7 = vcmp.eq.s32.totalorder %v2327_v55, %v8233_v9  ;;  %vm3486_vm12 = vcmp.eq.s32.totalorder %v2327_v55, %v8791_v22  ;;  %v7805_v34 = vsel %vm3521_vm4, 1.0, %v16346_v61 }
 0x542   : > { %v7806_v59 = vsel %vm3522_vm11, 1.0, %v16346_v61  ;;  %6679 = vmatprep.subr.bf16.mxu0 %v6658_v19  ;;  %vm3555_vm6 = vcmp.eq.s32.totalorder %v2473_v3, %v8233_v9  ;;  %vm3556_vm14 = vcmp.eq.s32.totalorder %v2473_v3, %v8791_v22  ;;  %v2469_v56 = vpop.permute.xlu0 %2468  ;;  %v7771_v13 = vsel %vm3487_vm1, 1.0, %v16346_v61 }
 0x543   : > { %v7772_v42 = vsel %vm3488_vm10, 1.0, %v16346_v61  ;;  %6680 = vmatpush1.bf16.msra.mxu0 %v6657_v21  ;;  %vm3553_vm9 = vcmp.eq.s32.totalorder %v2469_v56, %v8233_v9  ;;  %vm3554_vm13 = vcmp.eq.s32.totalorder %v2469_v56, %v8791_v22  ;;  %v5875_v32 = vadd.f32 %v7807_v6, %v15714_v35 }
 0x544   : > { %v5906_v18 = vadd.f32 %v7808_v63, %v15716_v57  ;;  %v7769_v12 = vsel %vm3485_vm7, 1.0, %v16346_v61  ;;  %v7770_v46 = vsel %vm3486_vm12, 1.0, %v16346_v61  ;;  %v2398_v54 = vpop.permute.xlu1 %2397  ;;  %v5813_v24 = vadd.f32 %v7805_v34, %v5812_v14 }
 0x545   : > { %v5844_v38 = vadd.f32 %v7806_v59, %v5843_v50  ;;  %v7839_v2 = vsel %vm3555_vm6, 1.0, %v16346_v61  ;;  %v7840_v53 = vsel %vm3556_vm14, 1.0, %v16346_v61  ;;  %v5750_v20 = vadd.f32 %v7771_v13, %v5749_v10 }
 0x546   : > { %v5781_v5 = vadd.f32 %v7772_v42, %v5780_v7  ;;  %v7837_v16 = vsel %vm3553_vm9, 1.0, %v16346_v61  ;;  %v7838_v31 = vsel %vm3554_vm13, 1.0, %v16346_v61  ;;  %v2394_v23 = vpop.permute.xlu0 %2393  ;;  %v5688_v58 = vadd.f32 %v7769_v12, %v5687_v51 }
 0x547   : > { %v5719_v33 = vadd.f32 %v7770_v46, %v5718_v8  ;;  %vm3519_vm0 = vcmp.eq.s32.totalorder %v2398_v54, %v8233_v9  ;;  %vm3520_vm2 = vcmp.eq.s32.totalorder %v2398_v54, %v8791_v22  ;;  %v5876_v40 = vadd.f32 %v7839_v2, %v5875_v32 }
 0x548   : > { %v5907_v30 = vadd.f32 %v7840_v53, %v5906_v18  ;;  %vm3517_vm8 = vcmp.eq.s32.totalorder %v2394_v23, %v8233_v9  ;;  %vm3518_vm3 = vcmp.eq.s32.totalorder %v2394_v23, %v8791_v22  ;;  %v2540_v35 = vpop.permute.xlu1 %2539  ;;  %v5814_v57 = vadd.f32 %v7837_v16, %v5813_v24 }
 0x549   : > { %v5845_v52 = vadd.f32 %v7838_v31, %v5844_v38  ;;  %vm3587_vm5 = vcmp.eq.s32.totalorder %v2540_v35, %v8233_v9  ;;  %vm3588_vm15 = vcmp.eq.s32.totalorder %v2540_v35, %v8791_v22  ;;  %v7803_v45 = vsel %vm3519_vm0, 1.0, %v16346_v61 }
 0x54a   : > { %v7804_v36 = vsel %vm3520_vm2, 1.0, %v16346_v61  ;;  %v7871_v11 = vsel %vm3587_vm5, 1.0, %v16346_v61  ;;  %v7872_v47 = vsel %vm3588_vm15, 1.0, %v16346_v61  ;;  %v2536_v48 = vpop.permute.xlu0 %2535  ;;  %v7801_v39 = vsel %vm3517_vm8, 1.0, %v16346_v61 }
 0x54b   : > { %v7802_v28 = vsel %vm3518_vm3, 1.0, %v16346_v61  ;;  %vm3585_vm4 = vcmp.eq.s32.totalorder %v2536_v48, %v8233_v9  ;;  %vm3586_vm11 = vcmp.eq.s32.totalorder %v2536_v48, %v8791_v22  ;;  %v5877_v44 = vadd.f32 %v7871_v11, %v5876_v40 }
 0x54c   : > { %v5908_v1 = vadd.f32 %v7872_v47, %v5907_v30  ;;  %v7869_v62 = vsel %vm3585_vm4, 1.0, %v16346_v61  ;;  %v7870_v25 = vsel %vm3586_vm11, 1.0, %v16346_v61  ;;  %v2465_v17 = vpop.permute.xlu1 %2464  ;;  %v5751_v0 = vadd.f32 %v7803_v45, %v5750_v20 }
 0x54d   : > { %v5815_v49 = vadd.f32 %v7869_v62, %v5814_v57  ;;  %v5846_v29 = vadd.f32 %v7870_v25, %v5845_v52  ;;  %vm3551_vm1 = vcmp.eq.s32.totalorder %v2465_v17, %v8233_v9  ;;  %vm3552_vm10 = vcmp.eq.s32.totalorder %v2465_v17, %v8791_v22 }
 0x54e   : > { %v5782_v41 = vadd.f32 %v7804_v36, %v5781_v5  ;;  %v7835_v26 = vsel %vm3551_vm1, 1.0, %v16346_v61  ;;  %v7836_v15 = vsel %vm3552_vm10, 1.0, %v16346_v61  ;;  %v2461_v43 = vpop.permute.xlu0 %2460  ;;  %v5689_v60 = vadd.f32 %v7801_v39, %v5688_v58 }
 0x54f   : > { %v5720_v27 = vadd.f32 %v7802_v28, %v5719_v33  ;;  %vm3549_vm7 = vcmp.eq.s32.totalorder %v2461_v43, %v8233_v9  ;;  %vm3550_vm12 = vcmp.eq.s32.totalorder %v2461_v43, %v8791_v22  ;;  %v6656_v4 = vpack.c.bf16 %v5908_v1, %v5846_v29 }
 0x550   : > { %v7833_v14 = vsel %vm3549_vm7, 1.0, %v16346_v61  ;;  %v7834_v50 = vsel %vm3550_vm12, 1.0, %v16346_v61  ;;  %v2532_v37 = vpop.permute.xlu1 %2531  ;;  %v6655_v10 = vpack.c.bf16 %v5877_v44, %v5815_v49  ;;  %v5752_v7 = vadd.f32 %v7835_v26, %v5751_v0 }
 0x551   : > { %v5783_v55 = vadd.f32 %v7836_v15, %v5782_v41  ;;  %vm3583_vm6 = vcmp.eq.s32.totalorder %v2532_v37, %v8233_v9  ;;  %vm3584_vm14 = vcmp.eq.s32.totalorder %v2532_v37, %v8791_v22  ;;  %v5690_v51 = vadd.f32 %v7833_v14, %v5689_v60  ;;  %6681 = vmatprep.subr.bf16.mxu0 %v6656_v4 }
 0x552   : > { %v5721_v8 = vadd.f32 %v7834_v50, %v5720_v27  ;;  %v7867_v19 = vsel %vm3583_vm6, 1.0, %v16346_v61  ;;  %v7868_v3 = vsel %vm3584_vm14, 1.0, %v16346_v61  ;;  %v2528_v21 = vpop.permute.xlu0 %2527  ;;  %6682 = vmatpush1.bf16.msra.mxu0 %v6655_v10  ;;  %v8121_v18 = vmov 1065369472  }
 0x553   : > { %v5753_v6 = vadd.f32 %v7867_v19, %v5752_v7  ;;  %v5784_v63 = vadd.f32 %v7868_v3, %v5783_v55  ;;  %vm3581_vm9 = vcmp.eq.s32.totalorder %v2528_v21, %v8233_v9  ;;  %vm3582_vm13 = vcmp.eq.s32.totalorder %v2528_v21, %v8791_v22 }
 0x554   : > { %v7865_v34 = vsel %vm3581_vm9, 1.0, %v16346_v61  ;;  %v7866_v59 = vsel %vm3582_vm13, 1.0, %v16346_v61  ;;  %v16891_v22 = vlaneseq (%p6710_p7)  ;;  %v8122_v24 = vmov (%p6710_p7), 0.0  }
 0x555   : > { %v5691_v56 = vadd.f32 %v7865_v34, %v5690_v51  ;;  %v5722_v13 = vadd.f32 %v7866_v59, %v5721_v8 }
 0x556   : > { %vm6718_vm0 = vcmp.lt.s32.totalorder (%p6710_p7), %v16891_v22, 256 }
 0x557   : > { %v6654_v42 = vpack.c.bf16 %v5784_v63, %v5722_v13  ;;  %v6653_v32 = vpack.c.bf16 %v5753_v6, %v5691_v56  ;;  %6720 = vst.msk [vmem:[%s219_s16] sm:$0x3] (%p6710_p7), %vm6718_vm0, %v8122_v24 }
 0x559   : > { %6683 = vmatprep.subr.bf16.mxu0 %v6654_v42 }
 0x55a   : > { %6684 = vmatpush1.bf16.msra.mxu0 %v6653_v32 }
 0x55d   : > { %6702 = vmatmul.mubr.bf16.vlgmr.msra.gmra.mxu0 %v8121_v18 }
 0x61d   : > { %v6703_v12 = vpop.f32.mrf.mxu0 }
 0x61f   : > { %v6705_v46 = vpop.f32.mrf.mxu0  ;;  %6715 = sbr.rel (!%p6710_p7) target bundleno = 1572 (0x624), region = 32 }
 0x621   : > { %v6707_v54 = vpop.f32.mrf.mxu0 }
 0x623   : > { %v6708_v9 = vpop.f32.mrf.mxu0 }
 0x624 PF: > { %v8123_v61 = vmov 1966171168   ;;  %v6724_v2 = vcombine.low %v6703_v12, %v6705_v46  ;;  %v16892_v20 = vld [vmem:[#allocation8_spill] sm:$0xff]  ;;  %v6721_v31 = vld [vmem:[%s219_s16] sm:$0x3]  ;;  %s7904_s19 = sshll.u32 %s8101_s20, 5  ;;  %v16893_v58 = vlaneseq }
 0x625   : > { %v6726_v38 = vunpack.c.l.s4 %v8123_v61  ;;  %s6761_s24 = sshll.u32 %s219_s16, 4  ;;  %s6759_s4 = scalar_lea.hbm %s15852_s3, %s7904_s19  ;;  %s6762_s24 = int_to_ptr.vmem [resolvable:$true] %s6761_s24 }
 0x626   : > { %vm6743_vm2 = vcmp.lt.s32.totalorder %v16893_v58, 256  ;;  %s6747_s7 = scalar_lea.sflag [#allocation5], %s217_s6  ;;  %s8019_s8 = scalar_lea.vmem %s6762_s24, 32 }
 0x627   : > { %v6727_v53 = vunpack.c.0.s8 %v6726_v38  ;;  %p8020_p9 = scmp.ne.s32.totalorder %s6762_s24, %s8019_s8  ;;  %s8124_s9 = smov [#allocation4]  }
 0x628   : > { %s8023_s20 = sshll.u32 %s8124_s9, 4  ;;  %s8024_s20 = int_to_ptr.vmem [resolvable:$false] %s8023_s20 }
 0x629   : > { %v6730_v5 = vsub.s32 %v6727_v53, %v16892_v20  ;;  %p8021_p10 = pnand %p8020_p9, %p8197_p8  ;;  %s8025_s10 = scalar_lea.vmem %s8024_s20, 64 }
 0x62a   : > { %p8026_p12 = scmp.lt.s32.totalorder %s6762_s24, %s8024_s20  ;;  %p8027_p13 = scmp.lt.s32.totalorder %s8025_s10, %s8019_s8 }
 0x62b   : > { %v6731_v16 = vrot.slane %v6724_v2, %v6730_v5  ;;  %p8022_p11 = pneg %p8021_p10 }
 0x62c   : > { %p8028_p1 = por %p8027_p13, %p8026_p12 }
 0x62d   : > { %v6738_v23 = vrot.slane %v6731_v16, %v6730_v5 }
 0x62e   : > { %p8029_p2 = pnand %p8028_p1, %p8022_p11 }
 0x62f   : > { %v6740_v33 = vadd.f32 %v6738_v23, %v6721_v31 }
 0x631   : > { %6745 = vst.msk [vmem:[%s219_s16] sm:$0x3] %vm6743_vm2, %v6740_v33 }
 0x632   : > { %8032 = shalt.err (!%p8029_p2)
}
 0x633   : > { %s8033_s11 = scalar_lea.hbm %s6759_s4, 32  ;;  %s8037_s14 = scalar_lea.hbm %s15852_s3, 128 }
 0x634   : > { %p8034_p3 = scmp.ne.s32.totalorder %s6759_s4, %s8033_s11  ;;  %p8038_p6 = scmp.lt.s32.totalorder %s6759_s4, %s15852_s3 }
 0x635   : > { %p8039_p7 = scmp.lt.s32.totalorder %s8037_s14, %s8033_s11 }
 0x636   : > { %p8035_p4 = pnand %p8034_p3, %p8197_p8 }
 0x637   : > { %p8040_p9 = por %p8039_p7, %p8038_p6 }
 0x638   : > { %p8036_p5 = pneg %p8035_p4 }
 0x63a   : > { %p8041_p10 = pnand %p8040_p9, %p8036_p5 }
 0x63c   : > { %8044 = shalt.err (!%p8041_p10)
}
 0x63d   : > { %7913 = dma.vmem_to_hbm [thread:$0]  (%p8197_p8), %s6762_s24, 32, %s6759_s4, %s6747_s7  }
 0x63e PF: > { %p7919_p11 = scmp.ge.s32.totalorder %s8113_s23, 2  ;;  %s6773_s16 = sand.u32 1, %s8085_s17  }
 0x63f   : > { %s6774_s19 = scalar_lea.sflag [#allocation5], %s6773_s16 }
 0x640   : > { %p7916_p12 = pnand %p7919_p11, %p8207_p0 }
 0x642   : > { %p7917_p13 = pneg %p7916_p12 }
 0x644   : > { %8080 = dma.done.wait (%p7917_p13), %s6774_s19, 32  }
 0x645   : > { %8082 = vsyncadd (%p7917_p13), %s6774_s19, 4294967264  ;;  %s22_s23 = sadd.s32 1, %s8113_s23   ;;  %s16894_s17 = smov %s8089_s18 }
 0x646   : > { %p19_p1 = scmp.ge.s32.totalorder %s22_s23, 18   ;;  %s16895_s18 = smov %s8093_s0 }
 0x647   : > { %s16896_s0 = smov %s8215_s5  ;;  %s16897_s19 = smov %s8105_s21 }
 0x648   : > { %s16898_s20 = smov %s8109_s22  ;;  %s16899_s21 = smov %s16902_s26 }
 0x649   : > { %s16900_s22 = smov %s16906_s27  ;;  %21 = sbr.rel (!%p19_p1) target bundleno = 20 (0x14), region = 70 }
 0x64e   :  { %6779 = vsyncpa [#allocation5], 1 }
 0x64f   :  { %6781 = vsyncpa [#allocation5 + $0x1], 1 }

</bundles_post_ra>
